<compile_context>
chip_gen: v7x
topology: tpu7x:2x2x1
jax: 0.10.0
libtpu: 0.0.40
codegen_flags: <defaults>
</compile_context>

<pallas_src>
import jax
import jax.numpy as jnp
from jax.experimental import pallas as pl
from jax.experimental.pallas import tpu as pltpu

EPS = 1e-5        # nn.BatchNorm1d default eps
L_IN = 128        # input length
C_IN = 4          # input channels
# (cin, cout, stride) per ResBlock; length halves whenever stride == 2.
BLOCK_CFG = ((4, 16, 1), (16, 32, 2), (32, 64, 2), (64, 96, 2), (96, 128, 2))
LAYER_NAMES = ("layer1", "layer2", "layer3", "layer4", "layer5")
C_LAST = 128      # channels after layer5
L_LAST = 8        # length after layer5
FC_HIDDEN = 128
W_COLS = 128      # lane width of the packed conv-weight blob


# -----------------------------------------------------------------------------
# Static layout of the packed conv / skip / fc2 weight blob (row offsets)
# -----------------------------------------------------------------------------
def _align16(v):
    return ((v + 15) // 16) * 16


def _make_w_layout():
    offs, o = [], 0
    for (cin, cout, _stride) in BLOCK_CFG:
        w1 = o; o = _align16(o + 3 * cin)      # conv1 weight, (3*cin, cout)
        w2 = o; o = _align16(o + 3 * cout)     # conv2 weight, (3*cout, cout)
        ws = o; o = _align16(o + cin)          # 1x1 skip weight, (cin, cout)
        offs.append((w1, w2, ws))
    fc2 = o; o = _align16(o + FC_HIDDEN)       # fc2 weight, (128, 1) in column 0
    return tuple(offs), fc2, o


_W_OFFS, _FC2_OFF, _W_ROWS = _make_w_layout()


# -----------------------------------------------------------------------------
# In-kernel helpers (operate on traced jnp values / VMEM refs)
# -----------------------------------------------------------------------------
def _bn(y, g, b):
    """Training-mode BatchNorm1d: biased batch stats over the flattened (N*L) rows."""
    mean = jnp.mean(y, axis=0, keepdims=True)
    var = jnp.mean(jnp.square(y - mean), axis=0, keepdims=True)
    return (y - mean) * (g * jax.lax.rsqrt(var + EPS)) + b


def _conv3_taps_s1(x, length):
    """Stride-1 'same' k=3 taps: lane-concat of [x[p-1], x[p], x[p+1]] (zero padded).

    x: (M, C) f32, rows ordered (batch, position), M = N * length.
    Returns (M, 3*C) f32.  Masks use a (M, 1) position column (cheap VPU work);
    pltpu.roll runs on the otherwise-idle XLU.
    """
    m = x.shape[0]
    pos = jax.lax.broadcasted_iota(jnp.int32, (m, 1), 0) % length
    prev = jnp.where(pos >= 1, pltpu.roll(x, shift=1, axis=0), 0.0)
    nxt = jnp.where(pos <= length - 2, pltpu.roll(x, shift=m - 1, axis=0), 0.0)
    return jnp.concatenate([prev, x, nxt], axis=1)


def _conv3_taps_s2(x_e, x_o, length_out):
    """Stride-2 k=3 taps from pre-downsampled rows: out[i] uses x[2i-1], x[2i], x[2i+1].

    x_e / x_o: (M/2, C) f32 rows at even / odd input positions.
    Returns (M/2, 3*C) f32: [x_o[i-1] (masked at i==0), x_e[i], x_o[i]].
    """
    m = x_e.shape[0]
    pos = jax.lax.broadcasted_iota(jnp.int32, (m, 1), 0) % length_out
    prev = jnp.where(pos >= 1, pltpu.roll(x_o, shift=1, axis=0), 0.0)
    return jnp.concatenate([prev, x_e, x_o], axis=1)


# -----------------------------------------------------------------------------
# Single fused kernel: 5 ResBlocks + MLP head, all activations VMEM-resident
# -----------------------------------------------------------------------------
def _cnn_kernel(x_ref, wconv_ref, bn_ref, fc1w_ref, fcb_ref, o_ref,
                ds2, ds3, ds4, ds5, fc_scr):
    ds_refs = (None, ds2, ds3, ds4, ds5)

    x = x_ref[...]                        # (N*128, 4) f32, rows ordered (batch, pos)
    length = L_IN
    for idx, (cin, cout, stride) in enumerate(BLOCK_CFG):
        w1_off, w2_off, ws_off = _W_OFFS[idx]
        w1 = wconv_ref[w1_off:w1_off + 3 * cin, :cout]     # (3*cin, cout) bf16
        w2 = wconv_ref[w2_off:w2_off + 3 * cout, :cout]    # (3*cout, cout) bf16
        ws = wconv_ref[ws_off:ws_off + cin, :cout]         # (cin, cout)    bf16
        r = 6 * idx
        g1, b1 = bn_ref[r + 0:r + 1, :cout], bn_ref[r + 1:r + 2, :cout]
        g2, b2 = bn_ref[r + 2:r + 3, :cout], bn_ref[r + 3:r + 4, :cout]
        gs, bs = bn_ref[r + 4:r + 5, :cout], bn_ref[r + 5:r + 6, :cout]

        if stride == 1:
            length_out = length
            taps = _conv3_taps_s1(x, length)
            x_skip = x
        else:
            length_out = length // 2
            dsr = ds_refs[idx]
            dsr[...] = x                                   # park x in VMEM scratch
            m_half = x.shape[0] // 2
            x_e = dsr[pl.ds(0, m_half, stride=2), :]       # even-position rows
            x_o = dsr[pl.ds(1, m_half, stride=2), :]       # odd-position rows
            taps = _conv3_taps_s2(x_e, x_o, length_out)
            x_skip = x_e                                   # 1x1 stride-2 skip input

        # conv1 (k=3, stride) + BN + ReLU -- ONE fused-tap matmul (bf16 MXU, f32 acc)
        h = jnp.dot(taps.astype(jnp.bfloat16), w1, preferred_element_type=jnp.float32)
        h = jnp.maximum(_bn(h, g1, b1), 0.0)

        # conv2 (k=3, stride 1) + BN
        taps2 = _conv3_taps_s1(h, length_out)
        y = jnp.dot(taps2.astype(jnp.bfloat16), w2, preferred_element_type=jnp.float32)
        y = _bn(y, g2, b2)

        # skip: 1x1 conv (stride already applied via even-row selection) + BN
        sk = jnp.dot(x_skip.astype(jnp.bfloat16), ws, preferred_element_type=jnp.float32)
        sk = _bn(sk, gs, bs)

        x = jnp.maximum(y + sk, 0.0)
        length = length_out

    # ---- predictor: Linear(128*8 -> 128) + ReLU + Linear(128 -> 1) ----
    # PyTorch flattens (N, C, L) with feature index c*L + p; fc1_w is pre-packed as
    # (L, C, hidden), so h[n] = sum_p act_rows[n*L + p] @ fc1_w[p].
    n_batch = x.shape[0] // L_LAST
    fc_scr[...] = x                                        # (N*8, 128) f32
    fc1_b = fcb_ref[0:1, :FC_HIDDEN]
    fc2_b = fcb_ref[1:2, 0:1]
    acc = jnp.zeros((n_batch, FC_HIDDEN), jnp.float32)
    for p in range(L_LAST):                                # 8 matmuls, M = batch size
        xp = fc_scr[pl.ds(p, n_batch, stride=L_LAST), :]   # (N, 128) rows at position p
        acc = acc + jnp.dot(xp.astype(jnp.bfloat16), fc1w_ref[p],
                            preferred_element_type=jnp.float32)
    h = jnp.maximum(acc + fc1_b, 0.0)
    fc2_w = wconv_ref[_FC2_OFF:_FC2_OFF + FC_HIDDEN, 0:1]  # (128, 1) bf16
    pred = jnp.dot(h.astype(jnp.bfloat16), fc2_w,
                   preferred_element_type=jnp.float32) + fc2_b
    o_ref[...] = pred


@jax.jit
def cnn_forward(x, kernel_params):
    """x: (N, 4, 128) -> (N, 1).  kernel_params: output of prepare_params()."""
    n, c, l = x.shape
    # Single tiny layout op outside the kernel: NCL -> (N*L, C) rows (batch-major).
    x_rows = jnp.transpose(x, (0, 2, 1)).reshape(n * l, c).astype(jnp.float32)
    wconv, bn, fc1w, fcb = kernel_params

    # VMEM scratch: one buffer per stride-2 layer input (for strided even/odd reads)
    # plus one for the flattened predictor input.
    ds_shapes, length = [], L_IN
    for (cin, _cout, stride) in BLOCK_CFG:
        if stride == 2:
            ds_shapes.append(pltpu.VMEM((n * length, cin), jnp.float32))
        length //= stride
    scratch = ds_shapes + [pltpu.VMEM((n * L_LAST, C_LAST), jnp.float32)]

    return pl.pallas_call(
        _cnn_kernel,
        out_shape=jax.ShapeDtypeStruct((n, 1), jnp.float32),
        in_specs=[pl.BlockSpec(memory_space=pltpu.MemorySpace.VMEM)] * 5,
        out_specs=pl.BlockSpec(memory_space=pltpu.MemorySpace.VMEM),
        scratch_shapes=scratch,
    )(x_rows, wconv, bn, fc1w, fcb)


# -----------------------------------------------------------------------------
# Parameter packing: pre-transpose / reshape / bf16-cast once (not per forward)
# -----------------------------------------------------------------------------
def _pack_conv3(w):
    """(Cout, Cin, 3) PyTorch Conv1d weight -> (3*Cin, Cout) bf16, tap-major rows."""
    cout, cin, k = w.shape
    return jnp.transpose(w, (2, 1, 0)).reshape(k * cin, cout).astype(jnp.bfloat16)


def prepare_params(params):
    """Pack everything into 4 kernel operands (one-time cost, reused every forward).

    Conv biases (b1/b2/bs) are intentionally dropped: each conv is immediately
    followed by training-mode BatchNorm, whose batch-mean subtraction cancels a
    per-channel additive bias exactly (matches PyTorch numerics).
    """
    wblob = jnp.zeros((_W_ROWS, W_COLS), jnp.bfloat16)
    bn = jnp.zeros((6 * len(BLOCK_CFG), W_COLS), jnp.float32)
    for idx, name in enumerate(LAYER_NAMES):
        p = params[name]
        cin, cout, _stride = BLOCK_CFG[idx]
        w1_off, w2_off, ws_off = _W_OFFS[idx]
        wblob = wblob.at[w1_off:w1_off + 3 * cin, :cout].set(_pack_conv3(p["w1"]))
        wblob = wblob.at[w2_off:w2_off + 3 * cout, :cout].set(_pack_conv3(p["w2"]))
        wblob = wblob.at[ws_off:ws_off + cin, :cout].set(
            p["ws"][:, :, 0].T.astype(jnp.bfloat16))
        r = 6 * idx
        bn = bn.at[r + 0, :cout].set(p["g1"])
        bn = bn.at[r + 1, :cout].set(p["be1"])
        bn = bn.at[r + 2, :cout].set(p["g2"])
        bn = bn.at[r + 3, :cout].set(p["be2"])
        bn = bn.at[r + 4, :cout].set(p["gs"])
        bn = bn.at[r + 5, :cout].set(p["bes"])
    # fc2 weight lives at the tail of the conv blob (column 0).
    wblob = wblob.at[_FC2_OFF:_FC2_OFF + FC_HIDDEN, 0:1].set(
        params["fc2_w"].T.astype(jnp.bfloat16))
    # fc1: (hidden, C*L) with feature index c*L + p  ->  (L, C, hidden)
    fc1w = jnp.transpose(params["fc1_w"].reshape(FC_HIDDEN, C_LAST, L_LAST),
                         (2, 1, 0)).astype(jnp.bfloat16)          # (8, 128, 128)
    fcb = jnp.zeros((2, W_COLS), jnp.float32)
    fcb = fcb.at[0, :FC_HIDDEN].set(params["fc1_b"])
    fcb = fcb.at[1, 0].set(params["fc2_b"][0])
    return (wblob, bn, fc1w, fcb)


# -----------------------------------------------------------------------------
# Deterministic parameter init (PyTorch-style uniform(-1/sqrt(fan_in), +))
# -----------------------------------------------------------------------------
def _conv_init(key, cout, cin, k):
    k1, k2 = jax.random.split(key)
    bound = 1.0 / (cin * k) ** 0.5
    w = jax.random.uniform(k1, (cout, cin, k), jnp.float32, -bound, bound)
    b = jax.random.uniform(k2, (cout,), jnp.float32, -bound, bound)
    return w, b


def _linear_init(key, cout, cin):
    k1, k2 = jax.random.split(key)
    bound = 1.0 / cin ** 0.5
    w = jax.random.uniform(k1, (cout, cin), jnp.float32, -bound, bound)
    b = jax.random.uniform(k2, (cout,), jnp.float32, -bound, bound)
    return w, b


def _res_block_init(key, cin, cout):
    k1, k2, k3 = jax.random.split(key, 3)
    w1, b1 = _conv_init(k1, cout, cin, 3)
    w2, b2 = _conv_init(k2, cout, cout, 3)
    ws, bs = _conv_init(k3, cout, cin, 1)
    ones, zeros = jnp.ones((cout,), jnp.float32), jnp.zeros((cout,), jnp.float32)
    # conv biases kept for PyTorch parameter parity; unused (cancelled by BN).
    return dict(w1=w1, b1=b1, g1=ones, be1=zeros,
                w2=w2, b2=b2, g2=ones, be2=zeros,
                ws=ws, bs=bs, gs=ones, bes=zeros)


def init_params(key):
    keys = jax.random.split(key, 7)
    params = {
        "layer1": _res_block_init(keys[0], 4, 16),
        "layer2": _res_block_init(keys[1], 16, 32),
        "layer3": _res_block_init(keys[2], 32, 64),
        "layer4": _res_block_init(keys[3], 64, 96),
        "layer5": _res_block_init(keys[4], 96, 128),
    }
    params["fc1_w"], params["fc1_b"] = _linear_init(keys[5], FC_HIDDEN, C_LAST * L_LAST)
    params["fc2_w"], params["fc2_b"] = _linear_init(keys[6], 1, FC_HIDDEN)
    return params


if __name__ == "__main__":
    key = jax.random.PRNGKey(0)
    pkey, xkey = jax.random.split(key)
    params = init_params(pkey)
    kparams = prepare_params(params)   # packed once, reused every forward

    # Module contract: input shape (N, 4, 128).
    x = jax.random.normal(xkey, (2, 4, 128), dtype=jnp.float32)

    pred = cnn_forward(x, kparams)
    pred = jax.block_until_ready(pred)
    assert pred.shape == (2, 1) and pred.dtype == jnp.float32
    print("KERNEL_OK")
</pallas_src>

<mosaic_0001>
module attributes {stable_mosaic.version = 11 : i64} {
  func.func @_cnn_kernel(%arg0: memref<256x4xf32, #tpu.memory_space<vmem>>, %arg1: memref<2000x128xbf16, #tpu.memory_space<vmem>>, %arg2: memref<30x128xf32, #tpu.memory_space<vmem>>, %arg3: memref<8x128x128xbf16, #tpu.memory_space<vmem>>, %arg4: memref<2x128xf32, #tpu.memory_space<vmem>>, %arg5: memref<2x1xf32, #tpu.memory_space<vmem>>, %arg6: memref<256x16xf32, #tpu.memory_space<vmem>>, %arg7: memref<128x32xf32, #tpu.memory_space<vmem>>, %arg8: memref<64x64xf32, #tpu.memory_space<vmem>>, %arg9: memref<32x96xf32, #tpu.memory_space<vmem>>, %arg10: memref<16x128xf32, #tpu.memory_space<vmem>>) attributes {dimension_semantics = [], scalar_prefetch = 0 : i64, scratch_operands = 5 : i64, tpu.core_type = #tpu.core_type<tc>} {
    %c0 = arith.constant 0 : index
    %c0_0 = arith.constant 0 : index
    %0 = vector.load %arg0[%c0, %c0_0] : memref<256x4xf32, #tpu.memory_space<vmem>>, vector<256x4xf32>
    %c0_1 = arith.constant 0 : index
    %c0_2 = arith.constant 0 : index
    %1 = vector.load %arg1[%c0_1, %c0_2] : memref<2000x128xbf16, #tpu.memory_space<vmem>>, vector<12x16xbf16>
    %c16 = arith.constant 16 : index
    %c0_3 = arith.constant 0 : index
    %2 = vector.load %arg1[%c16, %c0_3] : memref<2000x128xbf16, #tpu.memory_space<vmem>>, vector<48x16xbf16>
    %c64 = arith.constant 64 : index
    %c0_4 = arith.constant 0 : index
    %3 = vector.load %arg1[%c64, %c0_4] : memref<2000x128xbf16, #tpu.memory_space<vmem>>, vector<4x16xbf16>
    %c0_5 = arith.constant 0 : index
    %c0_6 = arith.constant 0 : index
    %4 = vector.load %arg2[%c0_5, %c0_6] : memref<30x128xf32, #tpu.memory_space<vmem>>, vector<1x16xf32>
    %c1 = arith.constant 1 : index
    %c0_7 = arith.constant 0 : index
    %5 = vector.load %arg2[%c1, %c0_7] : memref<30x128xf32, #tpu.memory_space<vmem>>, vector<1x16xf32>
    %c2 = arith.constant 2 : index
    %c0_8 = arith.constant 0 : index
    %6 = vector.load %arg2[%c2, %c0_8] : memref<30x128xf32, #tpu.memory_space<vmem>>, vector<1x16xf32>
    %c3 = arith.constant 3 : index
    %c0_9 = arith.constant 0 : index
    %7 = vector.load %arg2[%c3, %c0_9] : memref<30x128xf32, #tpu.memory_space<vmem>>, vector<1x16xf32>
    %c4 = arith.constant 4 : index
    %c0_10 = arith.constant 0 : index
    %8 = vector.load %arg2[%c4, %c0_10] : memref<30x128xf32, #tpu.memory_space<vmem>>, vector<1x16xf32>
    %c5 = arith.constant 5 : index
    %c0_11 = arith.constant 0 : index
    %9 = vector.load %arg2[%c5, %c0_11] : memref<30x128xf32, #tpu.memory_space<vmem>>, vector<1x16xf32>
    %10 = tpu.iota {dimensions = array<i32: 0>} : vector<256x1xi32>
    %c128_i32 = arith.constant 128 : i32
    %c0_i32 = arith.constant 0 : i32
    %11 = arith.cmpi eq, %c128_i32, %c0_i32 : i32
    %c1_i32 = arith.constant 1 : i32
    %12 = arith.select %11, %c1_i32, %c128_i32 : i32
    %13 = vector.broadcast %12 : i32 to vector<256x1xi32>
    %14 = arith.remsi %10, %13 : vector<256x1xi32>
    %c0_i32_12 = arith.constant 0 : i32
    %15 = vector.broadcast %c0_i32_12 : i32 to vector<256x1xi32>
    %16 = arith.cmpi ne, %14, %15 : vector<256x1xi32>
    %c0_i32_13 = arith.constant 0 : i32
    %17 = vector.broadcast %c0_i32_13 : i32 to vector<256x1xi32>
    %18 = arith.cmpi slt, %14, %17 : vector<256x1xi32>
    %c0_i32_14 = arith.constant 0 : i32
    %19 = arith.cmpi slt, %12, %c0_i32_14 : i32
    %20 = vector.broadcast %19 : i1 to vector<256x1xi1>
    %21 = vector.broadcast %20 : vector<256x1xi1> to vector<256x1xi1>
    %22 = arith.xori %18, %21 : vector<256x1xi1>
    %23 = arith.andi %22, %16 : vector<256x1xi1>
    %24 = vector.broadcast %12 : i32 to vector<256x1xi32>
    %25 = arith.addi %14, %24 : vector<256x1xi32>
    %26 = arith.select %23, %25, %14 : vector<256x1xi1>, vector<256x1xi32>
    %c1_i32_15 = arith.constant 1 : i32
    %27 = vector.broadcast %c1_i32_15 : i32 to vector<256x1xi32>
    %28 = arith.cmpi sge, %26, %27 : vector<256x1xi32>
    %c1_i32_16 = arith.constant 1 : i32
    %29 = tpu.dynamic_rotate %0 by %c1_i32_16 dim 0 : vector<256x4xf32>, i32 -> vector<256x4xf32>
    %cst = arith.constant 0.000000e+00 : f32
    %30 = vector.shape_cast %28 : vector<256x1xi1> to vector<256x1xi1>
    %31 = vector.broadcast %30 : vector<256x1xi1> to vector<256x4xi1>
    %32 = vector.broadcast %cst : f32 to vector<256x4xf32>
    %33 = arith.select %31, %29, %32 : vector<256x4xi1>, vector<256x4xf32>
    %c126_i32 = arith.constant 126 : i32
    %34 = vector.broadcast %c126_i32 : i32 to vector<256x1xi32>
    %35 = arith.cmpi sle, %26, %34 : vector<256x1xi32>
    %c255_i32 = arith.constant 255 : i32
    %36 = tpu.dynamic_rotate %0 by %c255_i32 dim 0 : vector<256x4xf32>, i32 -> vector<256x4xf32>
    %cst_17 = arith.constant 0.000000e+00 : f32
    %37 = vector.shape_cast %35 : vector<256x1xi1> to vector<256x1xi1>
    %38 = vector.broadcast %37 : vector<256x1xi1> to vector<256x4xi1>
    %39 = vector.broadcast %cst_17 : f32 to vector<256x4xf32>
    %40 = arith.select %38, %36, %39 : vector<256x4xi1>, vector<256x4xf32>
    %41 = tpu.concatenate %33, %0, %40 in 1 : vector<256x4xf32>, vector<256x4xf32>, vector<256x4xf32> -> vector<256x12xf32>
    %42 = arith.truncf %41 : vector<256x12xf32> to vector<256x12xbf16>
    %cst_18 = arith.constant dense<0.000000e+00> : vector<256x16xf32>
    %43 = tpu.matmul %42, %1, %cst_18 {dimension_numbers = #tpu.dot_dimension_numbers<[1], [0], [0], [1], [0, 0, 1, 1], [], []>} : vector<256x12xbf16>, vector<12x16xbf16>, vector<256x16xf32> -> vector<256x16xf32>
    %cst_19 = arith.constant dense<0.000000e+00> : vector<16xf32>
    %44 = vector.multi_reduction <add>, %43, %cst_19 [0] : vector<256x16xf32> to vector<16xf32>
    %45 = vector.shape_cast %44 : vector<16xf32> to vector<1x16xf32>
    %cst_20 = arith.constant 2.560000e+02 : f32
    %46 = vector.broadcast %cst_20 : f32 to vector<1x16xf32>
    %47 = arith.divf %45, %46 : vector<1x16xf32>
    %48 = vector.broadcast %47 : vector<1x16xf32> to vector<256x16xf32>
    %49 = arith.subf %43, %48 : vector<256x16xf32>
    %50 = arith.mulf %49, %49 : vector<256x16xf32>
    %cst_21 = arith.constant dense<0.000000e+00> : vector<16xf32>
    %51 = vector.multi_reduction <add>, %50, %cst_21 [0] : vector<256x16xf32> to vector<16xf32>
    %52 = vector.shape_cast %51 : vector<16xf32> to vector<1x16xf32>
    %cst_22 = arith.constant 2.560000e+02 : f32
    %53 = vector.broadcast %cst_22 : f32 to vector<1x16xf32>
    %54 = arith.divf %52, %53 : vector<1x16xf32>
    %55 = vector.broadcast %47 : vector<1x16xf32> to vector<256x16xf32>
    %56 = arith.subf %43, %55 : vector<256x16xf32>
    %cst_23 = arith.constant 9.99999974E-6 : f32
    %57 = vector.broadcast %cst_23 : f32 to vector<1x16xf32>
    %58 = arith.addf %54, %57 : vector<1x16xf32>
    %59 = math.rsqrt %58 : vector<1x16xf32>
    %60 = arith.mulf %4, %59 : vector<1x16xf32>
    %61 = vector.broadcast %60 : vector<1x16xf32> to vector<256x16xf32>
    %62 = arith.mulf %56, %61 : vector<256x16xf32>
    %63 = vector.broadcast %5 : vector<1x16xf32> to vector<256x16xf32>
    %64 = arith.addf %62, %63 : vector<256x16xf32>
    %cst_24 = arith.constant 0.000000e+00 : f32
    %65 = vector.broadcast %cst_24 : f32 to vector<256x16xf32>
    %66 = arith.maximumf %64, %65 : vector<256x16xf32>
    %67 = tpu.iota {dimensions = array<i32: 0>} : vector<256x1xi32>
    %c128_i32_25 = arith.constant 128 : i32
    %c0_i32_26 = arith.constant 0 : i32
    %68 = arith.cmpi eq, %c128_i32_25, %c0_i32_26 : i32
    %c1_i32_27 = arith.constant 1 : i32
    %69 = arith.select %68, %c1_i32_27, %c128_i32_25 : i32
    %70 = vector.broadcast %69 : i32 to vector<256x1xi32>
    %71 = arith.remsi %67, %70 : vector<256x1xi32>
    %c0_i32_28 = arith.constant 0 : i32
    %72 = vector.broadcast %c0_i32_28 : i32 to vector<256x1xi32>
    %73 = arith.cmpi ne, %71, %72 : vector<256x1xi32>
    %c0_i32_29 = arith.constant 0 : i32
    %74 = vector.broadcast %c0_i32_29 : i32 to vector<256x1xi32>
    %75 = arith.cmpi slt, %71, %74 : vector<256x1xi32>
    %c0_i32_30 = arith.constant 0 : i32
    %76 = arith.cmpi slt, %69, %c0_i32_30 : i32
    %77 = vector.broadcast %76 : i1 to vector<256x1xi1>
    %78 = vector.broadcast %77 : vector<256x1xi1> to vector<256x1xi1>
    %79 = arith.xori %75, %78 : vector<256x1xi1>
    %80 = arith.andi %79, %73 : vector<256x1xi1>
    %81 = vector.broadcast %69 : i32 to vector<256x1xi32>
    %82 = arith.addi %71, %81 : vector<256x1xi32>
    %83 = arith.select %80, %82, %71 : vector<256x1xi1>, vector<256x1xi32>
    %c1_i32_31 = arith.constant 1 : i32
    %84 = vector.broadcast %c1_i32_31 : i32 to vector<256x1xi32>
    %85 = arith.cmpi sge, %83, %84 : vector<256x1xi32>
    %c1_i32_32 = arith.constant 1 : i32
    %86 = tpu.dynamic_rotate %66 by %c1_i32_32 dim 0 : vector<256x16xf32>, i32 -> vector<256x16xf32>
    %cst_33 = arith.constant 0.000000e+00 : f32
    %87 = vector.shape_cast %85 : vector<256x1xi1> to vector<256x1xi1>
    %88 = vector.broadcast %87 : vector<256x1xi1> to vector<256x16xi1>
    %89 = vector.broadcast %cst_33 : f32 to vector<256x16xf32>
    %90 = arith.select %88, %86, %89 : vector<256x16xi1>, vector<256x16xf32>
    %c126_i32_34 = arith.constant 126 : i32
    %91 = vector.broadcast %c126_i32_34 : i32 to vector<256x1xi32>
    %92 = arith.cmpi sle, %83, %91 : vector<256x1xi32>
    %c255_i32_35 = arith.constant 255 : i32
    %93 = tpu.dynamic_rotate %66 by %c255_i32_35 dim 0 : vector<256x16xf32>, i32 -> vector<256x16xf32>
    %cst_36 = arith.constant 0.000000e+00 : f32
    %94 = vector.shape_cast %92 : vector<256x1xi1> to vector<256x1xi1>
    %95 = vector.broadcast %94 : vector<256x1xi1> to vector<256x16xi1>
    %96 = vector.broadcast %cst_36 : f32 to vector<256x16xf32>
    %97 = arith.select %95, %93, %96 : vector<256x16xi1>, vector<256x16xf32>
    %98 = tpu.concatenate %90, %66, %97 in 1 : vector<256x16xf32>, vector<256x16xf32>, vector<256x16xf32> -> vector<256x48xf32>
    %99 = arith.truncf %98 : vector<256x48xf32> to vector<256x48xbf16>
    %cst_37 = arith.constant dense<0.000000e+00> : vector<256x16xf32>
    %100 = tpu.matmul %99, %2, %cst_37 {dimension_numbers = #tpu.dot_dimension_numbers<[1], [0], [0], [1], [0, 0, 1, 1], [], []>} : vector<256x48xbf16>, vector<48x16xbf16>, vector<256x16xf32> -> vector<256x16xf32>
    %cst_38 = arith.constant dense<0.000000e+00> : vector<16xf32>
    %101 = vector.multi_reduction <add>, %100, %cst_38 [0] : vector<256x16xf32> to vector<16xf32>
    %102 = vector.shape_cast %101 : vector<16xf32> to vector<1x16xf32>
    %cst_39 = arith.constant 2.560000e+02 : f32
    %103 = vector.broadcast %cst_39 : f32 to vector<1x16xf32>
    %104 = arith.divf %102, %103 : vector<1x16xf32>
    %105 = vector.broadcast %104 : vector<1x16xf32> to vector<256x16xf32>
    %106 = arith.subf %100, %105 : vector<256x16xf32>
    %107 = arith.mulf %106, %106 : vector<256x16xf32>
    %cst_40 = arith.constant dense<0.000000e+00> : vector<16xf32>
    %108 = vector.multi_reduction <add>, %107, %cst_40 [0] : vector<256x16xf32> to vector<16xf32>
    %109 = vector.shape_cast %108 : vector<16xf32> to vector<1x16xf32>
    %cst_41 = arith.constant 2.560000e+02 : f32
    %110 = vector.broadcast %cst_41 : f32 to vector<1x16xf32>
    %111 = arith.divf %109, %110 : vector<1x16xf32>
    %112 = vector.broadcast %104 : vector<1x16xf32> to vector<256x16xf32>
    %113 = arith.subf %100, %112 : vector<256x16xf32>
    %cst_42 = arith.constant 9.99999974E-6 : f32
    %114 = vector.broadcast %cst_42 : f32 to vector<1x16xf32>
    %115 = arith.addf %111, %114 : vector<1x16xf32>
    %116 = math.rsqrt %115 : vector<1x16xf32>
    %117 = arith.mulf %6, %116 : vector<1x16xf32>
    %118 = vector.broadcast %117 : vector<1x16xf32> to vector<256x16xf32>
    %119 = arith.mulf %113, %118 : vector<256x16xf32>
    %120 = vector.broadcast %7 : vector<1x16xf32> to vector<256x16xf32>
    %121 = arith.addf %119, %120 : vector<256x16xf32>
    %122 = arith.truncf %0 : vector<256x4xf32> to vector<256x4xbf16>
    %cst_43 = arith.constant dense<0.000000e+00> : vector<256x16xf32>
    %123 = tpu.matmul %122, %3, %cst_43 {dimension_numbers = #tpu.dot_dimension_numbers<[1], [0], [0], [1], [0, 0, 1, 1], [], []>} : vector<256x4xbf16>, vector<4x16xbf16>, vector<256x16xf32> -> vector<256x16xf32>
    %cst_44 = arith.constant dense<0.000000e+00> : vector<16xf32>
    %124 = vector.multi_reduction <add>, %123, %cst_44 [0] : vector<256x16xf32> to vector<16xf32>
    %125 = vector.shape_cast %124 : vector<16xf32> to vector<1x16xf32>
    %cst_45 = arith.constant 2.560000e+02 : f32
    %126 = vector.broadcast %cst_45 : f32 to vector<1x16xf32>
    %127 = arith.divf %125, %126 : vector<1x16xf32>
    %128 = vector.broadcast %127 : vector<1x16xf32> to vector<256x16xf32>
    %129 = arith.subf %123, %128 : vector<256x16xf32>
    %130 = arith.mulf %129, %129 : vector<256x16xf32>
    %cst_46 = arith.constant dense<0.000000e+00> : vector<16xf32>
    %131 = vector.multi_reduction <add>, %130, %cst_46 [0] : vector<256x16xf32> to vector<16xf32>
    %132 = vector.shape_cast %131 : vector<16xf32> to vector<1x16xf32>
    %cst_47 = arith.constant 2.560000e+02 : f32
    %133 = vector.broadcast %cst_47 : f32 to vector<1x16xf32>
    %134 = arith.divf %132, %133 : vector<1x16xf32>
    %135 = vector.broadcast %127 : vector<1x16xf32> to vector<256x16xf32>
    %136 = arith.subf %123, %135 : vector<256x16xf32>
    %cst_48 = arith.constant 9.99999974E-6 : f32
    %137 = vector.broadcast %cst_48 : f32 to vector<1x16xf32>
    %138 = arith.addf %134, %137 : vector<1x16xf32>
    %139 = math.rsqrt %138 : vector<1x16xf32>
    %140 = arith.mulf %8, %139 : vector<1x16xf32>
    %141 = vector.broadcast %140 : vector<1x16xf32> to vector<256x16xf32>
    %142 = arith.mulf %136, %141 : vector<256x16xf32>
    %143 = vector.broadcast %9 : vector<1x16xf32> to vector<256x16xf32>
    %144 = arith.addf %142, %143 : vector<256x16xf32>
    %145 = arith.addf %121, %144 : vector<256x16xf32>
    %cst_49 = arith.constant 0.000000e+00 : f32
    %146 = vector.broadcast %cst_49 : f32 to vector<256x16xf32>
    %147 = arith.maximumf %145, %146 : vector<256x16xf32>
    %c80 = arith.constant 80 : index
    %c0_50 = arith.constant 0 : index
    %148 = vector.load %arg1[%c80, %c0_50] : memref<2000x128xbf16, #tpu.memory_space<vmem>>, vector<48x32xbf16>
    %c128 = arith.constant 128 : index
    %c0_51 = arith.constant 0 : index
    %149 = vector.load %arg1[%c128, %c0_51] : memref<2000x128xbf16, #tpu.memory_space<vmem>>, vector<96x32xbf16>
    %c224 = arith.constant 224 : index
    %c0_52 = arith.constant 0 : index
    %150 = vector.load %arg1[%c224, %c0_52] : memref<2000x128xbf16, #tpu.memory_space<vmem>>, vector<16x32xbf16>
    %c6 = arith.constant 6 : index
    %c0_53 = arith.constant 0 : index
    %151 = vector.load %arg2[%c6, %c0_53] : memref<30x128xf32, #tpu.memory_space<vmem>>, vector<1x32xf32>
    %c7 = arith.constant 7 : index
    %c0_54 = arith.constant 0 : index
    %152 = vector.load %arg2[%c7, %c0_54] : memref<30x128xf32, #tpu.memory_space<vmem>>, vector<1x32xf32>
    %c8 = arith.constant 8 : index
    %c0_55 = arith.constant 0 : index
    %153 = vector.load %arg2[%c8, %c0_55] : memref<30x128xf32, #tpu.memory_space<vmem>>, vector<1x32xf32>
    %c9 = arith.constant 9 : index
    %c0_56 = arith.constant 0 : index
    %154 = vector.load %arg2[%c9, %c0_56] : memref<30x128xf32, #tpu.memory_space<vmem>>, vector<1x32xf32>
    %c10 = arith.constant 10 : index
    %c0_57 = arith.constant 0 : index
    %155 = vector.load %arg2[%c10, %c0_57] : memref<30x128xf32, #tpu.memory_space<vmem>>, vector<1x32xf32>
    %c11 = arith.constant 11 : index
    %c0_58 = arith.constant 0 : index
    %156 = vector.load %arg2[%c11, %c0_58] : memref<30x128xf32, #tpu.memory_space<vmem>>, vector<1x32xf32>
    %c0_59 = arith.constant 0 : index
    %c0_60 = arith.constant 0 : index
    %157 = vector.load %arg6[%c0_59, %c0_60] : memref<256x16xf32, #tpu.memory_space<vmem>>, vector<256x16xf32>
    tpu.vector_store %arg6[%c0_59, %c0_60], %147 {strides = array<i32>} : memref<256x16xf32, #tpu.memory_space<vmem>>, vector<256x16xf32>,
    %c0_61 = arith.constant 0 : index
    %c0_62 = arith.constant 0 : index
    %158 = tpu.strided_load %arg6[%c0_61, %c0_62] {strides = array<i32: 2, 1>} : memref<256x16xf32, #tpu.memory_space<vmem>>, vector<128x16xf32>
    %c1_63 = arith.constant 1 : index
    %c0_64 = arith.constant 0 : index
    %159 = tpu.strided_load %arg6[%c1_63, %c0_64] {strides = array<i32: 2, 1>} : memref<256x16xf32, #tpu.memory_space<vmem>>, vector<128x16xf32>
    %160 = tpu.iota {dimensions = array<i32: 0>} : vector<128x1xi32>
    %c64_i32 = arith.constant 64 : i32
    %c0_i32_65 = arith.constant 0 : i32
    %161 = arith.cmpi eq, %c64_i32, %c0_i32_65 : i32
    %c1_i32_66 = arith.constant 1 : i32
    %162 = arith.select %161, %c1_i32_66, %c64_i32 : i32
    %163 = vector.broadcast %162 : i32 to vector<128x1xi32>
    %164 = arith.remsi %160, %163 : vector<128x1xi32>
    %c0_i32_67 = arith.constant 0 : i32
    %165 = vector.broadcast %c0_i32_67 : i32 to vector<128x1xi32>
    %166 = arith.cmpi ne, %164, %165 : vector<128x1xi32>
    %c0_i32_68 = arith.constant 0 : i32
    %167 = vector.broadcast %c0_i32_68 : i32 to vector<128x1xi32>
    %168 = arith.cmpi slt, %164, %167 : vector<128x1xi32>
    %c0_i32_69 = arith.constant 0 : i32
    %169 = arith.cmpi slt, %162, %c0_i32_69 : i32
    %170 = vector.broadcast %169 : i1 to vector<128x1xi1>
    %171 = vector.broadcast %170 : vector<128x1xi1> to vector<128x1xi1>
    %172 = arith.xori %168, %171 : vector<128x1xi1>
    %173 = arith.andi %172, %166 : vector<128x1xi1>
    %174 = vector.broadcast %162 : i32 to vector<128x1xi32>
    %175 = arith.addi %164, %174 : vector<128x1xi32>
    %176 = arith.select %173, %175, %164 : vector<128x1xi1>, vector<128x1xi32>
    %c1_i32_70 = arith.constant 1 : i32
    %177 = vector.broadcast %c1_i32_70 : i32 to vector<128x1xi32>
    %178 = arith.cmpi sge, %176, %177 : vector<128x1xi32>
    %c1_i32_71 = arith.constant 1 : i32
    %179 = tpu.dynamic_rotate %159 by %c1_i32_71 dim 0 : vector<128x16xf32>, i32 -> vector<128x16xf32>
    %cst_72 = arith.constant 0.000000e+00 : f32
    %180 = vector.shape_cast %178 : vector<128x1xi1> to vector<128x1xi1>
    %181 = vector.broadcast %180 : vector<128x1xi1> to vector<128x16xi1>
    %182 = vector.broadcast %cst_72 : f32 to vector<128x16xf32>
    %183 = arith.select %181, %179, %182 : vector<128x16xi1>, vector<128x16xf32>
    %184 = tpu.concatenate %183, %158, %159 in 1 : vector<128x16xf32>, vector<128x16xf32>, vector<128x16xf32> -> vector<128x48xf32>
    %185 = arith.truncf %184 : vector<128x48xf32> to vector<128x48xbf16>
    %cst_73 = arith.constant dense<0.000000e+00> : vector<128x32xf32>
    %186 = tpu.matmul %185, %148, %cst_73 {dimension_numbers = #tpu.dot_dimension_numbers<[1], [0], [0], [1], [0, 0, 1, 1], [], []>} : vector<128x48xbf16>, vector<48x32xbf16>, vector<128x32xf32> -> vector<128x32xf32>
    %cst_74 = arith.constant dense<0.000000e+00> : vector<32xf32>
    %187 = vector.multi_reduction <add>, %186, %cst_74 [0] : vector<128x32xf32> to vector<32xf32>
    %188 = vector.shape_cast %187 : vector<32xf32> to vector<1x32xf32>
    %cst_75 = arith.constant 1.280000e+02 : f32
    %189 = vector.broadcast %cst_75 : f32 to vector<1x32xf32>
    %190 = arith.divf %188, %189 : vector<1x32xf32>
    %191 = vector.broadcast %190 : vector<1x32xf32> to vector<128x32xf32>
    %192 = arith.subf %186, %191 : vector<128x32xf32>
    %193 = arith.mulf %192, %192 : vector<128x32xf32>
    %cst_76 = arith.constant dense<0.000000e+00> : vector<32xf32>
    %194 = vector.multi_reduction <add>, %193, %cst_76 [0] : vector<128x32xf32> to vector<32xf32>
    %195 = vector.shape_cast %194 : vector<32xf32> to vector<1x32xf32>
    %cst_77 = arith.constant 1.280000e+02 : f32
    %196 = vector.broadcast %cst_77 : f32 to vector<1x32xf32>
    %197 = arith.divf %195, %196 : vector<1x32xf32>
    %198 = vector.broadcast %190 : vector<1x32xf32> to vector<128x32xf32>
    %199 = arith.subf %186, %198 : vector<128x32xf32>
    %cst_78 = arith.constant 9.99999974E-6 : f32
    %200 = vector.broadcast %cst_78 : f32 to vector<1x32xf32>
    %201 = arith.addf %197, %200 : vector<1x32xf32>
    %202 = math.rsqrt %201 : vector<1x32xf32>
    %203 = arith.mulf %151, %202 : vector<1x32xf32>
    %204 = vector.broadcast %203 : vector<1x32xf32> to vector<128x32xf32>
    %205 = arith.mulf %199, %204 : vector<128x32xf32>
    %206 = vector.broadcast %152 : vector<1x32xf32> to vector<128x32xf32>
    %207 = arith.addf %205, %206 : vector<128x32xf32>
    %cst_79 = arith.constant 0.000000e+00 : f32
    %208 = vector.broadcast %cst_79 : f32 to vector<128x32xf32>
    %209 = arith.maximumf %207, %208 : vector<128x32xf32>
    %210 = tpu.iota {dimensions = array<i32: 0>} : vector<128x1xi32>
    %c64_i32_80 = arith.constant 64 : i32
    %c0_i32_81 = arith.constant 0 : i32
    %211 = arith.cmpi eq, %c64_i32_80, %c0_i32_81 : i32
    %c1_i32_82 = arith.constant 1 : i32
    %212 = arith.select %211, %c1_i32_82, %c64_i32_80 : i32
    %213 = vector.broadcast %212 : i32 to vector<128x1xi32>
    %214 = arith.remsi %210, %213 : vector<128x1xi32>
    %c0_i32_83 = arith.constant 0 : i32
    %215 = vector.broadcast %c0_i32_83 : i32 to vector<128x1xi32>
    %216 = arith.cmpi ne, %214, %215 : vector<128x1xi32>
    %c0_i32_84 = arith.constant 0 : i32
    %217 = vector.broadcast %c0_i32_84 : i32 to vector<128x1xi32>
    %218 = arith.cmpi slt, %214, %217 : vector<128x1xi32>
    %c0_i32_85 = arith.constant 0 : i32
    %219 = arith.cmpi slt, %212, %c0_i32_85 : i32
    %220 = vector.broadcast %219 : i1 to vector<128x1xi1>
    %221 = vector.broadcast %220 : vector<128x1xi1> to vector<128x1xi1>
    %222 = arith.xori %218, %221 : vector<128x1xi1>
    %223 = arith.andi %222, %216 : vector<128x1xi1>
    %224 = vector.broadcast %212 : i32 to vector<128x1xi32>
    %225 = arith.addi %214, %224 : vector<128x1xi32>
    %226 = arith.select %223, %225, %214 : vector<128x1xi1>, vector<128x1xi32>
    %c1_i32_86 = arith.constant 1 : i32
    %227 = vector.broadcast %c1_i32_86 : i32 to vector<128x1xi32>
    %228 = arith.cmpi sge, %226, %227 : vector<128x1xi32>
    %c1_i32_87 = arith.constant 1 : i32
    %229 = tpu.dynamic_rotate %209 by %c1_i32_87 dim 0 : vector<128x32xf32>, i32 -> vector<128x32xf32>
    %cst_88 = arith.constant 0.000000e+00 : f32
    %230 = vector.shape_cast %228 : vector<128x1xi1> to vector<128x1xi1>
    %231 = vector.broadcast %230 : vector<128x1xi1> to vector<128x32xi1>
    %232 = vector.broadcast %cst_88 : f32 to vector<128x32xf32>
    %233 = arith.select %231, %229, %232 : vector<128x32xi1>, vector<128x32xf32>
    %c62_i32 = arith.constant 62 : i32
    %234 = vector.broadcast %c62_i32 : i32 to vector<128x1xi32>
    %235 = arith.cmpi sle, %226, %234 : vector<128x1xi32>
    %c127_i32 = arith.constant 127 : i32
    %236 = tpu.dynamic_rotate %209 by %c127_i32 dim 0 : vector<128x32xf32>, i32 -> vector<128x32xf32>
    %cst_89 = arith.constant 0.000000e+00 : f32
    %237 = vector.shape_cast %235 : vector<128x1xi1> to vector<128x1xi1>
    %238 = vector.broadcast %237 : vector<128x1xi1> to vector<128x32xi1>
    %239 = vector.broadcast %cst_89 : f32 to vector<128x32xf32>
    %240 = arith.select %238, %236, %239 : vector<128x32xi1>, vector<128x32xf32>
    %241 = tpu.concatenate %233, %209, %240 in 1 : vector<128x32xf32>, vector<128x32xf32>, vector<128x32xf32> -> vector<128x96xf32>
    %242 = arith.truncf %241 : vector<128x96xf32> to vector<128x96xbf16>
    %cst_90 = arith.constant dense<0.000000e+00> : vector<128x32xf32>
    %243 = tpu.matmul %242, %149, %cst_90 {dimension_numbers = #tpu.dot_dimension_numbers<[1], [0], [0], [1], [0, 0, 1, 1], [], []>} : vector<128x96xbf16>, vector<96x32xbf16>, vector<128x32xf32> -> vector<128x32xf32>
    %cst_91 = arith.constant dense<0.000000e+00> : vector<32xf32>
    %244 = vector.multi_reduction <add>, %243, %cst_91 [0] : vector<128x32xf32> to vector<32xf32>
    %245 = vector.shape_cast %244 : vector<32xf32> to vector<1x32xf32>
    %cst_92 = arith.constant 1.280000e+02 : f32
    %246 = vector.broadcast %cst_92 : f32 to vector<1x32xf32>
    %247 = arith.divf %245, %246 : vector<1x32xf32>
    %248 = vector.broadcast %247 : vector<1x32xf32> to vector<128x32xf32>
    %249 = arith.subf %243, %248 : vector<128x32xf32>
    %250 = arith.mulf %249, %249 : vector<128x32xf32>
    %cst_93 = arith.constant dense<0.000000e+00> : vector<32xf32>
    %251 = vector.multi_reduction <add>, %250, %cst_93 [0] : vector<128x32xf32> to vector<32xf32>
    %252 = vector.shape_cast %251 : vector<32xf32> to vector<1x32xf32>
    %cst_94 = arith.constant 1.280000e+02 : f32
    %253 = vector.broadcast %cst_94 : f32 to vector<1x32xf32>
    %254 = arith.divf %252, %253 : vector<1x32xf32>
    %255 = vector.broadcast %247 : vector<1x32xf32> to vector<128x32xf32>
    %256 = arith.subf %243, %255 : vector<128x32xf32>
    %cst_95 = arith.constant 9.99999974E-6 : f32
    %257 = vector.broadcast %cst_95 : f32 to vector<1x32xf32>
    %258 = arith.addf %254, %257 : vector<1x32xf32>
    %259 = math.rsqrt %258 : vector<1x32xf32>
    %260 = arith.mulf %153, %259 : vector<1x32xf32>
    %261 = vector.broadcast %260 : vector<1x32xf32> to vector<128x32xf32>
    %262 = arith.mulf %256, %261 : vector<128x32xf32>
    %263 = vector.broadcast %154 : vector<1x32xf32> to vector<128x32xf32>
    %264 = arith.addf %262, %263 : vector<128x32xf32>
    %265 = arith.truncf %158 : vector<128x16xf32> to vector<128x16xbf16>
    %cst_96 = arith.constant dense<0.000000e+00> : vector<128x32xf32>
    %266 = tpu.matmul %265, %150, %cst_96 {dimension_numbers = #tpu.dot_dimension_numbers<[1], [0], [0], [1], [0, 0, 1, 1], [], []>} : vector<128x16xbf16>, vector<16x32xbf16>, vector<128x32xf32> -> vector<128x32xf32>
    %cst_97 = arith.constant dense<0.000000e+00> : vector<32xf32>
    %267 = vector.multi_reduction <add>, %266, %cst_97 [0] : vector<128x32xf32> to vector<32xf32>
    %268 = vector.shape_cast %267 : vector<32xf32> to vector<1x32xf32>
    %cst_98 = arith.constant 1.280000e+02 : f32
    %269 = vector.broadcast %cst_98 : f32 to vector<1x32xf32>
    %270 = arith.divf %268, %269 : vector<1x32xf32>
    %271 = vector.broadcast %270 : vector<1x32xf32> to vector<128x32xf32>
    %272 = arith.subf %266, %271 : vector<128x32xf32>
    %273 = arith.mulf %272, %272 : vector<128x32xf32>
    %cst_99 = arith.constant dense<0.000000e+00> : vector<32xf32>
    %274 = vector.multi_reduction <add>, %273, %cst_99 [0] : vector<128x32xf32> to vector<32xf32>
    %275 = vector.shape_cast %274 : vector<32xf32> to vector<1x32xf32>
    %cst_100 = arith.constant 1.280000e+02 : f32
    %276 = vector.broadcast %cst_100 : f32 to vector<1x32xf32>
    %277 = arith.divf %275, %276 : vector<1x32xf32>
    %278 = vector.broadcast %270 : vector<1x32xf32> to vector<128x32xf32>
    %279 = arith.subf %266, %278 : vector<128x32xf32>
    %cst_101 = arith.constant 9.99999974E-6 : f32
    %280 = vector.broadcast %cst_101 : f32 to vector<1x32xf32>
    %281 = arith.addf %277, %280 : vector<1x32xf32>
    %282 = math.rsqrt %281 : vector<1x32xf32>
    %283 = arith.mulf %155, %282 : vector<1x32xf32>
    %284 = vector.broadcast %283 : vector<1x32xf32> to vector<128x32xf32>
    %285 = arith.mulf %279, %284 : vector<128x32xf32>
    %286 = vector.broadcast %156 : vector<1x32xf32> to vector<128x32xf32>
    %287 = arith.addf %285, %286 : vector<128x32xf32>
    %288 = arith.addf %264, %287 : vector<128x32xf32>
    %cst_102 = arith.constant 0.000000e+00 : f32
    %289 = vector.broadcast %cst_102 : f32 to vector<128x32xf32>
    %290 = arith.maximumf %288, %289 : vector<128x32xf32>
    %c240 = arith.constant 240 : index
    %c0_103 = arith.constant 0 : index
    %291 = vector.load %arg1[%c240, %c0_103] : memref<2000x128xbf16, #tpu.memory_space<vmem>>, vector<96x64xbf16>
    %c336 = arith.constant 336 : index
    %c0_104 = arith.constant 0 : index
    %292 = vector.load %arg1[%c336, %c0_104] : memref<2000x128xbf16, #tpu.memory_space<vmem>>, vector<192x64xbf16>
    %c528 = arith.constant 528 : index
    %c0_105 = arith.constant 0 : index
    %293 = vector.load %arg1[%c528, %c0_105] : memref<2000x128xbf16, #tpu.memory_space<vmem>>, vector<32x64xbf16>
    %c12 = arith.constant 12 : index
    %c0_106 = arith.constant 0 : index
    %294 = vector.load %arg2[%c12, %c0_106] : memref<30x128xf32, #tpu.memory_space<vmem>>, vector<1x64xf32>
    %c13 = arith.constant 13 : index
    %c0_107 = arith.constant 0 : index
    %295 = vector.load %arg2[%c13, %c0_107] : memref<30x128xf32, #tpu.memory_space<vmem>>, vector<1x64xf32>
    %c14 = arith.constant 14 : index
    %c0_108 = arith.constant 0 : index
    %296 = vector.load %arg2[%c14, %c0_108] : memref<30x128xf32, #tpu.memory_space<vmem>>, vector<1x64xf32>
    %c15 = arith.constant 15 : index
    %c0_109 = arith.constant 0 : index
    %297 = vector.load %arg2[%c15, %c0_109] : memref<30x128xf32, #tpu.memory_space<vmem>>, vector<1x64xf32>
    %c16_110 = arith.constant 16 : index
    %c0_111 = arith.constant 0 : index
    %298 = vector.load %arg2[%c16_110, %c0_111] : memref<30x128xf32, #tpu.memory_space<vmem>>, vector<1x64xf32>
    %c17 = arith.constant 17 : index
    %c0_112 = arith.constant 0 : index
    %299 = vector.load %arg2[%c17, %c0_112] : memref<30x128xf32, #tpu.memory_space<vmem>>, vector<1x64xf32>
    %c0_113 = arith.constant 0 : index
    %c0_114 = arith.constant 0 : index
    %300 = vector.load %arg7[%c0_113, %c0_114] : memref<128x32xf32, #tpu.memory_space<vmem>>, vector<128x32xf32>
    tpu.vector_store %arg7[%c0_113, %c0_114], %290 {strides = array<i32>} : memref<128x32xf32, #tpu.memory_space<vmem>>, vector<128x32xf32>,
    %c0_115 = arith.constant 0 : index
    %c0_116 = arith.constant 0 : index
    %301 = tpu.strided_load %arg7[%c0_115, %c0_116] {strides = array<i32: 2, 1>} : memref<128x32xf32, #tpu.memory_space<vmem>>, vector<64x32xf32>
    %c1_117 = arith.constant 1 : index
    %c0_118 = arith.constant 0 : index
    %302 = tpu.strided_load %arg7[%c1_117, %c0_118] {strides = array<i32: 2, 1>} : memref<128x32xf32, #tpu.memory_space<vmem>>, vector<64x32xf32>
    %303 = tpu.iota {dimensions = array<i32: 0>} : vector<64x1xi32>
    %c32_i32 = arith.constant 32 : i32
    %c0_i32_119 = arith.constant 0 : i32
    %304 = arith.cmpi eq, %c32_i32, %c0_i32_119 : i32
    %c1_i32_120 = arith.constant 1 : i32
    %305 = arith.select %304, %c1_i32_120, %c32_i32 : i32
    %306 = vector.broadcast %305 : i32 to vector<64x1xi32>
    %307 = arith.remsi %303, %306 : vector<64x1xi32>
    %c0_i32_121 = arith.constant 0 : i32
    %308 = vector.broadcast %c0_i32_121 : i32 to vector<64x1xi32>
    %309 = arith.cmpi ne, %307, %308 : vector<64x1xi32>
    %c0_i32_122 = arith.constant 0 : i32
    %310 = vector.broadcast %c0_i32_122 : i32 to vector<64x1xi32>
    %311 = arith.cmpi slt, %307, %310 : vector<64x1xi32>
    %c0_i32_123 = arith.constant 0 : i32
    %312 = arith.cmpi slt, %305, %c0_i32_123 : i32
    %313 = vector.broadcast %312 : i1 to vector<64x1xi1>
    %314 = vector.broadcast %313 : vector<64x1xi1> to vector<64x1xi1>
    %315 = arith.xori %311, %314 : vector<64x1xi1>
    %316 = arith.andi %315, %309 : vector<64x1xi1>
    %317 = vector.broadcast %305 : i32 to vector<64x1xi32>
    %318 = arith.addi %307, %317 : vector<64x1xi32>
    %319 = arith.select %316, %318, %307 : vector<64x1xi1>, vector<64x1xi32>
    %c1_i32_124 = arith.constant 1 : i32
    %320 = vector.broadcast %c1_i32_124 : i32 to vector<64x1xi32>
    %321 = arith.cmpi sge, %319, %320 : vector<64x1xi32>
    %c1_i32_125 = arith.constant 1 : i32
    %322 = tpu.dynamic_rotate %302 by %c1_i32_125 dim 0 : vector<64x32xf32>, i32 -> vector<64x32xf32>
    %cst_126 = arith.constant 0.000000e+00 : f32
    %323 = vector.shape_cast %321 : vector<64x1xi1> to vector<64x1xi1>
    %324 = vector.broadcast %323 : vector<64x1xi1> to vector<64x32xi1>
    %325 = vector.broadcast %cst_126 : f32 to vector<64x32xf32>
    %326 = arith.select %324, %322, %325 : vector<64x32xi1>, vector<64x32xf32>
    %327 = tpu.concatenate %326, %301, %302 in 1 : vector<64x32xf32>, vector<64x32xf32>, vector<64x32xf32> -> vector<64x96xf32>
    %328 = arith.truncf %327 : vector<64x96xf32> to vector<64x96xbf16>
    %cst_127 = arith.constant dense<0.000000e+00> : vector<64x64xf32>
    %329 = tpu.matmul %328, %291, %cst_127 {dimension_numbers = #tpu.dot_dimension_numbers<[1], [0], [0], [1], [0, 0, 1, 1], [], []>} : vector<64x96xbf16>, vector<96x64xbf16>, vector<64x64xf32> -> vector<64x64xf32>
    %cst_128 = arith.constant dense<0.000000e+00> : vector<64xf32>
    %330 = vector.multi_reduction <add>, %329, %cst_128 [0] : vector<64x64xf32> to vector<64xf32>
    %331 = vector.shape_cast %330 : vector<64xf32> to vector<1x64xf32>
    %cst_129 = arith.constant 6.400000e+01 : f32
    %332 = vector.broadcast %cst_129 : f32 to vector<1x64xf32>
    %333 = arith.divf %331, %332 : vector<1x64xf32>
    %334 = vector.broadcast %333 : vector<1x64xf32> to vector<64x64xf32>
    %335 = arith.subf %329, %334 : vector<64x64xf32>
    %336 = arith.mulf %335, %335 : vector<64x64xf32>
    %cst_130 = arith.constant dense<0.000000e+00> : vector<64xf32>
    %337 = vector.multi_reduction <add>, %336, %cst_130 [0] : vector<64x64xf32> to vector<64xf32>
    %338 = vector.shape_cast %337 : vector<64xf32> to vector<1x64xf32>
    %cst_131 = arith.constant 6.400000e+01 : f32
    %339 = vector.broadcast %cst_131 : f32 to vector<1x64xf32>
    %340 = arith.divf %338, %339 : vector<1x64xf32>
    %341 = vector.broadcast %333 : vector<1x64xf32> to vector<64x64xf32>
    %342 = arith.subf %329, %341 : vector<64x64xf32>
    %cst_132 = arith.constant 9.99999974E-6 : f32
    %343 = vector.broadcast %cst_132 : f32 to vector<1x64xf32>
    %344 = arith.addf %340, %343 : vector<1x64xf32>
    %345 = math.rsqrt %344 : vector<1x64xf32>
    %346 = arith.mulf %294, %345 : vector<1x64xf32>
    %347 = vector.broadcast %346 : vector<1x64xf32> to vector<64x64xf32>
    %348 = arith.mulf %342, %347 : vector<64x64xf32>
    %349 = vector.broadcast %295 : vector<1x64xf32> to vector<64x64xf32>
    %350 = arith.addf %348, %349 : vector<64x64xf32>
    %cst_133 = arith.constant 0.000000e+00 : f32
    %351 = vector.broadcast %cst_133 : f32 to vector<64x64xf32>
    %352 = arith.maximumf %350, %351 : vector<64x64xf32>
    %353 = tpu.iota {dimensions = array<i32: 0>} : vector<64x1xi32>
    %c32_i32_134 = arith.constant 32 : i32
    %c0_i32_135 = arith.constant 0 : i32
    %354 = arith.cmpi eq, %c32_i32_134, %c0_i32_135 : i32
    %c1_i32_136 = arith.constant 1 : i32
    %355 = arith.select %354, %c1_i32_136, %c32_i32_134 : i32
    %356 = vector.broadcast %355 : i32 to vector<64x1xi32>
    %357 = arith.remsi %353, %356 : vector<64x1xi32>
    %c0_i32_137 = arith.constant 0 : i32
    %358 = vector.broadcast %c0_i32_137 : i32 to vector<64x1xi32>
    %359 = arith.cmpi ne, %357, %358 : vector<64x1xi32>
    %c0_i32_138 = arith.constant 0 : i32
    %360 = vector.broadcast %c0_i32_138 : i32 to vector<64x1xi32>
    %361 = arith.cmpi slt, %357, %360 : vector<64x1xi32>
    %c0_i32_139 = arith.constant 0 : i32
    %362 = arith.cmpi slt, %355, %c0_i32_139 : i32
    %363 = vector.broadcast %362 : i1 to vector<64x1xi1>
    %364 = vector.broadcast %363 : vector<64x1xi1> to vector<64x1xi1>
    %365 = arith.xori %361, %364 : vector<64x1xi1>
    %366 = arith.andi %365, %359 : vector<64x1xi1>
    %367 = vector.broadcast %355 : i32 to vector<64x1xi32>
    %368 = arith.addi %357, %367 : vector<64x1xi32>
    %369 = arith.select %366, %368, %357 : vector<64x1xi1>, vector<64x1xi32>
    %c1_i32_140 = arith.constant 1 : i32
    %370 = vector.broadcast %c1_i32_140 : i32 to vector<64x1xi32>
    %371 = arith.cmpi sge, %369, %370 : vector<64x1xi32>
    %c1_i32_141 = arith.constant 1 : i32
    %372 = tpu.dynamic_rotate %352 by %c1_i32_141 dim 0 : vector<64x64xf32>, i32 -> vector<64x64xf32>
    %cst_142 = arith.constant 0.000000e+00 : f32
    %373 = vector.shape_cast %371 : vector<64x1xi1> to vector<64x1xi1>
    %374 = vector.broadcast %373 : vector<64x1xi1> to vector<64x64xi1>
    %375 = vector.broadcast %cst_142 : f32 to vector<64x64xf32>
    %376 = arith.select %374, %372, %375 : vector<64x64xi1>, vector<64x64xf32>
    %c30_i32 = arith.constant 30 : i32
    %377 = vector.broadcast %c30_i32 : i32 to vector<64x1xi32>
    %378 = arith.cmpi sle, %369, %377 : vector<64x1xi32>
    %c63_i32 = arith.constant 63 : i32
    %379 = tpu.dynamic_rotate %352 by %c63_i32 dim 0 : vector<64x64xf32>, i32 -> vector<64x64xf32>
    %cst_143 = arith.constant 0.000000e+00 : f32
    %380 = vector.shape_cast %378 : vector<64x1xi1> to vector<64x1xi1>
    %381 = vector.broadcast %380 : vector<64x1xi1> to vector<64x64xi1>
    %382 = vector.broadcast %cst_143 : f32 to vector<64x64xf32>
    %383 = arith.select %381, %379, %382 : vector<64x64xi1>, vector<64x64xf32>
    %384 = tpu.concatenate %376, %352, %383 in 1 : vector<64x64xf32>, vector<64x64xf32>, vector<64x64xf32> -> vector<64x192xf32>
    %385 = arith.truncf %384 : vector<64x192xf32> to vector<64x192xbf16>
    %cst_144 = arith.constant dense<0.000000e+00> : vector<64x64xf32>
    %386 = tpu.matmul %385, %292, %cst_144 {dimension_numbers = #tpu.dot_dimension_numbers<[1], [0], [0], [1], [0, 0, 1, 1], [], []>} : vector<64x192xbf16>, vector<192x64xbf16>, vector<64x64xf32> -> vector<64x64xf32>
    %cst_145 = arith.constant dense<0.000000e+00> : vector<64xf32>
    %387 = vector.multi_reduction <add>, %386, %cst_145 [0] : vector<64x64xf32> to vector<64xf32>
    %388 = vector.shape_cast %387 : vector<64xf32> to vector<1x64xf32>
    %cst_146 = arith.constant 6.400000e+01 : f32
    %389 = vector.broadcast %cst_146 : f32 to vector<1x64xf32>
    %390 = arith.divf %388, %389 : vector<1x64xf32>
    %391 = vector.broadcast %390 : vector<1x64xf32> to vector<64x64xf32>
    %392 = arith.subf %386, %391 : vector<64x64xf32>
    %393 = arith.mulf %392, %392 : vector<64x64xf32>
    %cst_147 = arith.constant dense<0.000000e+00> : vector<64xf32>
    %394 = vector.multi_reduction <add>, %393, %cst_147 [0] : vector<64x64xf32> to vector<64xf32>
    %395 = vector.shape_cast %394 : vector<64xf32> to vector<1x64xf32>
    %cst_148 = arith.constant 6.400000e+01 : f32
    %396 = vector.broadcast %cst_148 : f32 to vector<1x64xf32>
    %397 = arith.divf %395, %396 : vector<1x64xf32>
    %398 = vector.broadcast %390 : vector<1x64xf32> to vector<64x64xf32>
    %399 = arith.subf %386, %398 : vector<64x64xf32>
    %cst_149 = arith.constant 9.99999974E-6 : f32
    %400 = vector.broadcast %cst_149 : f32 to vector<1x64xf32>
    %401 = arith.addf %397, %400 : vector<1x64xf32>
    %402 = math.rsqrt %401 : vector<1x64xf32>
    %403 = arith.mulf %296, %402 : vector<1x64xf32>
    %404 = vector.broadcast %403 : vector<1x64xf32> to vector<64x64xf32>
    %405 = arith.mulf %399, %404 : vector<64x64xf32>
    %406 = vector.broadcast %297 : vector<1x64xf32> to vector<64x64xf32>
    %407 = arith.addf %405, %406 : vector<64x64xf32>
    %408 = arith.truncf %301 : vector<64x32xf32> to vector<64x32xbf16>
    %cst_150 = arith.constant dense<0.000000e+00> : vector<64x64xf32>
    %409 = tpu.matmul %408, %293, %cst_150 {dimension_numbers = #tpu.dot_dimension_numbers<[1], [0], [0], [1], [0, 0, 1, 1], [], []>} : vector<64x32xbf16>, vector<32x64xbf16>, vector<64x64xf32> -> vector<64x64xf32>
    %cst_151 = arith.constant dense<0.000000e+00> : vector<64xf32>
    %410 = vector.multi_reduction <add>, %409, %cst_151 [0] : vector<64x64xf32> to vector<64xf32>
    %411 = vector.shape_cast %410 : vector<64xf32> to vector<1x64xf32>
    %cst_152 = arith.constant 6.400000e+01 : f32
    %412 = vector.broadcast %cst_152 : f32 to vector<1x64xf32>
    %413 = arith.divf %411, %412 : vector<1x64xf32>
    %414 = vector.broadcast %413 : vector<1x64xf32> to vector<64x64xf32>
    %415 = arith.subf %409, %414 : vector<64x64xf32>
    %416 = arith.mulf %415, %415 : vector<64x64xf32>
    %cst_153 = arith.constant dense<0.000000e+00> : vector<64xf32>
    %417 = vector.multi_reduction <add>, %416, %cst_153 [0] : vector<64x64xf32> to vector<64xf32>
    %418 = vector.shape_cast %417 : vector<64xf32> to vector<1x64xf32>
    %cst_154 = arith.constant 6.400000e+01 : f32
    %419 = vector.broadcast %cst_154 : f32 to vector<1x64xf32>
    %420 = arith.divf %418, %419 : vector<1x64xf32>
    %421 = vector.broadcast %413 : vector<1x64xf32> to vector<64x64xf32>
    %422 = arith.subf %409, %421 : vector<64x64xf32>
    %cst_155 = arith.constant 9.99999974E-6 : f32
    %423 = vector.broadcast %cst_155 : f32 to vector<1x64xf32>
    %424 = arith.addf %420, %423 : vector<1x64xf32>
    %425 = math.rsqrt %424 : vector<1x64xf32>
    %426 = arith.mulf %298, %425 : vector<1x64xf32>
    %427 = vector.broadcast %426 : vector<1x64xf32> to vector<64x64xf32>
    %428 = arith.mulf %422, %427 : vector<64x64xf32>
    %429 = vector.broadcast %299 : vector<1x64xf32> to vector<64x64xf32>
    %430 = arith.addf %428, %429 : vector<64x64xf32>
    %431 = arith.addf %407, %430 : vector<64x64xf32>
    %cst_156 = arith.constant 0.000000e+00 : f32
    %432 = vector.broadcast %cst_156 : f32 to vector<64x64xf32>
    %433 = arith.maximumf %431, %432 : vector<64x64xf32>
    %c560 = arith.constant 560 : index
    %c0_157 = arith.constant 0 : index
    %434 = vector.load %arg1[%c560, %c0_157] : memref<2000x128xbf16, #tpu.memory_space<vmem>>, vector<192x96xbf16>
    %c752 = arith.constant 752 : index
    %c0_158 = arith.constant 0 : index
    %435 = vector.load %arg1[%c752, %c0_158] : memref<2000x128xbf16, #tpu.memory_space<vmem>>, vector<288x96xbf16>
    %c1040 = arith.constant 1040 : index
    %c0_159 = arith.constant 0 : index
    %436 = vector.load %arg1[%c1040, %c0_159] : memref<2000x128xbf16, #tpu.memory_space<vmem>>, vector<64x96xbf16>
    %c18 = arith.constant 18 : index
    %c0_160 = arith.constant 0 : index
    %437 = vector.load %arg2[%c18, %c0_160] : memref<30x128xf32, #tpu.memory_space<vmem>>, vector<1x96xf32>
    %c19 = arith.constant 19 : index
    %c0_161 = arith.constant 0 : index
    %438 = vector.load %arg2[%c19, %c0_161] : memref<30x128xf32, #tpu.memory_space<vmem>>, vector<1x96xf32>
    %c20 = arith.constant 20 : index
    %c0_162 = arith.constant 0 : index
    %439 = vector.load %arg2[%c20, %c0_162] : memref<30x128xf32, #tpu.memory_space<vmem>>, vector<1x96xf32>
    %c21 = arith.constant 21 : index
    %c0_163 = arith.constant 0 : index
    %440 = vector.load %arg2[%c21, %c0_163] : memref<30x128xf32, #tpu.memory_space<vmem>>, vector<1x96xf32>
    %c22 = arith.constant 22 : index
    %c0_164 = arith.constant 0 : index
    %441 = vector.load %arg2[%c22, %c0_164] : memref<30x128xf32, #tpu.memory_space<vmem>>, vector<1x96xf32>
    %c23 = arith.constant 23 : index
    %c0_165 = arith.constant 0 : index
    %442 = vector.load %arg2[%c23, %c0_165] : memref<30x128xf32, #tpu.memory_space<vmem>>, vector<1x96xf32>
    %c0_166 = arith.constant 0 : index
    %c0_167 = arith.constant 0 : index
    %443 = vector.load %arg8[%c0_166, %c0_167] : memref<64x64xf32, #tpu.memory_space<vmem>>, vector<64x64xf32>
    tpu.vector_store %arg8[%c0_166, %c0_167], %433 {strides = array<i32>} : memref<64x64xf32, #tpu.memory_space<vmem>>, vector<64x64xf32>,
    %c0_168 = arith.constant 0 : index
    %c0_169 = arith.constant 0 : index
    %444 = tpu.strided_load %arg8[%c0_168, %c0_169] {strides = array<i32: 2, 1>} : memref<64x64xf32, #tpu.memory_space<vmem>>, vector<32x64xf32>
    %c1_170 = arith.constant 1 : index
    %c0_171 = arith.constant 0 : index
    %445 = tpu.strided_load %arg8[%c1_170, %c0_171] {strides = array<i32: 2, 1>} : memref<64x64xf32, #tpu.memory_space<vmem>>, vector<32x64xf32>
    %446 = tpu.iota {dimensions = array<i32: 0>} : vector<32x1xi32>
    %c16_i32 = arith.constant 16 : i32
    %c0_i32_172 = arith.constant 0 : i32
    %447 = arith.cmpi eq, %c16_i32, %c0_i32_172 : i32
    %c1_i32_173 = arith.constant 1 : i32
    %448 = arith.select %447, %c1_i32_173, %c16_i32 : i32
    %449 = vector.broadcast %448 : i32 to vector<32x1xi32>
    %450 = arith.remsi %446, %449 : vector<32x1xi32>
    %c0_i32_174 = arith.constant 0 : i32
    %451 = vector.broadcast %c0_i32_174 : i32 to vector<32x1xi32>
    %452 = arith.cmpi ne, %450, %451 : vector<32x1xi32>
    %c0_i32_175 = arith.constant 0 : i32
    %453 = vector.broadcast %c0_i32_175 : i32 to vector<32x1xi32>
    %454 = arith.cmpi slt, %450, %453 : vector<32x1xi32>
    %c0_i32_176 = arith.constant 0 : i32
    %455 = arith.cmpi slt, %448, %c0_i32_176 : i32
    %456 = vector.broadcast %455 : i1 to vector<32x1xi1>
    %457 = vector.broadcast %456 : vector<32x1xi1> to vector<32x1xi1>
    %458 = arith.xori %454, %457 : vector<32x1xi1>
    %459 = arith.andi %458, %452 : vector<32x1xi1>
    %460 = vector.broadcast %448 : i32 to vector<32x1xi32>
    %461 = arith.addi %450, %460 : vector<32x1xi32>
    %462 = arith.select %459, %461, %450 : vector<32x1xi1>, vector<32x1xi32>
    %c1_i32_177 = arith.constant 1 : i32
    %463 = vector.broadcast %c1_i32_177 : i32 to vector<32x1xi32>
    %464 = arith.cmpi sge, %462, %463 : vector<32x1xi32>
    %c1_i32_178 = arith.constant 1 : i32
    %465 = tpu.dynamic_rotate %445 by %c1_i32_178 dim 0 : vector<32x64xf32>, i32 -> vector<32x64xf32>
    %cst_179 = arith.constant 0.000000e+00 : f32
    %466 = vector.shape_cast %464 : vector<32x1xi1> to vector<32x1xi1>
    %467 = vector.broadcast %466 : vector<32x1xi1> to vector<32x64xi1>
    %468 = vector.broadcast %cst_179 : f32 to vector<32x64xf32>
    %469 = arith.select %467, %465, %468 : vector<32x64xi1>, vector<32x64xf32>
    %470 = tpu.concatenate %469, %444, %445 in 1 : vector<32x64xf32>, vector<32x64xf32>, vector<32x64xf32> -> vector<32x192xf32>
    %471 = arith.truncf %470 : vector<32x192xf32> to vector<32x192xbf16>
    %cst_180 = arith.constant dense<0.000000e+00> : vector<32x96xf32>
    %472 = tpu.matmul %471, %434, %cst_180 {dimension_numbers = #tpu.dot_dimension_numbers<[1], [0], [0], [1], [0, 0, 1, 1], [], []>} : vector<32x192xbf16>, vector<192x96xbf16>, vector<32x96xf32> -> vector<32x96xf32>
    %cst_181 = arith.constant dense<0.000000e+00> : vector<96xf32>
    %473 = vector.multi_reduction <add>, %472, %cst_181 [0] : vector<32x96xf32> to vector<96xf32>
    %474 = vector.shape_cast %473 : vector<96xf32> to vector<1x96xf32>
    %cst_182 = arith.constant 3.200000e+01 : f32
    %475 = vector.broadcast %cst_182 : f32 to vector<1x96xf32>
    %476 = arith.divf %474, %475 : vector<1x96xf32>
    %477 = vector.broadcast %476 : vector<1x96xf32> to vector<32x96xf32>
    %478 = arith.subf %472, %477 : vector<32x96xf32>
    %479 = arith.mulf %478, %478 : vector<32x96xf32>
    %cst_183 = arith.constant dense<0.000000e+00> : vector<96xf32>
    %480 = vector.multi_reduction <add>, %479, %cst_183 [0] : vector<32x96xf32> to vector<96xf32>
    %481 = vector.shape_cast %480 : vector<96xf32> to vector<1x96xf32>
    %cst_184 = arith.constant 3.200000e+01 : f32
    %482 = vector.broadcast %cst_184 : f32 to vector<1x96xf32>
    %483 = arith.divf %481, %482 : vector<1x96xf32>
    %484 = vector.broadcast %476 : vector<1x96xf32> to vector<32x96xf32>
    %485 = arith.subf %472, %484 : vector<32x96xf32>
    %cst_185 = arith.constant 9.99999974E-6 : f32
    %486 = vector.broadcast %cst_185 : f32 to vector<1x96xf32>
    %487 = arith.addf %483, %486 : vector<1x96xf32>
    %488 = math.rsqrt %487 : vector<1x96xf32>
    %489 = arith.mulf %437, %488 : vector<1x96xf32>
    %490 = vector.broadcast %489 : vector<1x96xf32> to vector<32x96xf32>
    %491 = arith.mulf %485, %490 : vector<32x96xf32>
    %492 = vector.broadcast %438 : vector<1x96xf32> to vector<32x96xf32>
    %493 = arith.addf %491, %492 : vector<32x96xf32>
    %cst_186 = arith.constant 0.000000e+00 : f32
    %494 = vector.broadcast %cst_186 : f32 to vector<32x96xf32>
    %495 = arith.maximumf %493, %494 : vector<32x96xf32>
    %496 = tpu.iota {dimensions = array<i32: 0>} : vector<32x1xi32>
    %c16_i32_187 = arith.constant 16 : i32
    %c0_i32_188 = arith.constant 0 : i32
    %497 = arith.cmpi eq, %c16_i32_187, %c0_i32_188 : i32
    %c1_i32_189 = arith.constant 1 : i32
    %498 = arith.select %497, %c1_i32_189, %c16_i32_187 : i32
    %499 = vector.broadcast %498 : i32 to vector<32x1xi32>
    %500 = arith.remsi %496, %499 : vector<32x1xi32>
    %c0_i32_190 = arith.constant 0 : i32
    %501 = vector.broadcast %c0_i32_190 : i32 to vector<32x1xi32>
    %502 = arith.cmpi ne, %500, %501 : vector<32x1xi32>
    %c0_i32_191 = arith.constant 0 : i32
    %503 = vector.broadcast %c0_i32_191 : i32 to vector<32x1xi32>
    %504 = arith.cmpi slt, %500, %503 : vector<32x1xi32>
    %c0_i32_192 = arith.constant 0 : i32
    %505 = arith.cmpi slt, %498, %c0_i32_192 : i32
    %506 = vector.broadcast %505 : i1 to vector<32x1xi1>
    %507 = vector.broadcast %506 : vector<32x1xi1> to vector<32x1xi1>
    %508 = arith.xori %504, %507 : vector<32x1xi1>
    %509 = arith.andi %508, %502 : vector<32x1xi1>
    %510 = vector.broadcast %498 : i32 to vector<32x1xi32>
    %511 = arith.addi %500, %510 : vector<32x1xi32>
    %512 = arith.select %509, %511, %500 : vector<32x1xi1>, vector<32x1xi32>
    %c1_i32_193 = arith.constant 1 : i32
    %513 = vector.broadcast %c1_i32_193 : i32 to vector<32x1xi32>
    %514 = arith.cmpi sge, %512, %513 : vector<32x1xi32>
    %c1_i32_194 = arith.constant 1 : i32
    %515 = tpu.dynamic_rotate %495 by %c1_i32_194 dim 0 : vector<32x96xf32>, i32 -> vector<32x96xf32>
    %cst_195 = arith.constant 0.000000e+00 : f32
    %516 = vector.shape_cast %514 : vector<32x1xi1> to vector<32x1xi1>
    %517 = vector.broadcast %516 : vector<32x1xi1> to vector<32x96xi1>
    %518 = vector.broadcast %cst_195 : f32 to vector<32x96xf32>
    %519 = arith.select %517, %515, %518 : vector<32x96xi1>, vector<32x96xf32>
    %c14_i32 = arith.constant 14 : i32
    %520 = vector.broadcast %c14_i32 : i32 to vector<32x1xi32>
    %521 = arith.cmpi sle, %512, %520 : vector<32x1xi32>
    %c31_i32 = arith.constant 31 : i32
    %522 = tpu.dynamic_rotate %495 by %c31_i32 dim 0 : vector<32x96xf32>, i32 -> vector<32x96xf32>
    %cst_196 = arith.constant 0.000000e+00 : f32
    %523 = vector.shape_cast %521 : vector<32x1xi1> to vector<32x1xi1>
    %524 = vector.broadcast %523 : vector<32x1xi1> to vector<32x96xi1>
    %525 = vector.broadcast %cst_196 : f32 to vector<32x96xf32>
    %526 = arith.select %524, %522, %525 : vector<32x96xi1>, vector<32x96xf32>
    %527 = tpu.concatenate %519, %495, %526 in 1 : vector<32x96xf32>, vector<32x96xf32>, vector<32x96xf32> -> vector<32x288xf32>
    %528 = arith.truncf %527 : vector<32x288xf32> to vector<32x288xbf16>
    %cst_197 = arith.constant dense<0.000000e+00> : vector<32x96xf32>
    %529 = tpu.matmul %528, %435, %cst_197 {dimension_numbers = #tpu.dot_dimension_numbers<[1], [0], [0], [1], [0, 0, 1, 1], [], []>} : vector<32x288xbf16>, vector<288x96xbf16>, vector<32x96xf32> -> vector<32x96xf32>
    %cst_198 = arith.constant dense<0.000000e+00> : vector<96xf32>
    %530 = vector.multi_reduction <add>, %529, %cst_198 [0] : vector<32x96xf32> to vector<96xf32>
    %531 = vector.shape_cast %530 : vector<96xf32> to vector<1x96xf32>
    %cst_199 = arith.constant 3.200000e+01 : f32
    %532 = vector.broadcast %cst_199 : f32 to vector<1x96xf32>
    %533 = arith.divf %531, %532 : vector<1x96xf32>
    %534 = vector.broadcast %533 : vector<1x96xf32> to vector<32x96xf32>
    %535 = arith.subf %529, %534 : vector<32x96xf32>
    %536 = arith.mulf %535, %535 : vector<32x96xf32>
    %cst_200 = arith.constant dense<0.000000e+00> : vector<96xf32>
    %537 = vector.multi_reduction <add>, %536, %cst_200 [0] : vector<32x96xf32> to vector<96xf32>
    %538 = vector.shape_cast %537 : vector<96xf32> to vector<1x96xf32>
    %cst_201 = arith.constant 3.200000e+01 : f32
    %539 = vector.broadcast %cst_201 : f32 to vector<1x96xf32>
    %540 = arith.divf %538, %539 : vector<1x96xf32>
    %541 = vector.broadcast %533 : vector<1x96xf32> to vector<32x96xf32>
    %542 = arith.subf %529, %541 : vector<32x96xf32>
    %cst_202 = arith.constant 9.99999974E-6 : f32
    %543 = vector.broadcast %cst_202 : f32 to vector<1x96xf32>
    %544 = arith.addf %540, %543 : vector<1x96xf32>
    %545 = math.rsqrt %544 : vector<1x96xf32>
    %546 = arith.mulf %439, %545 : vector<1x96xf32>
    %547 = vector.broadcast %546 : vector<1x96xf32> to vector<32x96xf32>
    %548 = arith.mulf %542, %547 : vector<32x96xf32>
    %549 = vector.broadcast %440 : vector<1x96xf32> to vector<32x96xf32>
    %550 = arith.addf %548, %549 : vector<32x96xf32>
    %551 = arith.truncf %444 : vector<32x64xf32> to vector<32x64xbf16>
    %cst_203 = arith.constant dense<0.000000e+00> : vector<32x96xf32>
    %552 = tpu.matmul %551, %436, %cst_203 {dimension_numbers = #tpu.dot_dimension_numbers<[1], [0], [0], [1], [0, 0, 1, 1], [], []>} : vector<32x64xbf16>, vector<64x96xbf16>, vector<32x96xf32> -> vector<32x96xf32>
    %cst_204 = arith.constant dense<0.000000e+00> : vector<96xf32>
    %553 = vector.multi_reduction <add>, %552, %cst_204 [0] : vector<32x96xf32> to vector<96xf32>
    %554 = vector.shape_cast %553 : vector<96xf32> to vector<1x96xf32>
    %cst_205 = arith.constant 3.200000e+01 : f32
    %555 = vector.broadcast %cst_205 : f32 to vector<1x96xf32>
    %556 = arith.divf %554, %555 : vector<1x96xf32>
    %557 = vector.broadcast %556 : vector<1x96xf32> to vector<32x96xf32>
    %558 = arith.subf %552, %557 : vector<32x96xf32>
    %559 = arith.mulf %558, %558 : vector<32x96xf32>
    %cst_206 = arith.constant dense<0.000000e+00> : vector<96xf32>
    %560 = vector.multi_reduction <add>, %559, %cst_206 [0] : vector<32x96xf32> to vector<96xf32>
    %561 = vector.shape_cast %560 : vector<96xf32> to vector<1x96xf32>
    %cst_207 = arith.constant 3.200000e+01 : f32
    %562 = vector.broadcast %cst_207 : f32 to vector<1x96xf32>
    %563 = arith.divf %561, %562 : vector<1x96xf32>
    %564 = vector.broadcast %556 : vector<1x96xf32> to vector<32x96xf32>
    %565 = arith.subf %552, %564 : vector<32x96xf32>
    %cst_208 = arith.constant 9.99999974E-6 : f32
    %566 = vector.broadcast %cst_208 : f32 to vector<1x96xf32>
    %567 = arith.addf %563, %566 : vector<1x96xf32>
    %568 = math.rsqrt %567 : vector<1x96xf32>
    %569 = arith.mulf %441, %568 : vector<1x96xf32>
    %570 = vector.broadcast %569 : vector<1x96xf32> to vector<32x96xf32>
    %571 = arith.mulf %565, %570 : vector<32x96xf32>
    %572 = vector.broadcast %442 : vector<1x96xf32> to vector<32x96xf32>
    %573 = arith.addf %571, %572 : vector<32x96xf32>
    %574 = arith.addf %550, %573 : vector<32x96xf32>
    %cst_209 = arith.constant 0.000000e+00 : f32
    %575 = vector.broadcast %cst_209 : f32 to vector<32x96xf32>
    %576 = arith.maximumf %574, %575 : vector<32x96xf32>
    %c1104 = arith.constant 1104 : index
    %c0_210 = arith.constant 0 : index
    %577 = vector.load %arg1[%c1104, %c0_210] : memref<2000x128xbf16, #tpu.memory_space<vmem>>, vector<288x128xbf16>
    %c1392 = arith.constant 1392 : index
    %c0_211 = arith.constant 0 : index
    %578 = vector.load %arg1[%c1392, %c0_211] : memref<2000x128xbf16, #tpu.memory_space<vmem>>, vector<384x128xbf16>
    %c1776 = arith.constant 1776 : index
    %c0_212 = arith.constant 0 : index
    %579 = vector.load %arg1[%c1776, %c0_212] : memref<2000x128xbf16, #tpu.memory_space<vmem>>, vector<96x128xbf16>
    %c24 = arith.constant 24 : index
    %c0_213 = arith.constant 0 : index
    %580 = vector.load %arg2[%c24, %c0_213] : memref<30x128xf32, #tpu.memory_space<vmem>>, vector<1x128xf32>
    %c25 = arith.constant 25 : index
    %c0_214 = arith.constant 0 : index
    %581 = vector.load %arg2[%c25, %c0_214] : memref<30x128xf32, #tpu.memory_space<vmem>>, vector<1x128xf32>
    %c26 = arith.constant 26 : index
    %c0_215 = arith.constant 0 : index
    %582 = vector.load %arg2[%c26, %c0_215] : memref<30x128xf32, #tpu.memory_space<vmem>>, vector<1x128xf32>
    %c27 = arith.constant 27 : index
    %c0_216 = arith.constant 0 : index
    %583 = vector.load %arg2[%c27, %c0_216] : memref<30x128xf32, #tpu.memory_space<vmem>>, vector<1x128xf32>
    %c28 = arith.constant 28 : index
    %c0_217 = arith.constant 0 : index
    %584 = vector.load %arg2[%c28, %c0_217] : memref<30x128xf32, #tpu.memory_space<vmem>>, vector<1x128xf32>
    %c29 = arith.constant 29 : index
    %c0_218 = arith.constant 0 : index
    %585 = vector.load %arg2[%c29, %c0_218] : memref<30x128xf32, #tpu.memory_space<vmem>>, vector<1x128xf32>
    %c0_219 = arith.constant 0 : index
    %c0_220 = arith.constant 0 : index
    %586 = vector.load %arg9[%c0_219, %c0_220] : memref<32x96xf32, #tpu.memory_space<vmem>>, vector<32x96xf32>
    tpu.vector_store %arg9[%c0_219, %c0_220], %576 {strides = array<i32>} : memref<32x96xf32, #tpu.memory_space<vmem>>, vector<32x96xf32>,
    %c0_221 = arith.constant 0 : index
    %c0_222 = arith.constant 0 : index
    %587 = tpu.strided_load %arg9[%c0_221, %c0_222] {strides = array<i32: 2, 1>} : memref<32x96xf32, #tpu.memory_space<vmem>>, vector<16x96xf32>
    %c1_223 = arith.constant 1 : index
    %c0_224 = arith.constant 0 : index
    %588 = tpu.strided_load %arg9[%c1_223, %c0_224] {strides = array<i32: 2, 1>} : memref<32x96xf32, #tpu.memory_space<vmem>>, vector<16x96xf32>
    %589 = tpu.iota {dimensions = array<i32: 0>} : vector<16x1xi32>
    %c8_i32 = arith.constant 8 : i32
    %c0_i32_225 = arith.constant 0 : i32
    %590 = arith.cmpi eq, %c8_i32, %c0_i32_225 : i32
    %c1_i32_226 = arith.constant 1 : i32
    %591 = arith.select %590, %c1_i32_226, %c8_i32 : i32
    %592 = vector.broadcast %591 : i32 to vector<16x1xi32>
    %593 = arith.remsi %589, %592 : vector<16x1xi32>
    %c0_i32_227 = arith.constant 0 : i32
    %594 = vector.broadcast %c0_i32_227 : i32 to vector<16x1xi32>
    %595 = arith.cmpi ne, %593, %594 : vector<16x1xi32>
    %c0_i32_228 = arith.constant 0 : i32
    %596 = vector.broadcast %c0_i32_228 : i32 to vector<16x1xi32>
    %597 = arith.cmpi slt, %593, %596 : vector<16x1xi32>
    %c0_i32_229 = arith.constant 0 : i32
    %598 = arith.cmpi slt, %591, %c0_i32_229 : i32
    %599 = vector.broadcast %598 : i1 to vector<16x1xi1>
    %600 = vector.broadcast %599 : vector<16x1xi1> to vector<16x1xi1>
    %601 = arith.xori %597, %600 : vector<16x1xi1>
    %602 = arith.andi %601, %595 : vector<16x1xi1>
    %603 = vector.broadcast %591 : i32 to vector<16x1xi32>
    %604 = arith.addi %593, %603 : vector<16x1xi32>
    %605 = arith.select %602, %604, %593 : vector<16x1xi1>, vector<16x1xi32>
    %c1_i32_230 = arith.constant 1 : i32
    %606 = vector.broadcast %c1_i32_230 : i32 to vector<16x1xi32>
    %607 = arith.cmpi sge, %605, %606 : vector<16x1xi32>
    %c1_i32_231 = arith.constant 1 : i32
    %608 = tpu.dynamic_rotate %588 by %c1_i32_231 dim 0 : vector<16x96xf32>, i32 -> vector<16x96xf32>
    %cst_232 = arith.constant 0.000000e+00 : f32
    %609 = vector.shape_cast %607 : vector<16x1xi1> to vector<16x1xi1>
    %610 = vector.broadcast %609 : vector<16x1xi1> to vector<16x96xi1>
    %611 = vector.broadcast %cst_232 : f32 to vector<16x96xf32>
    %612 = arith.select %610, %608, %611 : vector<16x96xi1>, vector<16x96xf32>
    %613 = tpu.concatenate %612, %587, %588 in 1 : vector<16x96xf32>, vector<16x96xf32>, vector<16x96xf32> -> vector<16x288xf32>
    %614 = arith.truncf %613 : vector<16x288xf32> to vector<16x288xbf16>
    %cst_233 = arith.constant dense<0.000000e+00> : vector<16x128xf32>
    %615 = tpu.matmul %614, %577, %cst_233 {dimension_numbers = #tpu.dot_dimension_numbers<[1], [0], [0], [1], [0, 0, 1, 1], [], []>} : vector<16x288xbf16>, vector<288x128xbf16>, vector<16x128xf32> -> vector<16x128xf32>
    %cst_234 = arith.constant dense<0.000000e+00> : vector<128xf32>
    %616 = vector.multi_reduction <add>, %615, %cst_234 [0] : vector<16x128xf32> to vector<128xf32>
    %617 = vector.shape_cast %616 : vector<128xf32> to vector<1x128xf32>
    %cst_235 = arith.constant 1.600000e+01 : f32
    %618 = vector.broadcast %cst_235 : f32 to vector<1x128xf32>
    %619 = arith.divf %617, %618 : vector<1x128xf32>
    %620 = vector.broadcast %619 : vector<1x128xf32> to vector<16x128xf32>
    %621 = arith.subf %615, %620 : vector<16x128xf32>
    %622 = arith.mulf %621, %621 : vector<16x128xf32>
    %cst_236 = arith.constant dense<0.000000e+00> : vector<128xf32>
    %623 = vector.multi_reduction <add>, %622, %cst_236 [0] : vector<16x128xf32> to vector<128xf32>
    %624 = vector.shape_cast %623 : vector<128xf32> to vector<1x128xf32>
    %cst_237 = arith.constant 1.600000e+01 : f32
    %625 = vector.broadcast %cst_237 : f32 to vector<1x128xf32>
    %626 = arith.divf %624, %625 : vector<1x128xf32>
    %627 = vector.broadcast %619 : vector<1x128xf32> to vector<16x128xf32>
    %628 = arith.subf %615, %627 : vector<16x128xf32>
    %cst_238 = arith.constant 9.99999974E-6 : f32
    %629 = vector.broadcast %cst_238 : f32 to vector<1x128xf32>
    %630 = arith.addf %626, %629 : vector<1x128xf32>
    %631 = math.rsqrt %630 : vector<1x128xf32>
    %632 = arith.mulf %580, %631 : vector<1x128xf32>
    %633 = vector.broadcast %632 : vector<1x128xf32> to vector<16x128xf32>
    %634 = arith.mulf %628, %633 : vector<16x128xf32>
    %635 = vector.broadcast %581 : vector<1x128xf32> to vector<16x128xf32>
    %636 = arith.addf %634, %635 : vector<16x128xf32>
    %cst_239 = arith.constant 0.000000e+00 : f32
    %637 = vector.broadcast %cst_239 : f32 to vector<16x128xf32>
    %638 = arith.maximumf %636, %637 : vector<16x128xf32>
    %639 = tpu.iota {dimensions = array<i32: 0>} : vector<16x1xi32>
    %c8_i32_240 = arith.constant 8 : i32
    %c0_i32_241 = arith.constant 0 : i32
    %640 = arith.cmpi eq, %c8_i32_240, %c0_i32_241 : i32
    %c1_i32_242 = arith.constant 1 : i32
    %641 = arith.select %640, %c1_i32_242, %c8_i32_240 : i32
    %642 = vector.broadcast %641 : i32 to vector<16x1xi32>
    %643 = arith.remsi %639, %642 : vector<16x1xi32>
    %c0_i32_243 = arith.constant 0 : i32
    %644 = vector.broadcast %c0_i32_243 : i32 to vector<16x1xi32>
    %645 = arith.cmpi ne, %643, %644 : vector<16x1xi32>
    %c0_i32_244 = arith.constant 0 : i32
    %646 = vector.broadcast %c0_i32_244 : i32 to vector<16x1xi32>
    %647 = arith.cmpi slt, %643, %646 : vector<16x1xi32>
    %c0_i32_245 = arith.constant 0 : i32
    %648 = arith.cmpi slt, %641, %c0_i32_245 : i32
    %649 = vector.broadcast %648 : i1 to vector<16x1xi1>
    %650 = vector.broadcast %649 : vector<16x1xi1> to vector<16x1xi1>
    %651 = arith.xori %647, %650 : vector<16x1xi1>
    %652 = arith.andi %651, %645 : vector<16x1xi1>
    %653 = vector.broadcast %641 : i32 to vector<16x1xi32>
    %654 = arith.addi %643, %653 : vector<16x1xi32>
    %655 = arith.select %652, %654, %643 : vector<16x1xi1>, vector<16x1xi32>
    %c1_i32_246 = arith.constant 1 : i32
    %656 = vector.broadcast %c1_i32_246 : i32 to vector<16x1xi32>
    %657 = arith.cmpi sge, %655, %656 : vector<16x1xi32>
    %c1_i32_247 = arith.constant 1 : i32
    %658 = tpu.dynamic_rotate %638 by %c1_i32_247 dim 0 : vector<16x128xf32>, i32 -> vector<16x128xf32>
    %cst_248 = arith.constant 0.000000e+00 : f32
    %659 = vector.shape_cast %657 : vector<16x1xi1> to vector<16x1xi1>
    %660 = vector.broadcast %659 : vector<16x1xi1> to vector<16x128xi1>
    %661 = vector.broadcast %cst_248 : f32 to vector<16x128xf32>
    %662 = arith.select %660, %658, %661 : vector<16x128xi1>, vector<16x128xf32>
    %c6_i32 = arith.constant 6 : i32
    %663 = vector.broadcast %c6_i32 : i32 to vector<16x1xi32>
    %664 = arith.cmpi sle, %655, %663 : vector<16x1xi32>
    %c15_i32 = arith.constant 15 : i32
    %665 = tpu.dynamic_rotate %638 by %c15_i32 dim 0 : vector<16x128xf32>, i32 -> vector<16x128xf32>
    %cst_249 = arith.constant 0.000000e+00 : f32
    %666 = vector.shape_cast %664 : vector<16x1xi1> to vector<16x1xi1>
    %667 = vector.broadcast %666 : vector<16x1xi1> to vector<16x128xi1>
    %668 = vector.broadcast %cst_249 : f32 to vector<16x128xf32>
    %669 = arith.select %667, %665, %668 : vector<16x128xi1>, vector<16x128xf32>
    %670 = tpu.concatenate %662, %638, %669 in 1 : vector<16x128xf32>, vector<16x128xf32>, vector<16x128xf32> -> vector<16x384xf32>
    %671 = arith.truncf %670 : vector<16x384xf32> to vector<16x384xbf16>
    %cst_250 = arith.constant dense<0.000000e+00> : vector<16x128xf32>
    %672 = tpu.matmul %671, %578, %cst_250 {dimension_numbers = #tpu.dot_dimension_numbers<[1], [0], [0], [1], [0, 0, 1, 1], [], []>} : vector<16x384xbf16>, vector<384x128xbf16>, vector<16x128xf32> -> vector<16x128xf32>
    %cst_251 = arith.constant dense<0.000000e+00> : vector<128xf32>
    %673 = vector.multi_reduction <add>, %672, %cst_251 [0] : vector<16x128xf32> to vector<128xf32>
    %674 = vector.shape_cast %673 : vector<128xf32> to vector<1x128xf32>
    %cst_252 = arith.constant 1.600000e+01 : f32
    %675 = vector.broadcast %cst_252 : f32 to vector<1x128xf32>
    %676 = arith.divf %674, %675 : vector<1x128xf32>
    %677 = vector.broadcast %676 : vector<1x128xf32> to vector<16x128xf32>
    %678 = arith.subf %672, %677 : vector<16x128xf32>
    %679 = arith.mulf %678, %678 : vector<16x128xf32>
    %cst_253 = arith.constant dense<0.000000e+00> : vector<128xf32>
    %680 = vector.multi_reduction <add>, %679, %cst_253 [0] : vector<16x128xf32> to vector<128xf32>
    %681 = vector.shape_cast %680 : vector<128xf32> to vector<1x128xf32>
    %cst_254 = arith.constant 1.600000e+01 : f32
    %682 = vector.broadcast %cst_254 : f32 to vector<1x128xf32>
    %683 = arith.divf %681, %682 : vector<1x128xf32>
    %684 = vector.broadcast %676 : vector<1x128xf32> to vector<16x128xf32>
    %685 = arith.subf %672, %684 : vector<16x128xf32>
    %cst_255 = arith.constant 9.99999974E-6 : f32
    %686 = vector.broadcast %cst_255 : f32 to vector<1x128xf32>
    %687 = arith.addf %683, %686 : vector<1x128xf32>
    %688 = math.rsqrt %687 : vector<1x128xf32>
    %689 = arith.mulf %582, %688 : vector<1x128xf32>
    %690 = vector.broadcast %689 : vector<1x128xf32> to vector<16x128xf32>
    %691 = arith.mulf %685, %690 : vector<16x128xf32>
    %692 = vector.broadcast %583 : vector<1x128xf32> to vector<16x128xf32>
    %693 = arith.addf %691, %692 : vector<16x128xf32>
    %694 = arith.truncf %587 : vector<16x96xf32> to vector<16x96xbf16>
    %cst_256 = arith.constant dense<0.000000e+00> : vector<16x128xf32>
    %695 = tpu.matmul %694, %579, %cst_256 {dimension_numbers = #tpu.dot_dimension_numbers<[1], [0], [0], [1], [0, 0, 1, 1], [], []>} : vector<16x96xbf16>, vector<96x128xbf16>, vector<16x128xf32> -> vector<16x128xf32>
    %cst_257 = arith.constant dense<0.000000e+00> : vector<128xf32>
    %696 = vector.multi_reduction <add>, %695, %cst_257 [0] : vector<16x128xf32> to vector<128xf32>
    %697 = vector.shape_cast %696 : vector<128xf32> to vector<1x128xf32>
    %cst_258 = arith.constant 1.600000e+01 : f32
    %698 = vector.broadcast %cst_258 : f32 to vector<1x128xf32>
    %699 = arith.divf %697, %698 : vector<1x128xf32>
    %700 = vector.broadcast %699 : vector<1x128xf32> to vector<16x128xf32>
    %701 = arith.subf %695, %700 : vector<16x128xf32>
    %702 = arith.mulf %701, %701 : vector<16x128xf32>
    %cst_259 = arith.constant dense<0.000000e+00> : vector<128xf32>
    %703 = vector.multi_reduction <add>, %702, %cst_259 [0] : vector<16x128xf32> to vector<128xf32>
    %704 = vector.shape_cast %703 : vector<128xf32> to vector<1x128xf32>
    %cst_260 = arith.constant 1.600000e+01 : f32
    %705 = vector.broadcast %cst_260 : f32 to vector<1x128xf32>
    %706 = arith.divf %704, %705 : vector<1x128xf32>
    %707 = vector.broadcast %699 : vector<1x128xf32> to vector<16x128xf32>
    %708 = arith.subf %695, %707 : vector<16x128xf32>
    %cst_261 = arith.constant 9.99999974E-6 : f32
    %709 = vector.broadcast %cst_261 : f32 to vector<1x128xf32>
    %710 = arith.addf %706, %709 : vector<1x128xf32>
    %711 = math.rsqrt %710 : vector<1x128xf32>
    %712 = arith.mulf %584, %711 : vector<1x128xf32>
    %713 = vector.broadcast %712 : vector<1x128xf32> to vector<16x128xf32>
    %714 = arith.mulf %708, %713 : vector<16x128xf32>
    %715 = vector.broadcast %585 : vector<1x128xf32> to vector<16x128xf32>
    %716 = arith.addf %714, %715 : vector<16x128xf32>
    %717 = arith.addf %693, %716 : vector<16x128xf32>
    %cst_262 = arith.constant 0.000000e+00 : f32
    %718 = vector.broadcast %cst_262 : f32 to vector<16x128xf32>
    %719 = arith.maximumf %717, %718 : vector<16x128xf32>
    %c0_263 = arith.constant 0 : index
    %c0_264 = arith.constant 0 : index
    %720 = vector.load %arg10[%c0_263, %c0_264] : memref<16x128xf32, #tpu.memory_space<vmem>>, vector<16x128xf32>
    tpu.vector_store %arg10[%c0_263, %c0_264], %719 {strides = array<i32>} : memref<16x128xf32, #tpu.memory_space<vmem>>, vector<16x128xf32>,
    %c0_265 = arith.constant 0 : index
    %c0_266 = arith.constant 0 : index
    %721 = vector.load %arg4[%c0_265, %c0_266] : memref<2x128xf32, #tpu.memory_space<vmem>>, vector<1x128xf32>
    %c1_267 = arith.constant 1 : index
    %c0_268 = arith.constant 0 : index
    %722 = vector.load %arg4[%c1_267, %c0_268] : memref<2x128xf32, #tpu.memory_space<vmem>>, vector<1x1xf32>
    %cst_269 = arith.constant 0.000000e+00 : f32
    %723 = vector.broadcast %cst_269 : f32 to vector<2x128xf32>
    %c0_270 = arith.constant 0 : index
    %c0_271 = arith.constant 0 : index
    %724 = tpu.strided_load %arg10[%c0_270, %c0_271] {strides = array<i32: 8, 1>} : memref<16x128xf32, #tpu.memory_space<vmem>>, vector<2x128xf32>
    %725 = arith.truncf %724 : vector<2x128xf32> to vector<2x128xbf16>
    %c0_272 = arith.constant 0 : index
    %c0_273 = arith.constant 0 : index
    %c0_274 = arith.constant 0 : index
    %726 = vector.load %arg3[%c0_272, %c0_273, %c0_274] : memref<8x128x128xbf16, #tpu.memory_space<vmem>>, vector<1x128x128xbf16>
    %727 = vector.shape_cast %726 : vector<1x128x128xbf16> to vector<128x128xbf16>
    %cst_275 = arith.constant dense<0.000000e+00> : vector<2x128xf32>
    %728 = tpu.matmul %725, %727, %cst_275 {dimension_numbers = #tpu.dot_dimension_numbers<[1], [0], [0], [1], [0, 0, 1, 1], [], []>} : vector<2x128xbf16>, vector<128x128xbf16>, vector<2x128xf32> -> vector<2x128xf32>
    %729 = arith.addf %723, %728 : vector<2x128xf32>
    %c1_276 = arith.constant 1 : index
    %c0_277 = arith.constant 0 : index
    %730 = tpu.strided_load %arg10[%c1_276, %c0_277] {strides = array<i32: 8, 1>} : memref<16x128xf32, #tpu.memory_space<vmem>>, vector<2x128xf32>
    %731 = arith.truncf %730 : vector<2x128xf32> to vector<2x128xbf16>
    %c1_278 = arith.constant 1 : index
    %c0_279 = arith.constant 0 : index
    %c0_280 = arith.constant 0 : index
    %732 = vector.load %arg3[%c1_278, %c0_279, %c0_280] : memref<8x128x128xbf16, #tpu.memory_space<vmem>>, vector<1x128x128xbf16>
    %733 = vector.shape_cast %732 : vector<1x128x128xbf16> to vector<128x128xbf16>
    %cst_281 = arith.constant dense<0.000000e+00> : vector<2x128xf32>
    %734 = tpu.matmul %731, %733, %cst_281 {dimension_numbers = #tpu.dot_dimension_numbers<[1], [0], [0], [1], [0, 0, 1, 1], [], []>} : vector<2x128xbf16>, vector<128x128xbf16>, vector<2x128xf32> -> vector<2x128xf32>
    %735 = arith.addf %729, %734 : vector<2x128xf32>
    %c2_282 = arith.constant 2 : index
    %c0_283 = arith.constant 0 : index
    %736 = tpu.strided_load %arg10[%c2_282, %c0_283] {strides = array<i32: 8, 1>} : memref<16x128xf32, #tpu.memory_space<vmem>>, vector<2x128xf32>
    %737 = arith.truncf %736 : vector<2x128xf32> to vector<2x128xbf16>
    %c2_284 = arith.constant 2 : index
    %c0_285 = arith.constant 0 : index
    %c0_286 = arith.constant 0 : index
    %738 = vector.load %arg3[%c2_284, %c0_285, %c0_286] : memref<8x128x128xbf16, #tpu.memory_space<vmem>>, vector<1x128x128xbf16>
    %739 = vector.shape_cast %738 : vector<1x128x128xbf16> to vector<128x128xbf16>
    %cst_287 = arith.constant dense<0.000000e+00> : vector<2x128xf32>
    %740 = tpu.matmul %737, %739, %cst_287 {dimension_numbers = #tpu.dot_dimension_numbers<[1], [0], [0], [1], [0, 0, 1, 1], [], []>} : vector<2x128xbf16>, vector<128x128xbf16>, vector<2x128xf32> -> vector<2x128xf32>
    %741 = arith.addf %735, %740 : vector<2x128xf32>
    %c3_288 = arith.constant 3 : index
    %c0_289 = arith.constant 0 : index
    %742 = tpu.strided_load %arg10[%c3_288, %c0_289] {strides = array<i32: 8, 1>} : memref<16x128xf32, #tpu.memory_space<vmem>>, vector<2x128xf32>
    %743 = arith.truncf %742 : vector<2x128xf32> to vector<2x128xbf16>
    %c3_290 = arith.constant 3 : index
    %c0_291 = arith.constant 0 : index
    %c0_292 = arith.constant 0 : index
    %744 = vector.load %arg3[%c3_290, %c0_291, %c0_292] : memref<8x128x128xbf16, #tpu.memory_space<vmem>>, vector<1x128x128xbf16>
    %745 = vector.shape_cast %744 : vector<1x128x128xbf16> to vector<128x128xbf16>
    %cst_293 = arith.constant dense<0.000000e+00> : vector<2x128xf32>
    %746 = tpu.matmul %743, %745, %cst_293 {dimension_numbers = #tpu.dot_dimension_numbers<[1], [0], [0], [1], [0, 0, 1, 1], [], []>} : vector<2x128xbf16>, vector<128x128xbf16>, vector<2x128xf32> -> vector<2x128xf32>
    %747 = arith.addf %741, %746 : vector<2x128xf32>
    %c4_294 = arith.constant 4 : index
    %c0_295 = arith.constant 0 : index
    %748 = tpu.strided_load %arg10[%c4_294, %c0_295] {strides = array<i32: 8, 1>} : memref<16x128xf32, #tpu.memory_space<vmem>>, vector<2x128xf32>
    %749 = arith.truncf %748 : vector<2x128xf32> to vector<2x128xbf16>
    %c4_296 = arith.constant 4 : index
    %c0_297 = arith.constant 0 : index
    %c0_298 = arith.constant 0 : index
    %750 = vector.load %arg3[%c4_296, %c0_297, %c0_298] : memref<8x128x128xbf16, #tpu.memory_space<vmem>>, vector<1x128x128xbf16>
    %751 = vector.shape_cast %750 : vector<1x128x128xbf16> to vector<128x128xbf16>
    %cst_299 = arith.constant dense<0.000000e+00> : vector<2x128xf32>
    %752 = tpu.matmul %749, %751, %cst_299 {dimension_numbers = #tpu.dot_dimension_numbers<[1], [0], [0], [1], [0, 0, 1, 1], [], []>} : vector<2x128xbf16>, vector<128x128xbf16>, vector<2x128xf32> -> vector<2x128xf32>
    %753 = arith.addf %747, %752 : vector<2x128xf32>
    %c5_300 = arith.constant 5 : index
    %c0_301 = arith.constant 0 : index
    %754 = tpu.strided_load %arg10[%c5_300, %c0_301] {strides = array<i32: 8, 1>} : memref<16x128xf32, #tpu.memory_space<vmem>>, vector<2x128xf32>
    %755 = arith.truncf %754 : vector<2x128xf32> to vector<2x128xbf16>
    %c5_302 = arith.constant 5 : index
    %c0_303 = arith.constant 0 : index
    %c0_304 = arith.constant 0 : index
    %756 = vector.load %arg3[%c5_302, %c0_303, %c0_304] : memref<8x128x128xbf16, #tpu.memory_space<vmem>>, vector<1x128x128xbf16>
    %757 = vector.shape_cast %756 : vector<1x128x128xbf16> to vector<128x128xbf16>
    %cst_305 = arith.constant dense<0.000000e+00> : vector<2x128xf32>
    %758 = tpu.matmul %755, %757, %cst_305 {dimension_numbers = #tpu.dot_dimension_numbers<[1], [0], [0], [1], [0, 0, 1, 1], [], []>} : vector<2x128xbf16>, vector<128x128xbf16>, vector<2x128xf32> -> vector<2x128xf32>
    %759 = arith.addf %753, %758 : vector<2x128xf32>
    %c6_306 = arith.constant 6 : index
    %c0_307 = arith.constant 0 : index
    %760 = tpu.strided_load %arg10[%c6_306, %c0_307] {strides = array<i32: 8, 1>} : memref<16x128xf32, #tpu.memory_space<vmem>>, vector<2x128xf32>
    %761 = arith.truncf %760 : vector<2x128xf32> to vector<2x128xbf16>
    %c6_308 = arith.constant 6 : index
    %c0_309 = arith.constant 0 : index
    %c0_310 = arith.constant 0 : index
    %762 = vector.load %arg3[%c6_308, %c0_309, %c0_310] : memref<8x128x128xbf16, #tpu.memory_space<vmem>>, vector<1x128x128xbf16>
    %763 = vector.shape_cast %762 : vector<1x128x128xbf16> to vector<128x128xbf16>
    %cst_311 = arith.constant dense<0.000000e+00> : vector<2x128xf32>
    %764 = tpu.matmul %761, %763, %cst_311 {dimension_numbers = #tpu.dot_dimension_numbers<[1], [0], [0], [1], [0, 0, 1, 1], [], []>} : vector<2x128xbf16>, vector<128x128xbf16>, vector<2x128xf32> -> vector<2x128xf32>
    %765 = arith.addf %759, %764 : vector<2x128xf32>
    %c7_312 = arith.constant 7 : index
    %c0_313 = arith.constant 0 : index
    %766 = tpu.strided_load %arg10[%c7_312, %c0_313] {strides = array<i32: 8, 1>} : memref<16x128xf32, #tpu.memory_space<vmem>>, vector<2x128xf32>
    %767 = arith.truncf %766 : vector<2x128xf32> to vector<2x128xbf16>
    %c7_314 = arith.constant 7 : index
    %c0_315 = arith.constant 0 : index
    %c0_316 = arith.constant 0 : index
    %768 = vector.load %arg3[%c7_314, %c0_315, %c0_316] : memref<8x128x128xbf16, #tpu.memory_space<vmem>>, vector<1x128x128xbf16>
    %769 = vector.shape_cast %768 : vector<1x128x128xbf16> to vector<128x128xbf16>
    %cst_317 = arith.constant dense<0.000000e+00> : vector<2x128xf32>
    %770 = tpu.matmul %767, %769, %cst_317 {dimension_numbers = #tpu.dot_dimension_numbers<[1], [0], [0], [1], [0, 0, 1, 1], [], []>} : vector<2x128xbf16>, vector<128x128xbf16>, vector<2x128xf32> -> vector<2x128xf32>
    %771 = arith.addf %765, %770 : vector<2x128xf32>
    %772 = vector.broadcast %721 : vector<1x128xf32> to vector<2x128xf32>
    %773 = arith.addf %771, %772 : vector<2x128xf32>
    %cst_318 = arith.constant 0.000000e+00 : f32
    %774 = vector.broadcast %cst_318 : f32 to vector<2x128xf32>
    %775 = arith.maximumf %773, %774 : vector<2x128xf32>
    %c1872 = arith.constant 1872 : index
    %c0_319 = arith.constant 0 : index
    %776 = vector.load %arg1[%c1872, %c0_319] : memref<2000x128xbf16, #tpu.memory_space<vmem>>, vector<128x1xbf16>
    %777 = arith.truncf %775 : vector<2x128xf32> to vector<2x128xbf16>
    %cst_320 = arith.constant dense<0.000000e+00> : vector<2x1xf32>
    %778 = tpu.matmul %777, %776, %cst_320 {dimension_numbers = #tpu.dot_dimension_numbers<[1], [0], [0], [1], [0, 0, 1, 1], [], []>} : vector<2x128xbf16>, vector<128x1xbf16>, vector<2x1xf32> -> vector<2x1xf32>
    %779 = vector.broadcast %722 : vector<1x1xf32> to vector<2x1xf32>
    %780 = arith.addf %778, %779 : vector<2x1xf32>
    %c0_321 = arith.constant 0 : index
    %c0_322 = arith.constant 0 : index
    %781 = vector.load %arg5[%c0_321, %c0_322] : memref<2x1xf32, #tpu.memory_space<vmem>>, vector<2x1xf32>
    tpu.vector_store %arg5[%c0_321, %c0_322], %780 {strides = array<i32>} : memref<2x1xf32, #tpu.memory_space<vmem>>, vector<2x1xf32>,
    return
  }
}

</mosaic_0001>

<bundles_post_ra>
// kernel: cnn_forward.1
= control target key start
LH: loop header
LB: loop body
LE: loop exit
PB: predicated region body
PF: predicated region fallthrough
CT: control target
= control target key end

     0   :  { %10 = vsyncpa [#allocation8], 0  ;;  %s15399_s0 = inlined_call_operand.vmem [shape: f32[256,4], index: 0, kind: input, shape index: {}]   ;;  %s15400_s1 = inlined_call_operand.hbm [shape: bf16[2000,128], index: 1, kind: input, shape index: {}]   ;;  %s15401_s2 = inlined_call_operand.vmem [shape: f32[30,128], index: 2, kind: input, shape index: {}]   ;;  %s15402_s3 = inlined_call_operand.hbm [shape: bf16[8,128,128], index: 3, kind: input, shape index: {}]   ;;  %s15403_s4 = inlined_call_operand.vmem [shape: f32[2,128], index: 4, kind: input, shape index: {}]   ;;  %s15404_s5 = inlined_call_operand.vmem [shape: f32[2,1], index: 5, kind: output, shape index: {}]  }
   0x1   :  { %11 = vsyncpa [#allocation10], 0  ;;  %s10902_s18 = smov [#allocation7]   ;;  %s10854_s22 = scalar_lea.hbm %s15400_s1, 16000 }
   0x2   :  { %s19_s19 = sshll.u32 %s10902_s18, 4  ;;  %p10855_p0 = scmp.ne.s32.totalorder %s15400_s1, %s10854_s22  ;;  %s20_s19 = int_to_ptr.vmem [resolvable:$true] %s19_s19 }
   0x3   :  { %p10858_p1 = scmp.lt.u32.totalorder %s10854_s22, %s15400_s1 }
   0x5   :  { %p10860_p2 = pnand %p10858_p1, %p10855_p0 }
   0x7   :  { %10863 = shalt.err (!%p10860_p2)
}
   0x8   :  { %s10864_s27 = scalar_lea.vmem %s20_s19, 16000  ;;  %p10869_p4 = scmp.lt.s32.totalorder %s20_s19, %s20_s19 }
   0x9   :  { %p10865_p3 = scmp.ne.s32.totalorder %s20_s19, %s10864_s27  ;;  %p10870_p5 = scmp.lt.s32.totalorder %s10864_s27, %s10864_s27 }
   0xb   :  { %p10871_p6 = por %p10870_p5, %p10869_p4 }
   0xd   :  { %p10872_p7 = pnand %p10871_p6, %p10865_p3 }
   0xf   :  { %10875 = shalt.err (!%p10872_p7)
}
  0x10   :  { %s10903_s28 = smov 64   ;;  %s10904_s29 = smov 4  }
  0x11   :  { %25 = dma.hbm_to_vmem [thread:$0]  %s15400_s1, 16000, %s20_s19, [#allocation8], %s10903_s28, %s10903_s28, %s10904_s29  }
  0x12   :  { %s10905_s7 = smov [#allocation9]   ;;  %s10876_s11 = scalar_lea.hbm %s15402_s3, 8192 }
  0x13   :  { %s33_s8 = sshll.u32 %s10905_s7, 4  ;;  %p10877_p8 = scmp.ne.s32.totalorder %s15402_s3, %s10876_s11  ;;  %s34_s8 = int_to_ptr.vmem [resolvable:$true] %s33_s8 }
  0x14   :  { %p10880_p9 = scmp.lt.u32.totalorder %s10876_s11, %s15402_s3 }
  0x16   :  { %p10882_p10 = pnand %p10880_p9, %p10877_p8 }
  0x18   :  { %10885 = shalt.err (!%p10882_p10)
}
  0x19   :  { %s10886_s16 = scalar_lea.vmem %s34_s8, 8192  ;;  %p10891_p12 = scmp.lt.s32.totalorder %s34_s8, %s34_s8 }
  0x1a   :  { %p10887_p11 = scmp.ne.s32.totalorder %s34_s8, %s10886_s16  ;;  %p10892_p13 = scmp.lt.s32.totalorder %s10886_s16, %s10886_s16 }
  0x1c   :  { %p10893_p0 = por %p10892_p13, %p10891_p12 }
  0x1e   :  { %p10894_p1 = pnand %p10893_p0, %p10887_p11 }
  0x20   :  { %10897 = shalt.err (!%p10894_p1)
}
  0x21   :  { %39 = dma.hbm_to_vmem [thread:$0]  %s15402_s3, 8192, %s34_s8, [#allocation10], %s10903_s28, %s10903_s28, %s10904_s29  }
  0x22   :  { %10898 = dma.done.wait [#allocation8], 16000  }
  0x23   :  { %10899 = vsyncadd [#allocation8], 4294951296 }
  0x24   :  { %10900 = dma.done.wait [#allocation10], 8192  }
  0x25   :  { %10901 = vsyncadd [#allocation10], 4294959104  ;;  %v96_v0 = vlaneseq  ;;  %v10978_v2 = vld [vmem:[%s15399_s0] sm:$0xff]  ;;  %v10983_v3 = vld [vmem:[%s15399_s0 + $0x8] sm:$0xff]  ;;  %s10906_s12 = smov 8   ;;  %vm1291_vm1 = vcmask 1045504  }
  0x26   :  { %v10988_v4 = vld [vmem:[%s15399_s0 + $0x10] sm:$0xff]  ;;  %v10013_v5 = vpack.i.bf16 %v10983_v3, %v10978_v2  ;;  %v738_v6 = vrot.slane %v10978_v2, 1  ;;  %v10997_v7 = vld [vmem:[%s15399_s0 + $0x18] sm:$0xff]  ;;  %v11002_v8 = vld [vmem:[%s15399_s0 + $0x20] sm:$0xff]  ;;  %v739_v9 = vrot.slane %v10983_v3, 1  ;;  %v546_v58 = vrot.slane %v10983_v3, 7 }
  0x27   :  { %v10973_v1 = vshrl.u32 %v96_v0, 7  ;;  %v740_v10 = vrot.slane %v10988_v4, 1  ;;  %v10018_v11 = vpack.i.bf16 %v10997_v7, %v10988_v4  ;;  %v741_v13 = vrot.slane %v10997_v7, 1  ;;  %v11016_v15 = vld [vmem:[%s15399_s0 + $0x28] sm:$0xff]  ;;  %v11021_v16 = vld [vmem:[%s15399_s0 + $0x30] sm:$0xff]  ;;  %v11036_v22 = vld [vmem:[%s15399_s0 + $0x38] sm:$0xff] }
  0x28   :  { %10014 = vrot.lane.b32.xlu0 %v10013_v5, %s10904_s29  ;;  %v742_v14 = vrot.slane %v11002_v8, 1  ;;  %v11041_v23 = vld [vmem:[%s15399_s0 + $0x40] sm:$0xff]  ;;  %v743_v24 = vrot.slane %v11016_v15, 1  ;;  %v744_v25 = vrot.slane %v11021_v16, 1  ;;  %v10023_v27 = vpack.i.bf16 %v11016_v15, %v11002_v8  ;;  %v11058_v32 = vld [vmem:[%s15399_s0 + $0x48] sm:$0xff]  ;;  %v11063_v33 = vld [vmem:[%s15399_s0 + $0x50] sm:$0xff] }
  0x29   :  { %15462 = vst [vmem:[#allocation13_spill] sm:$0xff] %v10973_v1  ;;  %vm770_vm0 = vcmp.lt.s32.totalorder %v10973_v1, 7  ;;  %v745_v30 = vrot.slane %v11036_v22, 1  ;;  %v746_v31 = vrot.slane %v11041_v23, 1  ;;  %v10038_v34 = vpack.i.bf16 %v11036_v22, %v11021_v16  ;;  %v11072_v36 = vld [vmem:[%s15399_s0 + $0x58] sm:$0xff]  ;;  %v11085_v42 = vld [vmem:[%s15399_s0 + $0x60] sm:$0xff] }
  0x2a   :  { %v800_v17 = vsel %vm770_vm0, %v739_v9, %v740_v10  ;;  %v801_v18 = vsel %vm770_vm0, %v738_v6, %v739_v9  ;;  %v798_v20 = vsel %vm770_vm0, %v741_v13, %v742_v14  ;;  %v799_v21 = vsel %vm770_vm0, %v740_v10, %v741_v13  ;;  %v11080_v41 = vld [vmem:[#allocation7] sm:$0x3f]   ;;  %v11102_v47 = vld [vmem:[%s15399_s0 + $0x68] sm:$0xff]  ;;  %v11119_v54 = vld [vmem:[%s15399_s0 + $0x78] sm:$0xff]  ;;  %s10907_s13 = smov 16   ;;  %s10908_s14 = smov 32  }
  0x2b   :  { %v10028_v19 = vpack.i.bf16 %v800_v17, %v801_v18  ;;  %v10033_v26 = vpack.i.bf16 %v798_v20, %v799_v21  ;;  %v796_v28 = vsel %vm770_vm0, %v743_v24, %v744_v25  ;;  %v797_v29 = vsel %vm770_vm0, %v742_v14, %v743_v24  ;;  %10000 = vmatprep.subr.msk.bf16.mxu0 %vm1291_vm1, %v11080_v41  ;;  %v11113_v52 = vld [vmem:[%s15399_s0 + $0x70] sm:$0xff]  ;;  %v11124_v55 = vld [vmem:[%s15399_s0 + $0x80] sm:$0xff]  ;;  %v11148_v17 = vld [vmem:[%s15399_s0 + $0x88] sm:$0xff]  ;;  %s10910_s9 = smov 96  }
  0x2c   :  { %10019 = vrot.lane.b32.xlu0 %v10018_v11, %s10904_s29  ;;  %v10043_v35 = vpack.i.bf16 %v796_v28, %v797_v29  ;;  %v747_v37 = vrot.slane %v11058_v32, 1  ;;  %v748_v38 = vrot.slane %v11063_v33, 1  ;;  %v794_v39 = vsel %vm770_vm0, %v745_v30, %v746_v31  ;;  %v11159_v21 = vld [vmem:[%s15399_s0 + $0x90] sm:$0xff]  ;;  %v68_v28 = vld [vmem:[%s15399_s0 + $0x98] sm:$0xff]  ;;  %v11177_v29 = vld [vmem:[%s15399_s0 + $0xa0] sm:$0xff] }
  0x2d   :  { %10029 = vrot.lane.b32.xlu1 %v10028_v19, %s10906_s12  ;;  %v795_v40 = vsel %vm770_vm0, %v744_v25, %v745_v30  ;;  %v11088_v43 = vadd.s32 120, %v10973_v1  ;;  %v11091_v44 = vadd.s32 248, %v10973_v1  ;;  %v10053_v46 = vpack.i.bf16 %v11058_v32, %v11041_v23  ;;  %v78_v12 = vld [vmem:[%s15399_s0 + $0xe8] sm:$0xff] }
  0x2e   :  { %v10048_v45 = vpack.i.bf16 %v794_v39, %v795_v40  ;;  %v792_v48 = vsel %vm770_vm0, %v747_v37, %v748_v38  ;;  %v793_v49 = vsel %vm770_vm0, %v746_v31, %v747_v37  ;;  %v749_v50 = vrot.slane %v11072_v36, 1 }
  0x2f   :  { %15463 = vst [vmem:[#allocation14_spill] sm:$0xff] %v11088_v43  ;;  %v750_v51 = vrot.slane %v11085_v42, 1  ;;  %v133_v53 = vand.u32 127, %v10973_v1  ;;  %v238_v56 = vand.u32 127, %v11088_v43  ;;  %v350_v57 = vand.u32 127, %v11091_v44 }
  0x30   :  { %10024 = vrot.lane.b32.xlu0 %v10023_v27, %s10904_s29  ;;  %v545_v59 = vrot.slane %v10978_v2, 7  ;;  %v10058_v60 = vpack.i.bf16 %v11072_v36, %v11063_v33  ;;  %v10063_v61 = vpack.i.bf16 %v792_v48, %v793_v49  ;;  %v791_v63 = vsel %vm770_vm0, %v748_v38, %v749_v50  ;;  %v11201_v49 = vld [vmem:[%s15399_s0 + $0xf8] sm:$0xff] }
  0x31   :  { %10034 = vrot.lane.b32.xlu1 %v10033_v26, %s10906_s12  ;;  %v790_v62 = vsel %vm770_vm0, %v749_v50, %v750_v51  ;;  %v751_v0 = vrot.slane %v11102_v47, 1  ;;  %v752_v5 = vrot.slane %v11113_v52, 1  ;;  %v753_v9 = vrot.slane %v11119_v54, 1 }
  0x32   :  { %v754_v10 = vrot.slane %v11124_v55, 1  ;;  %v548_v11 = vrot.slane %v10997_v7, 7  ;;  %v550_v13 = vrot.slane %v11016_v15, 7  ;;  %vm577_vm2 = vcmp.lt.s32.totalorder %v10973_v1, 1 }
  0x33   :  { %v10068_v19 = vpack.i.bf16 %v790_v62, %v791_v63  ;;  %v10073_v20 = vpack.i.bf16 %v11102_v47, %v11085_v42  ;;  %v788_v24 = vsel %vm770_vm0, %v751_v0, %v752_v5  ;;  %v789_v25 = vsel %vm770_vm0, %v750_v51, %v751_v0  ;;  %v71_v62 = vld [vmem:[%s15399_s0 + $0xb0] sm:$0xff]  ;;  %v72_v63 = vld [vmem:[%s15399_s0 + $0xb8] sm:$0xff] }
  0x34   :  { %10044 = vrot.lane.b32.xlu0 %v10043_v35, %s10906_s12  ;;  %vm11165_vm3 = vcmp.le.s32.totalorder %v238_v56, 126  ;;  %v786_v27 = vsel %vm770_vm0, %v753_v9, %v754_v10  ;;  %v11185_v35 = vld [vmem:[%s15399_s0 + $0xa8] sm:$0xff]  ;;  %v10078_v38 = vpack.i.bf16 %v11119_v54, %v11113_v52  ;;  %v10083_v39 = vpack.i.bf16 %v788_v24, %v789_v25  ;;  %v73_v24 = vld [vmem:[%s15399_s0 + $0xc0] sm:$0xff] }
  0x35   :  { %10039 = vrot.lane.b32.xlu1 %v10038_v34, %s10904_s29  ;;  %v755_v40 = vrot.slane %v11148_v17, 1  ;;  %v756_v48 = vrot.slane %v11159_v21, 1  ;;  %v547_v0 = vrot.slane %v10988_v4, 7  ;;  %vm11214_vm4 = vcmp.ge.s32.totalorder %v133_v53, 1  ;;  %v74_v53 = vld [vmem:[%s15399_s0 + $0xc8] sm:$0xff] }
  0x36   :  { %v1293_v25 = vsel %vm1291_vm1, %v11080_v41, 0  ;;  %v76_v41 = vld [vmem:[%s15399_s0 + $0xd8] sm:$0xff]  ;;  %v10098_v56 = vpack.i.bf16 %v68_v28, %v11159_v21  ;;  %v760_v50 = vrot.slane %v71_v62, 1  ;;  %v761_v37 = vrot.slane %v72_v63, 1 }
  0x37   :  { %9545 = vmatpush3.bf16.msra.mxu0 %v1293_v25  ;;  %v11260_v25 = vld [vmem:[%s15399_s0 + $0xf0] sm:$0xff]  ;;  %v762_v30 = vrot.slane %v73_v24, 1  ;;  %v763_v18 = vrot.slane %v74_v53, 1  ;;  %vm11271_vm5 = vcmp.le.s32.totalorder %v350_v57, 126  ;;  %vm1155_vm6 = vcmask 31744  }
  0x38   :  { %10054 = vrot.lane.b32.xlu0 %v10053_v46, %s10904_s29  ;;  %v882_v46 = vsel %vm11165_vm3, %v786_v27, 0.0  ;;  %v784_v27 = vsel %vm770_vm0, %v755_v40, %v756_v48  ;;  %vm1188_vm7 = vcmask 64512   ;;  %vm1242_vm8 = vcmask 97280  }
  0x39   :  { %10049 = vrot.lane.b32.xlu1 %v10048_v45, %s10906_s12  ;;  %v787_v45 = vsel %vm770_vm0, %v752_v5, %v753_v9  ;;  %vm1456_vm10 = vcmask 130048   ;;  %vm2869_vm11 = vcmask 1041408   ;;  %vm2249_vm12 = vcmask 261120  }
  0x3a   :  { %v10088_v9 = vpack.i.bf16 %v882_v46, %v787_v45  ;;  %v11244_v45 = vsel %vm577_vm2, %v547_v0, %v548_v11  ;;  %v769_v46 = vrot.slane %v11201_v49, 1  ;;  %vm2316_vm13 = vcmask 392192  }
  0x3c   :  { %10064 = vrot.lane.b32.xlu0 %v10063_v61, %s10906_s12  ;;  %v758_v61 = vrot.slane %v11177_v29, 1  ;;  %v802_v21 = vsel %vm770_vm0, %v769_v46, %v738_v6  ;;  %v768_v6 = vrot.slane %v11260_v25, 1 }
  0x3d   :  { %10059 = vrot.lane.b32.xlu1 %v10058_v60, %s10904_s29  ;;  %v757_v60 = vrot.slane %v68_v28, 1  ;;  %v765_v28 = vrot.slane %v76_v41, 1 }
  0x3f   :  { %v782_v34 = vsel %vm770_vm0, %v757_v60, %v758_v61  ;;  %v783_v31 = vsel %vm770_vm0, %v756_v48, %v757_v60  ;;  %v10113_v48 = vpack.i.bf16 %v11185_v35, %v11177_v29  ;;  %v767_v60 = vrot.slane %v78_v12, 1 }
  0x40   :  { %10074 = vrot.lane.b32.xlu0 %v10073_v20, %s10904_s29  ;;  %v759_v20 = vrot.slane %v11185_v35, 1  ;;  %v10108_v57 = vpack.i.bf16 %v782_v34, %v783_v31  ;;  %v553_v34 = vrot.slane %v11041_v23, 7  ;;  %v10118_v29 = vpack.i.bf16 %v72_v63, %v71_v62 }
  0x41   :  { %10069 = vrot.lane.b32.xlu1 %v10068_v19, %s10906_s12  ;;  %v10093_v19 = vpack.i.bf16 %v11148_v17, %v11124_v55  ;;  %v557_v62 = vrot.slane %v11085_v42, 7  ;;  %v11316_v63 = vadd.s32 128, %v10973_v1 }
  0x44   :  { %10084 = vrot.lane.b32.xlu0 %v10083_v39, %s10906_s12  ;;  %v75_v39 = vld [vmem:[%s15399_s0 + $0xd0] sm:$0xff] }
  0x45   :  { %10079 = vrot.lane.b32.xlu1 %v10078_v38, %s10904_s29  ;;  %v785_v38 = vsel %vm770_vm0, %v754_v10, %v755_v40  ;;  %v77_v10 = vld [vmem:[%s15399_s0 + $0xe0] sm:$0xff]  ;;  %v15405_v40 = vrot.slane %v11201_v49, 7  ;;  %v764_v14 = vrot.slane %v75_v39, 1 }
  0x46   :  { %v10103_v51 = vpack.i.bf16 %v784_v27, %v785_v38  ;;  %v780_v27 = vsel %vm770_vm0, %v759_v20, %v760_v50  ;;  %v781_v38 = vsel %vm770_vm0, %v758_v61, %v759_v20  ;;  %v779_v61 = vsel %vm770_vm0, %v760_v50, %v761_v37 }
  0x47   :  { %v609_v44 = vsel %vm577_vm2, %v15405_v40, %v545_v59  ;;  %v898_v40 = vsel %vm11271_vm5, %v802_v21, 0.0  ;;  %v10123_v35 = vpack.i.bf16 %v780_v27, %v781_v38  ;;  %v10133_v21 = vpack.i.bf16 %v74_v53, %v73_v24 }
  0x48   :  { %10094 = vrot.lane.b32.xlu0 %v10093_v19, %s10904_s29  ;;  %v766_v19 = vrot.slane %v77_v10, 1  ;;  %v674_v31 = vsel %vm11214_vm4, %v609_v44, 0.0  ;;  %v776_v44 = vsel %vm770_vm0, %v763_v18, %v764_v14  ;;  %v775_v53 = vsel %vm770_vm0, %v764_v14, %v765_v28 }
  0x49   :  { %10089 = vrot.lane.b32.xlu1 %v10088_v9, %s10906_s12  ;;  %v89_v9 = vld [vmem:[#allocation7 + $0x20] sm:$0x3] }
  0x4a   :  { %v774_v24 = vsel %vm770_vm0, %v765_v28, %v766_v19  ;;  %v773_v27 = vsel %vm770_vm0, %v766_v19, %v767_v60  ;;  %v561_v28 = vrot.slane %v11124_v55, 7 }
  0x4c   :  { %10104 = vrot.lane.b32.xlu0 %v10103_v51, %s10906_s12  ;;  %v778_v51 = vsel %vm770_vm0, %v761_v37, %v762_v30  ;;  %v10138_v37 = vpack.i.bf16 %v76_v41, %v75_v39  ;;  %v10158_v39 = vpack.i.bf16 %v11201_v49, %v11260_v25  ;;  %v245_v41 = vand.u32 127, %v11316_v63 }
  0x4d   :  { %10099 = vrot.lane.b32.xlu1 %v10098_v56, %s10904_s29  ;;  %v549_v56 = vrot.slane %v11002_v8, 7  ;;  %v10128_v20 = vpack.i.bf16 %v778_v51, %v779_v61 }
  0x4e   :  { %vm11415_vm9 = vcmp.ge.s32.totalorder %v245_v41, 1 }
  0x50   :  { %10114 = vrot.lane.b32.xlu0 %v10113_v48, %s10904_s29  ;;  %v772_v48 = vsel %vm770_vm0, %v767_v60, %v768_v6 }
  0x51   :  { %10109 = vrot.lane.b32.xlu1 %v10108_v57, %s10906_s12  ;;  %v777_v57 = vsel %vm770_vm0, %v762_v30, %v763_v18  ;;  %v10148_v18 = vpack.i.bf16 %v774_v24, %v775_v53  ;;  %v10153_v30 = vpack.i.bf16 %v78_v12, %v77_v10  ;;  %v10163_v14 = vpack.i.bf16 %v772_v48, %v773_v27 }
  0x52   :  { %v10143_v50 = vpack.i.bf16 %v776_v44, %v777_v57  ;;  %v771_v12 = vsel %vm770_vm0, %v768_v6, %v769_v46  ;;  %v608_v46 = vsel %vm577_vm2, %v545_v59, %v546_v58  ;;  %v604_v59 = vsel %vm577_vm2, %v549_v56, %v550_v13 }
  0x53   :  { %v10168_v10 = vpack.i.bf16 %v898_v40, %v771_v12  ;;  %v607_v40 = vsel %vm577_vm2, %v546_v58, %v547_v0  ;;  %v605_v44 = vsel %vm577_vm2, %v548_v11, %v549_v56 }
  0x54   :  { %10124 = vrot.lane.b32.xlu0 %v10123_v35, %s10906_s12 }
  0x55   :  { %10119 = vrot.lane.b32.xlu1 %v10118_v29, %s10904_s29 }
  0x58   :  { %10134 = vrot.lane.b32.xlu0 %v10133_v21, %s10904_s29 }
  0x59   :  { %10129 = vrot.lane.b32.xlu1 %v10128_v20, %s10906_s12 }
  0x5c   :  { %10144 = vrot.lane.b32.xlu0 %v10143_v50, %s10906_s12 }
  0x5d   :  { %10139 = vrot.lane.b32.xlu1 %v10138_v37, %s10904_s29 }
  0x60   :  { %10154 = vrot.lane.b32.xlu0 %v10153_v30, %s10904_s29 }
  0x61   :  { %10149 = vrot.lane.b32.xlu1 %v10148_v18, %s10906_s12 }
  0x64   :  { %10164 = vrot.lane.b32.xlu0 %v10163_v14, %s10906_s12 }
  0x65   :  { %10159 = vrot.lane.b32.xlu1 %v10158_v39, %s10904_s29 }
  0x69   :  { %10169 = vrot.lane.b32.xlu1 %v10168_v10, %s10906_s12 }
  0x9a   :  { %v10015_v25 = vpop.permute.xlu0 %10014 }
  0x9b   :  { %v10017_v19 = vunpack.i.h.bf16 %v10015_v25  ;;  %v10016_v60 = vunpack.i.l.bf16 %v10015_v25  ;;  %v15470_v25 = vrot.slane %v11036_v22, 7 }
  0x9d   :  { %v1156_v29 = vsel %vm1155_vm6, %v674_v31, %v10016_v60  ;;  %v1157_v35 = vsel %vm1155_vm6, %v608_v46, %v10017_v19  ;;  %v15471_v19 = vrot.slane %v11021_v16, 7  ;;  %v15474_v16 = vmov %v15470_v25 }
  0x9e   :  { %v10020_v38 = vpop.permute.xlu0 %10019  ;;  %v601_v15 = vsel %vm577_vm2, %v15474_v16, %v553_v34 }
  0x9f   :  { %v10030_v6 = vpop.permute.xlu1 %10029  ;;  %v10022_v20 = vunpack.i.h.bf16 %v10020_v38  ;;  %v10021_v2 = vunpack.i.l.bf16 %v10020_v38  ;;  %v602_v60 = vsel %vm577_vm2, %v15471_v19, %v15470_v25  ;;  %v15472_v46 = vmov %v15471_v19 }
  0xa0   :  { %v10032_v51 = vunpack.i.h.bf16 %v10030_v6  ;;  %v10031_v61 = vunpack.i.l.bf16 %v10030_v6  ;;  %v603_v6 = vsel %vm577_vm2, %v550_v13, %v15472_v46 }
  0xa1   :  { %v1159_v0 = vsel %vm1155_vm6, %v11244_v45, %v10022_v20  ;;  %v1158_v31 = vsel %vm1155_vm6, %v607_v40, %v10021_v2 }
  0xa2   :  { %v1189_v3 = vsel %vm1188_vm7, %v1156_v29, %v10031_v61  ;;  %v1190_v58 = vsel %vm1188_vm7, %v1157_v35, %v10032_v51  ;;  %v10025_v57 = vpop.permute.xlu0 %10024  ;;  %v15473_v35 = vrot.slane %v11058_v32, 7 }
  0xa3   :  { %v10035_v21 = vpop.permute.xlu1 %10034  ;;  %v1221_v37 = vpack.c.bf16 %v1190_v58, %v1189_v3  ;;  %v10027_v53 = vunpack.i.h.bf16 %v10025_v57  ;;  %v10026_v18 = vunpack.i.l.bf16 %v10025_v57 }
  0xa4   :  { %v10037_v50 = vunpack.i.h.bf16 %v10035_v21  ;;  %v10036_v24 = vunpack.i.l.bf16 %v10035_v21  ;;  %v600_v51 = vsel %vm577_vm2, %v553_v34, %v15473_v35 }
  0xa5   :  { %9546 = vmatprep.mubr.msk.bf16.mxu0 %vm1242_vm8, %v1221_v37  ;;  %v1161_v48 = vsel %vm1155_vm6, %v604_v59, %v10027_v53  ;;  %v1160_v8 = vsel %vm1155_vm6, %v605_v44, %v10026_v18 }
  0xa6   :  { %v1192_v45 = vsel %vm1188_vm7, %v1159_v0, %v10037_v50  ;;  %v1191_v30 = vsel %vm1188_vm7, %v1158_v31, %v10036_v24  ;;  %v10045_v39 = vpop.permute.xlu0 %10044 }
  0xa7   :  { %v10040_v27 = vpop.permute.xlu1 %10039  ;;  %v1222_v14 = vpack.c.bf16 %v1192_v45, %v1191_v30  ;;  %v10047_v11 = vunpack.i.h.bf16 %v10045_v39  ;;  %v10046_v56 = vunpack.i.l.bf16 %v10045_v39  ;;  %v15477_v45 = vrot.slane %v11072_v36, 7 }
  0xa8   :  { %v10042_v12 = vunpack.i.h.bf16 %v10040_v27  ;;  %v10041_v10 = vunpack.i.l.bf16 %v10040_v27  ;;  %v15478_v30 = vrot.slane %v11063_v33, 7  ;;  %v15480_v27 = vmov %v15473_v35 }
  0xa9   :  { %9547 = vmatmul.mubr.msk.bf16.vlgmr.msra.gmra.mrb[0].mxu0 %vm1242_vm8, %v1222_v14  ;;  %v1193_v40 = vsel %vm1188_vm7, %v1160_v8, %v10046_v56  ;;  %v1194_v38 = vsel %vm1188_vm7, %v1161_v48, %v10047_v11  ;;  %v15481_v11 = vrot.slane %v11102_v47, 7  ;;  %v15482_v33 = vmov %v15477_v45 }
  0xaa   :  { %v10055_v13 = vpop.permute.xlu0 %10054  ;;  %v1223_v61 = vpack.c.bf16 %v1194_v38, %v1193_v40  ;;  %v1163_v58 = vsel %vm1155_vm6, %v602_v60, %v10042_v12  ;;  %v1162_v0 = vsel %vm1155_vm6, %v603_v6, %v10041_v10  ;;  %v598_v48 = vsel %vm577_vm2, %v15478_v30, %v15477_v45  ;;  %v10811_v45 = vld [vmem:[%s15399_s0 + $0x98] sm:$0xff] }
  0xab   :  { %v10050_v29 = vpop.permute.xlu1 %10049  ;;  %v10057_v59 = vunpack.i.h.bf16 %v10055_v13  ;;  %v10056_v3 = vunpack.i.l.bf16 %v10055_v13  ;;  %v15479_v8 = vmov %v15478_v30  ;;  %v596_v56 = vsel %vm577_vm2, %v557_v62, %v15481_v11 }
  0xac   :  { %v10052_v20 = vunpack.i.h.bf16 %v10050_v29  ;;  %v10051_v2 = vunpack.i.l.bf16 %v10050_v29  ;;  %9550 = vmatprep.mubr.msk.bf16.mxu0 %vm1242_vm8, %v1223_v61  ;;  %v599_v63 = vsel %vm577_vm2, %v15480_v27, %v15479_v8  ;;  %v597_v32 = vsel %vm577_vm2, %v15482_v33, %v557_v62  ;;  %v10813_v27 = vld [vmem:[%s15399_s0 + $0xa8] sm:$0xff] }
  0xad   :  { %v1165_v22 = vsel %vm1155_vm6, %v600_v51, %v10057_v59  ;;  %v1164_v34 = vsel %vm1155_vm6, %v601_v15, %v10056_v3  ;;  %v15483_v13 = vrot.slane %v11119_v54, 7  ;;  %v15485_v3 = vrot.slane %v11113_v52, 7 }
  0xae   :  { %v1195_v31 = vsel %vm1188_vm7, %v1162_v0, %v10051_v2  ;;  %v1196_v23 = vsel %vm1188_vm7, %v1163_v58, %v10052_v20  ;;  %v10065_v44 = vpop.permute.xlu0 %10064  ;;  %v564_v30 = vrot.slane %v10811_v45, 7 }
  0xaf   :  { %v10060_v21 = vpop.permute.xlu1 %10059  ;;  %v1224_v57 = vpack.c.bf16 %v1196_v23, %v1195_v31  ;;  %v10067_v37 = vunpack.i.h.bf16 %v10065_v44  ;;  %v10066_v50 = vunpack.i.l.bf16 %v10065_v44  ;;  %v593_v61 = vsel %vm577_vm2, %v15483_v13, %v561_v28 }
  0xb0   :  { %v10062_v53 = vunpack.i.h.bf16 %v10060_v21  ;;  %v10061_v18 = vunpack.i.l.bf16 %v10060_v21  ;;  %v15484_v59 = vmov %v15483_v13  ;;  %v15486_v0 = vmov %v15485_v3 }
  0xb1   :  { %9551 = vmatmul.mubr.msk.bf16.gmra.mrb[4].mxu0 %vm1242_vm8, %v1224_v57  ;;  %v1197_v41 = vsel %vm1188_vm7, %v1164_v34, %v10066_v50  ;;  %v1198_v39 = vsel %vm1188_vm7, %v1165_v22, %v10067_v37  ;;  %v594_v58 = vsel %vm577_vm2, %v15485_v3, %v15484_v59  ;;  %v15487_v31 = vmov %v15481_v11 }
  0xb2   :  { %v10075_v12 = vpop.permute.xlu0 %10074  ;;  %v1225_v10 = vpack.c.bf16 %v1198_v39, %v1197_v41  ;;  %v1167_v6 = vsel %vm1155_vm6, %v598_v48, %v10062_v53  ;;  %v1166_v40 = vsel %vm1155_vm6, %v599_v63, %v10061_v18  ;;  %v595_v23 = vsel %vm577_vm2, %v15487_v31, %v15486_v0  ;;  %v10817_v31 = vld [vmem:[%s15399_s0 + $0xc8] sm:$0xff] }
  0xb3   :  { %v10070_v14 = vpop.permute.xlu1 %10069  ;;  %v10077_v60 = vunpack.i.h.bf16 %v10075_v12  ;;  %v10076_v46 = vunpack.i.l.bf16 %v10075_v12  ;;  %v15488_v44 = vrot.slane %v11148_v17, 7  ;;  %v690_v52 = vsel %vm11415_vm9, %v593_v61, 0.0  ;;  %v10814_v12 = vld [vmem:[%s15399_s0 + $0xa0] sm:$0xff] }
  0xb4   :  { %v10072_v25 = vunpack.i.h.bf16 %v10070_v14  ;;  %v10071_v19 = vunpack.i.l.bf16 %v10070_v14  ;;  %9554 = vmatprep.mubr.msk.bf16.mxu0 %vm1242_vm8, %v1225_v10  ;;  %v566_v63 = vrot.slane %v10813_v27, 7  ;;  %v565_v10 = vrot.slane %v10814_v12, 7 }
  0xb5   :  { %v1169_v36 = vsel %vm1155_vm6, %v596_v56, %v10077_v60  ;;  %v1168_v62 = vsel %vm1155_vm6, %v597_v32, %v10076_v46  ;;  %v592_v54 = vsel %vm577_vm2, %v561_v28, %v15488_v44  ;;  %v10812_v28 = vld [vmem:[%s15399_s0 + $0x90] sm:$0xff] }
  0xb6   :  { %v1199_v38 = vsel %vm1188_vm7, %v1166_v40, %v10071_v19  ;;  %v1200_v42 = vsel %vm1188_vm7, %v1167_v6, %v10072_v25  ;;  %v10085_v35 = vpop.permute.xlu0 %10084  ;;  %v563_v8 = vrot.slane %v10812_v28, 7  ;;  %v15489_v40 = vmov %v15488_v44 }
  0xb7   :  { %v10080_v29 = vpop.permute.xlu1 %10079  ;;  %v1226_v51 = vpack.c.bf16 %v1200_v42, %v1199_v38  ;;  %v10087_v16 = vunpack.i.h.bf16 %v10085_v35  ;;  %v10086_v15 = vunpack.i.l.bf16 %v10085_v35  ;;  %v588_v35 = vsel %vm577_vm2, %v565_v10, %v566_v63 }
  0xb8   :  { %v10082_v20 = vunpack.i.h.bf16 %v10080_v29  ;;  %v10081_v2 = vunpack.i.l.bf16 %v10080_v29  ;;  %v590_v6 = vsel %vm577_vm2, %v563_v8, %v564_v30  ;;  %v591_v38 = vsel %vm577_vm2, %v15489_v40, %v563_v8 }
  0xb9   :  { %9555 = vmatmul.mubr.msk.bf16.gmra.mrb[8].mxu0 %vm1242_vm8, %v1226_v51  ;;  %v1201_v22 = vsel %vm1188_vm7, %v1168_v62, %v10086_v15  ;;  %v1202_v34 = vsel %vm1188_vm7, %v1169_v36, %v10087_v16  ;;  %v589_v51 = vsel %vm577_vm2, %v564_v30, %v565_v10 }
  0xba   :  { %v10095_v57 = vpop.permute.xlu0 %10094  ;;  %v1227_v47 = vpack.c.bf16 %v1202_v34, %v1201_v22  ;;  %v1171_v48 = vsel %vm1155_vm6, %v594_v58, %v10082_v20  ;;  %v1170_v55 = vsel %vm1155_vm6, %v595_v23, %v10081_v2  ;;  %v10815_v20 = vld [vmem:[%s15399_s0 + $0xb8] sm:$0xff]  ;;  %v10816_v58 = vld [vmem:[%s15399_s0 + $0xb0] sm:$0xff]  ;;  %v570_v23 = vrot.slane %v10817_v31, 7 }
  0xbb   :  { %v10090_v21 = vpop.permute.xlu1 %10089  ;;  %v10097_v53 = vunpack.i.h.bf16 %v10095_v57  ;;  %v10096_v18 = vunpack.i.l.bf16 %v10095_v57  ;;  %v568_v2 = vrot.slane %v10815_v20, 7  ;;  %v567_v0 = vrot.slane %v10816_v58, 7 }
  0xbc   :  { %v10092_v37 = vunpack.i.h.bf16 %v10090_v21  ;;  %v10091_v50 = vunpack.i.l.bf16 %v10090_v21  ;;  %9558 = vmatprep.mubr.msk.bf16.mxu0 %vm1242_vm8, %v1227_v47  ;;  %v10818_v47 = vld [vmem:[%s15399_s0 + $0xc0] sm:$0xff] }
  0xbd   :  { %v1173_v14 = vsel %vm1155_vm6, %v592_v54, %v10097_v53  ;;  %v1172_v11 = vsel %vm1155_vm6, %v690_v52, %v10096_v18  ;;  %v586_v30 = vsel %vm577_vm2, %v567_v0, %v568_v2 }
  0xbe   :  { %v1203_v41 = vsel %vm1188_vm7, %v1170_v55, %v10091_v50  ;;  %v1204_v39 = vsel %vm1188_vm7, %v1171_v48, %v10092_v37  ;;  %v10105_v33 = vpop.permute.xlu0 %10104  ;;  %v569_v37 = vrot.slane %v10818_v47, 7  ;;  %v587_v48 = vsel %vm577_vm2, %v566_v63, %v567_v0  ;;  %v10819_v63 = vld [vmem:[%s15399_s0 + $0xd8] sm:$0xff]  ;;  %v10823_v47 = vld [vmem:[%s15399_s0 + $0xf0] sm:$0xff] }
  0xbf   :  { %v10100_v56 = vpop.permute.xlu1 %10099  ;;  %v1228_v32 = vpack.c.bf16 %v1204_v39, %v1203_v41  ;;  %v10107_v25 = vunpack.i.h.bf16 %v10105_v33  ;;  %v10106_v19 = vunpack.i.l.bf16 %v10105_v33  ;;  %v572_v12 = vrot.slane %v10819_v63, 7 }
  0xc0   :  { %v10102_v60 = vunpack.i.h.bf16 %v10100_v56  ;;  %v10101_v46 = vunpack.i.l.bf16 %v10100_v56  ;;  %v584_v41 = vsel %vm577_vm2, %v569_v37, %v570_v23  ;;  %v585_v39 = vsel %vm577_vm2, %v568_v2, %v569_v37 }
  0xc1   :  { %9559 = vmatmul.mubr.msk.bf16.gmra.mrb[12].mxu0 %vm1242_vm8, %v1228_v32  ;;  %v1205_v42 = vsel %vm1188_vm7, %v1172_v11, %v10106_v19  ;;  %v1206_v36 = vsel %vm1188_vm7, %v1173_v14, %v10107_v25  ;;  %v10820_v19 = vld [vmem:[%s15399_s0 + $0xd0] sm:$0xff]  ;;  %v575_v37 = vrot.slane %v10823_v47, 7 }
  0xc2   :  { %v1229_v62 = vpack.c.bf16 %v1206_v36, %v1205_v42  ;;  %v10115_v16 = vpop.permute.xlu0 %10114  ;;  %v1175_v59 = vsel %vm1155_vm6, %v590_v6, %v10102_v60  ;;  %v1174_v3 = vsel %vm1155_vm6, %v591_v38, %v10101_v46  ;;  %v571_v60 = vrot.slane %v10820_v19, 7  ;;  %v10821_v46 = vld [vmem:[%s15399_s0 + $0xe8] sm:$0xff] }
  0xc3   :  { %v10110_v29 = vpop.permute.xlu1 %10109  ;;  %v10117_v61 = vunpack.i.h.bf16 %v10115_v16  ;;  %v10116_v17 = vunpack.i.l.bf16 %v10115_v16  ;;  %v574_v6 = vrot.slane %v10821_v46, 7 }
  0xc4   :  { %v10112_v15 = vunpack.i.h.bf16 %v10110_v29  ;;  %v10111_v13 = vunpack.i.l.bf16 %v10110_v29  ;;  %9562 = vmatprep.mubr.msk.bf16.mxu0 %vm1242_vm8, %v1229_v62  ;;  %v582_v20 = vsel %vm577_vm2, %v571_v60, %v572_v12  ;;  %v583_v2 = vsel %vm577_vm2, %v570_v23, %v571_v60 }
  0xc5   :  { %v1177_v44 = vsel %vm1155_vm6, %v588_v35, %v10117_v61  ;;  %v1176_v54 = vsel %vm1155_vm6, %v589_v51, %v10116_v17  ;;  %v10822_v51 = vld [vmem:[%s15399_s0 + $0xe0] sm:$0xff] }
  0xc6   :  { %v1207_v22 = vsel %vm1188_vm7, %v1174_v3, %v10111_v13  ;;  %v1208_v34 = vsel %vm1188_vm7, %v1175_v59, %v10112_v15  ;;  %v10125_v57 = vpop.permute.xlu0 %10124  ;;  %v573_v16 = vrot.slane %v10822_v51, 7 }
  0xc7   :  { %v1230_v21 = vpack.c.bf16 %v1208_v34, %v1207_v22  ;;  %v10120_v52 = vpop.permute.xlu1 %10119  ;;  %v10127_v50 = vunpack.i.h.bf16 %v10125_v57  ;;  %v10126_v53 = vunpack.i.l.bf16 %v10125_v57 }
  0xc8   :  { %v10122_v18 = vunpack.i.h.bf16 %v10120_v52  ;;  %v10121_v45 = vunpack.i.l.bf16 %v10120_v52  ;;  %v580_v31 = vsel %vm577_vm2, %v573_v16, %v574_v6  ;;  %v581_v22 = vsel %vm577_vm2, %v572_v12, %v573_v16 }
  0xc9   :  { %9563 = vmatmul.mubr.msk.bf16.gmra.mrb[16].mxu0 %vm1242_vm8, %v1230_v21  ;;  %v1209_v55 = vsel %vm1188_vm7, %v1176_v54, %v10126_v53  ;;  %v1210_v28 = vsel %vm1188_vm7, %v1177_v44, %v10127_v50 }
  0xca   :  { %v1231_v8 = vpack.c.bf16 %v1210_v28, %v1209_v55  ;;  %v10135_v14 = vpop.permute.xlu0 %10134  ;;  %v1179_v10 = vsel %vm1155_vm6, %v586_v30, %v10122_v18  ;;  %v1178_v25 = vsel %vm1155_vm6, %v587_v48, %v10121_v45 }
  0xcb   :  { %v10130_v27 = vpop.permute.xlu1 %10129  ;;  %v10137_v33 = vunpack.i.h.bf16 %v10135_v14  ;;  %v10136_v32 = vunpack.i.l.bf16 %v10135_v14 }
  0xcc   :  { %v10132_v11 = vunpack.i.h.bf16 %v10130_v27  ;;  %v10131_v56 = vunpack.i.l.bf16 %v10130_v27  ;;  %9566 = vmatprep.mubr.msk.bf16.mxu0 %vm1242_vm8, %v1231_v8 }
  0xcd   :  { %v1181_v36 = vsel %vm1155_vm6, %v584_v41, %v10137_v33  ;;  %v1180_v62 = vsel %vm1155_vm6, %v585_v39, %v10136_v32  ;;  %v15490_v39 = vrot.slane %v11201_v49, 7 }
  0xce   :  { %v1211_v40 = vsel %vm1188_vm7, %v1178_v25, %v10131_v56  ;;  %v1212_v38 = vsel %vm1188_vm7, %v1179_v10, %v10132_v11  ;;  %v10145_v35 = vpop.permute.xlu0 %10144  ;;  %v579_v11 = vsel %vm577_vm2, %v574_v6, %v575_v37 }
  0xcf   :  { %v1232_v42 = vpack.c.bf16 %v1212_v38, %v1211_v40  ;;  %v10140_v29 = vpop.permute.xlu1 %10139  ;;  %v10147_v15 = vunpack.i.h.bf16 %v10145_v35  ;;  %v10146_v13 = vunpack.i.l.bf16 %v10145_v35  ;;  %v578_v14 = vsel %vm577_vm2, %v575_v37, %v15490_v39 }
  0xd0   :  { %v10142_v61 = vunpack.i.h.bf16 %v10140_v29  ;;  %v10141_v17 = vunpack.i.l.bf16 %v10140_v29 }
  0xd1   :  { %9567 = vmatmul.mubr.msk.bf16.gmra.mrb[20].mxu0 %vm1242_vm8, %v1232_v42  ;;  %v1213_v59 = vsel %vm1188_vm7, %v1180_v62, %v10146_v13  ;;  %v1214_v3 = vsel %vm1188_vm7, %v1181_v36, %v10147_v15 }
  0xd2   :  { %v1233_v58 = vpack.c.bf16 %v1214_v3, %v1213_v59  ;;  %v10155_v34 = vpop.permute.xlu0 %10154  ;;  %v1183_v57 = vsel %vm1155_vm6, %v582_v20, %v10142_v61  ;;  %v1182_v23 = vsel %vm1155_vm6, %v583_v2, %v10141_v17 }
  0xd3   :  { %v10150_v0 = vpop.permute.xlu1 %10149  ;;  %v10157_v54 = vunpack.i.h.bf16 %v10155_v34  ;;  %v10156_v52 = vunpack.i.l.bf16 %v10155_v34 }
  0xd4   :  { %v10152_v21 = vunpack.i.h.bf16 %v10150_v0  ;;  %v10151_v44 = vunpack.i.l.bf16 %v10150_v0  ;;  %9570 = vmatprep.mubr.msk.bf16.mxu0 %vm1242_vm8, %v1233_v58 }
  0xd5   :  { %v1185_v45 = vsel %vm1155_vm6, %v580_v31, %v10157_v54  ;;  %v1184_v30 = vsel %vm1155_vm6, %v581_v22, %v10156_v52 }
  0xd6   :  { %v1215_v50 = vsel %vm1188_vm7, %v1182_v23, %v10151_v44  ;;  %v1216_v53 = vsel %vm1188_vm7, %v1183_v57, %v10152_v21  ;;  %v10165_v55 = vpop.permute.xlu0 %10164 }
  0xd7   :  { %v1234_v18 = vpack.c.bf16 %v1216_v53, %v1215_v50  ;;  %v10160_v48 = vpop.permute.xlu1 %10159  ;;  %v10167_v28 = vunpack.i.h.bf16 %v10165_v55  ;;  %v10166_v8 = vunpack.i.l.bf16 %v10165_v55 }
  0xd8   :  { %v10162_v27 = vunpack.i.h.bf16 %v10160_v48  ;;  %v10161_v41 = vunpack.i.l.bf16 %v10160_v48 }
  0xd9   :  { %9571 = vmatmul.mubr.msk.bf16.gmra.mrb[24].mxu0 %vm1242_vm8, %v1234_v18  ;;  %v1217_v56 = vsel %vm1188_vm7, %v1184_v30, %v10166_v8  ;;  %v1218_v33 = vsel %vm1188_vm7, %v1185_v45, %v10167_v28 }
  0xda   :  { %v1235_v32 = vpack.c.bf16 %v1218_v33, %v1217_v56  ;;  %v1187_v25 = vsel %vm1155_vm6, %v578_v14, %v10162_v27  ;;  %v1186_v19 = vsel %vm1155_vm6, %v579_v11, %v10161_v41 }
  0xdb   :  { %v10170_v63 = vpop.permute.xlu1 %10169 }
  0xdc   :  { %v10172_v12 = vunpack.i.h.bf16 %v10170_v63  ;;  %v10171_v10 = vunpack.i.l.bf16 %v10170_v63  ;;  %9574 = vmatprep.mubr.msk.bf16.mxu0 %vm1242_vm8, %v1235_v32 }
  0xde   :  { %v1219_v49 = vsel %vm1188_vm7, %v1186_v19, %v10171_v10  ;;  %v1220_v60 = vsel %vm1188_vm7, %v1187_v25, %v10172_v12 }
  0xdf   :  { %v1236_v46 = vpack.c.bf16 %v1220_v60, %v1219_v49 }
  0xe1   :  { %9575 = vmatmul.mubr.msk.bf16.gmra.mrb[28].mxu0 %vm1242_vm8, %v1236_v46 }
 0x17c   :  { %v11599_v6 = vpop.f32.mrb[0].mxu0 }
 0x17d   :  { %v11601_v40 = vpop.f32.mrb[1].mxu0  ;;  %v1460_v35 = vsel %vm1456_vm10, %v11599_v6, 0.0 }
 0x17e   :  { %v11603_v38 = vpop.f32.mrb[2].mxu0  ;;  %v1457_v36 = vsel %vm1456_vm10, %v11601_v40, 0.0 }
 0x17f   :  { %v11605_v42 = vpop.f32.mrb[3].mxu0  ;;  %v1462_v16 = vsel %vm1456_vm10, %v11603_v38, 0.0 }
 0x180   :  { %v1458_v62 = vsel %vm1456_vm10, %v11605_v42, 0.0 }
 0x181   :  { %v1459_v29 = vadd.f32 %v1458_v62, %v1457_v36 }
 0x183   :  { %v1461_v51 = vadd.f32 %v1460_v35, %v1459_v29 }
 0x184   :  { %v11615_v15 = vpop.f32.mrb[4].mxu0 }
 0x185   :  { %v11617_v13 = vpop.f32.mrb[5].mxu0  ;;  %v1463_v61 = vadd.f32 %v1462_v16, %v1461_v51  ;;  %v1468_v0 = vsel %vm1456_vm10, %v11615_v15, 0.0 }
 0x186   :  { %v1464_v17 = vsel %vm1456_vm10, %v11617_v13, 0.0  ;;  %v11621_v20 = vpop.f32.mrb[6].mxu0 }
 0x187   :  { %v1465_v2 = vadd.f32 %v1464_v17, %v1463_v61  ;;  %v11623_v59 = vpop.f32.mrb[7].mxu0  ;;  %v1470_v22 = vsel %vm1456_vm10, %v11621_v20, 0.0 }
 0x188   :  { %v1466_v3 = vsel %vm1456_vm10, %v11623_v59, 0.0 }
 0x189   :  { %v1467_v58 = vadd.f32 %v1466_v3, %v1465_v2 }
 0x18b   :  { %v1469_v31 = vadd.f32 %v1468_v0, %v1467_v58 }
 0x18c   :  { %v11631_v34 = vpop.f32.mrb[8].mxu0 }
 0x18d   :  { %v11633_v21 = vpop.f32.mrb[9].mxu0  ;;  %v1471_v44 = vadd.f32 %v1470_v22, %v1469_v31  ;;  %v1476_v50 = vsel %vm1456_vm10, %v11631_v34, 0.0 }
 0x18e   :  { %v1472_v54 = vsel %vm1456_vm10, %v11633_v21, 0.0  ;;  %v11637_v52 = vpop.f32.mrb[10].mxu0 }
 0x18f   :  { %v1473_v57 = vadd.f32 %v1472_v54, %v1471_v44  ;;  %v11639_v23 = vpop.f32.mrb[11].mxu0  ;;  %v1478_v18 = vsel %vm1456_vm10, %v11637_v52, 0.0 }
 0x190   :  { %v1474_v47 = vsel %vm1456_vm10, %v11639_v23, 0.0 }
 0x191   :  { %v1475_v37 = vadd.f32 %v1474_v47, %v1473_v57 }
 0x193   :  { %v1477_v53 = vadd.f32 %v1476_v50, %v1475_v37 }
 0x194   :  { %v11647_v45 = vpop.f32.mrb[12].mxu0 }
 0x195   :  { %v11649_v30 = vpop.f32.mrb[13].mxu0  ;;  %v1479_v48 = vadd.f32 %v1478_v18, %v1477_v53  ;;  %v1484_v14 = vsel %vm1456_vm10, %v11647_v45, 0.0 }
 0x196   :  { %v1480_v55 = vsel %vm1456_vm10, %v11649_v30, 0.0  ;;  %v11653_v28 = vpop.f32.mrb[14].mxu0 }
 0x197   :  { %v1481_v8 = vadd.f32 %v1480_v55, %v1479_v48  ;;  %v11655_v27 = vpop.f32.mrb[15].mxu0  ;;  %v1486_v56 = vsel %vm1456_vm10, %v11653_v28, 0.0 }
 0x198   :  { %v1482_v41 = vsel %vm1456_vm10, %v11655_v27, 0.0 }
 0x199   :  { %v1483_v39 = vadd.f32 %v1482_v41, %v1481_v8 }
 0x19b   :  { %v1485_v11 = vadd.f32 %v1484_v14, %v1483_v39 }
 0x19c   :  { %v11663_v33 = vpop.f32.mrb[16].mxu0 }
 0x19d   :  { %v11665_v32 = vpop.f32.mrb[17].mxu0  ;;  %v1487_v63 = vadd.f32 %v1486_v56, %v1485_v11  ;;  %v1492_v46 = vsel %vm1456_vm10, %v11663_v33, 0.0 }
 0x19e   :  { %v1488_v12 = vsel %vm1456_vm10, %v11665_v32, 0.0  ;;  %v11669_v10 = vpop.f32.mrb[18].mxu0 }
 0x19f   :  { %v1489_v25 = vadd.f32 %v1488_v12, %v1487_v63  ;;  %v11671_v19 = vpop.f32.mrb[19].mxu0  ;;  %v1494_v62 = vsel %vm1456_vm10, %v11669_v10, 0.0 }
 0x1a0   :  { %v1490_v49 = vsel %vm1456_vm10, %v11671_v19, 0.0 }
 0x1a1   :  { %v1491_v60 = vadd.f32 %v1490_v49, %v1489_v25 }
 0x1a3   :  { %v1493_v36 = vadd.f32 %v1492_v46, %v1491_v60 }
 0x1a4   :  { %v11679_v29 = vpop.f32.mrb[20].mxu0 }
 0x1a5   :  { %v11681_v35 = vpop.f32.mrb[21].mxu0  ;;  %v1495_v51 = vadd.f32 %v1494_v62, %v1493_v36  ;;  %v1500_v0 = vsel %vm1456_vm10, %v11679_v29, 0.0 }
 0x1a6   :  { %v1496_v16 = vsel %vm1456_vm10, %v11681_v35, 0.0  ;;  %v11685_v61 = vpop.f32.mrb[22].mxu0 }
 0x1a7   :  { %v1497_v17 = vadd.f32 %v1496_v16, %v1495_v51  ;;  %v1412_v2 = vpop.f32.mrb[23].mxu0  ;;  %v1502_v22 = vsel %vm1456_vm10, %v11685_v61, 0.0 }
 0x1a8   :  { %v1498_v3 = vsel %vm1456_vm10, %v1412_v2, 0.0 }
 0x1a9   :  { %v1499_v58 = vadd.f32 %v1498_v3, %v1497_v17 }
 0x1ab   :  { %v1501_v31 = vadd.f32 %v1500_v0, %v1499_v58 }
 0x1ac   :  { %v9572_v44 = vpop.f32.mrb[24].mxu0 }
 0x1ad   :  { %v1425_v54 = vpop.f32.mrb[25].mxu0  ;;  %v1503_v57 = vadd.f32 %v1502_v22, %v1501_v31  ;;  %v1508_v55 = vsel %vm1456_vm10, %v9572_v44, 0.0 }
 0x1ae   :  { %v1504_v47 = vsel %vm1456_vm10, %v1425_v54, 0.0  ;;  %v9573_v37 = vpop.f32.mrb[26].mxu0 }
 0x1af   :  { %v1505_v50 = vadd.f32 %v1504_v47, %v1503_v57  ;;  %v1428_v53 = vpop.f32.mrb[27].mxu0  ;;  %v1510_v41 = vsel %vm1456_vm10, %v9573_v37, 0.0 }
 0x1b0   :  { %v1506_v18 = vsel %vm1456_vm10, %v1428_v53, 0.0 }
 0x1b1   :  { %v1507_v48 = vadd.f32 %v1506_v18, %v1505_v50 }
 0x1b3   :  { %v1509_v8 = vadd.f32 %v1508_v55, %v1507_v48 }
 0x1b4   :  { %v9576_v39 = vpop.f32.mrb[28].mxu0 }
 0x1b5   :  { %v1441_v14 = vpop.f32.mrb[29].mxu0  ;;  %v1511_v11 = vadd.f32 %v1510_v41, %v1509_v8  ;;  %v1516_v46 = vsel %vm1456_vm10, %v9576_v39, 0.0 }
 0x1b6   :  { %v1512_v56 = vsel %vm1456_vm10, %v1441_v14, 0.0  ;;  %v9577_v63 = vpop.f32.mrb[30].mxu0 }
 0x1b7   :  { %v1513_v12 = vadd.f32 %v1512_v56, %v1511_v11  ;;  %v1444_v25 = vpop.f32.mrb[31].mxu0  ;;  %v1518_v62 = vsel %vm1456_vm10, %v9577_v63, 0.0 }
 0x1b8   :  { %v1514_v49 = vsel %vm1456_vm10, %v1444_v25, 0.0 }
 0x1b9   :  { %v1515_v60 = vadd.f32 %v1514_v49, %v1513_v12 }
 0x1bb   :  { %v1517_v36 = vadd.f32 %v1516_v46, %v1515_v60 }
 0x1bd   :  { %v1519_v51 = vadd.f32 %v1518_v62, %v1517_v36 }
 0x1bf   :  { %v1520_v16 = vrot.slane %v1519_v51, 4 }
 0x1c1   :  { %v1521_v17 = vadd.f32 %v1520_v16, %v1519_v51 }
 0x1c3   :  { %v1522_v3 = vrot.slane %v1521_v17, 2 }
 0x1c5   :  { %v1523_v58 = vadd.f32 %v1522_v3, %v1521_v17 }
 0x1c7   :  { %v1524_v0 = vrot.slane %v1523_v58, 1 }
 0x1c9   :  { %v1525_v31 = vadd.f32 %v1524_v0, %v1523_v58 }
 0x1cb   :  { %v1527_v22 = vmul.f32 0.00390625, %v1525_v31 }
 0x1cd   :  { %v11701_v57 = vsub.f32 %v11601_v40, %v1527_v22  ;;  %v11704_v47 = vsub.f32 %v11605_v42, %v1527_v22  ;;  %v11707_v50 = vsub.f32 %v11599_v6, %v1527_v22  ;;  %v11710_v18 = vsub.f32 %v11603_v38, %v1527_v22 }
 0x1ce   :  { %v11713_v48 = vsub.f32 %v11617_v13, %v1527_v22  ;;  %v11716_v55 = vsub.f32 %v11623_v59, %v1527_v22  ;;  %v11719_v8 = vsub.f32 %v11615_v15, %v1527_v22  ;;  %v11722_v40 = vsub.f32 %v11621_v20, %v1527_v22 }
 0x1cf   :  { %v11725_v42 = vsub.f32 %v11633_v21, %v1527_v22  ;;  %v11728_v6 = vsub.f32 %v11639_v23, %v1527_v22  ;;  %v11731_v38 = vsub.f32 %v11631_v34, %v1527_v22  ;;  %v11734_v13 = vsub.f32 %v11637_v52, %v1527_v22 }
 0x1d0   :  { %v11737_v59 = vsub.f32 %v11649_v30, %v1527_v22  ;;  %v11740_v15 = vsub.f32 %v11655_v27, %v1527_v22  ;;  %v11743_v20 = vsub.f32 %v11647_v45, %v1527_v22  ;;  %v11746_v21 = vsub.f32 %v11653_v28, %v1527_v22 }
 0x1d1   :  { %v11749_v23 = vsub.f32 %v11665_v32, %v1527_v22  ;;  %v11752_v34 = vsub.f32 %v11671_v19, %v1527_v22  ;;  %v11755_v52 = vsub.f32 %v11663_v33, %v1527_v22  ;;  %v11758_v30 = vsub.f32 %v11669_v10, %v1527_v22 }
 0x1d2   :  { %v11761_v27 = vsub.f32 %v11681_v35, %v1527_v22  ;;  %v11763_v45 = vsub.f32 %v1412_v2, %v1527_v22  ;;  %v11766_v28 = vsub.f32 %v11679_v29, %v1527_v22  ;;  %v11769_v32 = vsub.f32 %v11685_v61, %v1527_v22 }
 0x1d3   :  { %v11771_v41 = vsub.f32 %v1425_v54, %v1527_v22  ;;  %v11773_v19 = vsub.f32 %v1428_v53, %v1527_v22  ;;  %v11775_v33 = vsub.f32 %v9572_v44, %v1527_v22  ;;  %v11777_v11 = vsub.f32 %v9573_v37, %v1527_v22 }
 0x1d4   :  { %v11779_v10 = vsub.f32 %v1441_v14, %v1527_v22  ;;  %v11781_v35 = vsub.f32 %v1444_v25, %v1527_v22  ;;  %v11783_v2 = vsub.f32 %v9576_v39, %v1527_v22  ;;  %v11785_v56 = vsub.f32 %v9577_v63, %v1527_v22 }
 0x1d5   :  { %v1560_v29 = vmul.f32 %v11701_v57, %v11701_v57  ;;  %v1561_v61 = vmul.f32 %v11704_v47, %v11704_v47  ;;  %v1562_v44 = vmul.f32 %v11707_v50, %v11707_v50  ;;  %v1563_v54 = vmul.f32 %v11710_v18, %v11710_v18 }
 0x1d6   :  { %v1564_v14 = vmul.f32 %v11713_v48, %v11713_v48  ;;  %v1565_v25 = vmul.f32 %v11716_v55, %v11716_v55  ;;  %v1566_v46 = vmul.f32 %v11719_v8, %v11719_v8  ;;  %v1567_v51 = vmul.f32 %v11722_v40, %v11722_v40 }
 0x1d7   :  { %v1592_v37 = vsel %vm1456_vm10, %v1560_v29, 0.0  ;;  %v1593_v53 = vsel %vm1456_vm10, %v1561_v61, 0.0  ;;  %v1595_v63 = vsel %vm1456_vm10, %v1562_v44, 0.0  ;;  %v1597_v49 = vsel %vm1456_vm10, %v1563_v54, 0.0 }
 0x1d8   :  { %v1594_v39 = vadd.f32 %v1593_v53, %v1592_v37  ;;  %v1599_v36 = vsel %vm1456_vm10, %v1564_v14, 0.0  ;;  %v1601_v16 = vsel %vm1456_vm10, %v1565_v25, 0.0  ;;  %v1568_v3 = vmul.f32 %v11725_v42, %v11725_v42 }
 0x1d9   :  { %v1603_v58 = vsel %vm1456_vm10, %v1566_v46, 0.0  ;;  %v1569_v31 = vmul.f32 %v11728_v6, %v11728_v6  ;;  %v1605_v22 = vsel %vm1456_vm10, %v1567_v51, 0.0  ;;  %v1570_v61 = vmul.f32 %v11731_v38, %v11731_v38 }
 0x1da   :  { %v1596_v12 = vadd.f32 %v1595_v63, %v1594_v39  ;;  %v1607_v44 = vsel %vm1456_vm10, %v1568_v3, 0.0  ;;  %v1571_v37 = vmul.f32 %v11734_v13, %v11734_v13  ;;  %v1572_v14 = vmul.f32 %v11737_v59, %v11737_v59 }
 0x1db   :  { %v1609_v53 = vsel %vm1456_vm10, %v1569_v31, 0.0  ;;  %v1611_v63 = vsel %vm1456_vm10, %v1570_v61, 0.0  ;;  %v1573_v25 = vmul.f32 %v11740_v15, %v11740_v15  ;;  %v1574_v46 = vmul.f32 %v11743_v20, %v11743_v20 }
 0x1dc   :  { %v1598_v60 = vadd.f32 %v1597_v49, %v1596_v12  ;;  %v1613_v49 = vsel %vm1456_vm10, %v1571_v37, 0.0  ;;  %v1575_v51 = vmul.f32 %v11746_v21, %v11746_v21  ;;  %v1576_v3 = vmul.f32 %v11749_v23, %v11749_v23 }
 0x1dd   :  { %v1577_v31 = vmul.f32 %v11752_v34, %v11752_v34  ;;  %v1578_v61 = vmul.f32 %v11755_v52, %v11755_v52  ;;  %v1579_v37 = vmul.f32 %v11758_v30, %v11758_v30 }
 0x1de   :  { %v1600_v62 = vadd.f32 %v1599_v36, %v1598_v60  ;;  %v1615_v36 = vsel %vm1456_vm10, %v1572_v14, 0.0  ;;  %v1580_v14 = vmul.f32 %v11761_v27, %v11761_v27 }
 0x1e0   :  { %v1602_v17 = vadd.f32 %v1601_v16, %v1600_v62  ;;  %v1617_v16 = vsel %vm1456_vm10, %v1573_v25, 0.0  ;;  %v1581_v25 = vmul.f32 %v11763_v45, %v11763_v45 }
 0x1e2   :  { %v1604_v0 = vadd.f32 %v1603_v58, %v1602_v17  ;;  %v1619_v58 = vsel %vm1456_vm10, %v1574_v46, 0.0  ;;  %v1582_v46 = vmul.f32 %v11766_v28, %v11766_v28 }
 0x1e4   :  { %v1606_v29 = vadd.f32 %v1605_v22, %v1604_v0  ;;  %v1621_v22 = vsel %vm1456_vm10, %v1575_v51, 0.0  ;;  %v1583_v51 = vmul.f32 %v11769_v32, %v11769_v32 }
 0x1e6   :  { %v1608_v54 = vadd.f32 %v1607_v44, %v1606_v29  ;;  %v1623_v44 = vsel %vm1456_vm10, %v1576_v3, 0.0  ;;  %v1584_v3 = vmul.f32 %v11771_v41, %v11771_v41 }
 0x1e8   :  { %v1610_v39 = vadd.f32 %v1609_v53, %v1608_v54  ;;  %v1625_v53 = vsel %vm1456_vm10, %v1577_v31, 0.0  ;;  %v1585_v31 = vmul.f32 %v11773_v19, %v11773_v19 }
 0x1ea   :  { %v1612_v12 = vadd.f32 %v1611_v63, %v1610_v39  ;;  %v1627_v63 = vsel %vm1456_vm10, %v1578_v61, 0.0  ;;  %v1586_v61 = vmul.f32 %v11775_v33, %v11775_v33 }
 0x1ec   :  { %v1614_v60 = vadd.f32 %v1613_v49, %v1612_v12  ;;  %v1629_v49 = vsel %vm1456_vm10, %v1579_v37, 0.0  ;;  %v1587_v37 = vmul.f32 %v11777_v11, %v11777_v11 }
 0x1ee   :  { %v1616_v62 = vadd.f32 %v1615_v36, %v1614_v60  ;;  %v1631_v36 = vsel %vm1456_vm10, %v1580_v14, 0.0  ;;  %v1588_v14 = vmul.f32 %v11779_v10, %v11779_v10 }
 0x1f0   :  { %v1618_v17 = vadd.f32 %v1617_v16, %v1616_v62  ;;  %v1633_v16 = vsel %vm1456_vm10, %v1581_v25, 0.0  ;;  %v1589_v25 = vmul.f32 %v11781_v35, %v11781_v35 }
 0x1f2   :  { %v1620_v0 = vadd.f32 %v1619_v58, %v1618_v17  ;;  %v1635_v58 = vsel %vm1456_vm10, %v1582_v46, 0.0  ;;  %v1590_v46 = vmul.f32 %v11783_v2, %v11783_v2 }
 0x1f4   :  { %v1622_v29 = vadd.f32 %v1621_v22, %v1620_v0  ;;  %v1637_v22 = vsel %vm1456_vm10, %v1583_v51, 0.0  ;;  %v1591_v51 = vmul.f32 %v11785_v56, %v11785_v56 }
 0x1f6   :  { %v1624_v54 = vadd.f32 %v1623_v44, %v1622_v29  ;;  %v1639_v44 = vsel %vm1456_vm10, %v1584_v3, 0.0  ;;  %v10594_v3 = vld [vmem:[#allocation7 + $0x8] sm:$0xff]  }
 0x1f7   :  { %9578 = vmatprep.subr.bf16.mxu0 %v10594_v3  ;;  %9994 = vmatprep.subr.bf16.mxu1 %v10594_v3 }
 0x1f8   :  { %v1626_v39 = vadd.f32 %v1625_v53, %v1624_v54  ;;  %v1641_v53 = vsel %vm1456_vm10, %v1585_v31, 0.0  ;;  %v1653_v31 = vsel %vm1456_vm10, %v1591_v51, 0.0  ;;  %9579 = vmatpush3.bf16.msra.mxu0 %v10594_v3  ;;  %9997 = vmatpush3.bf16.msra.mxu1 %v10594_v3 }
 0x1fa   :  { %v1628_v12 = vadd.f32 %v1627_v63, %v1626_v39  ;;  %v1643_v63 = vsel %vm1456_vm10, %v1586_v61, 0.0  ;;  %v10596_v61 = vld [vmem:[#allocation7 + $0x18] sm:$0xff]  }
 0x1fc   :  { %v1630_v60 = vadd.f32 %v1629_v49, %v1628_v12  ;;  %v1645_v49 = vsel %vm1456_vm10, %v1587_v37, 0.0 }
 0x1fe   :  { %v1632_v62 = vadd.f32 %v1631_v36, %v1630_v60  ;;  %v1647_v36 = vsel %vm1456_vm10, %v1588_v14, 0.0 }
 0x200   :  { %v1634_v17 = vadd.f32 %v1633_v16, %v1632_v62  ;;  %v1649_v16 = vsel %vm1456_vm10, %v1589_v25, 0.0  ;;  %v90_v25 = vld [vmem:[%s15401_s2] sm:$0x1] }
 0x202   :  { %v1636_v0 = vadd.f32 %v1635_v58, %v1634_v17  ;;  %v1651_v58 = vsel %vm1456_vm10, %v1590_v46, 0.0 }
 0x204   :  { %v1638_v29 = vadd.f32 %v1637_v22, %v1636_v0 }
 0x206   :  { %v1640_v54 = vadd.f32 %v1639_v44, %v1638_v29  ;;  %v10595_v29 = vld [vmem:[#allocation7 + $0x10] sm:$0xff]  }
 0x207   :  { %9580 = vmatprep.subr.bf16.mxu0 %v10595_v29  ;;  %9995 = vmatprep.subr.bf16.mxu1 %v10595_v29 }
 0x208   :  { %v1642_v39 = vadd.f32 %v1641_v53, %v1640_v54  ;;  %9581 = vmatpush3.bf16.msra.mxu0 %v10595_v29  ;;  %9998 = vmatpush3.bf16.msra.mxu1 %v10595_v29 }
 0x209   :  { %9582 = vmatprep.subr.bf16.mxu0 %v10596_v61  ;;  %9996 = vmatprep.subr.bf16.mxu1 %v10596_v61 }
 0x20a   :  { %v1644_v12 = vadd.f32 %v1643_v63, %v1642_v39 }
 0x20c   :  { %v1646_v60 = vadd.f32 %v1645_v49, %v1644_v12  ;;  %9583 = vmatpush3.bf16.msra.mxu0 %v10596_v61  ;;  %9999 = vmatpush3.bf16.msra.mxu1 %v10596_v61  ;;  %v11887_v49 = vsub.s32 0, %v10973_v1 }
 0x20d   :  { %10001 = vmatprep.subr.msk.bf16.mxu0 %vm2869_vm11, %v89_v9 }
 0x20e   :  { %v1648_v62 = vadd.f32 %v1647_v36, %v1646_v60  ;;  %15491 = vst [vmem:[#allocation15_spill] sm:$0xff] %v11887_v49 }
 0x210   :  { %v1650_v17 = vadd.f32 %v1649_v16, %v1648_v62  ;;  %v11893_v62 = vld [vmem:[%s15401_s2 + $0x1] ss:$0 sm:$0xff] }
 0x212   :  { %v1652_v0 = vadd.f32 %v1651_v58, %v1650_v17 }
 0x214   :  { %v1654_v22 = vadd.f32 %v1653_v31, %v1652_v0 }
 0x216   :  { %v1655_v44 = vrot.slane %v1654_v22, 4 }
 0x218   :  { %v1656_v54 = vadd.f32 %v1655_v44, %v1654_v22 }
 0x21a   :  { %v1657_v37 = vrot.slane %v1656_v54, 2 }
 0x21c   :  { %v1658_v53 = vadd.f32 %v1657_v37, %v1656_v54 }
 0x21e   :  { %v1659_v39 = vrot.slane %v1658_v53, 1 }
 0x220   :  { %v1660_v14 = vadd.f32 %v1659_v39, %v1658_v53 }
 0x222   :  { %v1661_v63 = vmul.f32 0.00390625, %v1660_v14 }
 0x224   :  { %v1662_v12 = vadd.f32 1e-05, %v1661_v63 }
 0x226   :  { %10781 = vrsqrt.f32 %v1662_v12 }
 0x230   :  { %v10782_v60 = vpop.eup %10781 }
 0x231   :  { %v1664_v46 = vmul.f32 %v10782_v60, %v90_v25 }
 0x233   :  { %v1668_v36 = vrot.slane %v1664_v46, %v11887_v49 }
 0x235   :  { %v1698_v51 = vmul.f32 %v1668_v36, %v11781_v35  ;;  %v1671_v17 = vmul.f32 %v1668_v36, %v11707_v50  ;;  %v1672_v3 = vmul.f32 %v1668_v36, %v11710_v18  ;;  %v1669_v0 = vmul.f32 %v1668_v36, %v11701_v57 }
 0x236   :  { %v1670_v31 = vmul.f32 %v1668_v36, %v11704_v47  ;;  %v1673_v22 = vmul.f32 %v1668_v36, %v11713_v48  ;;  %v1674_v61 = vmul.f32 %v1668_v36, %v11716_v55  ;;  %v1675_v35 = vmul.f32 %v1668_v36, %v11719_v8 }
 0x237   :  { %v1734_v16 = vadd.f32 %v11893_v62, %v1698_v51  ;;  %v1707_v58 = vadd.f32 %v11893_v62, %v1671_v17  ;;  %v1708_v29 = vadd.f32 %v11893_v62, %v1672_v3  ;;  %v1676_v44 = vmul.f32 %v1668_v36, %v11722_v40 }
 0x238   :  { %v1677_v50 = vmul.f32 %v1668_v36, %v11725_v42  ;;  %v1678_v18 = vmul.f32 %v1668_v36, %v11728_v6  ;;  %v1694_v57 = vmul.f32 %v1668_v36, %v11773_v19  ;;  %v1679_v48 = vmul.f32 %v1668_v36, %v11731_v38 }
 0x239   :  { %v11907_v54 = vmax.f32 %v1707_v58, 0.0  ;;  %v11912_v37 = vmax.f32 %v1708_v29, 0.0  ;;  %v11914_v47 = vmax.f32 %v1734_v16, 0.0  ;;  %v1680_v55 = vmul.f32 %v1668_v36, %v11734_v13 }
 0x23a   :  { %v1699_v8 = vmul.f32 %v1668_v36, %v11783_v2  ;;  %v1681_v40 = vmul.f32 %v1668_v36, %v11737_v59  ;;  %v1700_v53 = vmul.f32 %v1668_v36, %v11785_v56  ;;  %v1705_v6 = vadd.f32 %v11893_v62, %v1669_v0 }
 0x23b   :  { %v10178_v42 = vpack.i.bf16 %v11912_v37, %v11907_v54  ;;  %v1682_v19 = vmul.f32 %v1668_v36, %v11740_v15  ;;  %v1683_v39 = vmul.f32 %v1668_v36, %v11743_v20  ;;  %v1684_v14 = vmul.f32 %v1668_v36, %v11746_v21 }
 0x23c   :  { %v1706_v38 = vadd.f32 %v11893_v62, %v1670_v31  ;;  %v1685_v13 = vmul.f32 %v1668_v36, %v11749_v23  ;;  %v1686_v2 = vmul.f32 %v1668_v36, %v11752_v34  ;;  %v1687_v59 = vmul.f32 %v1668_v36, %v11755_v52 }
 0x23d   :  { %10179 = vrot.lane.b32.xlu1 %v10178_v42, %s10907_s13  ;;  %v11933_v56 = vadd.f32 %v11893_v62, %v1694_v57  ;;  %v1688_v20 = vmul.f32 %v1668_v36, %v11758_v30  ;;  %v1689_v21 = vmul.f32 %v1668_v36, %v11761_v27  ;;  %v11939_v63 = vadd.f32 %v11893_v62, %v1699_v8 }
 0x23e   :  { %v1690_v23 = vmul.f32 %v1668_v36, %v11763_v45  ;;  %v1691_v34 = vmul.f32 %v1668_v36, %v11766_v28  ;;  %v11944_v52 = vadd.f32 %v11893_v62, %v1700_v53  ;;  %v11946_v12 = vmax.f32 %v1705_v6, 0.0 }
 0x23f   :  { %v1692_v25 = vmul.f32 %v1668_v36, %v11769_v32  ;;  %v1693_v60 = vmul.f32 %v1668_v36, %v11771_v41  ;;  %v1709_v30 = vadd.f32 %v11893_v62, %v1673_v22  ;;  %v11951_v46 = vmax.f32 %v1706_v38, 0.0 }
 0x240   :  { %v1695_v27 = vmul.f32 %v1668_v36, %v11775_v33  ;;  %v1696_v51 = vmul.f32 %v1668_v36, %v11777_v11  ;;  %v1697_v45 = vmul.f32 %v1668_v36, %v11779_v10  ;;  %v1710_v28 = vadd.f32 %v11893_v62, %v1674_v61 }
 0x241   :  { %v1711_v16 = vadd.f32 %v11893_v62, %v1675_v35  ;;  %v1712_v17 = vadd.f32 %v11893_v62, %v1676_v44  ;;  %v1713_v32 = vadd.f32 %v11893_v62, %v1677_v50  ;;  %v10173_v41 = vpack.i.bf16 %v11951_v46, %v11946_v12 }
 0x242   :  { %v1714_v3 = vadd.f32 %v11893_v62, %v1678_v18  ;;  %v1715_v58 = vadd.f32 %v11893_v62, %v1679_v48  ;;  %v1716_v33 = vadd.f32 %v11893_v62, %v1680_v55  ;;  %v1717_v11 = vadd.f32 %v11893_v62, %v1681_v40 }
 0x243   :  { %v1718_v10 = vadd.f32 %v11893_v62, %v1682_v19  ;;  %v1719_v36 = vadd.f32 %v11893_v62, %v1683_v39  ;;  %v1720_v0 = vadd.f32 %v11893_v62, %v1684_v14  ;;  %10174 = vrot.lane.b32.xlu0 %v10173_v41, %s10907_s13  ;;  %v11970_v31 = vmax.f32 %v1709_v30, 0.0 }
 0x244   :  { %v1721_v22 = vadd.f32 %v11893_v62, %v1685_v13  ;;  %v1722_v29 = vadd.f32 %v11893_v62, %v1686_v2  ;;  %v1723_v61 = vadd.f32 %v11893_v62, %v1687_v59  ;;  %v1724_v35 = vadd.f32 %v11893_v62, %v1688_v20 }
 0x245   :  { %v1725_v44 = vadd.f32 %v11893_v62, %v1689_v21  ;;  %v1726_v50 = vadd.f32 %v11893_v62, %v1690_v23  ;;  %v1727_v18 = vadd.f32 %v11893_v62, %v1691_v34  ;;  %v1728_v57 = vadd.f32 %v11893_v62, %v1692_v25 }
 0x246   :  { %v1729_v48 = vadd.f32 %v11893_v62, %v1693_v60  ;;  %v1731_v55 = vadd.f32 %v11893_v62, %v1695_v27  ;;  %v1732_v8 = vadd.f32 %v11893_v62, %v1696_v51  ;;  %v1867_v40 = vrot.slane %v11907_v54, 1 }
 0x247   :  { %v1733_v53 = vadd.f32 %v11893_v62, %v1697_v45  ;;  %v1771_v42 = vrot.slane %v11907_v54, 7  ;;  %v1868_v6 = vrot.slane %v11912_v37, 1  ;;  %v1869_v19 = vrot.slane %v11970_v31, 1 }
 0x248   :  { %v1772_v39 = vrot.slane %v11912_v37, 7  ;;  %v11989_v14 = vmax.f32 %v1710_v28, 0.0  ;;  %v11991_v38 = vmax.f32 %v1711_v16, 0.0  ;;  %v11993_v13 = vmax.f32 %v1712_v17, 0.0 }
 0x249   :  { %v11995_v2 = vmax.f32 %v1713_v32, 0.0  ;;  %v11997_v59 = vmax.f32 %v1714_v3, 0.0  ;;  %v1924_v62 = vsel %vm770_vm0, %v1868_v6, %v1869_v19  ;;  %v1925_v20 = vsel %vm770_vm0, %v1867_v40, %v1868_v6 }
 0x24a   :  { %v12005_v21 = vmax.f32 %v1715_v58, 0.0  ;;  %v12007_v23 = vmax.f32 %v1716_v33, 0.0  ;;  %v12009_v34 = vmax.f32 %v1717_v11, 0.0  ;;  %v10188_v25 = vpack.i.bf16 %v1924_v62, %v1925_v20 }
 0x24b   :  { %v12011_v60 = vmax.f32 %v1718_v10, 0.0  ;;  %v12013_v30 = vmax.f32 %v1719_v36, 0.0  ;;  %v12015_v27 = vmax.f32 %v1720_v0, 0.0  ;;  %v12017_v51 = vmax.f32 %v1721_v22, 0.0 }
 0x24c   :  { %v12019_v45 = vmax.f32 %v1722_v29, 0.0  ;;  %v12021_v28 = vmax.f32 %v1723_v61, 0.0  ;;  %v12023_v16 = vmax.f32 %v1724_v35, 0.0  ;;  %v12025_v17 = vmax.f32 %v1725_v44, 0.0  ;;  %10189 = vrot.lane.b32.xlu1 %v10188_v25, %s10908_s14 }
 0x24d   :  { %v12028_v32 = vmax.f32 %v1726_v50, 0.0  ;;  %v12030_v41 = vmax.f32 %v1727_v18, 0.0  ;;  %v12032_v3 = vmax.f32 %v1728_v57, 0.0  ;;  %v12034_v58 = vmax.f32 %v1729_v48, 0.0 }
 0x24e   :  { %v12037_v33 = vmax.f32 %v11933_v56, 0.0  ;;  %v12039_v11 = vmax.f32 %v1731_v55, 0.0  ;;  %v12041_v10 = vmax.f32 %v1732_v8, 0.0  ;;  %v12043_v36 = vmax.f32 %v1733_v53, 0.0 }
 0x24f   :  { %v12046_v0 = vmax.f32 %v11939_v63, 0.0  ;;  %v15406_v22 = vrot.slane %v11946_v12, 1  ;;  %v1866_v29 = vrot.slane %v11951_v46, 1  ;;  %v10198_v61 = vpack.i.bf16 %v11993_v13, %v11991_v38 }
 0x250   :  { %v12053_v35 = vmax.f32 %v11944_v52, 0.0  ;;  %v1871_v56 = vrot.slane %v11991_v38, 1  ;;  %v1872_v44 = vrot.slane %v11993_v13, 1  ;;  %v1873_v50 = vrot.slane %v11995_v2, 1 }
 0x251   :  { %v1926_v57 = vsel %vm770_vm0, %v1866_v29, %v1867_v40  ;;  %v1927_v48 = vsel %vm770_vm0, %v15406_v22, %v1866_v29  ;;  %10199 = vrot.lane.b32.xlu1 %v10198_v61, %s10907_s13  ;;  %v1870_v20 = vrot.slane %v11989_v14, 1  ;;  %v1875_v29 = vrot.slane %v12005_v21, 1 }
 0x252   :  { %v10183_v55 = vpack.i.bf16 %v1926_v57, %v1927_v48  ;;  %v1920_v8 = vsel %vm770_vm0, %v1872_v44, %v1873_v50  ;;  %v1921_v53 = vsel %vm770_vm0, %v1871_v56, %v1872_v44  ;;  %v1876_v61 = vrot.slane %v12007_v23, 1 }
 0x253   :  { %v10213_v62 = vpack.i.bf16 %v1920_v8, %v1921_v53  ;;  %v1877_v57 = vrot.slane %v12009_v34, 1  ;;  %v10193_v6 = vpack.i.bf16 %v11989_v14, %v11970_v31  ;;  %v1922_v48 = vsel %vm770_vm0, %v1870_v20, %v1871_v56 }
 0x254   :  { %10184 = vrot.lane.b32.xlu0 %v10183_v55, %s10908_s14  ;;  %v1923_v44 = vsel %vm770_vm0, %v1869_v19, %v1870_v20  ;;  %v1917_v55 = vsel %vm770_vm0, %v1875_v29, %v1876_v61  ;;  %v1880_v52 = vrot.slane %v12015_v27, 1  ;;  %v15407_v56 = vrot.slane %v12017_v51, 1 }
 0x255   :  { %10214 = vrot.lane.b32.xlu1 %v10213_v62, %s10908_s14  ;;  %v10218_v62 = vpack.i.bf16 %v12007_v23, %v12005_v21  ;;  %v1916_v53 = vsel %vm770_vm0, %v1876_v61, %v1877_v57  ;;  %v10203_v25 = vpack.i.bf16 %v1922_v48, %v1923_v44  ;;  %v1879_v40 = vrot.slane %v12013_v30, 1 }
 0x256   :  { %v10233_v63 = vpack.i.bf16 %v1916_v53, %v1917_v55  ;;  %v1878_v15 = vrot.slane %v12011_v60, 1  ;;  %v1912_v48 = vsel %vm770_vm0, %v1880_v52, %v15407_v56  ;;  %v10208_v8 = vpack.i.bf16 %v11997_v59, %v11995_v2 }
 0x257   :  { %v10238_v44 = vpack.i.bf16 %v12015_v27, %v12013_v30  ;;  %v1913_v53 = vsel %vm770_vm0, %v1879_v40, %v1880_v52  ;;  %v10258_v52 = vpack.i.bf16 %v12023_v16, %v12021_v28  ;;  %v1883_v26 = vrot.slane %v12021_v28, 1 }
 0x258   :  { %10194 = vrot.lane.b32.xlu0 %v10193_v6, %s10907_s13  ;;  %v1874_v6 = vrot.slane %v11997_v59, 1  ;;  %v15409_v56 = vrot.slane %v12025_v17, 1  ;;  %v1882_v61 = vrot.slane %v12019_v45, 1  ;;  %v15545_v43 = vrot.slane %v12053_v35, 7 }
 0x259   :  { %10219 = vrot.lane.b32.xlu1 %v10218_v62, %s10907_s13  ;;  %v15552_v49 = vrot.slane %v12043_v36, 7 }
 0x25a   :  { %v1918_v55 = vsel %vm770_vm0, %v1874_v6, %v1875_v29  ;;  %v1919_v62 = vsel %vm770_vm0, %v1873_v50, %v1874_v6  ;;  %v1914_v29 = vsel %vm770_vm0, %v1878_v15, %v1879_v40  ;;  %v1915_v50 = vsel %vm770_vm0, %v1877_v57, %v1878_v15 }
 0x25b   :  { %v15410_v6 = vrot.slane %v12053_v35, 7  ;;  %v10223_v22 = vpack.i.bf16 %v1918_v55, %v1919_v62  ;;  %v15408_v40 = vrot.slane %v12043_v36, 1  ;;  %v1895_v57 = vrot.slane %v12046_v0, 1 }
 0x25c   :  { %10204 = vrot.lane.b32.xlu0 %v10203_v25, %s10908_s14  ;;  %v10228_v25 = vpack.i.bf16 %v12011_v60, %v12009_v34  ;;  %v1884_v62 = vrot.slane %v12023_v16, 1  ;;  %v1896_v55 = vrot.slane %v12053_v35, 1  ;;  %v12169_v15 = vsel %vm577_vm2, %v1771_v42, %v1772_v39 }
 0x25d   :  { %10234 = vrot.lane.b32.xlu1 %v10233_v63, %s10908_s14  ;;  %v1944_v63 = vsel %vm11165_vm3, %v1912_v48, 0.0 }
 0x25e   :  { %v10253_v48 = vpack.i.bf16 %v1944_v63, %v1913_v53  ;;  %v1897_v53 = vsel %vm770_vm0, %v1895_v57, %v1896_v55  ;;  %v15492_v63 = vrot.slane %v11946_v12, 1 }
 0x260   :  { %10209 = vrot.lane.b32.xlu0 %v10208_v8, %s10907_s13  ;;  %v10243_v8 = vpack.i.bf16 %v1914_v29, %v1915_v50  ;;  %v1928_v29 = vsel %vm770_vm0, %v1896_v55, %v15492_v63  ;;  %v15493_v50 = vrot.slane %v11951_v46, 7 }
 0x261   :  { %10239 = vrot.lane.b32.xlu1 %v10238_v44, %s10907_s13  ;;  %v1894_v44 = vrot.slane %v11914_v47, 1  ;;  %v1960_v55 = vsel %vm11271_vm5, %v1928_v29, 0.0  ;;  %v15497_v29 = vrot.slane %v11993_v13, 7  ;;  %vm4610_vm5 = vcmask 785408  }
 0x262   :  { %v12184_v18 = vsel %vm577_vm2, %v15493_v50, %v1771_v42  ;;  %v15494_v19 = vmov %v15493_v50  ;;  %v12218_v63 = vpack.i.bf16 %v1960_v55, %v1897_v53  ;;  %v15498_v50 = vrot.slane %v11991_v38, 7 }
 0x263   :  { %v12199_v54 = vsel %vm770_vm0, %v1894_v44, %v1895_v57  ;;  %v12205_v46 = vsel %vm770_vm0, %v15408_v40, %v1894_v44  ;;  %v1887_v57 = vrot.slane %v12030_v41, 1  ;;  %v15500_v53 = vrot.slane %v11989_v14, 7 }
 0x264   :  { %10224 = vrot.lane.b32.xlu0 %v10223_v22, %s10908_s14  ;;  %v15495_v22 = vrot.slane %v11946_v12, 7  ;;  %v1908_v12 = vsel %vm770_vm0, %v1884_v62, %v15409_v56  ;;  %v15501_v44 = vrot.slane %v12007_v23, 7  ;;  %v15502_v40 = vrot.slane %v12005_v21, 7 }
 0x265   :  { %10254 = vrot.lane.b32.xlu1 %v10253_v48, %s10908_s14  ;;  %v1909_v48 = vsel %vm770_vm0, %v1883_v26, %v1884_v62  ;;  %v12243_v62 = vsel %vm2869_vm11, %v89_v9, 0  ;;  %v15506_v9 = vrot.slane %v11995_v2, 7  ;;  %v15537_v56 = vrot.slane %v12041_v10, 7 }
 0x266   :  { %v12192_v20 = vsel %vm577_vm2, %v15495_v22, %v15494_v19  ;;  %v15496_v42 = vmov %v15495_v22  ;;  %v12232_v22 = vsel %vm577_vm2, %v15498_v50, %v15497_v29  ;;  %v12251_v29 = vsel %vm577_vm2, %v15502_v40, %v15501_v44 }
 0x267   :  { %v12213_v19 = vsel %vm577_vm2, %v15410_v6, %v15496_v42  ;;  %v15499_v42 = vmov %v15498_v50  ;;  %v15503_v38 = vmov %v15502_v40  ;;  %v15504_v50 = vrot.slane %v11997_v59, 7 }
 0x268   :  { %v12240_v55 = vsel %vm577_vm2, %v15500_v53, %v15499_v42  ;;  %10229 = vrot.lane.b32.xlu0 %v10228_v25, %s10907_s13  ;;  %v1888_v40 = vrot.slane %v12032_v3, 1  ;;  %v15507_v21 = vmov %v15506_v9  ;;  %v15508_v44 = vrot.slane %v11993_v13, 7 }
 0x269   :  { %v12259_v42 = vsel %vm577_vm2, %v15504_v50, %v15503_v38  ;;  %v15505_v25 = vmov %v15504_v50  ;;  %10259 = vrot.lane.b32.xlu1 %v10258_v52, %s10907_s13  ;;  %v15509_v59 = vrot.slane %v11989_v14, 7  ;;  %v15510_v50 = vrot.slane %v11970_v31, 7 }
 0x26a   :  { %v12267_v53 = vsel %vm577_vm2, %v15506_v9, %v15505_v25  ;;  %v12277_v38 = vsel %vm577_vm2, %v15508_v44, %v15507_v21  ;;  %v15512_v13 = vrot.slane %v12015_v27, 7  ;;  %v15513_v9 = vrot.slane %v12013_v30, 7 }
 0x26b   :  { %v12285_v25 = vsel %vm577_vm2, %v15510_v50, %v15509_v59  ;;  %v15511_v52 = vmov %v15510_v50  ;;  %v15515_v44 = vrot.slane %v12011_v60, 7  ;;  %v15520_v60 = vrot.slane %v12023_v16, 7 }
 0x26c   :  { %v12293_v2 = vsel %vm577_vm2, %v1772_v39, %v15511_v52  ;;  %v12301_v14 = vsel %vm577_vm2, %v15513_v9, %v15512_v13  ;;  %v15514_v21 = vmov %v15513_v9  ;;  %v15517_v39 = vrot.slane %v12009_v34, 7  ;;  %10244 = vrot.lane.b32.xlu0 %v10243_v8, %s10908_s14 }
 0x26d   :  { %v12309_v31 = vsel %vm577_vm2, %v15515_v44, %v15514_v21  ;;  %v15516_v37 = vmov %v15515_v44  ;;  %v15519_v52 = vrot.slane %v12007_v23, 7  ;;  %v10248_v13 = vpack.i.bf16 %v12019_v45, %v12017_v51 }
 0x26e   :  { %v12317_v59 = vsel %vm577_vm2, %v15517_v39, %v15516_v37  ;;  %v15518_v50 = vmov %v15517_v39  ;;  %v10268_v9 = vpack.i.bf16 %v1908_v12, %v1909_v48  ;;  %v15521_v21 = vrot.slane %v12021_v28, 7 }
 0x26f   :  { %v12325_v30 = vsel %vm577_vm2, %v15519_v52, %v15518_v50  ;;  %v15523_v23 = vrot.slane %v12019_v45, 7  ;;  %v10278_v48 = vpack.i.bf16 %v12032_v3, %v12030_v41  ;;  %v1889_v12 = vrot.slane %v12034_v58, 1 }
 0x270   :  { %v12335_v44 = vsel %vm577_vm2, %v15521_v21, %v15520_v60  ;;  %v15522_v34 = vmov %v15521_v21  ;;  %v15525_v50 = vrot.slane %v12017_v51, 7  ;;  %v15527_v60 = vrot.slane %v12015_v27, 7  ;;  %10269 = vrot.lane.b32.xlu1 %v10268_v9, %s10908_s14  ;;  %10249 = vrot.lane.b32.xlu0 %v10248_v13, %s10907_s13 }
 0x271   :  { %v12343_v37 = vsel %vm577_vm2, %v15523_v23, %v15522_v34  ;;  %v15524_v39 = vmov %v15523_v23  ;;  %v1910_v21 = vsel %vm770_vm0, %v1882_v61, %v1883_v26  ;;  %v15528_v45 = vrot.slane %v12032_v3, 7 }
 0x272   :  { %v12355_v28 = vsel %vm577_vm2, %v15525_v50, %v15524_v39  ;;  %v15526_v52 = vmov %v15525_v50  ;;  %v15529_v34 = vrot.slane %v12030_v41, 7  ;;  %v15531_v27 = vrot.slane %v12028_v32, 7 }
 0x273   :  { %v12363_v8 = vsel %vm577_vm2, %v15527_v60, %v15526_v52  ;;  %v15533_v26 = vrot.slane %v12025_v17, 7  ;;  %v15534_v60 = vrot.slane %v12017_v51, 1  ;;  %v1905_v41 = vsel %vm770_vm0, %v1887_v57, %v1888_v40 }
 0x274   :  { %v12374_v23 = vsel %vm577_vm2, %v15529_v34, %v15528_v45  ;;  %v15530_v39 = vmov %v15529_v34  ;;  %v15532_v9 = vmov %v15531_v27  ;;  %v15553_v13 = vmov %v15552_v49  ;;  %10279 = vrot.lane.b32.xlu1 %v10278_v48, %s10907_s13 }
 0x275   :  { %v12382_v50 = vsel %vm577_vm2, %v15531_v27, %v15530_v39  ;;  %v12390_v52 = vsel %vm577_vm2, %v15533_v26, %v15532_v9  ;;  %v1911_v45 = vsel %vm770_vm0, %v15534_v60, %v1882_v61  ;;  %v15535_v34 = vmov %v15533_v26 }
 0x276   :  { %v15536_v39 = vrot.slane %v12023_v16, 7  ;;  %v15538_v9 = vrot.slane %v12039_v11, 7  ;;  %v15540_v26 = vrot.slane %v12037_v33, 7  ;;  %v15555_v48 = vrot.slane %v12025_v17, 1 }
 0x278   :  { %v12404_v27 = vsel %vm577_vm2, %v15536_v39, %v15535_v34  ;;  %v12412_v51 = vsel %vm577_vm2, %v15538_v9, %v15537_v56  ;;  %v15539_v61 = vmov %v15538_v9  ;;  %v15541_v16 = vmov %v15540_v26 }
 0x279   :  { %v12420_v60 = vsel %vm577_vm2, %v15540_v26, %v15539_v61  ;;  %v15542_v34 = vrot.slane %v12034_v58, 7  ;;  %v15544_v56 = vrot.slane %v12032_v3, 7  ;;  %v15546_v61 = vrot.slane %v12046_v0, 7 }
 0x27a   :  { %v15549_v3 = vrot.slane %v11914_v47, 7 }
 0x27b   :  { %v12428_v39 = vsel %vm577_vm2, %v15542_v34, %v15541_v16  ;;  %v15543_v6 = vmov %v15542_v34  ;;  %v12444_v26 = vsel %vm577_vm2, %v15546_v61, %v15545_v43  ;;  %v1904_v16 = vsel %vm770_vm0, %v1888_v40, %v1889_v12 }
 0x27c   :  { %v12436_v9 = vsel %vm577_vm2, %v15544_v56, %v15543_v6  ;;  %15547 = vst [vmem:[#allocation16_spill] sm:$0xff] %v12444_v26  ;;  %v15548_v34 = vmov %v15546_v61  ;;  %v15551_v56 = vmov %v15549_v3  ;;  %v15554_v40 = vrot.slane %v12041_v10, 7 }
 0x27d   :  { %v12455_v6 = vsel %vm577_vm2, %v15549_v3, %v15548_v34  ;;  %v12463_v43 = vsel %vm577_vm2, %v15552_v49, %v15551_v56  ;;  %v10263_v34 = vpack.i.bf16 %v1910_v21, %v1911_v45  ;;  %v10288_v3 = vpack.i.bf16 %v1904_v16, %v1905_v41 }
 0x27e   :  { %15550 = vst [vmem:[#allocation17_spill] sm:$0xff] %v12455_v6  ;;  %v12471_v61 = vsel %vm577_vm2, %v15554_v40, %v15553_v13  ;;  %v1886_v6 = vrot.slane %v12028_v32, 1  ;;  %v1891_v26 = vrot.slane %v12039_v11, 1  ;;  %v1892_v49 = vrot.slane %v12041_v10, 1 }
 0x27f   :  { %10264 = vrot.lane.b32.xlu0 %v10263_v34, %s10908_s14  ;;  %10289 = vrot.lane.b32.xlu1 %v10288_v3, %s10908_s14  ;;  %v10273_v56 = vpack.i.bf16 %v12028_v32, %v12025_v17  ;;  %v10298_v45 = vpack.i.bf16 %v12041_v10, %v12039_v11  ;;  %v15556_v41 = vrot.slane %v12043_v36, 1  ;;  %v1890_v40 = vrot.slane %v12037_v33, 1 }
 0x280   :  { %v1906_v13 = vsel %vm770_vm0, %v1886_v6, %v1887_v57  ;;  %v1907_v21 = vsel %vm770_vm0, %v15555_v48, %v1886_v6  ;;  %v1901_v32 = vsel %vm770_vm0, %v1891_v26, %v1892_v49  ;;  %v10293_v11 = vpack.i.bf16 %v12037_v33, %v12034_v58 }
 0x281   :  { %v1900_v16 = vsel %vm770_vm0, %v1892_v49, %v15556_v41  ;;  %v10283_v57 = vpack.i.bf16 %v1906_v13, %v1907_v21  ;;  %v1902_v10 = vsel %vm770_vm0, %v1890_v40, %v1891_v26  ;;  %v1903_v6 = vsel %vm770_vm0, %v1889_v12, %v1890_v40 }
 0x282   :  { %v10308_v17 = vpack.i.bf16 %v1900_v16, %v1901_v32  ;;  %v15557_v34 = vpack.i.bf16 %v12053_v35, %v12046_v0  ;;  %v10303_v3 = vpack.i.bf16 %v1902_v10, %v1903_v6  ;;  %v10313_v58 = vpack.i.bf16 %v11914_v47, %v12043_v36 }
 0x283   :  { %10274 = vrot.lane.b32.xlu0 %v10273_v56, %s10907_s13  ;;  %10299 = vrot.lane.b32.xlu1 %v10298_v45, %s10907_s13  ;;  %v15558_v33 = vpack.i.bf16 %v12199_v54, %v12205_v46 }
 0x287   :  { %10284 = vrot.lane.b32.xlu0 %v10283_v57, %s10908_s14  ;;  %10309 = vrot.lane.b32.xlu1 %v10308_v17, %s10908_s14  ;;  %v1833_v57 = vsel %vm11214_vm4, %v12213_v19, 0.0  ;;  %vm4549_vm4 = vcmask 523264  }
 0x28b   :  { %10294 = vrot.lane.b32.xlu0 %v10293_v11, %s10907_s13  ;;  %10319 = vrot.lane.b32.xlu1 %v15557_v34, %s10907_s13 }
 0x28f   :  { %10304 = vrot.lane.b32.xlu0 %v10303_v3, %s10908_s14  ;;  %10329 = vrot.lane.b32.xlu1 %v12218_v63, %s10908_s14 }
 0x293   :  { %10314 = vrot.lane.b32.xlu0 %v10313_v58, %s10907_s13 }
 0x297   :  { %10324 = vrot.lane.b32.xlu0 %v15558_v33, %s10908_s14 }
 0x2af   :  { %v10180_v12 = vpop.permute.xlu1 %10179 }
 0x2b0   :  { %v10182_v26 = vunpack.i.h.bf16 %v10180_v12  ;;  %v10181_v0 = vunpack.i.l.bf16 %v10180_v12 }
 0x2b2   :  { %v2219_v63 = vsel %vm1456_vm10, %v12184_v18, %v10181_v0  ;;  %v2220_v47 = vsel %vm1456_vm10, %v12169_v15, %v10182_v26  ;;  %v10825_v0 = vld [vmem:[%s15399_s0 + $0x8] sm:$0xff] }
 0x2b5   :  { %v10175_v36 = vpop.permute.xlu0 %10174 }
 0x2b6   :  { %v10177_v21 = vunpack.i.h.bf16 %v10175_v36  ;;  %v10176_v45 = vunpack.i.l.bf16 %v10175_v36 }
 0x2b8   :  { %v2217_v40 = vsel %vm1456_vm10, %v1833_v57, %v10176_v45  ;;  %v2218_v11 = vsel %vm1456_vm10, %v12192_v20, %v10177_v21  ;;  %v10824_v20 = vld [vmem:[%s15399_s0] sm:$0xff] }
 0x2be   :  { %v10190_v35 = vpop.permute.xlu1 %10189 }
 0x2bf   :  { %v10192_v49 = vunpack.i.h.bf16 %v10190_v35  ;;  %v10191_v56 = vunpack.i.l.bf16 %v10190_v35  ;;  %v2805_v35 = vpack.c.bf16 %v10825_v0, %v10824_v20 }
 0x2c1   :  { %v2252_v13 = vsel %vm2249_vm12, %v2219_v63, %v10191_v56  ;;  %v2253_v48 = vsel %vm2249_vm12, %v2220_v47, %v10192_v49 }
 0x2c2   :  { %v2283_v54 = vpack.c.bf16 %v2253_v48, %v2252_v13 }
 0x2c3   :  { %v10200_v46 = vpop.permute.xlu1 %10199 }
 0x2c4   :  { %v10202_v41 = vunpack.i.h.bf16 %v10200_v46  ;;  %v10201_v16 = vunpack.i.l.bf16 %v10200_v46 }
 0x2c6   :  { %v10185_v32 = vpop.permute.xlu0 %10184  ;;  %v2224_v58 = vsel %vm1456_vm10, %v12232_v22, %v10202_v41  ;;  %v2223_v5 = vsel %vm1456_vm10, %v12240_v55, %v10201_v16 }
 0x2c7   :  { %v10187_v18 = vunpack.i.h.bf16 %v10185_v32  ;;  %v10186_v17 = vunpack.i.l.bf16 %v10185_v32  ;;  %v10215_v15 = vpop.permute.xlu1 %10214 }
 0x2c8   :  { %v10217_v10 = vunpack.i.h.bf16 %v10215_v15  ;;  %v10216_v6 = vunpack.i.l.bf16 %v10215_v15 }
 0x2c9   :  { %v2250_v34 = vsel %vm2249_vm12, %v2217_v40, %v10186_v17  ;;  %v2251_v3 = vsel %vm2249_vm12, %v2218_v11, %v10187_v18 }
 0x2ca   :  { %v2282_v19 = vpack.c.bf16 %v2251_v3, %v2250_v34  ;;  %v10195_v33 = vpop.permute.xlu0 %10194  ;;  %v2256_v12 = vsel %vm2249_vm12, %v2223_v5, %v10216_v6  ;;  %v2257_v26 = vsel %vm2249_vm12, %v2224_v58, %v10217_v10  ;;  %v15559_v34 = vpack.c.bf16 %v10997_v7, %v10988_v4 }
 0x2cb   :  { %v2285_v49 = vpack.c.bf16 %v2257_v26, %v2256_v12  ;;  %v10220_v22 = vpop.permute.xlu1 %10219  ;;  %v10197_v56 = vunpack.i.h.bf16 %v10195_v33  ;;  %v10196_v63 = vunpack.i.l.bf16 %v10195_v33  ;;  %v10828_v12 = vld [vmem:[%s15399_s0 + $0x30] sm:$0xff]  ;;  %v10829_v26 = vld [vmem:[%s15399_s0 + $0x38] sm:$0xff] }
 0x2cc   :  { %9584 = vmatprep.mubr.msk.bf16.mxu0 %vm2316_vm13, %v2282_v19  ;;  %v10222_v55 = vunpack.i.h.bf16 %v10220_v22  ;;  %v10221_v47 = vunpack.i.l.bf16 %v10220_v22  ;;  %v2808_v20 = vpack.c.bf16 %v10829_v26, %v10828_v12 }
 0x2cd   :  { %9585 = vmatmul.mubr.msk.bf16.vlgmr.msra.gmra.mrb[32].mxu0 %vm2316_vm13, %v2283_v54  ;;  %v2221_v21 = vsel %vm1456_vm10, %v12293_v2, %v10196_v63  ;;  %v2222_v45 = vsel %vm1456_vm10, %v12285_v25, %v10197_v56  ;;  %v10826_v25 = vld [vmem:[%s15399_s0 + $0x20] sm:$0xff] }
 0x2ce   :  { %9617 = vmatpush3.bf16.msra.mxu0 %v12243_v62  ;;  %v10205_v36 = vpop.permute.xlu0 %10204  ;;  %9618 = vmatprep.mubr.msk.bf16.mxu0 %vm1155_vm6, %v2805_v35  ;;  %v2228_v54 = vsel %vm1456_vm10, %v12251_v29, %v10222_v55  ;;  %v2227_v62 = vsel %vm1456_vm10, %v12259_v42, %v10221_v47  ;;  %v10827_v29 = vld [vmem:[%s15399_s0 + $0x28] sm:$0xff] }
 0x2cf   :  { %v10207_v13 = vunpack.i.h.bf16 %v10205_v36  ;;  %v10206_v48 = vunpack.i.l.bf16 %v10205_v36  ;;  %v10235_v46 = vpop.permute.xlu1 %10234  ;;  %v2807_v40 = vpack.c.bf16 %v10827_v29, %v10826_v25 }
 0x2d0   :  { %v10237_v41 = vunpack.i.h.bf16 %v10235_v46  ;;  %v10236_v16 = vunpack.i.l.bf16 %v10235_v46 }
 0x2d1   :  { %v2254_v32 = vsel %vm2249_vm12, %v2221_v21, %v10206_v48  ;;  %v2255_v57 = vsel %vm2249_vm12, %v2222_v45, %v10207_v13  ;;  %v10831_v48 = vld [vmem:[%s15399_s0 + $0x48] sm:$0xff] }
 0x2d2   :  { %v10210_v18 = vpop.permute.xlu0 %10209  ;;  %v2284_v17 = vpack.c.bf16 %v2255_v57, %v2254_v32  ;;  %v2260_v15 = vsel %vm2249_vm12, %v2227_v62, %v10236_v16  ;;  %v2261_v2 = vsel %vm2249_vm12, %v2228_v54, %v10237_v41  ;;  %v10832_v57 = vld [vmem:[%s15399_s0 + $0x50] sm:$0xff] }
 0x2d3   :  { %v2287_v42 = vpack.c.bf16 %v2261_v2, %v2260_v15  ;;  %v10240_v11 = vpop.permute.xlu1 %10239  ;;  %v10212_v10 = vunpack.i.h.bf16 %v10210_v18  ;;  %v10211_v6 = vunpack.i.l.bf16 %v10210_v18  ;;  %v10833_v18 = vld [vmem:[%s15399_s0 + $0x58] sm:$0xff] }
 0x2d4   :  { %9588 = vmatprep.mubr.msk.bf16.mxu1 %vm2316_vm13, %v2284_v17  ;;  %v10242_v3 = vunpack.i.h.bf16 %v10240_v11  ;;  %v10241_v58 = vunpack.i.l.bf16 %v10240_v11  ;;  %v2810_v17 = vpack.c.bf16 %v10833_v18, %v10832_v57 }
 0x2d5   :  { %9589 = vmatmul.mubr.msk.bf16.vlgmr.msra.gmra.mrb[0].mxu1 %vm2316_vm13, %v2285_v49  ;;  %9619 = vmatmul.mubr.msk.bf16.vlgmr.msra.gmra.mrb[36].mxu0 %vm1155_vm6, %v15559_v34  ;;  %v2226_v4 = vsel %vm1456_vm10, %v12267_v53, %v10212_v10  ;;  %v2225_v7 = vsel %vm1456_vm10, %v12277_v38, %v10211_v6  ;;  %v10830_v38 = vld [vmem:[%s15399_s0 + $0x40] sm:$0xff] }
 0x2d6   :  { %v10225_v5 = vpop.permute.xlu0 %10224  ;;  %9622 = vmatprep.mubr.msk.bf16.mxu0 %vm1155_vm6, %v2807_v40  ;;  %v2232_v63 = vsel %vm1456_vm10, %v12301_v14, %v10242_v3  ;;  %v2231_v55 = vsel %vm1456_vm10, %v12309_v31, %v10241_v58  ;;  %v2809_v46 = vpack.c.bf16 %v10831_v48, %v10830_v38 }
 0x2d7   :  { %v10227_v19 = vunpack.i.h.bf16 %v10225_v5  ;;  %v10226_v33 = vunpack.i.l.bf16 %v10225_v5  ;;  %v10255_v0 = vpop.permute.xlu1 %10254  ;;  %v10835_v5 = vld [vmem:[%s15399_s0 + $0x68] sm:$0xff] }
 0x2d8   :  { %v10257_v35 = vunpack.i.h.bf16 %v10255_v0  ;;  %v10256_v49 = vunpack.i.l.bf16 %v10255_v0 }
 0x2d9   :  { %v2258_v22 = vsel %vm2249_vm12, %v2225_v7, %v10226_v33  ;;  %v2259_v56 = vsel %vm2249_vm12, %v2226_v4, %v10227_v19  ;;  %v1849_v4 = vsel %vm11415_vm9, %v12363_v8, 0.0 }
 0x2da   :  { %v2286_v47 = vpack.c.bf16 %v2259_v56, %v2258_v22  ;;  %v10230_v36 = vpop.permute.xlu0 %10229  ;;  %v2264_v13 = vsel %vm2249_vm12, %v2231_v55, %v10256_v49  ;;  %v2265_v53 = vsel %vm2249_vm12, %v2232_v63, %v10257_v35  ;;  %v10836_v49 = vld [vmem:[%s15399_s0 + $0x70] sm:$0xff]  ;;  %v10837_v22 = vld [vmem:[%s15399_s0 + $0x78] sm:$0xff] }
 0x2db   :  { %v2289_v21 = vpack.c.bf16 %v2265_v53, %v2264_v13  ;;  %v10260_v14 = vpop.permute.xlu1 %10259  ;;  %v10232_v45 = vunpack.i.h.bf16 %v10230_v36  ;;  %v10231_v41 = vunpack.i.l.bf16 %v10230_v36  ;;  %v2812_v56 = vpack.c.bf16 %v10837_v22, %v10836_v49 }
 0x2dc   :  { %9592 = vmatprep.mubr.msk.bf16.mxu1 %vm2316_vm13, %v2286_v47  ;;  %v10262_v31 = vunpack.i.h.bf16 %v10260_v14  ;;  %v10261_v16 = vunpack.i.l.bf16 %v10260_v14  ;;  %v10838_v14 = vld [vmem:[%s15399_s0 + $0x80] sm:$0xff] }
 0x2dd   :  { %9593 = vmatmul.mubr.msk.bf16.gmra.mrb[4].mxu1 %vm2316_vm13, %v2287_v42  ;;  %9623 = vmatmul.mubr.msk.bf16.gmra.mrb[40].mxu0 %vm1155_vm6, %v2808_v20  ;;  %v2230_v2 = vsel %vm1456_vm10, %v12317_v59, %v10232_v45  ;;  %v2229_v25 = vsel %vm1456_vm10, %v12325_v30, %v10231_v41  ;;  %v10834_v30 = vld [vmem:[%s15399_s0 + $0x60] sm:$0xff]  ;;  %v10839_v45 = vld [vmem:[%s15399_s0 + $0x88] sm:$0xff] }
 0x2de   :  { %v10245_v54 = vpop.permute.xlu0 %10244  ;;  %9626 = vmatprep.mubr.msk.bf16.mxu0 %vm1155_vm6, %v2809_v46  ;;  %v2236_v10 = vsel %vm1456_vm10, %v12335_v44, %v10262_v31  ;;  %v2235_v6 = vsel %vm1456_vm10, %v12343_v37, %v10261_v16  ;;  %v2811_v19 = vpack.c.bf16 %v10835_v5, %v10834_v30  ;;  %v2813_v41 = vpack.c.bf16 %v10839_v45, %v10838_v14  ;;  %v10843_v5 = vld [vmem:[%s15399_s0 + $0xa8] sm:$0xff] }
 0x2df   :  { %v10247_v62 = vunpack.i.h.bf16 %v10245_v54  ;;  %v10246_v32 = vunpack.i.l.bf16 %v10245_v54 }
 0x2e1   :  { %v2262_v42 = vsel %vm2249_vm12, %v2229_v25, %v10246_v32  ;;  %v2263_v11 = vsel %vm2249_vm12, %v2230_v2, %v10247_v62 }
 0x2e2   :  { %v10270_v15 = vpop.permute.xlu1 %10269  ;;  %v2288_v34 = vpack.c.bf16 %v2263_v11, %v2262_v42  ;;  %v10250_v3 = vpop.permute.xlu0 %10249 }
 0x2e3   :  { %v10272_v29 = vunpack.i.h.bf16 %v10270_v15  ;;  %v10271_v40 = vunpack.i.l.bf16 %v10270_v15  ;;  %v10252_v12 = vunpack.i.h.bf16 %v10250_v3  ;;  %v10251_v26 = vunpack.i.l.bf16 %v10250_v3  ;;  %v10841_v15 = vld [vmem:[%s15399_s0 + $0x98] sm:$0xff] }
 0x2e4   :  { %9596 = vmatprep.mubr.msk.bf16.mxu1 %vm2316_vm13, %v2288_v34 }
 0x2e5   :  { %v2268_v58 = vsel %vm2249_vm12, %v2235_v6, %v10271_v40  ;;  %v2269_v59 = vsel %vm2249_vm12, %v2236_v10, %v10272_v29  ;;  %9597 = vmatmul.mubr.msk.bf16.gmra.mrb[8].mxu1 %vm2316_vm13, %v2289_v21  ;;  %9627 = vmatmul.mubr.msk.bf16.gmra.mrb[44].mxu0 %vm1155_vm6, %v2810_v17  ;;  %v2234_v55 = vsel %vm1456_vm10, %v12355_v28, %v10252_v12  ;;  %v10840_v17 = vld [vmem:[%s15399_s0 + $0x90] sm:$0xff] }
 0x2e6   :  { %v2291_v33 = vpack.c.bf16 %v2269_v59, %v2268_v58  ;;  %v10280_v44 = vpop.permute.xlu1 %10279  ;;  %9630 = vmatprep.mubr.msk.bf16.mxu0 %vm1155_vm6, %v2811_v19  ;;  %v2233_v47 = vsel %vm1456_vm10, %v1849_v4, %v10251_v26  ;;  %v2814_v2 = vpack.c.bf16 %v10841_v15, %v10840_v17  ;;  %v10844_v4 = vld [vmem:[%s15399_s0 + $0xb0] sm:$0xff] }
 0x2e7   :  { %v10282_v37 = vunpack.i.h.bf16 %v10280_v44  ;;  %v10281_v20 = vunpack.i.l.bf16 %v10280_v44 }
 0x2e9   :  { %v2240_v53 = vsel %vm1456_vm10, %v12374_v23, %v10282_v37  ;;  %v2239_v38 = vsel %vm1456_vm10, %v12382_v50, %v10281_v20 }
 0x2ed   :  { %9631 = vmatmul.mubr.msk.bf16.gmra.mrb[48].mxu0 %vm1155_vm6, %v2812_v56 }
 0x2ee   :  { %9634 = vmatprep.mubr.msk.bf16.mxu0 %vm1155_vm6, %v2813_v41 }
 0x2f1   :  { %v10265_v0 = vpop.permute.xlu0 %10264  ;;  %v10290_v63 = vpop.permute.xlu1 %10289 }
 0x2f2   :  { %v10267_v7 = vunpack.i.h.bf16 %v10265_v0  ;;  %v10266_v35 = vunpack.i.l.bf16 %v10265_v0  ;;  %v10292_v36 = vunpack.i.h.bf16 %v10290_v63  ;;  %v10291_v24 = vunpack.i.l.bf16 %v10290_v63 }
 0x2f4   :  { %v2266_v8 = vsel %vm2249_vm12, %v2233_v47, %v10266_v35  ;;  %v2267_v13 = vsel %vm2249_vm12, %v2234_v55, %v10267_v7  ;;  %v2272_v21 = vsel %vm2249_vm12, %v2239_v38, %v10291_v24  ;;  %v2273_v28 = vsel %vm2249_vm12, %v2240_v53, %v10292_v36  ;;  %v10845_v7 = vld [vmem:[%s15399_s0 + $0xb8] sm:$0xff]  ;;  %v15560_v24 = vld [vmem:[#allocation16_spill] sm:$0xff] }
 0x2f5   :  { %v2290_v48 = vpack.c.bf16 %v2267_v13, %v2266_v8  ;;  %v10275_v46 = vpop.permute.xlu0 %10274  ;;  %v2293_v31 = vpack.c.bf16 %v2273_v28, %v2272_v21  ;;  %v10300_v23 = vpop.permute.xlu1 %10299  ;;  %9635 = vmatmul.mubr.msk.bf16.gmra.mrb[52].mxu0 %vm1155_vm6, %v2814_v2  ;;  %v2816_v35 = vpack.c.bf16 %v10845_v7, %v10844_v4  ;;  %v15561_v13 = vld [vmem:[#allocation17_spill] sm:$0xff]  ;;  %v10847_v21 = vld [vmem:[%s15399_s0 + $0xc8] sm:$0xff] }
 0x2f6   :  { %v10277_v16 = vunpack.i.h.bf16 %v10275_v46  ;;  %v10276_v54 = vunpack.i.l.bf16 %v10275_v46  ;;  %v10302_v50 = vunpack.i.h.bf16 %v10300_v23  ;;  %v10301_v62 = vunpack.i.l.bf16 %v10300_v23 }
 0x2f7   :  { %9600 = vmatprep.mubr.msk.bf16.mxu1 %vm2316_vm13, %v2290_v48 }
 0x2f8   :  { %9601 = vmatmul.mubr.msk.bf16.gmra.mrb[12].mxu1 %vm2316_vm13, %v2291_v33  ;;  %v2238_v29 = vsel %vm1456_vm10, %v12390_v52, %v10277_v16  ;;  %v2237_v40 = vsel %vm1456_vm10, %v12404_v27, %v10276_v54  ;;  %v2244_v34 = vsel %vm1456_vm10, %v12412_v51, %v10302_v50  ;;  %v2243_v3 = vsel %vm1456_vm10, %v12420_v60, %v10301_v62  ;;  %v10842_v27 = vld [vmem:[%s15399_s0 + $0xa0] sm:$0xff] }
 0x2f9   :  { %v10285_v32 = vpop.permute.xlu0 %10284  ;;  %v10310_v25 = vpop.permute.xlu1 %10309  ;;  %v2815_v19 = vpack.c.bf16 %v10843_v5, %v10842_v27 }
 0x2fa   :  { %v10287_v57 = vunpack.i.h.bf16 %v10285_v32  ;;  %v10286_v18 = vunpack.i.l.bf16 %v10285_v32  ;;  %v10312_v42 = vunpack.i.h.bf16 %v10310_v25  ;;  %v10311_v11 = vunpack.i.l.bf16 %v10310_v25  ;;  %v10852_v25 = vld [vmem:[%s15399_s0 + $0xf8] sm:$0xff] }
 0x2fb   :  { %9638 = vmatprep.mubr.msk.bf16.mxu0 %vm1155_vm6, %v2815_v19 }
 0x2fc   :  { %v2270_v10 = vsel %vm2249_vm12, %v2237_v40, %v10286_v18  ;;  %v2271_v6 = vsel %vm2249_vm12, %v2238_v29, %v10287_v57  ;;  %v2276_v30 = vsel %vm2249_vm12, %v2243_v3, %v10311_v11  ;;  %v2277_v52 = vsel %vm2249_vm12, %v2244_v34, %v10312_v42  ;;  %v10848_v57 = vld [vmem:[%s15399_s0 + $0xd0] sm:$0xff]  ;;  %v10849_v18 = vld [vmem:[%s15399_s0 + $0xd8] sm:$0xff] }
 0x2fd   :  { %v2292_v58 = vpack.c.bf16 %v2271_v6, %v2270_v10  ;;  %v10295_v59 = vpop.permute.xlu0 %10294  ;;  %v2295_v33 = vpack.c.bf16 %v2277_v52, %v2276_v30  ;;  %v10320_v51 = vpop.permute.xlu1 %10319  ;;  %9639 = vmatmul.mubr.msk.bf16.gmra.mrb[56].mxu0 %vm1155_vm6, %v2816_v35  ;;  %v2818_v17 = vpack.c.bf16 %v10849_v18, %v10848_v57  ;;  %v10853_v29 = vld [vmem:[%s15399_s0 + $0xf0] sm:$0xff] }
 0x2fe   :  { %v10297_v44 = vunpack.i.h.bf16 %v10295_v59  ;;  %v10296_v12 = vunpack.i.l.bf16 %v10295_v59  ;;  %v10322_v60 = vunpack.i.h.bf16 %v10320_v51  ;;  %v10321_v26 = vunpack.i.l.bf16 %v10320_v51 }
 0x2ff   :  { %9604 = vmatprep.mubr.msk.bf16.mxu1 %vm2316_vm13, %v2292_v58  ;;  %v2820_v40 = vpack.c.bf16 %v10852_v25, %v10853_v29 }
 0x300   :  { %9605 = vmatmul.mubr.msk.bf16.gmra.mrb[16].mxu1 %vm2316_vm13, %v2293_v31  ;;  %v2242_v22 = vsel %vm1456_vm10, %v12428_v39, %v10297_v44  ;;  %v2241_v56 = vsel %vm1456_vm10, %v12436_v9, %v10296_v12  ;;  %v2248_v8 = vsel %vm1456_vm10, %v15560_v24, %v10322_v60  ;;  %v2247_v53 = vsel %vm1456_vm10, %v15561_v13, %v10321_v26  ;;  %v10846_v9 = vld [vmem:[%s15399_s0 + $0xc0] sm:$0xff] }
 0x301   :  { %v10305_v37 = vpop.permute.xlu0 %10304  ;;  %v10330_v49 = vpop.permute.xlu1 %10329  ;;  %v2817_v28 = vpack.c.bf16 %v10847_v21, %v10846_v9 }
 0x302   :  { %v10307_v20 = vunpack.i.h.bf16 %v10305_v37  ;;  %v10306_v0 = vunpack.i.l.bf16 %v10305_v37  ;;  %v10332_v63 = vunpack.i.h.bf16 %v10330_v49  ;;  %v10331_v55 = vunpack.i.l.bf16 %v10330_v49 }
 0x303   :  { %9642 = vmatprep.mubr.msk.bf16.mxu0 %vm1155_vm6, %v2817_v28 }
 0x304   :  { %v2274_v47 = vsel %vm2249_vm12, %v2241_v56, %v10306_v0  ;;  %v2275_v36 = vsel %vm2249_vm12, %v2242_v22, %v10307_v20  ;;  %v2281_v46 = vsel %vm2249_vm12, %v2248_v8, %v10332_v63  ;;  %v2280_v39 = vsel %vm2249_vm12, %v2247_v53, %v10331_v55 }
 0x305   :  { %v2294_v38 = vpack.c.bf16 %v2275_v36, %v2274_v47  ;;  %v10315_v48 = vpop.permute.xlu0 %10314  ;;  %v2297_v14 = vpack.c.bf16 %v2281_v46, %v2280_v39  ;;  %9643 = vmatmul.mubr.msk.bf16.gmra.mrb[60].mxu0 %vm1155_vm6, %v2818_v17 }
 0x306   :  { %v10317_v45 = vunpack.i.h.bf16 %v10315_v48  ;;  %v10316_v41 = vunpack.i.l.bf16 %v10315_v48 }
 0x307   :  { %9608 = vmatprep.mubr.msk.bf16.mxu1 %vm2316_vm13, %v2294_v38 }
 0x308   :  { %9609 = vmatmul.mubr.msk.bf16.gmra.mrb[20].mxu1 %vm2316_vm13, %v2295_v33  ;;  %v2246_v54 = vsel %vm1456_vm10, %v12463_v43, %v10317_v45  ;;  %v2245_v50 = vsel %vm1456_vm10, %v12471_v61, %v10316_v41  ;;  %v10850_v43 = vld [vmem:[%s15399_s0 + $0xe0] sm:$0xff]  ;;  %v10851_v61 = vld [vmem:[%s15399_s0 + $0xe8] sm:$0xff] }
 0x309   :  { %v10325_v31 = vpop.permute.xlu0 %10324  ;;  %v2819_v2 = vpack.c.bf16 %v10851_v61, %v10850_v43 }
 0x30a   :  { %v10327_v23 = vunpack.i.h.bf16 %v10325_v31  ;;  %v10326_v16 = vunpack.i.l.bf16 %v10325_v31 }
 0x30b   :  { %9646 = vmatprep.mubr.msk.bf16.mxu0 %vm1155_vm6, %v2819_v2 }
 0x30c   :  { %v2278_v62 = vsel %vm2249_vm12, %v2245_v50, %v10326_v16  ;;  %v2279_v32 = vsel %vm2249_vm12, %v2246_v54, %v10327_v23 }
 0x30d   :  { %v2296_v15 = vpack.c.bf16 %v2279_v32, %v2278_v62  ;;  %9647 = vmatmul.mubr.msk.bf16.gmra.mrb[64].mxu0 %vm1155_vm6, %v2820_v40 }
 0x30f   :  { %9612 = vmatprep.mubr.msk.bf16.mxu1 %vm2316_vm13, %v2296_v15 }
 0x310   :  { %9613 = vmatmul.mubr.msk.bf16.gmra.mrb[24].mxu1 %vm2316_vm13, %v2297_v14 }
 0x3a0   :  { %v12747_v42 = vpop.f32.mrb[32].mxu0 }
 0x3a1   :  { %v12749_v11 = vpop.f32.mrb[33].mxu0  ;;  %v2529_v59 = vsel %vm1456_vm10, %v12747_v42, 0.0 }
 0x3a2   :  { %v12751_v10 = vpop.f32.mrb[34].mxu0  ;;  %v2526_v34 = vsel %vm1456_vm10, %v12749_v11, 0.0 }
 0x3a3   :  { %v12753_v6 = vpop.f32.mrb[35].mxu0  ;;  %v2531_v52 = vsel %vm1456_vm10, %v12751_v10, 0.0 }
 0x3a4   :  { %v2527_v3 = vsel %vm1456_vm10, %v12753_v6, 0.0 }
 0x3a5   :  { %v2528_v58 = vadd.f32 %v2527_v3, %v2526_v34 }
 0x3a7   :  { %v2530_v30 = vadd.f32 %v2529_v59, %v2528_v58 }
 0x3a8   :  { %v12763_v27 = vpop.f32.mrb[0].mxu1  ;;  %v12765_v5 = vpop.f32.mrb[36].mxu0 }
 0x3a9   :  { %v12767_v19 = vpop.f32.mrb[1].mxu1  ;;  %v2532_v33 = vadd.f32 %v2531_v52, %v2530_v30  ;;  %v12769_v51 = vpop.f32.mrb[37].mxu0  ;;  %v2537_v22 = vsel %vm1456_vm10, %v12763_v27, 0.0  ;;  %v3037_v56 = vsel %vm1456_vm10, %v12765_v5, 0.0 }
 0x3aa   :  { %v2533_v44 = vsel %vm1456_vm10, %v12767_v19, 0.0  ;;  %v12773_v12 = vpop.f32.mrb[2].mxu1  ;;  %v12775_v60 = vpop.f32.mrb[38].mxu0  ;;  %v3034_v0 = vsel %vm1456_vm10, %v12769_v51, 0.0 }
 0x3ab   :  { %v2534_v26 = vadd.f32 %v2533_v44, %v2532_v33  ;;  %v12777_v37 = vpop.f32.mrb[3].mxu1  ;;  %v12779_v20 = vpop.f32.mrb[39].mxu0  ;;  %v2539_v47 = vsel %vm1456_vm10, %v12773_v12, 0.0  ;;  %v3039_v36 = vsel %vm1456_vm10, %v12775_v60, 0.0 }
 0x3ac   :  { %v2535_v4 = vsel %vm1456_vm10, %v12777_v37, 0.0  ;;  %v3035_v7 = vsel %vm1456_vm10, %v12779_v20, 0.0 }
 0x3ad   :  { %v2536_v35 = vadd.f32 %v2535_v4, %v2534_v26  ;;  %v3036_v49 = vadd.f32 %v3035_v7, %v3034_v0 }
 0x3af   :  { %v2538_v63 = vadd.f32 %v2537_v22, %v2536_v35  ;;  %v3038_v55 = vadd.f32 %v3037_v56, %v3036_v49 }
 0x3b0   :  { %v12795_v24 = vpop.f32.mrb[4].mxu1  ;;  %v12797_v8 = vpop.f32.mrb[40].mxu0 }
 0x3b1   :  { %v12799_v13 = vpop.f32.mrb[5].mxu1  ;;  %v2540_v53 = vadd.f32 %v2539_v47, %v2538_v63  ;;  %v12801_v38 = vpop.f32.mrb[41].mxu0  ;;  %v3040_v48 = vadd.f32 %v3039_v36, %v3038_v55  ;;  %v2545_v50 = vsel %vm1456_vm10, %v12795_v24, 0.0  ;;  %v3045_v62 = vsel %vm1456_vm10, %v12797_v8, 0.0 }
 0x3b2   :  { %v2541_v46 = vsel %vm1456_vm10, %v12799_v13, 0.0  ;;  %v3041_v39 = vsel %vm1456_vm10, %v12801_v38, 0.0  ;;  %v12807_v9 = vpop.f32.mrb[6].mxu1  ;;  %v12809_v21 = vpop.f32.mrb[42].mxu0 }
 0x3b3   :  { %v2542_v28 = vadd.f32 %v2541_v46, %v2540_v53  ;;  %v3042_v14 = vadd.f32 %v3041_v39, %v3040_v48  ;;  %v12811_v45 = vpop.f32.mrb[7].mxu1  ;;  %v12813_v41 = vpop.f32.mrb[43].mxu0  ;;  %v2547_v18 = vsel %vm1456_vm10, %v12807_v9, 0.0  ;;  %v3047_v17 = vsel %vm1456_vm10, %v12809_v21, 0.0 }
 0x3b4   :  { %v2543_v31 = vsel %vm1456_vm10, %v12811_v45, 0.0  ;;  %v3043_v23 = vsel %vm1456_vm10, %v12813_v41, 0.0 }
 0x3b5   :  { %v2544_v16 = vadd.f32 %v2543_v31, %v2542_v28  ;;  %v3044_v54 = vadd.f32 %v3043_v23, %v3042_v14 }
 0x3b7   :  { %v2546_v32 = vadd.f32 %v2545_v50, %v2544_v16  ;;  %v3046_v57 = vadd.f32 %v3045_v62, %v3044_v54 }
 0x3b8   :  { %v12827_v15 = vpop.f32.mrb[8].mxu1  ;;  %v12829_v43 = vpop.f32.mrb[44].mxu0 }
 0x3b9   :  { %v12831_v61 = vpop.f32.mrb[9].mxu1  ;;  %v2548_v2 = vadd.f32 %v2547_v18, %v2546_v32  ;;  %v12833_v25 = vpop.f32.mrb[45].mxu0  ;;  %v3048_v29 = vadd.f32 %v3047_v17, %v3046_v57  ;;  %v2553_v7 = vsel %vm1456_vm10, %v12827_v15, 0.0  ;;  %v3053_v35 = vsel %vm1456_vm10, %v12829_v43, 0.0 }
 0x3ba   :  { %v2549_v40 = vsel %vm1456_vm10, %v12831_v61, 0.0  ;;  %v3049_v34 = vsel %vm1456_vm10, %v12833_v25, 0.0  ;;  %v12839_v3 = vpop.f32.mrb[10].mxu1  ;;  %v12841_v58 = vpop.f32.mrb[46].mxu0 }
 0x3bb   :  { %v2550_v59 = vadd.f32 %v2549_v40, %v2548_v2  ;;  %v3050_v30 = vadd.f32 %v3049_v34, %v3048_v29  ;;  %v12843_v52 = vpop.f32.mrb[11].mxu1  ;;  %v12845_v33 = vpop.f32.mrb[47].mxu0  ;;  %v2555_v56 = vsel %vm1456_vm10, %v12839_v3, 0.0  ;;  %v3055_v63 = vsel %vm1456_vm10, %v12841_v58, 0.0 }
 0x3bc   :  { %v2551_v44 = vsel %vm1456_vm10, %v12843_v52, 0.0  ;;  %v3051_v26 = vsel %vm1456_vm10, %v12845_v33, 0.0 }
 0x3bd   :  { %v2552_v0 = vadd.f32 %v2551_v44, %v2550_v59  ;;  %v3052_v4 = vadd.f32 %v3051_v26, %v3050_v30 }
 0x3bf   :  { %v2554_v49 = vadd.f32 %v2553_v7, %v2552_v0  ;;  %v3054_v22 = vadd.f32 %v3053_v35, %v3052_v4 }
 0x3c0   :  { %v12861_v47 = vpop.f32.mrb[48].mxu0 }
 0x3c1   :  { %15562 = vst [vmem:[#allocation16_spill] sm:$0xff] %v12861_v47  ;;  %v2556_v53 = vadd.f32 %v2555_v56, %v2554_v49  ;;  %v12865_v48 = vpop.f32.mrb[49].mxu0  ;;  %v3056_v46 = vadd.f32 %v3055_v63, %v3054_v22  ;;  %v3061_v2 = vsel %vm1456_vm10, %v12861_v47, 0.0 }
 0x3c2   :  { %v3057_v28 = vsel %vm1456_vm10, %v12865_v48, 0.0  ;;  %v12873_v31 = vpop.f32.mrb[50].mxu0 }
 0x3c3   :  { %15563 = vst [vmem:[#allocation17_spill] sm:$0xff] %v12873_v31  ;;  %v3058_v16 = vadd.f32 %v3057_v28, %v3056_v46  ;;  %v12877_v50 = vpop.f32.mrb[51].mxu0  ;;  %v3063_v59 = vsel %vm1456_vm10, %v12873_v31, 0.0 }
 0x3c4   :  { %15564 = vst [vmem:[#allocation18_spill] sm:$0xff] %v12877_v50  ;;  %v3059_v32 = vsel %vm1456_vm10, %v12877_v50, 0.0 }
 0x3c5   :  { %v3060_v18 = vadd.f32 %v3059_v32, %v3058_v16 }
 0x3c7   :  { %v3062_v40 = vadd.f32 %v3061_v2, %v3060_v18 }
 0x3c8   :  { %v12893_v44 = vpop.f32.mrb[52].mxu0 }
 0x3c9   :  { %15565 = vst [vmem:[#allocation19_spill] sm:$0xff] %v12893_v44  ;;  %v12897_v4 = vpop.f32.mrb[53].mxu0  ;;  %v3064_v7 = vadd.f32 %v3063_v59, %v3062_v40 }
 0x3ca   :  { %15566 = vst [vmem:[#allocation20_spill] sm:$0xff] %v12897_v4  ;;  %v3065_v49 = vsel %vm1456_vm10, %v12897_v4, 0.0  ;;  %v12905_v56 = vpop.f32.mrb[54].mxu0 }
 0x3cb   :  { %v12859_v55 = vpop.f32.mrb[12].mxu1  ;;  %15567 = vst [vmem:[#allocation21_spill] sm:$0xff] %v12905_v56 }
 0x3cc   :  { %v12863_v36 = vpop.f32.mrb[13].mxu1  ;;  %v2561_v17 = vsel %vm1456_vm10, %v12859_v55, 0.0 }
 0x3cd   :  { %v2557_v39 = vsel %vm1456_vm10, %v12863_v36, 0.0  ;;  %v12871_v14 = vpop.f32.mrb[14].mxu1 }
 0x3ce   :  { %v2558_v23 = vadd.f32 %v2557_v39, %v2556_v53  ;;  %v12875_v54 = vpop.f32.mrb[15].mxu1  ;;  %v2563_v34 = vsel %vm1456_vm10, %v12871_v14, 0.0  ;;  %v3066_v53 = vadd.f32 %v3065_v49, %v3064_v7  ;;  %v12909_v39 = vpop.f32.mrb[55].mxu0 }
 0x3cf   :  { %v2559_v62 = vsel %vm1456_vm10, %v12875_v54, 0.0  ;;  %15568 = vst [vmem:[#allocation22_spill] sm:$0xff] %v12909_v39 }
 0x3d0   :  { %v2560_v57 = vadd.f32 %v2559_v62, %v2558_v23  ;;  %v3067_v23 = vsel %vm1456_vm10, %v12909_v39, 0.0 }
 0x3d1   :  { %v3068_v62 = vadd.f32 %v3067_v23, %v3066_v53 }
 0x3d2   :  { %v2562_v29 = vadd.f32 %v2561_v17, %v2560_v57  ;;  %v3069_v57 = vsel %vm1456_vm10, %v12893_v44, 0.0 }
 0x3d3   :  { %v12891_v30 = vpop.f32.mrb[16].mxu1  ;;  %v3070_v17 = vadd.f32 %v3069_v57, %v3068_v62 }
 0x3d4   :  { %v12895_v26 = vpop.f32.mrb[17].mxu1  ;;  %v2564_v0 = vadd.f32 %v2563_v34, %v2562_v29  ;;  %v2569_v32 = vsel %vm1456_vm10, %v12891_v30, 0.0  ;;  %v3071_v29 = vsel %vm1456_vm10, %v12905_v56, 0.0  ;;  %v12925_v34 = vpop.f32.mrb[56].mxu0 }
 0x3d5   :  { %v2565_v35 = vsel %vm1456_vm10, %v12895_v26, 0.0  ;;  %v12903_v22 = vpop.f32.mrb[18].mxu1  ;;  %15569 = vst [vmem:[#allocation23_spill] sm:$0xff] %v12925_v34  ;;  %v12929_v7 = vpop.f32.mrb[57].mxu0  ;;  %v3077_v1 = vsel %vm1456_vm10, %v12925_v34, 0.0 }
 0x3d6   :  { %v2566_v63 = vadd.f32 %v2565_v35, %v2564_v0  ;;  %v12907_v46 = vpop.f32.mrb[19].mxu1  ;;  %v2571_v2 = vsel %vm1456_vm10, %v12903_v22, 0.0  ;;  %15570 = vst [vmem:[#allocation24_spill] sm:$0xff] %v12929_v7  ;;  %v3072_v35 = vadd.f32 %v3071_v29, %v3070_v17 }
 0x3d7   :  { %v2567_v28 = vsel %vm1456_vm10, %v12907_v46, 0.0 }
 0x3d8   :  { %v2568_v16 = vadd.f32 %v2567_v28, %v2566_v63  ;;  %v3073_v63 = vsel %vm1456_vm10, %v12929_v7, 0.0  ;;  %v12937_v28 = vpop.f32.mrb[58].mxu0 }
 0x3d9   :  { %15571 = vst [vmem:[#allocation25_spill] sm:$0xff] %v12937_v28 }
 0x3da   :  { %v2570_v18 = vadd.f32 %v2569_v32, %v2568_v16  ;;  %v3074_v16 = vadd.f32 %v3073_v63, %v3072_v35  ;;  %v12941_v32 = vpop.f32.mrb[59].mxu0  ;;  %v3079_v63 = vsel %vm1456_vm10, %v12937_v28, 0.0 }
 0x3db   :  { %v12923_v40 = vpop.f32.mrb[20].mxu1  ;;  %15572 = vst [vmem:[#allocation26_spill] sm:$0xff] %v12941_v32  ;;  %v12957_v56 = vpop.f32.mrb[60].mxu0 }
 0x3dc   :  { %v12927_v59 = vpop.f32.mrb[21].mxu1  ;;  %v2572_v0 = vadd.f32 %v2571_v2, %v2570_v18  ;;  %v3075_v18 = vsel %vm1456_vm10, %v12941_v32, 0.0  ;;  %v2577_v29 = vsel %vm1456_vm10, %v12923_v40, 0.0  ;;  %15573 = vst [vmem:[#allocation27_spill] sm:$0xff] %v12957_v56 }
 0x3dd   :  { %v2573_v49 = vsel %vm1456_vm10, %v12927_v59, 0.0  ;;  %v12935_v53 = vpop.f32.mrb[22].mxu1  ;;  %v3076_v2 = vadd.f32 %v3075_v18, %v3074_v16 }
 0x3de   :  { %v2574_v23 = vadd.f32 %v2573_v49, %v2572_v0  ;;  %v12939_v62 = vpop.f32.mrb[23].mxu1  ;;  %v2579_v49 = vsel %vm1456_vm10, %v12935_v53, 0.0 }
 0x3df   :  { %v2575_v57 = vsel %vm1456_vm10, %v12939_v62, 0.0  ;;  %v3078_v35 = vadd.f32 %v3077_v1, %v3076_v2 }
 0x3e0   :  { %v2576_v17 = vadd.f32 %v2575_v57, %v2574_v23  ;;  %v12961_v57 = vpop.f32.mrb[61].mxu0 }
 0x3e1   :  { %15574 = vst [vmem:[#allocation28_spill] sm:$0xff] %v12961_v57  ;;  %v3080_v18 = vadd.f32 %v3079_v63, %v3078_v35  ;;  %v3081_v1 = vsel %vm1456_vm10, %v12961_v57, 0.0  ;;  %v3085_v57 = vsel %vm1456_vm10, %v12957_v56, 0.0 }
 0x3e2   :  { %v2578_v0 = vadd.f32 %v2577_v29, %v2576_v17  ;;  %v12969_v29 = vpop.f32.mrb[62].mxu0 }
 0x3e3   :  { %v12955_v7 = vpop.f32.mrb[24].mxu1  ;;  %15575 = vst [vmem:[#allocation29_spill] sm:$0xff] %v12969_v29  ;;  %v3082_v34 = vadd.f32 %v3081_v1, %v3080_v18  ;;  %v12971_v44 = vpop.f32.mrb[63].mxu0  ;;  %v3087_v18 = vsel %vm1456_vm10, %v12969_v29, 0.0 }
 0x3e4   :  { %v12959_v23 = vpop.f32.mrb[25].mxu1  ;;  %v2580_v16 = vadd.f32 %v2579_v49, %v2578_v0  ;;  %15576 = vst [vmem:[#allocation30_spill] sm:$0xff] %v12971_v44  ;;  %v3083_v35 = vsel %vm1456_vm10, %v12971_v44, 0.0  ;;  %v2585_v39 = vsel %vm1456_vm10, %v12955_v7, 0.0 }
 0x3e5   :  { %v2581_v17 = vsel %vm1456_vm10, %v12959_v23, 0.0  ;;  %v12967_v2 = vpop.f32.mrb[26].mxu1  ;;  %v3084_v63 = vadd.f32 %v3083_v35, %v3082_v34 }
 0x3e6   :  { %v2582_v28 = vadd.f32 %v2581_v17, %v2580_v16  ;;  %v2514_v32 = vpop.f32.mrb[27].mxu1  ;;  %v2587_v16 = vsel %vm1456_vm10, %v12967_v2, 0.0  ;;  %v12984_v17 = vpop.f32.mrb[64].mxu0 }
 0x3e7   :  { %v2583_v0 = vsel %vm1456_vm10, %v2514_v32, 0.0  ;;  %v3086_v31 = vadd.f32 %v3085_v57, %v3084_v63  ;;  %v12986_v44 = vpop.f32.mrb[65].mxu0 }
 0x3e8   :  { %v2584_v49 = vadd.f32 %v2583_v0, %v2582_v28  ;;  %15577 = vst [vmem:[#allocation31_spill] sm:$0xff] %v12986_v44  ;;  %v3089_v28 = vsel %vm1456_vm10, %v12986_v44, 0.0  ;;  %v12990_v0 = vpop.f32.mrb[66].mxu0 }
 0x3e9   :  { %v3088_v34 = vadd.f32 %v3087_v18, %v3086_v31  ;;  %v12992_v57 = vpop.f32.mrb[67].mxu0  ;;  %v3095_v31 = vsel %vm1456_vm10, %v12990_v0, 0.0 }
 0x3ea   :  { %v2586_v4 = vadd.f32 %v2585_v39, %v2584_v49  ;;  %15578 = vst [vmem:[#allocation32_spill] sm:$0xff] %v12992_v57  ;;  %v3091_v49 = vsel %vm1456_vm10, %v12992_v57, 0.0 }
 0x3eb   :  { %v3090_v39 = vadd.f32 %v3089_v28, %v3088_v34 }
 0x3ec   :  { %v2588_v1 = vadd.f32 %v2587_v16, %v2586_v4  ;;  %v3093_v4 = vsel %vm1456_vm10, %v12984_v17, 0.0 }
 0x3ed   :  { %v3092_v29 = vadd.f32 %v3091_v49, %v3090_v39 }
 0x3ee   :  { %v2589_v35 = vrot.slane %v2588_v1, 4 }
 0x3ef   :  { %v3094_v56 = vadd.f32 %v3093_v4, %v3092_v29 }
 0x3f0   :  { %v2590_v63 = vadd.f32 %v2589_v35, %v2588_v1 }
 0x3f1   :  { %v3096_v44 = vadd.f32 %v3095_v31, %v3094_v56 }
 0x3f2   :  { %v2591_v16 = vrot.slane %v2590_v63, 2 }
 0x3f4   :  { %v2592_v18 = vadd.f32 %v2591_v16, %v2590_v63 }
 0x3f6   :  { %v2593_v47 = vrot.slane %v2592_v18, 1 }
 0x3f8   :  { %v2594_v50 = vadd.f32 %v2593_v47, %v2592_v18 }
 0x3fa   :  { %v2595_v34 = vmul.f32 0.00390625, %v2594_v50 }
 0x3fc   :  { %v13001_v28 = vsub.f32 %v12749_v11, %v2595_v34  ;;  %v13004_v57 = vsub.f32 %v12753_v6, %v2595_v34  ;;  %v13007_v1 = vsub.f32 %v12747_v42, %v2595_v34  ;;  %v13010_v35 = vsub.f32 %v12751_v10, %v2595_v34 }
 0x3fd   :  { %v13013_v29 = vsub.f32 %v12767_v19, %v2595_v34  ;;  %v13016_v56 = vsub.f32 %v12777_v37, %v2595_v34  ;;  %v13019_v47 = vsub.f32 %v12763_v27, %v2595_v34  ;;  %v13022_v11 = vsub.f32 %v12773_v12, %v2595_v34 }
 0x3fe   :  { %15579 = vst [vmem:[#allocation33_spill] sm:$0xff] %v13007_v1  ;;  %15580 = vst [vmem:[#allocation34_spill] sm:$0xff] %v13010_v35  ;;  %v13025_v6 = vsub.f32 %v12799_v13, %v2595_v34  ;;  %v13028_v42 = vsub.f32 %v12811_v45, %v2595_v34  ;;  %v13031_v10 = vsub.f32 %v12795_v24, %v2595_v34 }
 0x3ff   :  { %15581 = vst [vmem:[#allocation35_spill] sm:$0xff] %v13013_v29  ;;  %15582 = vst [vmem:[#allocation36_spill] sm:$0xff] %v13016_v56  ;;  %v13034_v19 = vsub.f32 %v12807_v9, %v2595_v34  ;;  %v13037_v37 = vsub.f32 %v12831_v61, %v2595_v34  ;;  %v13040_v27 = vsub.f32 %v12843_v52, %v2595_v34 }
 0x400   :  { %15583 = vst [vmem:[#allocation37_spill] sm:$0xff] %v13019_v47  ;;  %15584 = vst [vmem:[#allocation38_spill] sm:$0xff] %v13022_v11  ;;  %v13043_v12 = vsub.f32 %v12827_v15, %v2595_v34  ;;  %v13046_v13 = vsub.f32 %v12839_v3, %v2595_v34  ;;  %v13049_v45 = vsub.f32 %v12863_v36, %v2595_v34 }
 0x401   :  { %15585 = vst [vmem:[#allocation39_spill] sm:$0xff] %v13025_v6  ;;  %15586 = vst [vmem:[#allocation40_spill] sm:$0xff] %v13028_v42  ;;  %v13052_v24 = vsub.f32 %v12875_v54, %v2595_v34  ;;  %v13055_v9 = vsub.f32 %v12859_v55, %v2595_v34  ;;  %v13058_v61 = vsub.f32 %v12871_v14, %v2595_v34 }
 0x402   :  { %15587 = vst [vmem:[#allocation41_spill] sm:$0xff] %v13031_v10  ;;  %15588 = vst [vmem:[#allocation42_spill] sm:$0xff] %v13034_v19  ;;  %v13061_v52 = vsub.f32 %v12895_v26, %v2595_v34  ;;  %v13064_v15 = vsub.f32 %v12907_v46, %v2595_v34  ;;  %v13067_v3 = vsub.f32 %v12891_v30, %v2595_v34 }
 0x403   :  { %15589 = vst [vmem:[#allocation43_spill] sm:$0xff] %v13037_v37  ;;  %15590 = vst [vmem:[#allocation44_spill] sm:$0xff] %v13040_v27  ;;  %v13070_v36 = vsub.f32 %v12903_v22, %v2595_v34  ;;  %v13073_v54 = vsub.f32 %v12927_v59, %v2595_v34  ;;  %v13076_v55 = vsub.f32 %v12939_v62, %v2595_v34  ;;  %v3097_v62 = vrot.slane %v3096_v44, 4 }
 0x404   :  { %15591 = vst [vmem:[#allocation45_spill] sm:$0xff] %v13043_v12  ;;  %15592 = vst [vmem:[#allocation46_spill] sm:$0xff] %v13046_v13  ;;  %v13079_v14 = vsub.f32 %v12923_v40, %v2595_v34  ;;  %v13082_v50 = vsub.f32 %v12935_v53, %v2595_v34  ;;  %v13085_v26 = vsub.f32 %v12959_v23, %v2595_v34 }
 0x405   :  { %15593 = vst [vmem:[#allocation47_spill] sm:$0xff] %v13049_v45  ;;  %v13087_v30 = vsub.f32 %v2514_v32, %v2595_v34  ;;  %v13090_v22 = vsub.f32 %v12955_v7, %v2595_v34  ;;  %v13093_v46 = vsub.f32 %v12967_v2, %v2595_v34  ;;  %v2628_v59 = vmul.f32 %v13001_v28, %v13001_v28 }
 0x406   :  { %v2629_v40 = vmul.f32 %v13004_v57, %v13004_v57  ;;  %v2630_v53 = vmul.f32 %v13007_v1, %v13007_v1  ;;  %v2631_v32 = vmul.f32 %v13010_v35, %v13010_v35  ;;  %v3098_v2 = vadd.f32 %v3097_v62, %v3096_v44 }
 0x407   :  { %v2660_v23 = vsel %vm1456_vm10, %v2628_v59, 0.0  ;;  %v2632_v49 = vmul.f32 %v13013_v29, %v13013_v29  ;;  %v2633_v16 = vmul.f32 %v13016_v56, %v13016_v56  ;;  %v2634_v59 = vmul.f32 %v13019_v47, %v13019_v47 }
 0x408   :  { %v2661_v7 = vsel %vm1456_vm10, %v2629_v40, 0.0  ;;  %v2663_v63 = vsel %vm1456_vm10, %v2630_v53, 0.0  ;;  %v2665_v31 = vsel %vm1456_vm10, %v2631_v32, 0.0  ;;  %v3099_v34 = vrot.slane %v3098_v2, 2 }
 0x409   :  { %v2662_v39 = vadd.f32 %v2661_v7, %v2660_v23  ;;  %v2667_v40 = vsel %vm1456_vm10, %v2632_v49, 0.0  ;;  %v2635_v44 = vmul.f32 %v13022_v11, %v13022_v11  ;;  %v2669_v62 = vsel %vm1456_vm10, %v2633_v16, 0.0 }
 0x40a   :  { %v3100_v7 = vadd.f32 %v3099_v34, %v3098_v2  ;;  %v2671_v32 = vsel %vm1456_vm10, %v2634_v59, 0.0  ;;  %v2640_v16 = vmul.f32 %v13037_v37, %v13037_v37  ;;  %v2641_v2 = vmul.f32 %v13040_v27, %v13040_v27 }
 0x40b   :  { %v2664_v4 = vadd.f32 %v2663_v63, %v2662_v39  ;;  %v2636_v39 = vmul.f32 %v13025_v6, %v13025_v6  ;;  %v2637_v63 = vmul.f32 %v13028_v42, %v13028_v42  ;;  %v2673_v34 = vsel %vm1456_vm10, %v2635_v44, 0.0 }
 0x40c   :  { %v2683_v44 = vsel %vm1456_vm10, %v2640_v16, 0.0 }
 0x40d   :  { %v2666_v18 = vadd.f32 %v2665_v31, %v2664_v4  ;;  %v2638_v4 = vmul.f32 %v13031_v10, %v13031_v10  ;;  %v3101_v31 = vrot.slane %v3100_v7, 1 }
 0x40f   :  { %v2668_v23 = vadd.f32 %v2667_v40, %v2666_v18  ;;  %v2639_v18 = vmul.f32 %v13034_v19, %v13034_v19  ;;  %v3102_v40 = vadd.f32 %v3101_v31, %v3100_v7  ;;  %v2677_v19 = vsel %vm1456_vm10, %v2637_v63, 0.0 }
 0x410   :  { %v2679_v37 = vsel %vm1456_vm10, %v2638_v4, 0.0  ;;  %v2685_v7 = vsel %vm1456_vm10, %v2641_v2, 0.0  ;;  %v15600_v2 = vld [vmem:[#allocation16_spill] sm:$0xff] }
 0x411   :  { %v2670_v53 = vadd.f32 %v2669_v62, %v2668_v23  ;;  %v2642_v23 = vmul.f32 %v13043_v12, %v13043_v12  ;;  %v2675_v62 = vsel %vm1456_vm10, %v2636_v39, 0.0  ;;  %v3103_v10 = vmul.f32 0.00390625, %v3102_v40 }
 0x412   :  { %v2681_v27 = vsel %vm1456_vm10, %v2639_v18, 0.0 }
 0x413   :  { %v2672_v49 = vadd.f32 %v2671_v32, %v2670_v53  ;;  %v2643_v53 = vmul.f32 %v13046_v13, %v13046_v13  ;;  %v13142_v31 = vsub.f32 %v12769_v51, %v3103_v10  ;;  %v13145_v39 = vsub.f32 %v12779_v20, %v3103_v10 }
 0x414   :  { %v13151_v63 = vsub.f32 %v12775_v60, %v3103_v10  ;;  %v13154_v4 = vsub.f32 %v12801_v38, %v3103_v10  ;;  %v13157_v18 = vsub.f32 %v12813_v41, %v3103_v10  ;;  %v13163_v16 = vsub.f32 %v12809_v21, %v3103_v10 }
 0x415   :  { %v2674_v59 = vadd.f32 %v2673_v34, %v2672_v49  ;;  %15594 = vst [vmem:[#allocation48_spill] sm:$0xff] %v13142_v31  ;;  %15595 = vst [vmem:[#allocation49_spill] sm:$0xff] %v13145_v39  ;;  %v13148_v34 = vsub.f32 %v12765_v5, %v3103_v10  ;;  %v13166_v20 = vsub.f32 %v12833_v25, %v3103_v10  ;;  %v15601_v25 = vld [vmem:[#allocation17_spill] sm:$0xff] }
 0x416   :  { %15597 = vst [vmem:[#allocation51_spill] sm:$0xff] %v13151_v63  ;;  %v13169_v5 = vsub.f32 %v12845_v33, %v3103_v10  ;;  %v13172_v60 = vsub.f32 %v12829_v43, %v3103_v10  ;;  %v13175_v38 = vsub.f32 %v12841_v58, %v3103_v10  ;;  %v13178_v41 = vsub.f32 %v12865_v48, %v3103_v10  ;;  %v15602_v33 = vld [vmem:[#allocation20_spill] sm:$0xff]  ;;  %v15603_v43 = vld [vmem:[#allocation22_spill] sm:$0xff]  ;;  %v15604_v58 = vld [vmem:[#allocation19_spill] sm:$0xff] }
 0x417   :  { %v2676_v32 = vadd.f32 %v2675_v62, %v2674_v59  ;;  %15596 = vst [vmem:[#allocation50_spill] sm:$0xff] %v13148_v34  ;;  %v13184_v59 = vsub.f32 %v15600_v2, %v3103_v10  ;;  %v13187_v40 = vsub.f32 %v15601_v25, %v3103_v10  ;;  %v13190_v62 = vsub.f32 %v15602_v33, %v3103_v10  ;;  %v15605_v48 = vld [vmem:[#allocation21_spill] sm:$0xff]  ;;  %v15607_v2 = vld [vmem:[#allocation26_spill] sm:$0xff]  ;;  %v15608_v25 = vld [vmem:[#allocation23_spill] sm:$0xff] }
 0x418   :  { %v13199_v13 = vsub.f32 %v15605_v48, %v3103_v10  ;;  %v13205_v12 = vsub.f32 %v15607_v2, %v3103_v10  ;;  %v13208_v42 = vsub.f32 %v15608_v25, %v3103_v10  ;;  %v15609_v33 = vld [vmem:[#allocation25_spill] sm:$0xff]  ;;  %v15615_v48 = vld [vmem:[#allocation27_spill] sm:$0xff]  ;;  %v15621_v25 = vld [vmem:[#allocation32_spill] sm:$0xff]  ;;  %v13238_v1 = vsub.f32 %v12990_v0, %v3103_v10 }
 0x419   :  { %v2678_v49 = vadd.f32 %v2677_v19, %v2676_v32  ;;  %v13160_v19 = vsub.f32 %v12797_v8, %v3103_v10  ;;  %v15598_v8 = vld [vmem:[#allocation18_spill] sm:$0xff]  ;;  %v13193_v32 = vsub.f32 %v15603_v43, %v3103_v10  ;;  %v13211_v6 = vsub.f32 %v15609_v33, %v3103_v10  ;;  %v15611_v43 = vld [vmem:[#allocation28_spill] sm:$0xff]  ;;  %v15619_v2 = vld [vmem:[#allocation31_spill] sm:$0xff] }
 0x41a   :  { %v13214_v11 = vsub.f32 %v15611_v43, %v3103_v10  ;;  %v13220_v56 = vsub.f32 %v15615_v48, %v3103_v10  ;;  %v13226_v29 = vsub.f32 %v15619_v2, %v3103_v10  ;;  %v13229_v35 = vsub.f32 %v15621_v25, %v3103_v10  ;;  %v10597_v43 = vld [vmem:[#allocation7 + $0x70] sm:$0xff]   ;;  %15623 = vst [vmem:[#allocation26_spill] sm:$0xff] %v13238_v1 }
 0x41b   :  { %v2680_v51 = vadd.f32 %v2679_v37, %v2678_v49  ;;  %v13181_v37 = vsub.f32 %v15598_v8, %v3103_v10  ;;  %v13196_v49 = vsub.f32 %v15604_v58, %v3103_v10  ;;  %v15606_v8 = vld [vmem:[#allocation24_spill] sm:$0xff]  ;;  %15610 = vst [vmem:[#allocation16_spill] sm:$0xff] %v13211_v6  ;;  %v15613_v58 = vld [vmem:[#allocation30_spill] sm:$0xff]  ;;  %v13232_v33 = vsub.f32 %v12984_v17, %v3103_v10 }
 0x41c   :  { %15612 = vst [vmem:[#allocation17_spill] sm:$0xff] %v13214_v11  ;;  %v13217_v47 = vsub.f32 %v15613_v58, %v3103_v10  ;;  %15616 = vst [vmem:[#allocation22_spill] sm:$0xff] %v13220_v56  ;;  %v2644_v58 = vmul.f32 %v13049_v45, %v13049_v45  ;;  %v2687_v48 = vsel %vm1456_vm10, %v2642_v23, 0.0  ;;  %9700 = vmatprep.subr.bf16.mxu0 %v10597_v43 }
 0x41d   :  { %15599 = vst [vmem:[#allocation18_spill] sm:$0xff] %v13181_v37  ;;  %v2682_v21 = vadd.f32 %v2681_v27, %v2680_v51  ;;  %v13202_v27 = vsub.f32 %v15606_v8, %v3103_v10  ;;  %v15617_v8 = vld [vmem:[#allocation29_spill] sm:$0xff]  ;;  %15620 = vst [vmem:[#allocation21_spill] sm:$0xff] %v13226_v29  ;;  %9701 = vmatpush3.bf16.msra.mxu0 %v10597_v43  ;;  %v2646_v17 = vmul.f32 %v13055_v9, %v13055_v9 }
 0x41e   :  { %15614 = vst [vmem:[#allocation20_spill] sm:$0xff] %v13217_v47  ;;  %15622 = vst [vmem:[#allocation24_spill] sm:$0xff] %v13232_v33  ;;  %v2691_v25 = vsel %vm1456_vm10, %v2644_v58, 0.0  ;;  %v3136_v23 = vmul.f32 %v13142_v31, %v13142_v31  ;;  %v3137_v0 = vmul.f32 %v13145_v39, %v13145_v39  ;;  %v3138_v43 = vmul.f32 %v13148_v34, %v13148_v34 }
 0x41f   :  { %v2684_v51 = vadd.f32 %v2683_v44, %v2682_v21  ;;  %v13223_v44 = vsub.f32 %v15617_v8, %v3103_v10  ;;  %v2647_v10 = vmul.f32 %v13058_v61, %v13058_v61  ;;  %v2695_v58 = vsel %vm1456_vm10, %v2646_v17, 0.0 }
 0x420   :  { %v3140_v39 = vmul.f32 %v13154_v4, %v13154_v4  ;;  %v3171_v17 = vsel %vm1456_vm10, %v3138_v43, 0.0  ;;  %v3142_v43 = vmul.f32 %v13160_v19, %v13160_v19 }
 0x421   :  { %15618 = vst [vmem:[#allocation19_spill] sm:$0xff] %v13223_v44  ;;  %v2686_v21 = vadd.f32 %v2685_v7, %v2684_v51  ;;  %v2645_v7 = vmul.f32 %v13052_v24, %v13052_v24  ;;  %v2689_v51 = vsel %vm1456_vm10, %v2643_v53, 0.0 }
 0x423   :  { %v2688_v8 = vadd.f32 %v2687_v48, %v2686_v21  ;;  %v2693_v21 = vsel %vm1456_vm10, %v2645_v7, 0.0  ;;  %v2648_v48 = vmul.f32 %v13061_v52, %v13061_v52  ;;  %v2649_v7 = vmul.f32 %v13064_v15, %v13064_v15 }
 0x425   :  { %v2690_v2 = vadd.f32 %v2689_v51, %v2688_v8  ;;  %v3139_v51 = vmul.f32 %v13151_v63, %v13151_v63 }
 0x427   :  { %v2692_v45 = vadd.f32 %v2691_v25, %v2690_v2  ;;  %v3168_v2 = vsel %vm1456_vm10, %v3136_v23, 0.0  ;;  %v3169_v25 = vsel %vm1456_vm10, %v3137_v0, 0.0  ;;  %v3141_v0 = vmul.f32 %v13157_v18, %v13157_v18 }
 0x428   :  { %v3173_v31 = vsel %vm1456_vm10, %v3139_v51, 0.0  ;;  %v3143_v51 = vmul.f32 %v13163_v16, %v13163_v16 }
 0x429   :  { %v2694_v53 = vadd.f32 %v2693_v21, %v2692_v45  ;;  %v2697_v45 = vsel %vm1456_vm10, %v2647_v10, 0.0  ;;  %v3170_v21 = vadd.f32 %v3169_v25, %v3168_v2  ;;  %v2651_v10 = vmul.f32 %v13070_v36, %v13070_v36 }
 0x42b   :  { %v2696_v8 = vadd.f32 %v2695_v58, %v2694_v53  ;;  %v2650_v53 = vmul.f32 %v13067_v3, %v13067_v3  ;;  %v2699_v58 = vsel %vm1456_vm10, %v2648_v48, 0.0  ;;  %v3172_v23 = vadd.f32 %v3171_v17, %v3170_v21 }
 0x42d   :  { %v2698_v34 = vadd.f32 %v2697_v45, %v2696_v8  ;;  %v2701_v8 = vsel %vm1456_vm10, %v2649_v7, 0.0  ;;  %v3174_v2 = vadd.f32 %v3173_v31, %v3172_v23  ;;  %v3175_v45 = vsel %vm1456_vm10, %v3140_v39, 0.0 }
 0x42e   :  { %v2703_v48 = vsel %vm1456_vm10, %v2650_v53, 0.0  ;;  %v2653_v31 = vmul.f32 %v13076_v55, %v13076_v55  ;;  %v3144_v39 = vmul.f32 %v13166_v20, %v13166_v20  ;;  %v2654_v53 = vmul.f32 %v13079_v14, %v13079_v14 }
 0x42f   :  { %v2700_v63 = vadd.f32 %v2699_v58, %v2698_v34  ;;  %v2652_v34 = vmul.f32 %v13073_v54, %v13073_v54  ;;  %v3176_v21 = vadd.f32 %v3175_v45, %v3174_v2  ;;  %v3177_v58 = vsel %vm1456_vm10, %v3141_v0, 0.0 }
 0x430   :  { %v3145_v0 = vmul.f32 %v13169_v5, %v13169_v5 }
 0x431   :  { %v2702_v25 = vadd.f32 %v2701_v8, %v2700_v63  ;;  %v2705_v63 = vsel %vm1456_vm10, %v2651_v10, 0.0  ;;  %v3178_v7 = vadd.f32 %v3177_v58, %v3176_v21  ;;  %v3179_v8 = vsel %vm1456_vm10, %v3142_v43, 0.0 }
 0x432   :  { %v2707_v2 = vsel %vm1456_vm10, %v2652_v34, 0.0  ;;  %v2655_v10 = vmul.f32 %v13082_v50, %v13082_v50  ;;  %v2709_v21 = vsel %vm1456_vm10, %v2653_v31, 0.0  ;;  %v3146_v43 = vmul.f32 %v13172_v60, %v13172_v60 }
 0x433   :  { %v2704_v17 = vadd.f32 %v2703_v48, %v2702_v25  ;;  %v3180_v25 = vadd.f32 %v3179_v8, %v3178_v7  ;;  %v3181_v48 = vsel %vm1456_vm10, %v3143_v51, 0.0  ;;  %v2656_v34 = vmul.f32 %v13085_v26, %v13085_v26 }
 0x434   :  { %v2711_v7 = vsel %vm1456_vm10, %v2654_v53, 0.0  ;;  %v3147_v51 = vmul.f32 %v13175_v38, %v13175_v38  ;;  %v2657_v31 = vmul.f32 %v13087_v30, %v13087_v30  ;;  %v2658_v53 = vmul.f32 %v13090_v22, %v13090_v22 }
 0x435   :  { %v2706_v23 = vadd.f32 %v2705_v63, %v2704_v17  ;;  %v3182_v17 = vadd.f32 %v3181_v48, %v3180_v25  ;;  %v3183_v63 = vsel %vm1456_vm10, %v3144_v39, 0.0  ;;  %v2713_v25 = vsel %vm1456_vm10, %v2655_v10, 0.0 }
 0x436   :  { %v3148_v39 = vmul.f32 %v13178_v41, %v13178_v41  ;;  %v2659_v10 = vmul.f32 %v13093_v46, %v13093_v46 }
 0x437   :  { %v2708_v45 = vadd.f32 %v2707_v2, %v2706_v23  ;;  %v3184_v23 = vadd.f32 %v3183_v63, %v3182_v17  ;;  %v3185_v2 = vsel %vm1456_vm10, %v3145_v0, 0.0  ;;  %v2715_v17 = vsel %vm1456_vm10, %v2656_v34, 0.0 }
 0x438   :  { %v3149_v0 = vmul.f32 %v13181_v37, %v13181_v37  ;;  %v2719_v34 = vsel %vm1456_vm10, %v2658_v53, 0.0  ;;  %v3153_v53 = vmul.f32 %v13193_v32, %v13193_v32 }
 0x439   :  { %v2710_v58 = vadd.f32 %v2709_v21, %v2708_v45  ;;  %v3186_v45 = vadd.f32 %v3185_v2, %v3184_v23  ;;  %v3187_v21 = vsel %vm1456_vm10, %v3146_v43, 0.0  ;;  %v2717_v23 = vsel %vm1456_vm10, %v2657_v31, 0.0 }
 0x43a   :  { %v3150_v43 = vmul.f32 %v13184_v59, %v13184_v59 }
 0x43b   :  { %v2712_v8 = vadd.f32 %v2711_v7, %v2710_v58  ;;  %v3188_v58 = vadd.f32 %v3187_v21, %v3186_v45  ;;  %v3189_v7 = vsel %vm1456_vm10, %v3147_v51, 0.0  ;;  %v3151_v21 = vmul.f32 %v13187_v40, %v13187_v40 }
 0x43c   :  { %v3193_v51 = vsel %vm1456_vm10, %v3149_v0, 0.0  ;;  %v3154_v0 = vmul.f32 %v13196_v49, %v13196_v49 }
 0x43d   :  { %v2714_v48 = vadd.f32 %v2713_v25, %v2712_v8  ;;  %v3190_v8 = vadd.f32 %v3189_v7, %v3188_v58  ;;  %v3191_v25 = vsel %vm1456_vm10, %v3148_v39, 0.0  ;;  %v3152_v58 = vmul.f32 %v13190_v62, %v13190_v62 }
 0x43f   :  { %v2716_v63 = vadd.f32 %v2715_v17, %v2714_v48  ;;  %v3192_v45 = vadd.f32 %v3191_v25, %v3190_v8  ;;  %v2721_v17 = vsel %vm1456_vm10, %v2659_v10, 0.0  ;;  %v3199_v10 = vsel %vm1456_vm10, %v3152_v58, 0.0 }
 0x441   :  { %v2718_v2 = vadd.f32 %v2717_v23, %v2716_v63  ;;  %v3194_v37 = vadd.f32 %v3193_v51, %v3192_v45  ;;  %v3195_v63 = vsel %vm1456_vm10, %v3150_v43, 0.0  ;;  %v3197_v23 = vsel %vm1456_vm10, %v3151_v21, 0.0 }
 0x442   :  { %v3155_v45 = vmul.f32 %v13199_v13, %v13199_v13  ;;  %v3156_v51 = vmul.f32 %v13202_v27, %v13202_v27  ;;  %v3203_v21 = vsel %vm1456_vm10, %v3154_v0, 0.0 }
 0x443   :  { %v2720_v48 = vadd.f32 %v2719_v34, %v2718_v2  ;;  %v3196_v7 = vadd.f32 %v3195_v63, %v3194_v37  ;;  %v3201_v37 = vsel %vm1456_vm10, %v3153_v53, 0.0  ;;  %v3157_v63 = vmul.f32 %v13205_v12, %v13205_v12 }
 0x444   :  { %v3205_v58 = vsel %vm1456_vm10, %v3155_v45, 0.0  ;;  %v3207_v53 = vsel %vm1456_vm10, %v3156_v51, 0.0  ;;  %v3160_v45 = vmul.f32 %v13214_v11, %v13214_v11  ;;  %v10598_v51 = vld [vmem:[#allocation7 + $0x28] sm:$0xff]  }
 0x445   :  { %v2722_v31 = vadd.f32 %v2721_v17, %v2720_v48  ;;  %v3198_v8 = vadd.f32 %v3197_v23, %v3196_v7  ;;  %v3158_v23 = vmul.f32 %v13208_v42, %v13208_v42  ;;  %9650 = vmatprep.subr.bf16.mxu1 %v10598_v51 }
 0x446   :  { %9651 = vmatpush3.bf16.msra.mxu1 %v10598_v51 }
 0x447   :  { %v2723_v39 = vrot.slane %v2722_v31, 4  ;;  %v3200_v25 = vadd.f32 %v3199_v10, %v3198_v8  ;;  %v3209_v10 = vsel %vm1456_vm10, %v3157_v63, 0.0  ;;  %v3215_v63 = vsel %vm1456_vm10, %v3160_v45, 0.0 }
 0x449   :  { %v2724_v2 = vadd.f32 %v2723_v39, %v2722_v31  ;;  %v3202_v43 = vadd.f32 %v3201_v37, %v3200_v25  ;;  %v3211_v37 = vsel %vm1456_vm10, %v3158_v23, 0.0 }
 0x44b   :  { %v2725_v34 = vrot.slane %v2724_v2, 2  ;;  %v3204_v17 = vadd.f32 %v3203_v21, %v3202_v43 }
 0x44d   :  { %v2726_v48 = vadd.f32 %v2725_v34, %v2724_v2  ;;  %v3206_v7 = vadd.f32 %v3205_v58, %v3204_v17  ;;  %v3159_v34 = vmul.f32 %v13211_v6, %v13211_v6  ;;  %v10599_v17 = vld [vmem:[#allocation7 + $0x30] sm:$0xff]  }
 0x44e   :  { %9652 = vmatprep.subr.bf16.mxu1 %v10599_v17 }
 0x44f   :  { %v2727_v31 = vrot.slane %v2726_v48, 1  ;;  %v3208_v8 = vadd.f32 %v3207_v53, %v3206_v7  ;;  %v92_v7 = vld [vmem:[%s15401_s2 + $0x2] sm:$0x1]  ;;  %v3162_v53 = vmul.f32 %v13220_v56, %v13220_v56  ;;  %9653 = vmatpush3.bf16.msra.mxu1 %v10599_v17  ;;  %v15636_v56 = vld [vmem:[#allocation44_spill] sm:$0xff] }
 0x451   :  { %v2728_v39 = vadd.f32 %v2727_v31, %v2726_v48  ;;  %v3210_v25 = vadd.f32 %v3209_v10, %v3208_v8  ;;  %v3213_v48 = vsel %vm1456_vm10, %v3159_v34, 0.0  ;;  %v3161_v31 = vmul.f32 %v13217_v47, %v13217_v47  ;;  %v15637_v47 = vld [vmem:[#allocation45_spill] sm:$0xff] }
 0x452   :  { %v3163_v34 = vmul.f32 %v13223_v44, %v13223_v44  ;;  %v15635_v44 = vld [vmem:[#allocation43_spill] sm:$0xff] }
 0x453   :  { %v2729_v2 = vmul.f32 0.00390625, %v2728_v39  ;;  %v3212_v43 = vadd.f32 %v3211_v37, %v3210_v25  ;;  %v10600_v39 = vld [vmem:[#allocation7 + $0x38] sm:$0xff]   ;;  %v3217_v8 = vsel %vm1456_vm10, %v3161_v31, 0.0  ;;  %v3219_v37 = vsel %vm1456_vm10, %v3162_v53, 0.0 }
 0x454   :  { %9654 = vmatprep.subr.bf16.mxu1 %v10600_v39  ;;  %v15624_v25 = vld [vmem:[#allocation15_spill] sm:$0xff]  ;;  %v3165_v31 = vmul.f32 %v13229_v35, %v13229_v35  ;;  %v3167_v53 = vmul.f32 %v13238_v1, %v13238_v1  ;;  %v15632_v1 = vld [vmem:[#allocation40_spill] sm:$0xff] }
 0x455   :  { %v2730_v0 = vadd.f32 1e-05, %v2729_v2  ;;  %v3214_v21 = vadd.f32 %v3213_v48, %v3212_v43  ;;  %9655 = vmatpush3.bf16.msra.mxu1 %v10600_v39  ;;  %v3164_v48 = vmul.f32 %v13226_v29, %v13226_v29  ;;  %v15634_v29 = vld [vmem:[#allocation42_spill] sm:$0xff] }
 0x456   :  { %v3225_v39 = vsel %vm1456_vm10, %v3165_v31, 0.0  ;;  %v13397_v31 = vld [vmem:[%s15401_s2 + $0x3] ss:$0 sm:$0xff] }
 0x457   :  { %10783 = vrsqrt.f32 %v2730_v0  ;;  %v3216_v58 = vadd.f32 %v3215_v63, %v3214_v21  ;;  %v3221_v21 = vsel %vm1456_vm10, %v3163_v34, 0.0  ;;  %v3223_v63 = vsel %vm1456_vm10, %v3164_v48, 0.0 }
 0x459   :  { %v3218_v10 = vadd.f32 %v3217_v8, %v3216_v58 }
 0x45b   :  { %v3220_v45 = vadd.f32 %v3219_v37, %v3218_v10 }
 0x45d   :  { %v3222_v51 = vadd.f32 %v3221_v21, %v3220_v45 }
 0x461   :  { %v10784_v23 = vpop.eup %10783 }
 0x462   :  { %v2732_v2 = vmul.f32 %v10784_v23, %v92_v7  ;;  %v3166_v7 = vmul.f32 %v13232_v33, %v13232_v33  ;;  %v15633_v33 = vld [vmem:[#allocation41_spill] sm:$0xff] }
 0x464   :  { %v2736_v0 = vrot.slane %v2732_v2, %v15624_v25  ;;  %v3229_v2 = vsel %vm1456_vm10, %v3167_v53, 0.0  ;;  %v15626_v53 = vld [vmem:[#allocation34_spill] sm:$0xff] }
 0x466   :  { %v2766_v43 = vmul.f32 %v2736_v0, %v13087_v30  ;;  %v13379_v17 = vmul.f32 %v2736_v0, %v13090_v22  ;;  %v13385_v58 = vmul.f32 %v2736_v0, %v13093_v46  ;;  %v3224_v30 = vadd.f32 %v3223_v63, %v3222_v51 }
 0x467   :  { %v3227_v22 = vsel %vm1456_vm10, %v3166_v7, 0.0  ;;  %v2738_v7 = vmul.f32 %v2736_v0, %v13004_v57  ;;  %v2746_v57 = vmul.f32 %v2736_v0, %v15632_v1  ;;  %v2756_v1 = vmul.f32 %v2736_v0, %v13058_v61 }
 0x468   :  { %v3226_v23 = vadd.f32 %v3225_v39, %v3224_v30  ;;  %v2737_v30 = vmul.f32 %v2736_v0, %v13001_v28  ;;  %v15625_v39 = vld [vmem:[#allocation33_spill] sm:$0xff] }
 0x46a   :  { %v3228_v8 = vadd.f32 %v3227_v22, %v3226_v23  ;;  %v2739_v23 = vmul.f32 %v2736_v0, %v15625_v39  ;;  %v2740_v22 = vmul.f32 %v2736_v0, %v15626_v53  ;;  %v2747_v39 = vmul.f32 %v2736_v0, %v15633_v33 }
 0x46b   :  { %v2748_v53 = vmul.f32 %v2736_v0, %v15634_v29  ;;  %v2757_v33 = vmul.f32 %v2736_v0, %v13061_v52  ;;  %v2758_v29 = vmul.f32 %v2736_v0, %v13064_v15  ;;  %v13432_v61 = vadd.f32 %v13397_v31, %v2737_v30 }
 0x46c   :  { %v3230_v10 = vadd.f32 %v3229_v2, %v3228_v8  ;;  %v15627_v8 = vld [vmem:[#allocation35_spill] sm:$0xff]  ;;  %v13435_v52 = vadd.f32 %v13397_v31, %v2738_v7  ;;  %v13438_v15 = vadd.f32 %v13397_v31, %v2739_v23  ;;  %v13465_v30 = vadd.f32 %v13397_v31, %v2747_v39 }
 0x46d   :  { %v2741_v2 = vmul.f32 %v2736_v0, %v15627_v8  ;;  %v2749_v8 = vmul.f32 %v2736_v0, %v15635_v44  ;;  %v2759_v44 = vmul.f32 %v2736_v0, %v13067_v3  ;;  %v13441_v3 = vadd.f32 %v13397_v31, %v2740_v22 }
 0x46e   :  { %v3231_v34 = vrot.slane %v3230_v10, 4  ;;  %v13468_v7 = vadd.f32 %v13397_v31, %v2748_v53  ;;  %v13492_v39 = vadd.f32 %v13397_v31, %v2756_v1 }
 0x46f   :  { %v13471_v23 = vadd.f32 %v13397_v31, %v2749_v8  ;;  %v13495_v8 = vadd.f32 %v13397_v31, %v2757_v33  ;;  %v13519_v33 = vld [vmem:[%s15401_s2 + $0x5] ss:$0 sm:$0xff] }
 0x470   :  { %v3232_v37 = vadd.f32 %v3231_v34, %v3230_v10  ;;  %v15628_v10 = vld [vmem:[#allocation36_spill] sm:$0xff] }
 0x471   :  { %v2742_v34 = vmul.f32 %v2736_v0, %v15628_v10  ;;  %v2750_v10 = vmul.f32 %v2736_v0, %v15636_v56  ;;  %v2760_v56 = vmul.f32 %v2736_v0, %v13070_v36  ;;  %v13444_v36 = vadd.f32 %v13397_v31, %v2741_v2 }
 0x472   :  { %v3233_v46 = vrot.slane %v3232_v37, 2 }
 0x473   :  { %v13474_v2 = vadd.f32 %v13397_v31, %v2750_v10  ;;  %v13498_v10 = vadd.f32 %v13397_v31, %v2758_v29 }
 0x474   :  { %v3234_v45 = vadd.f32 %v3233_v46, %v3232_v37  ;;  %v15629_v37 = vld [vmem:[#allocation37_spill] sm:$0xff] }
 0x475   :  { %v2743_v46 = vmul.f32 %v2736_v0, %v15629_v37  ;;  %v2751_v37 = vmul.f32 %v2736_v0, %v15637_v47  ;;  %v2761_v47 = vmul.f32 %v2736_v0, %v13073_v54  ;;  %v13447_v54 = vadd.f32 %v13397_v31, %v2742_v34  ;;  %15640 = vst [vmem:[#allocation23_spill] sm:$0xff] %v13498_v10  ;;  %v15662_v10 = vld [vmem:[#allocation26_spill] sm:$0xff] }
 0x476   :  { %v3235_v48 = vrot.slane %v3234_v45, 1 }
 0x477   :  { %v13477_v34 = vadd.f32 %v13397_v31, %v2751_v37  ;;  %v13507_v37 = vadd.f32 %v13397_v31, %v2761_v47  ;;  %v13533_v47 = vadd.f32 %v13397_v31, %v13385_v58 }
 0x478   :  { %v3236_v21 = vadd.f32 %v3235_v48, %v3234_v45  ;;  %v13407_v45 = vadd.f32 %v13397_v31, %v2766_v43  ;;  %v15630_v48 = vld [vmem:[#allocation38_spill] sm:$0xff]  ;;  %v15639_v43 = vld [vmem:[#allocation47_spill] sm:$0xff] }
 0x479   :  { %v2753_v6 = vmul.f32 %v2736_v0, %v15639_v43  ;;  %v2763_v43 = vmul.f32 %v2736_v0, %v13079_v14  ;;  %15643 = vst [vmem:[#allocation30_spill] sm:$0xff] %v13507_v37  ;;  %15649 = vst [vmem:[#allocation34_spill] sm:$0xff] %v13533_v47 }
 0x47a   :  { %v3237_v51 = vmul.f32 0.00390625, %v3236_v21  ;;  %v2744_v21 = vmul.f32 %v2736_v0, %v15630_v48  ;;  %v2754_v48 = vmul.f32 %v2736_v0, %v13052_v24  ;;  %v2764_v24 = vmul.f32 %v2736_v0, %v13082_v50 }
 0x47c   :  { %v3238_v63 = vadd.f32 1e-05, %v3237_v51  ;;  %v15631_v51 = vld [vmem:[#allocation39_spill] sm:$0xff]  ;;  %v13453_v14 = vadd.f32 %v13397_v31, %v2744_v21  ;;  %v13483_v21 = vadd.f32 %v13397_v31, %v2753_v6  ;;  %v13504_v6 = vadd.f32 %v13397_v31, %v2760_v56 }
 0x47d   :  { %v2745_v28 = vmul.f32 %v2736_v0, %v15631_v51  ;;  %v2755_v51 = vmul.f32 %v2736_v0, %v13055_v9  ;;  %v2765_v9 = vmul.f32 %v2736_v0, %v13085_v26  ;;  %v94_v26 = vld [vmem:[%s15401_s2 + $0x4] sm:$0x1]  ;;  %v13522_v29 = vadd.f32 %v13397_v31, %v2764_v24 }
 0x47e   :  { %10785 = vrsqrt.f32 %v3238_v63  ;;  %v15638_v63 = vld [vmem:[#allocation46_spill] sm:$0xff]  ;;  %15642 = vst [vmem:[#allocation28_spill] sm:$0xff] %v13504_v6  ;;  %v13529_v56 = vadd.f32 %v13397_v31, %v13379_v17 }
 0x47f   :  { %v2752_v11 = vmul.f32 %v2736_v0, %v15638_v63  ;;  %v2762_v63 = vmul.f32 %v2736_v0, %v13076_v55  ;;  %v13450_v55 = vadd.f32 %v13397_v31, %v2743_v46  ;;  %v13456_v50 = vadd.f32 %v13397_v31, %v2745_v28  ;;  %15646 = vst [vmem:[#allocation31_spill] sm:$0xff] %v13522_v29  ;;  %v15653_v29 = vld [vmem:[#allocation51_spill] sm:$0xff] }
 0x480   :  { %v13462_v0 = vadd.f32 %v13397_v31, %v2746_v57  ;;  %v13486_v28 = vadd.f32 %v13397_v31, %v2754_v48  ;;  %v13489_v57 = vadd.f32 %v13397_v31, %v2755_v51  ;;  %v13513_v51 = vadd.f32 %v13397_v31, %v2763_v43  ;;  %15648 = vst [vmem:[#allocation33_spill] sm:$0xff] %v13529_v56  ;;  %v15650_v43 = vld [vmem:[#allocation48_spill] sm:$0xff] }
 0x481   :  { %v13480_v46 = vadd.f32 %v13397_v31, %v2752_v11  ;;  %v13501_v11 = vadd.f32 %v13397_v31, %v2759_v44  ;;  %v13510_v48 = vadd.f32 %v13397_v31, %v2762_v63  ;;  %v13525_v44 = vadd.f32 %v13397_v31, %v2765_v9 }
 0x482   :  { %15645 = vst [vmem:[#allocation29_spill] sm:$0xff] %v13513_v51 }
 0x483   :  { %15641 = vst [vmem:[#allocation25_spill] sm:$0xff] %v13501_v11  ;;  %15644 = vst [vmem:[#allocation27_spill] sm:$0xff] %v13510_v48 }
 0x484   :  { %15647 = vst [vmem:[#allocation32_spill] sm:$0xff] %v13525_v44 }
 0x488   :  { %v10786_v22 = vpop.eup %10785 }
 0x489   :  { %v3240_v53 = vmul.f32 %v10786_v22, %v94_v26  ;;  %v15651_v22 = vld [vmem:[#allocation49_spill] sm:$0xff] }
 0x48b   :  { %v3244_v1 = vrot.slane %v3240_v53, %v15624_v25  ;;  %v15652_v25 = vld [vmem:[#allocation50_spill] sm:$0xff] }
 0x48d   :  { %v3274_v63 = vmul.f32 %v3244_v1, %v13229_v35  ;;  %v3245_v26 = vmul.f32 %v3244_v1, %v15650_v43  ;;  %v3246_v53 = vmul.f32 %v3244_v1, %v15651_v22  ;;  %v3247_v24 = vmul.f32 %v3244_v1, %v15652_v25  ;;  %v15654_v22 = vld [vmem:[#allocation18_spill] sm:$0xff] }
 0x48e   :  { %v3248_v51 = vmul.f32 %v3244_v1, %v15653_v29  ;;  %v3249_v9 = vmul.f32 %v3244_v1, %v13154_v4  ;;  %v3250_v44 = vmul.f32 %v3244_v1, %v13157_v18  ;;  %v3251_v17 = vmul.f32 %v3244_v1, %v13160_v19 }
 0x48f   :  { %v3310_v56 = vadd.f32 %v13519_v33, %v3274_v63  ;;  %v3252_v58 = vmul.f32 %v3244_v1, %v13163_v16  ;;  %v3253_v35 = vmul.f32 %v3244_v1, %v13166_v20  ;;  %v3254_v31 = vmul.f32 %v3244_v1, %v13169_v5 }
 0x490   :  { %v3255_v43 = vmul.f32 %v3244_v1, %v13172_v60  ;;  %v3256_v25 = vmul.f32 %v3244_v1, %v13175_v38  ;;  %v3257_v29 = vmul.f32 %v3244_v1, %v13178_v41  ;;  %v3258_v4 = vmul.f32 %v3244_v1, %v15654_v22 }
 0x491   :  { %v3342_v18 = vadd.f32 %v3310_v56, %v13407_v45  ;;  %v3259_v19 = vmul.f32 %v3244_v1, %v13184_v59  ;;  %v3260_v63 = vmul.f32 %v3244_v1, %v13187_v40  ;;  %v3261_v16 = vmul.f32 %v3244_v1, %v13190_v62  ;;  %v15655_v45 = vld [vmem:[#allocation16_spill] sm:$0xff]  ;;  %v15656_v59 = vld [vmem:[#allocation17_spill] sm:$0xff]  ;;  %v15658_v62 = vld [vmem:[#allocation22_spill] sm:$0xff] }
 0x492   :  { %v3262_v20 = vmul.f32 %v3244_v1, %v13193_v32  ;;  %v3263_v5 = vmul.f32 %v3244_v1, %v13196_v49  ;;  %v3264_v60 = vmul.f32 %v3244_v1, %v13199_v13  ;;  %v3265_v38 = vmul.f32 %v3244_v1, %v13202_v27  ;;  %v15657_v40 = vld [vmem:[#allocation20_spill] sm:$0xff]  ;;  %v15659_v32 = vld [vmem:[#allocation19_spill] sm:$0xff]  ;;  %v15660_v13 = vld [vmem:[#allocation21_spill] sm:$0xff] }
 0x493   :  { %v3374_v47 = vmax.f32 %v3342_v18, 0.0  ;;  %v3266_v41 = vmul.f32 %v3244_v1, %v13205_v12  ;;  %v3267_v22 = vmul.f32 %v3244_v1, %v13208_v42  ;;  %v3268_v56 = vmul.f32 %v3244_v1, %v15655_v45  ;;  %v15661_v27 = vld [vmem:[#allocation24_spill] sm:$0xff] }
 0x494   :  { %v3269_v48 = vmul.f32 %v3244_v1, %v15656_v59  ;;  %v3270_v37 = vmul.f32 %v3244_v1, %v15657_v40  ;;  %v3271_v6 = vmul.f32 %v3244_v1, %v15658_v62  ;;  %v3272_v11 = vmul.f32 %v3244_v1, %v15659_v32 }
 0x495   :  { %3432 = vst.msk [vmem:[#allocation2 + $0xe8] sm:$0xff] %vm1456_vm10, %v3374_v47  ;;  %v3273_v49 = vmul.f32 %v3244_v1, %v15660_v13  ;;  %v3275_v18 = vmul.f32 %v3244_v1, %v15661_v27  ;;  %v3276_v12 = vmul.f32 %v3244_v1, %v15662_v10  ;;  %v3281_v42 = vadd.f32 %v13519_v33, %v3245_v26 }
 0x496   :  { %v3282_v45 = vadd.f32 %v13519_v33, %v3246_v53  ;;  %v3283_v59 = vadd.f32 %v13519_v33, %v3247_v24  ;;  %v3284_v40 = vadd.f32 %v13519_v33, %v3248_v51  ;;  %v3285_v62 = vadd.f32 %v13519_v33, %v3249_v9 }
 0x497   :  { %v3286_v32 = vadd.f32 %v13519_v33, %v3250_v44  ;;  %v3287_v47 = vadd.f32 %v13519_v33, %v3251_v17  ;;  %v3288_v13 = vadd.f32 %v13519_v33, %v3252_v58  ;;  %v3289_v27 = vadd.f32 %v13519_v33, %v3253_v35 }
 0x498   :  { %v3290_v10 = vadd.f32 %v13519_v33, %v3254_v31  ;;  %v3291_v1 = vadd.f32 %v13519_v33, %v3255_v43  ;;  %v3292_v26 = vadd.f32 %v13519_v33, %v3256_v25  ;;  %v3293_v53 = vadd.f32 %v13519_v33, %v3257_v29 }
 0x499   :  { %v3294_v51 = vadd.f32 %v13519_v33, %v3258_v4  ;;  %v3295_v24 = vadd.f32 %v13519_v33, %v3259_v19  ;;  %v3296_v44 = vadd.f32 %v13519_v33, %v3260_v63  ;;  %v3297_v9 = vadd.f32 %v13519_v33, %v3261_v16 }
 0x49a   :  { %v3298_v17 = vadd.f32 %v13519_v33, %v3262_v20  ;;  %v3299_v58 = vadd.f32 %v13519_v33, %v3263_v5  ;;  %v3300_v35 = vadd.f32 %v13519_v33, %v3264_v60  ;;  %v3301_v31 = vadd.f32 %v13519_v33, %v3265_v38 }
 0x49b   :  { %v3302_v43 = vadd.f32 %v13519_v33, %v3266_v41  ;;  %v3303_v25 = vadd.f32 %v13519_v33, %v3267_v22  ;;  %v3304_v29 = vadd.f32 %v13519_v33, %v3268_v56  ;;  %v3305_v4 = vadd.f32 %v13519_v33, %v3269_v48 }
 0x49c   :  { %v3306_v19 = vadd.f32 %v13519_v33, %v3270_v37  ;;  %v3307_v63 = vadd.f32 %v13519_v33, %v3271_v6  ;;  %v3308_v16 = vadd.f32 %v13519_v33, %v3272_v11  ;;  %v3309_v20 = vadd.f32 %v13519_v33, %v3273_v49 }
 0x49d   :  { %v3311_v5 = vadd.f32 %v13519_v33, %v3275_v18  ;;  %v3312_v60 = vadd.f32 %v13519_v33, %v3276_v12  ;;  %v3313_v38 = vadd.f32 %v3281_v42, %v13432_v61  ;;  %v3314_v41 = vadd.f32 %v3282_v45, %v13435_v52 }
 0x49e   :  { %v3315_v22 = vadd.f32 %v3283_v59, %v13438_v15  ;;  %v3316_v48 = vadd.f32 %v3284_v40, %v13441_v3  ;;  %v3317_v37 = vadd.f32 %v3285_v62, %v13444_v36  ;;  %v3318_v6 = vadd.f32 %v3286_v32, %v13447_v54  ;;  %v15670_v59 = vld [vmem:[#allocation32_spill] sm:$0xff]  ;;  %v15671_v62 = vld [vmem:[#allocation33_spill] sm:$0xff] }
 0x49f   :  { %v3319_v11 = vadd.f32 %v3287_v47, %v13450_v55  ;;  %v3320_v56 = vadd.f32 %v3288_v13, %v13453_v14  ;;  %v3321_v49 = vadd.f32 %v3289_v27, %v13456_v50  ;;  %v3322_v33 = vadd.f32 %v3290_v10, %v13462_v0  ;;  %v15672_v47 = vld [vmem:[#allocation34_spill] sm:$0xff] }
 0x4a0   :  { %v3323_v61 = vadd.f32 %v3291_v1, %v13465_v30  ;;  %v3324_v52 = vadd.f32 %v3292_v26, %v13468_v7  ;;  %v3325_v15 = vadd.f32 %v3293_v53, %v13471_v23  ;;  %v3326_v3 = vadd.f32 %v3294_v51, %v13474_v2  ;;  %v15663_v7 = vld [vmem:[#allocation23_spill] sm:$0xff]  ;;  %v15664_v2 = vld [vmem:[#allocation25_spill] sm:$0xff] }
 0x4a1   :  { %v3327_v36 = vadd.f32 %v3295_v24, %v13477_v34  ;;  %v3328_v54 = vadd.f32 %v3296_v44, %v13480_v46  ;;  %v3329_v55 = vadd.f32 %v3297_v9, %v13483_v21  ;;  %v3330_v14 = vadd.f32 %v3298_v17, %v13486_v28  ;;  %v15665_v34 = vld [vmem:[#allocation28_spill] sm:$0xff]  ;;  %v15666_v21 = vld [vmem:[#allocation30_spill] sm:$0xff]  ;;  %v15667_v28 = vld [vmem:[#allocation27_spill] sm:$0xff] }
 0x4a2   :  { %v3331_v50 = vadd.f32 %v3299_v58, %v13489_v57  ;;  %v13621_v0 = vadd.f32 %v3300_v35, %v13492_v39  ;;  %v13624_v30 = vadd.f32 %v3301_v31, %v13495_v8  ;;  %v13627_v23 = vadd.f32 %v3302_v43, %v15663_v7  ;;  %v15668_v39 = vld [vmem:[#allocation29_spill] sm:$0xff]  ;;  %v15669_v8 = vld [vmem:[#allocation31_spill] sm:$0xff] }
 0x4a3   :  { %v13630_v18 = vadd.f32 %v3303_v25, %v15664_v2  ;;  %v13633_v46 = vadd.f32 %v3304_v29, %v15665_v34  ;;  %v13636_v12 = vadd.f32 %v3305_v4, %v15666_v21  ;;  %v13639_v57 = vadd.f32 %v3306_v19, %v15667_v28 }
 0x4a4   :  { %v13642_v42 = vadd.f32 %v3307_v63, %v15668_v39  ;;  %v13645_v45 = vadd.f32 %v3308_v16, %v15669_v8  ;;  %v13648_v40 = vadd.f32 %v3309_v20, %v15670_v59  ;;  %v13651_v32 = vadd.f32 %v3311_v5, %v15671_v62 }
 0x4a5   :  { %v13654_v13 = vadd.f32 %v3312_v60, %v15672_v47  ;;  %v3349_v27 = vmax.f32 %v3317_v37, 0.0  ;;  %v3350_v10 = vmax.f32 %v3318_v6, 0.0  ;;  %v3351_v1 = vmax.f32 %v3319_v11, 0.0 }
 0x4a6   :  { %v3352_v26 = vmax.f32 %v3320_v56, 0.0  ;;  %v3345_v53 = vmax.f32 %v3313_v38, 0.0  ;;  %v3346_v51 = vmax.f32 %v3314_v41, 0.0  ;;  %v3347_v24 = vmax.f32 %v3315_v22, 0.0 }
 0x4a7   :  { %3407 = vst.msk [vmem:[#allocation2 + $0x20] sm:$0xff] %vm1456_vm10, %v3349_v27  ;;  %3408 = vst.msk [vmem:[#allocation2 + $0x28] sm:$0xff] %vm1456_vm10, %v3350_v10  ;;  %v3348_v44 = vmax.f32 %v3316_v48, 0.0  ;;  %v3353_v9 = vmax.f32 %v3321_v49, 0.0  ;;  %v3354_v17 = vmax.f32 %v3322_v33, 0.0  ;;  %v3355_v58 = vmax.f32 %v3323_v61, 0.0 }
 0x4a8   :  { %3409 = vst.msk [vmem:[#allocation2 + $0x30] sm:$0xff] %vm1456_vm10, %v3351_v1  ;;  %3410 = vst.msk [vmem:[#allocation2 + $0x38] sm:$0xff] %vm1456_vm10, %v3352_v26  ;;  %v3356_v35 = vmax.f32 %v3324_v52, 0.0  ;;  %v3357_v31 = vmax.f32 %v3325_v15, 0.0  ;;  %v3358_v43 = vmax.f32 %v3326_v3, 0.0  ;;  %v3359_v25 = vmax.f32 %v3327_v36, 0.0 }
 0x4a9   :  { %3403 = vst.msk [vmem:[#allocation2] sm:$0xff] %vm1456_vm10, %v3345_v53  ;;  %3404 = vst.msk [vmem:[#allocation2 + $0x8] sm:$0xff] %vm1456_vm10, %v3346_v51  ;;  %v3360_v29 = vmax.f32 %v3328_v54, 0.0  ;;  %v3361_v4 = vmax.f32 %v3329_v55, 0.0  ;;  %v3362_v19 = vmax.f32 %v3330_v14, 0.0  ;;  %v3363_v63 = vmax.f32 %v3331_v50, 0.0 }
 0x4aa   :  { %3405 = vst.msk [vmem:[#allocation2 + $0x10] sm:$0xff] %vm1456_vm10, %v3347_v24  ;;  %3406 = vst.msk [vmem:[#allocation2 + $0x18] sm:$0xff] %vm1456_vm10, %v3348_v44  ;;  %v3364_v16 = vmax.f32 %v13621_v0, 0.0  ;;  %v3365_v20 = vmax.f32 %v13624_v30, 0.0  ;;  %v3366_v5 = vmax.f32 %v13627_v23, 0.0  ;;  %v3367_v60 = vmax.f32 %v13630_v18, 0.0 }
 0x4ab   :  { %3411 = vst.msk [vmem:[#allocation2 + $0x40] sm:$0xff] %vm1456_vm10, %v3353_v9  ;;  %3412 = vst.msk [vmem:[#allocation2 + $0x48] sm:$0xff] %vm1456_vm10, %v3354_v17  ;;  %v3368_v38 = vmax.f32 %v13633_v46, 0.0  ;;  %v3369_v41 = vmax.f32 %v13636_v12, 0.0  ;;  %v3370_v22 = vmax.f32 %v13639_v57, 0.0  ;;  %v3371_v48 = vmax.f32 %v13642_v42, 0.0 }
 0x4ac   :  { %3413 = vst.msk [vmem:[#allocation2 + $0x50] sm:$0xff] %vm1456_vm10, %v3355_v58  ;;  %3414 = vst.msk [vmem:[#allocation2 + $0x58] sm:$0xff] %vm1456_vm10, %v3356_v35  ;;  %v3372_v37 = vmax.f32 %v13645_v45, 0.0  ;;  %v3373_v6 = vmax.f32 %v13648_v40, 0.0  ;;  %v3375_v11 = vmax.f32 %v13651_v32, 0.0  ;;  %v3376_v56 = vmax.f32 %v13654_v13, 0.0 }
 0x4ad   :  { %3415 = vst.msk [vmem:[#allocation2 + $0x60] sm:$0xff] %vm1456_vm10, %v3357_v31  ;;  %3416 = vst.msk [vmem:[#allocation2 + $0x68] sm:$0xff] %vm1456_vm10, %v3358_v43  ;;  %v15673_v12 = vld [vmem:[#allocation13_spill] sm:$0xff] }
 0x4ae   :  { %3417 = vst.msk [vmem:[#allocation2 + $0x70] sm:$0xff] %vm1456_vm10, %v3359_v25  ;;  %3418 = vst.msk [vmem:[#allocation2 + $0x78] sm:$0xff] %vm1456_vm10, %v3360_v29  ;;  %v3439_v49 = vld [vmem:[#allocation2 + $0x20] ss:$2 sm:$0xff]  ;;  %v3471_v33 = vld [vmem:[#allocation2 + $0x21] ss:$2 sm:$0xff] }
 0x4af   :  { %3419 = vst.msk [vmem:[#allocation2 + $0x80] sm:$0xff] %vm1456_vm10, %v3361_v4  ;;  %3420 = vst.msk [vmem:[#allocation2 + $0x88] sm:$0xff] %vm1456_vm10, %v3362_v19  ;;  %v3441_v61 = vld [vmem:[#allocation2 + $0x30] ss:$2 sm:$0xff]  ;;  %v3473_v15 = vld [vmem:[#allocation2 + $0x31] ss:$2 sm:$0xff] }
 0x4b0   :  { %3421 = vst.msk [vmem:[#allocation2 + $0x90] sm:$0xff] %vm1456_vm10, %v3363_v63  ;;  %3422 = vst.msk [vmem:[#allocation2 + $0x98] sm:$0xff] %vm1456_vm10, %v3364_v16  ;;  %v3435_v52 = vld [vmem:[#allocation2] ss:$2 sm:$0xff]  ;;  %v10338_v3 = vpack.i.bf16 %v3441_v61, %v3439_v49  ;;  %v4884_v36 = vpack.c.bf16 %v3441_v61, %v3439_v49  ;;  %v3709_v14 = vrot.slane %v3473_v15, 7  ;;  %v3708_v7 = vrot.slane %v3471_v33, 7 }
 0x4b1   :  { %3423 = vst.msk [vmem:[#allocation2 + $0xa0] sm:$0xff] %vm1456_vm10, %v3365_v20  ;;  %3424 = vst.msk [vmem:[#allocation2 + $0xa8] sm:$0xff] %vm1456_vm10, %v3366_v5  ;;  %v3437_v54 = vld [vmem:[#allocation2 + $0x10] ss:$2 sm:$0xff]  ;;  %v13699_v23 = vld [vmem:[#allocation2 + $0x1] ss:$2 sm:$0xff]  ;;  %v10348_v57 = vpack.i.bf16 %v3473_v15, %v3471_v33 }
 0x4b2   :  { %3425 = vst.msk [vmem:[#allocation2 + $0xb0] sm:$0xff] %vm1456_vm10, %v3367_v60  ;;  %3426 = vst.msk [vmem:[#allocation2 + $0xb8] sm:$0xff] %vm1456_vm10, %v3368_v38  ;;  %v3443_v55 = vld [vmem:[#allocation2 + $0x40] ss:$2 sm:$0xff]  ;;  %v10333_v50 = vpack.i.bf16 %v3437_v54, %v3435_v52  ;;  %v4883_v0 = vpack.c.bf16 %v3437_v54, %v3435_v52  ;;  %10339 = vrot.lane.b32.xlu1 %v10338_v3, %s10907_s13  ;;  %v3469_v2 = vld [vmem:[#allocation2 + $0x11] ss:$2 sm:$0xff]  ;;  %v13707_v28 = vsel %vm577_vm2, %v3708_v7, %v3709_v14 }
 0x4b3   :  { %3427 = vst.msk [vmem:[#allocation2 + $0xc0] sm:$0xff] %vm1456_vm10, %v3369_v41  ;;  %3428 = vst.msk [vmem:[#allocation2 + $0xc8] sm:$0xff] %vm1456_vm10, %v3370_v22  ;;  %v3445_v30 = vld [vmem:[#allocation2 + $0x50] ss:$2 sm:$0xff]  ;;  %v3707_v34 = vrot.slane %v3469_v2, 7  ;;  %v3706_v46 = vrot.slane %v13699_v23, 7  ;;  %v10343_v45 = vpack.i.bf16 %v3469_v2, %v13699_v23 }
 0x4b4   :  { %3429 = vst.msk [vmem:[#allocation2 + $0xd0] sm:$0xff] %vm1456_vm10, %v3371_v48  ;;  %3430 = vst.msk [vmem:[#allocation2 + $0xd8] sm:$0xff] %vm1456_vm10, %v3372_v37  ;;  %10334 = vrot.lane.b32.xlu0 %v10333_v50, %s10907_s13  ;;  %9702 = vmatprep.mubr.msk.bf16.mxu0 %vm1456_vm10, %v4883_v0  ;;  %v4885_v18 = vpack.c.bf16 %v3445_v30, %v3443_v55  ;;  %v3447_v21 = vld [vmem:[#allocation2 + $0x60] ss:$2 sm:$0xff]  ;;  %v3479_v42 = vld [vmem:[#allocation2 + $0x61] ss:$2 sm:$0xff]  ;;  %v10353_v58 = vpack.i.bf16 %v3445_v30, %v3443_v55 }
 0x4b5   :  { %3431 = vst.msk [vmem:[#allocation2 + $0xe0] sm:$0xff] %vm1456_vm10, %v3373_v6  ;;  %3433 = vst.msk [vmem:[#allocation2 + $0xf0] sm:$0xff] %vm1456_vm10, %v3375_v11  ;;  %9703 = vmatmul.mubr.msk.bf16.vlgmr.msra.gmra.mrb[68].mxu0 %vm1456_vm10, %v4884_v36  ;;  %v3449_v39 = vld [vmem:[#allocation2 + $0x70] ss:$2 sm:$0xff]  ;;  %v3481_v8 = vld [vmem:[#allocation2 + $0x71] ss:$2 sm:$0xff]  ;;  %v13716_v26 = vsel %vm577_vm2, %v3707_v34, %v3708_v7  ;;  %v13720_v53 = vsel %vm577_vm2, %v3706_v46, %v3707_v34 }
 0x4b6   :  { %3434 = vst.msk [vmem:[#allocation2 + $0xf8] sm:$0xff] %vm1456_vm10, %v3376_v56  ;;  %9706 = vmatprep.mubr.msk.bf16.mxu0 %vm1456_vm10, %v4885_v18  ;;  %v3713_v59 = vrot.slane %v3481_v8, 7  ;;  %v3712_v40 = vrot.slane %v3479_v42, 7  ;;  %v3475_v62 = vld [vmem:[#allocation2 + $0x41] ss:$2 sm:$0xff]  ;;  %10349 = vrot.lane.b32.xlu1 %v10348_v57, %s10908_s14  ;;  %v10358_v51 = vpack.i.bf16 %v3449_v39, %v3447_v21  ;;  %v4886_v29 = vpack.c.bf16 %v3449_v39, %v3447_v21 }
 0x4b7   :  { %v3477_v32 = vld [vmem:[#allocation2 + $0x51] ss:$2 sm:$0xff]  ;;  %v3710_v13 = vrot.slane %v3475_v62, 7  ;;  %v3451_v27 = vld [vmem:[#allocation2 + $0x80] ss:$2 sm:$0xff]  ;;  %v10368_v22 = vpack.i.bf16 %v3481_v8, %v3479_v42 }
 0x4b8   :  { %v3711_v47 = vrot.slane %v3477_v32, 7  ;;  %10344 = vrot.lane.b32.xlu0 %v10343_v45, %s10908_s14  ;;  %v3453_v10 = vld [vmem:[#allocation2 + $0x90] ss:$2 sm:$0xff]  ;;  %v3487_v1 = vld [vmem:[#allocation2 + $0xa1] ss:$2 sm:$0xff]  ;;  %v13724_v17 = vsel %vm577_vm2, %v3712_v40, %v3713_v59  ;;  %v10363_v56 = vpack.i.bf16 %v3477_v32, %v3475_v62 }
 0x4b9   :  { %v3489_v24 = vld [vmem:[#allocation2 + $0xb1] ss:$2 sm:$0xff]  ;;  %v3716_v44 = vrot.slane %v3487_v1, 7  ;;  %v3483_v9 = vld [vmem:[#allocation2 + $0x81] ss:$2 sm:$0xff]  ;;  %v13737_v16 = vsel %vm577_vm2, %v3709_v14, %v3710_v13  ;;  %v4887_v20 = vpack.c.bf16 %v3453_v10, %v3451_v27  ;;  %v10373_v7 = vpack.i.bf16 %v3453_v10, %v3451_v27 }
 0x4ba   :  { %v3717_v35 = vrot.slane %v3489_v24, 7  ;;  %v3485_v31 = vld [vmem:[#allocation2 + $0x91] ss:$2 sm:$0xff]  ;;  %v3714_v43 = vrot.slane %v3483_v9, 7  ;;  %v13728_v25 = vsel %vm577_vm2, %v3711_v47, %v3712_v40  ;;  %10359 = vrot.lane.b32.xlu1 %v10358_v51, %s10907_s13  ;;  %v13733_v63 = vsel %vm577_vm2, %v3710_v13, %v3711_v47  ;;  %v3491_v38 = vld [vmem:[#allocation2 + $0xc1] ss:$2 sm:$0xff] }
 0x4bb   :  { %v3715_v4 = vrot.slane %v3485_v31, 7  ;;  %v3493_v37 = vld [vmem:[#allocation2 + $0xd1] ss:$2 sm:$0xff]  ;;  %v3718_v6 = vrot.slane %v3491_v38, 7  ;;  %v3455_v49 = vld [vmem:[#allocation2 + $0xa0] ss:$2 sm:$0xff]  ;;  %v10388_v18 = vpack.i.bf16 %v3489_v24, %v3487_v1  ;;  %v10383_v34 = vpack.i.bf16 %v3485_v31, %v3483_v9 }
 0x4bc   :  { %v3495_v19 = vld [vmem:[#allocation2 + $0xe1] ss:$2 sm:$0xff]  ;;  %10354 = vrot.lane.b32.xlu0 %v10353_v58, %s10907_s13  ;;  %v13742_v41 = vsel %vm577_vm2, %v3716_v44, %v3717_v35  ;;  %v3457_v33 = vld [vmem:[#allocation2 + $0xb0] ss:$2 sm:$0xff]  ;;  %v3719_v61 = vrot.slane %v3493_v37, 7  ;;  %v13756_v15 = vsel %vm577_vm2, %v3713_v59, %v3714_v43  ;;  %v10403_v45 = vpack.i.bf16 %v3493_v37, %v3491_v38 }
 0x4bd   :  { %v3497_v5 = vld [vmem:[#allocation2 + $0xf1] ss:$2 sm:$0xff]  ;;  %v3720_v60 = vrot.slane %v3495_v19, 7  ;;  %9707 = vmatmul.mubr.msk.bf16.gmra.mrb[72].mxu0 %vm1456_vm10, %v4886_v29  ;;  %v13747_v11 = vsel %vm577_vm2, %v3715_v4, %v3716_v44  ;;  %v13752_v52 = vsel %vm577_vm2, %v3714_v43, %v3715_v4  ;;  %v13767_v54 = vsel %vm577_vm2, %v3717_v35, %v3718_v6  ;;  %v3459_v0 = vld [vmem:[#allocation2 + $0xc0] ss:$2 sm:$0xff] }
 0x4be   :  { %v3721_v48 = vrot.slane %v3497_v5, 7  ;;  %9710 = vmatprep.mubr.msk.bf16.mxu0 %vm1456_vm10, %v4887_v20  ;;  %10369 = vrot.lane.b32.xlu1 %v10368_v22, %s10908_s14  ;;  %v13776_v14 = vsel %vm577_vm2, %v3718_v6, %v3719_v61  ;;  %v10378_v50 = vpack.i.bf16 %v3457_v33, %v3455_v49  ;;  %v3461_v30 = vld [vmem:[#allocation2 + $0xd0] ss:$2 sm:$0xff]  ;;  %v4888_v23 = vpack.c.bf16 %v3457_v33, %v3455_v49 }
 0x4bf   :  { %v13772_v55 = vsel %vm577_vm2, %v3719_v61, %v3720_v60  ;;  %v4889_v2 = vpack.c.bf16 %v3461_v30, %v3459_v0  ;;  %v3465_v21 = vld [vmem:[#allocation2 + $0xf0] ss:$2 sm:$0xff]  ;;  %v10393_v39 = vpack.i.bf16 %v3461_v30, %v3459_v0  ;;  %v10408_v8 = vpack.i.bf16 %v3497_v5, %v3495_v19 }
 0x4c0   :  { %v3737_v3 = vsel %vm577_vm2, %v3721_v48, %v3706_v46  ;;  %v13763_v36 = vsel %vm577_vm2, %v3720_v60, %v3721_v48  ;;  %10364 = vrot.lane.b32.xlu0 %v10363_v56, %s10908_s14  ;;  %v3463_v46 = vld [vmem:[#allocation2 + $0xe0] ss:$2 sm:$0xff]  ;;  %v3502_v59 = vand.u32 63, %v15673_v12 }
 0x4c1   :  { %v10398_v57 = vpack.i.bf16 %v3465_v21, %v3463_v46  ;;  %v4890_v42 = vpack.c.bf16 %v3465_v21, %v3463_v46 }
 0x4c2   :  { %10379 = vrot.lane.b32.xlu1 %v10378_v50, %s10907_s13  ;;  %vm13790_vm14 = vcmp.ge.s32.totalorder %v3502_v59, 1 }
 0x4c3   :  { %v3770_v51 = vsel %vm13790_vm14, %v3737_v3, 0.0 }
 0x4c4   :  { %10374 = vrot.lane.b32.xlu0 %v10373_v7, %s10907_s13 }
 0x4c5   :  { %9711 = vmatmul.mubr.msk.bf16.gmra.mrb[76].mxu0 %vm1456_vm10, %v4888_v23 }
 0x4c6   :  { %9714 = vmatprep.mubr.msk.bf16.mxu0 %vm1456_vm10, %v4889_v2  ;;  %10389 = vrot.lane.b32.xlu1 %v10388_v18, %s10908_s14 }
 0x4c8   :  { %10384 = vrot.lane.b32.xlu0 %v10383_v34, %s10908_s14 }
 0x4ca   :  { %10399 = vrot.lane.b32.xlu1 %v10398_v57, %s10907_s13 }
 0x4cc   :  { %10394 = vrot.lane.b32.xlu0 %v10393_v39, %s10907_s13 }
 0x4cd   :  { %9715 = vmatmul.mubr.msk.bf16.gmra.mrb[80].mxu0 %vm1456_vm10, %v4890_v42 }
 0x4ce   :  { %10409 = vrot.lane.b32.xlu1 %v10408_v8, %s10908_s14 }
 0x4d0   :  { %10404 = vrot.lane.b32.xlu0 %v10403_v45, %s10908_s14 }
 0x524   :  { %v10340_v40 = vpop.permute.xlu1 %10339 }
 0x525   :  { %v10342_v32 = vunpack.i.h.bf16 %v10340_v40  ;;  %v10341_v47 = vunpack.i.l.bf16 %v10340_v40 }
 0x526   :  { %v10335_v62 = vpop.permute.xlu0 %10334 }
 0x527   :  { %v10337_v27 = vunpack.i.h.bf16 %v10335_v62  ;;  %v10336_v10 = vunpack.i.l.bf16 %v10335_v62  ;;  %v3917_v58 = vsel %vm1456_vm10, %v13707_v28, %v10342_v32  ;;  %v3916_v35 = vsel %vm1456_vm10, %v13716_v26, %v10341_v47 }
 0x528   :  { %v10350_v1 = vpop.permute.xlu1 %10349  ;;  %v105_v26 = vadd.s32 64, %v15673_v12 }
 0x529   :  { %v10352_v24 = vunpack.i.h.bf16 %v10350_v1  ;;  %v10351_v44 = vunpack.i.l.bf16 %v10350_v1  ;;  %v3915_v29 = vsel %vm1456_vm10, %v13720_v53, %v10337_v27  ;;  %v3914_v4 = vsel %vm1456_vm10, %v3770_v51, %v10336_v10 }
 0x52a   :  { %v10345_v9 = vpop.permute.xlu0 %10344  ;;  %v3558_v50 = vand.u32 63, %v105_v26 }
 0x52b   :  { %v10347_v31 = vunpack.i.h.bf16 %v10345_v9  ;;  %v10346_v43 = vunpack.i.l.bf16 %v10345_v9  ;;  %v3932_v19 = vsel %vm2249_vm12, %v3916_v35, %v10351_v44  ;;  %v3933_v20 = vsel %vm2249_vm12, %v3917_v58, %v10352_v24 }
 0x52c   :  { %v3947_v5 = vpack.c.bf16 %v3933_v20, %v3932_v19  ;;  %v10360_v28 = vpop.permute.xlu1 %10359  ;;  %vm13822_vm15 = vcmp.ge.s32.totalorder %v3558_v50, 1 }
 0x52d   :  { %v3930_v60 = vsel %vm2249_vm12, %v3914_v4, %v10346_v43  ;;  %v3931_v38 = vsel %vm2249_vm12, %v3915_v29, %v10347_v31  ;;  %v10362_v37 = vunpack.i.h.bf16 %v10360_v28  ;;  %v10361_v6 = vunpack.i.l.bf16 %v10360_v28 }
 0x52e   :  { %v3946_v22 = vpack.c.bf16 %v3931_v38, %v3930_v60  ;;  %v10355_v48 = vpop.permute.xlu0 %10354  ;;  %v3778_v62 = vsel %vm13822_vm15, %v13756_v15, 0.0 }
 0x52f   :  { %v10357_v56 = vunpack.i.h.bf16 %v10355_v48  ;;  %v10356_v53 = vunpack.i.l.bf16 %v10355_v48  ;;  %v3921_v0 = vsel %vm1456_vm10, %v13724_v17, %v10362_v37  ;;  %v3920_v30 = vsel %vm1456_vm10, %v13728_v25, %v10361_v6 }
 0x530   :  { %9656 = vmatprep.mubr.msk.bf16.mxu1 %vm2316_vm13, %v3946_v22  ;;  %v10370_v49 = vpop.permute.xlu1 %10369 }
 0x531   :  { %9657 = vmatmul.mubr.msk.bf16.vlgmr.msra.gmra.mrb[28].mxu1 %vm2316_vm13, %v3947_v5  ;;  %v10372_v33 = vunpack.i.h.bf16 %v10370_v49  ;;  %v10371_v61 = vunpack.i.l.bf16 %v10370_v49  ;;  %v3919_v2 = vsel %vm1456_vm10, %v13733_v63, %v10357_v56  ;;  %v3918_v18 = vsel %vm1456_vm10, %v13737_v16, %v10356_v53 }
 0x532   :  { %v10365_v3 = vpop.permute.xlu0 %10364 }
 0x533   :  { %v10367_v7 = vunpack.i.h.bf16 %v10365_v3  ;;  %v10366_v23 = vunpack.i.l.bf16 %v10365_v3  ;;  %v3936_v34 = vsel %vm2249_vm12, %v3920_v30, %v10371_v61  ;;  %v3937_v46 = vsel %vm2249_vm12, %v3921_v0, %v10372_v33 }
 0x534   :  { %v3949_v21 = vpack.c.bf16 %v3937_v46, %v3936_v34  ;;  %v10380_v39 = vpop.permute.xlu1 %10379 }
 0x535   :  { %v3934_v57 = vsel %vm2249_vm12, %v3918_v18, %v10366_v23  ;;  %v3935_v17 = vsel %vm2249_vm12, %v3919_v2, %v10367_v7  ;;  %v10382_v8 = vunpack.i.h.bf16 %v10380_v39  ;;  %v10381_v45 = vunpack.i.l.bf16 %v10380_v39 }
 0x536   :  { %v3948_v42 = vpack.c.bf16 %v3935_v17, %v3934_v57  ;;  %v10375_v25 = vpop.permute.xlu0 %10374 }
 0x537   :  { %v10377_v63 = vunpack.i.h.bf16 %v10375_v25  ;;  %v10376_v16 = vunpack.i.l.bf16 %v10375_v25  ;;  %v3925_v10 = vsel %vm1456_vm10, %v13742_v41, %v10382_v8  ;;  %v3924_v1 = vsel %vm1456_vm10, %v13747_v11, %v10381_v45 }
 0x538   :  { %9660 = vmatprep.mubr.msk.bf16.mxu1 %vm2316_vm13, %v3948_v42  ;;  %v10390_v40 = vpop.permute.xlu1 %10389 }
 0x539   :  { %9661 = vmatmul.mubr.msk.bf16.gmra.mrb[32].mxu1 %vm2316_vm13, %v3949_v21  ;;  %v10392_v32 = vunpack.i.h.bf16 %v10390_v40  ;;  %v10391_v47 = vunpack.i.l.bf16 %v10390_v40  ;;  %v3923_v44 = vsel %vm1456_vm10, %v13752_v52, %v10377_v63  ;;  %v3922_v9 = vsel %vm1456_vm10, %v3778_v62, %v10376_v16 }
 0x53a   :  { %v10385_v27 = vpop.permute.xlu0 %10384 }
 0x53b   :  { %v10387_v51 = vunpack.i.h.bf16 %v10385_v27  ;;  %v10386_v24 = vunpack.i.l.bf16 %v10385_v27  ;;  %v3940_v58 = vsel %vm2249_vm12, %v3924_v1, %v10391_v47  ;;  %v3941_v15 = vsel %vm2249_vm12, %v3925_v10, %v10392_v32 }
 0x53c   :  { %v3951_v35 = vpack.c.bf16 %v3941_v15, %v3940_v58  ;;  %v10400_v41 = vpop.permute.xlu1 %10399 }
 0x53d   :  { %v3938_v31 = vsel %vm2249_vm12, %v3922_v9, %v10386_v24  ;;  %v3939_v43 = vsel %vm2249_vm12, %v3923_v44, %v10387_v51  ;;  %v10402_v11 = vunpack.i.h.bf16 %v10400_v41  ;;  %v10401_v19 = vunpack.i.l.bf16 %v10400_v41 }
 0x53e   :  { %v3950_v29 = vpack.c.bf16 %v3939_v43, %v3938_v31  ;;  %v10395_v4 = vpop.permute.xlu0 %10394 }
 0x53f   :  { %v10397_v20 = vunpack.i.h.bf16 %v10395_v4  ;;  %v10396_v5 = vunpack.i.l.bf16 %v10395_v4  ;;  %v3929_v22 = vsel %vm1456_vm10, %v13763_v36, %v10402_v11  ;;  %v3928_v48 = vsel %vm1456_vm10, %v13772_v55, %v10401_v19 }
 0x540   :  { %9664 = vmatprep.mubr.msk.bf16.mxu1 %vm2316_vm13, %v3950_v29  ;;  %v10410_v52 = vpop.permute.xlu1 %10409 }
 0x541   :  { %9665 = vmatmul.mubr.msk.bf16.gmra.mrb[36].mxu1 %vm2316_vm13, %v3951_v35  ;;  %v10412_v60 = vunpack.i.h.bf16 %v10410_v52  ;;  %v10411_v38 = vunpack.i.l.bf16 %v10410_v52  ;;  %v3927_v6 = vsel %vm1456_vm10, %v13776_v14, %v10397_v20  ;;  %v3926_v56 = vsel %vm1456_vm10, %v13767_v54, %v10396_v5 }
 0x542   :  { %v10405_v28 = vpop.permute.xlu0 %10404 }
 0x543   :  { %v10407_v26 = vunpack.i.h.bf16 %v10405_v28  ;;  %v10406_v37 = vunpack.i.l.bf16 %v10405_v28  ;;  %v3944_v53 = vsel %vm2249_vm12, %v3928_v48, %v10411_v38  ;;  %v3945_v49 = vsel %vm2249_vm12, %v3929_v22, %v10412_v60 }
 0x544   :  { %v3953_v33 = vpack.c.bf16 %v3945_v49, %v3944_v53 }
 0x545   :  { %v3942_v61 = vsel %vm2249_vm12, %v3926_v56, %v10406_v37  ;;  %v3943_v36 = vsel %vm2249_vm12, %v3927_v6, %v10407_v26 }
 0x546   :  { %v3952_v3 = vpack.c.bf16 %v3943_v36, %v3942_v61 }
 0x548   :  { %9668 = vmatprep.mubr.msk.bf16.mxu1 %vm2316_vm13, %v3952_v3 }
 0x549   :  { %9669 = vmatmul.mubr.msk.bf16.gmra.mrb[40].mxu1 %vm2316_vm13, %v3953_v33 }
 0x588   :  { %v9704_v55 = vpop.f32.mrb[68].mxu0 }
 0x589   :  { %v4955_v50 = vpop.f32.mrb[69].mxu0  ;;  %v5021_v23 = vsel %vm2249_vm12, %v9704_v55, 0.0 }
 0x58a   :  { %v9705_v14 = vpop.f32.mrb[70].mxu0  ;;  %v5018_v54 = vsel %vm2249_vm12, %v4955_v50, 0.0 }
 0x58b   :  { %v4958_v0 = vpop.f32.mrb[71].mxu0  ;;  %v5023_v18 = vsel %vm2249_vm12, %v9705_v14, 0.0 }
 0x58c   :  { %v5019_v30 = vsel %vm2249_vm12, %v4958_v0, 0.0 }
 0x58d   :  { %v5020_v7 = vadd.f32 %v5019_v30, %v5018_v54 }
 0x58f   :  { %v5022_v2 = vadd.f32 %v5021_v23, %v5020_v7 }
 0x590   :  { %v9708_v34 = vpop.f32.mrb[72].mxu0 }
 0x591   :  { %v4971_v46 = vpop.f32.mrb[73].mxu0  ;;  %v5024_v21 = vadd.f32 %v5023_v18, %v5022_v2  ;;  %v5029_v45 = vsel %vm2249_vm12, %v9708_v34, 0.0 }
 0x592   :  { %v5025_v57 = vsel %vm2249_vm12, %v4971_v46, 0.0  ;;  %v9709_v17 = vpop.f32.mrb[74].mxu0 }
 0x593   :  { %v5026_v39 = vadd.f32 %v5025_v57, %v5024_v21  ;;  %v4974_v42 = vpop.f32.mrb[75].mxu0  ;;  %v5031_v16 = vsel %vm2249_vm12, %v9709_v17, 0.0 }
 0x594   :  { %v5027_v25 = vsel %vm2249_vm12, %v4974_v42, 0.0 }
 0x595   :  { %v5028_v8 = vadd.f32 %v5027_v25, %v5026_v39 }
 0x597   :  { %v5030_v63 = vadd.f32 %v5029_v45, %v5028_v8 }
 0x598   :  { %v9712_v40 = vpop.f32.mrb[76].mxu0 }
 0x599   :  { %v4987_v62 = vpop.f32.mrb[77].mxu0  ;;  %v5032_v32 = vadd.f32 %v5031_v16, %v5030_v63  ;;  %v5037_v44 = vsel %vm2249_vm12, %v9712_v40, 0.0 }
 0x59a   :  { %v5033_v47 = vsel %vm2249_vm12, %v4987_v62, 0.0  ;;  %v9713_v27 = vpop.f32.mrb[78].mxu0 }
 0x59b   :  { %v5034_v10 = vadd.f32 %v5033_v47, %v5032_v32  ;;  %v4990_v1 = vpop.f32.mrb[79].mxu0  ;;  %v5039_v58 = vsel %vm2249_vm12, %v9713_v27, 0.0 }
 0x59c   :  { %v5035_v51 = vsel %vm2249_vm12, %v4990_v1, 0.0 }
 0x59d   :  { %v5036_v24 = vadd.f32 %v5035_v51, %v5034_v10 }
 0x59f   :  { %v5038_v9 = vadd.f32 %v5037_v44, %v5036_v24 }
 0x5a0   :  { %v9716_v15 = vpop.f32.mrb[80].mxu0 }
 0x5a1   :  { %v5003_v35 = vpop.f32.mrb[81].mxu0  ;;  %v5040_v31 = vadd.f32 %v5039_v58, %v5038_v9  ;;  %v5045_v20 = vsel %vm2249_vm12, %v9716_v15, 0.0 }
 0x5a2   :  { %v5041_v43 = vsel %vm2249_vm12, %v5003_v35, 0.0  ;;  %v9717_v41 = vpop.f32.mrb[82].mxu0 }
 0x5a3   :  { %v5042_v29 = vadd.f32 %v5041_v43, %v5040_v31  ;;  %v5006_v4 = vpop.f32.mrb[83].mxu0  ;;  %v5047_v52 = vsel %vm2249_vm12, %v9717_v41, 0.0 }
 0x5a4   :  { %v5043_v11 = vsel %vm2249_vm12, %v5006_v4, 0.0 }
 0x5a5   :  { %v5044_v19 = vadd.f32 %v5043_v11, %v5042_v29 }
 0x5a7   :  { %v5046_v5 = vadd.f32 %v5045_v20, %v5044_v19 }
 0x5a9   :  { %v5048_v60 = vadd.f32 %v5047_v52, %v5046_v5 }
 0x5ab   :  { %v5049_v38 = vrot.slane %v5048_v60, 4 }
 0x5ad   :  { %v5050_v28 = vadd.f32 %v5049_v38, %v5048_v60 }
 0x5af   :  { %v5051_v22 = vrot.slane %v5050_v28, 2 }
 0x5b1   :  { %v5052_v48 = vadd.f32 %v5051_v22, %v5050_v28 }
 0x5b3   :  { %v5053_v26 = vrot.slane %v5052_v48, 1 }
 0x5b5   :  { %v5054_v37 = vadd.f32 %v5053_v26, %v5052_v48 }
 0x5b7   :  { %v5055_v6 = vmul.f32 0.0078125, %v5054_v37 }
 0x5b9   :  { %v13874_v56 = vsub.f32 %v4955_v50, %v5055_v6  ;;  %v13876_v53 = vsub.f32 %v4958_v0, %v5055_v6  ;;  %v13878_v49 = vsub.f32 %v9704_v55, %v5055_v6  ;;  %v13880_v33 = vsub.f32 %v9705_v14, %v5055_v6 }
 0x5ba   :  { %v13882_v61 = vsub.f32 %v4971_v46, %v5055_v6  ;;  %v13884_v36 = vsub.f32 %v4974_v42, %v5055_v6  ;;  %v13886_v3 = vsub.f32 %v9708_v34, %v5055_v6  ;;  %v13888_v54 = vsub.f32 %v9709_v17, %v5055_v6 }
 0x5bb   :  { %v13890_v30 = vsub.f32 %v4987_v62, %v5055_v6  ;;  %v13892_v7 = vsub.f32 %v4990_v1, %v5055_v6  ;;  %v13894_v50 = vsub.f32 %v9712_v40, %v5055_v6  ;;  %v13896_v0 = vsub.f32 %v9713_v27, %v5055_v6 }
 0x5bc   :  { %v13898_v55 = vsub.f32 %v5003_v35, %v5055_v6  ;;  %v13900_v14 = vsub.f32 %v5006_v4, %v5055_v6  ;;  %v13902_v23 = vsub.f32 %v9716_v15, %v5055_v6  ;;  %v13904_v2 = vsub.f32 %v9717_v41, %v5055_v6 }
 0x5bd   :  { %v5072_v18 = vmul.f32 %v13874_v56, %v13874_v56  ;;  %v5073_v34 = vmul.f32 %v13876_v53, %v13876_v53  ;;  %v5074_v46 = vmul.f32 %v13878_v49, %v13878_v49  ;;  %v5075_v21 = vmul.f32 %v13880_v33, %v13880_v33 }
 0x5be   :  { %v5076_v42 = vmul.f32 %v13882_v61, %v13882_v61  ;;  %v5077_v45 = vmul.f32 %v13884_v36, %v13884_v36  ;;  %v5078_v40 = vmul.f32 %v13886_v3, %v13886_v3  ;;  %v5079_v47 = vmul.f32 %v13888_v54, %v13888_v54 }
 0x5bf   :  { %v5088_v57 = vsel %vm2249_vm12, %v5072_v18, 0.0  ;;  %v5089_v17 = vsel %vm2249_vm12, %v5073_v34, 0.0  ;;  %v5091_v25 = vsel %vm2249_vm12, %v5074_v46, 0.0  ;;  %v5093_v63 = vsel %vm2249_vm12, %v5075_v21, 0.0 }
 0x5c0   :  { %v5090_v39 = vadd.f32 %v5089_v17, %v5088_v57  ;;  %v5095_v62 = vsel %vm2249_vm12, %v5076_v42, 0.0  ;;  %v5097_v27 = vsel %vm2249_vm12, %v5077_v45, 0.0  ;;  %v5080_v1 = vmul.f32 %v13890_v30, %v13890_v30  ;;  %v3401_v45 = vld [vmem:[%s15401_s2 + $0xa] sm:$0x1] }
 0x5c1   :  { %v5099_v51 = vsel %vm2249_vm12, %v5078_v40, 0.0  ;;  %v5081_v44 = vmul.f32 %v13892_v7, %v13892_v7  ;;  %v5101_v9 = vsel %vm2249_vm12, %v5079_v47, 0.0  ;;  %v5082_v15 = vmul.f32 %v13894_v50, %v13894_v50  ;;  %v15678_v40 = vld [vmem:[#allocation15_spill] sm:$0xff] }
 0x5c2   :  { %v5092_v8 = vadd.f32 %v5091_v25, %v5090_v39  ;;  %v5103_v35 = vsel %vm2249_vm12, %v5080_v1, 0.0  ;;  %v5083_v43 = vmul.f32 %v13896_v0, %v13896_v0  ;;  %v5084_v4 = vmul.f32 %v13898_v55, %v13898_v55 }
 0x5c3   :  { %v5105_v41 = vsel %vm2249_vm12, %v5081_v44, 0.0  ;;  %v5107_v11 = vsel %vm2249_vm12, %v5082_v15, 0.0  ;;  %v5085_v20 = vmul.f32 %v13900_v14, %v13900_v14  ;;  %v5086_v60 = vmul.f32 %v13902_v23, %v13902_v23 }
 0x5c4   :  { %v5094_v16 = vadd.f32 %v5093_v63, %v5092_v8  ;;  %v5109_v5 = vsel %vm2249_vm12, %v5083_v43, 0.0  ;;  %v5111_v38 = vsel %vm2249_vm12, %v5084_v4, 0.0  ;;  %v5087_v22 = vmul.f32 %v13904_v2, %v13904_v2 }
 0x5c5   :  { %v5113_v48 = vsel %vm2249_vm12, %v5085_v20, 0.0  ;;  %v5115_v37 = vsel %vm2249_vm12, %v5086_v60, 0.0 }
 0x5c6   :  { %v5096_v32 = vadd.f32 %v5095_v62, %v5094_v16  ;;  %v5117_v18 = vsel %vm2249_vm12, %v5087_v22, 0.0 }
 0x5c8   :  { %v5098_v10 = vadd.f32 %v5097_v27, %v5096_v32 }
 0x5ca   :  { %v5100_v24 = vadd.f32 %v5099_v51, %v5098_v10 }
 0x5cc   :  { %v5102_v58 = vadd.f32 %v5101_v9, %v5100_v24 }
 0x5ce   :  { %v5104_v31 = vadd.f32 %v5103_v35, %v5102_v58 }
 0x5d0   :  { %v5106_v29 = vadd.f32 %v5105_v41, %v5104_v31 }
 0x5d2   :  { %v5108_v19 = vadd.f32 %v5107_v11, %v5106_v29 }
 0x5d4   :  { %v5110_v52 = vadd.f32 %v5109_v5, %v5108_v19 }
 0x5d6   :  { %v5112_v28 = vadd.f32 %v5111_v38, %v5110_v52 }
 0x5d8   :  { %v5114_v26 = vadd.f32 %v5113_v48, %v5112_v28 }
 0x5da   :  { %v5116_v6 = vadd.f32 %v5115_v37, %v5114_v26 }
 0x5dc   :  { %v5118_v34 = vadd.f32 %v5117_v18, %v5116_v6 }
 0x5de   :  { %v5119_v46 = vrot.slane %v5118_v34, 4 }
 0x5e0   :  { %v5120_v21 = vadd.f32 %v5119_v46, %v5118_v34 }
 0x5e2   :  { %v5121_v57 = vrot.slane %v5120_v21, 2 }
 0x5e4   :  { %v5122_v17 = vadd.f32 %v5121_v57, %v5120_v21 }
 0x5e6   :  { %v5123_v39 = vrot.slane %v5122_v17, 1 }
 0x5e8   :  { %v5124_v42 = vadd.f32 %v5123_v39, %v5122_v17 }
 0x5ea   :  { %v5125_v25 = vmul.f32 0.0078125, %v5124_v42 }
 0x5ec   :  { %v5126_v8 = vadd.f32 1e-05, %v5125_v25 }
 0x5ee   :  { %10787 = vrsqrt.f32 %v5126_v8 }
 0x5f8   :  { %v10788_v63 = vpop.eup %10787 }
 0x5f9   :  { %v5128_v16 = vmul.f32 %v10788_v63, %v3401_v45 }
 0x5fb   :  { %v13958_v62 = vrot.slane %v5128_v16, %v15678_v40  ;;  %v10601_v16 = vld [vmem:[#allocation7 + $0x40] sm:$0xff]  }
 0x5fc   :  { %9672 = vmatprep.subr.bf16.mxu1 %v10601_v16 }
 0x5fd   :  { %v13962_v32 = vmul.f32 %v13958_v62, %v13878_v49  ;;  %v13966_v47 = vmul.f32 %v13958_v62, %v13880_v33  ;;  %v13970_v27 = vmul.f32 %v13958_v62, %v13882_v61  ;;  %v13974_v10 = vmul.f32 %v13958_v62, %v13884_v36  ;;  %9673 = vmatpush3.bf16.msra.mxu1 %v10601_v16 }
 0x5fe   :  { %v13978_v1 = vmul.f32 %v13958_v62, %v13886_v3  ;;  %v13982_v49 = vmul.f32 %v13958_v62, %v13888_v54  ;;  %v13986_v33 = vmul.f32 %v13958_v62, %v13890_v30  ;;  %v13990_v61 = vmul.f32 %v13958_v62, %v13892_v7 }
 0x5ff   :  { %v13994_v36 = vmul.f32 %v13958_v62, %v13894_v50  ;;  %v13998_v3 = vmul.f32 %v13958_v62, %v13896_v0  ;;  %v14002_v54 = vmul.f32 %v13958_v62, %v13898_v55  ;;  %v14006_v30 = vmul.f32 %v13958_v62, %v13900_v14 }
 0x600   :  { %v14010_v7 = vmul.f32 %v13958_v62, %v13902_v23  ;;  %v14014_v50 = vmul.f32 %v13958_v62, %v13904_v2 }
 0x604   :  { %v14016_v51 = vpop.f32.mrb[28].mxu1 }
 0x605   :  { %v14018_v0 = vpop.f32.mrb[29].mxu1  ;;  %v4096_v9 = vsel %vm2249_vm12, %v14016_v51, 0.0 }
 0x606   :  { %v14020_v24 = vpop.f32.mrb[30].mxu1  ;;  %v4093_v14 = vsel %vm2249_vm12, %v14018_v0, 0.0 }
 0x607   :  { %v14022_v55 = vpop.f32.mrb[31].mxu1  ;;  %v4098_v58 = vsel %vm2249_vm12, %v14020_v24, 0.0 }
 0x608   :  { %v4094_v44 = vsel %vm2249_vm12, %v14022_v55, 0.0 }
 0x609   :  { %v4095_v23 = vadd.f32 %v4094_v44, %v4093_v14  ;;  %v10602_v14 = vld [vmem:[#allocation7 + $0x48] sm:$0xff]  }
 0x60a   :  { %9674 = vmatprep.subr.bf16.mxu1 %v10602_v14 }
 0x60b   :  { %v4097_v2 = vadd.f32 %v4096_v9, %v4095_v23  ;;  %9675 = vmatpush3.bf16.msra.mxu1 %v10602_v14 }
 0x60c   :  { %v14032_v15 = vpop.f32.mrb[32].mxu1 }
 0x60d   :  { %v4046_v35 = vpop.f32.mrb[33].mxu1  ;;  %v4099_v31 = vadd.f32 %v4098_v58, %v4097_v2  ;;  %v4104_v20 = vsel %vm2249_vm12, %v14032_v15, 0.0  ;;  %v10603_v58 = vld [vmem:[#allocation7 + $0x50] sm:$0xff]  }
 0x60e   :  { %v4100_v43 = vsel %vm2249_vm12, %v4046_v35, 0.0  ;;  %v9663_v41 = vpop.f32.mrb[34].mxu1  ;;  %9676 = vmatprep.subr.bf16.mxu1 %v10603_v58 }
 0x60f   :  { %v4101_v29 = vadd.f32 %v4100_v43, %v4099_v31  ;;  %v4049_v4 = vpop.f32.mrb[35].mxu1  ;;  %v4106_v52 = vsel %vm2249_vm12, %v9663_v41, 0.0  ;;  %9677 = vmatpush3.bf16.msra.mxu1 %v10603_v58 }
 0x610   :  { %v4102_v11 = vsel %vm2249_vm12, %v4049_v4, 0.0 }
 0x611   :  { %v4103_v19 = vadd.f32 %v4102_v11, %v4101_v29  ;;  %v10604_v29 = vld [vmem:[#allocation7 + $0x58] sm:$0xff]  }
 0x612   :  { %9678 = vmatprep.subr.bf16.mxu1 %v10604_v29 }
 0x613   :  { %v4105_v5 = vadd.f32 %v4104_v20, %v4103_v19  ;;  %v10605_v20 = vld [vmem:[#allocation7 + $0x60] sm:$0xff]   ;;  %9679 = vmatpush3.bf16.msra.mxu1 %v10604_v29 }
 0x614   :  { %v9666_v60 = vpop.f32.mrb[36].mxu1  ;;  %9680 = vmatprep.subr.bf16.mxu1 %v10605_v20 }
 0x615   :  { %v4062_v38 = vpop.f32.mrb[37].mxu1  ;;  %v4107_v28 = vadd.f32 %v4106_v52, %v4105_v5  ;;  %v4112_v34 = vsel %vm2249_vm12, %v9666_v60, 0.0 }
 0x616   :  { %v4108_v22 = vsel %vm2249_vm12, %v4062_v38, 0.0  ;;  %v9667_v48 = vpop.f32.mrb[38].mxu1 }
 0x617   :  { %v4109_v26 = vadd.f32 %v4108_v22, %v4107_v28  ;;  %v4065_v37 = vpop.f32.mrb[39].mxu1  ;;  %v4114_v21 = vsel %vm2249_vm12, %v9667_v48, 0.0  ;;  %9681 = vmatpush3.bf16.msra.mxu1 %v10605_v20 }
 0x618   :  { %v4110_v6 = vsel %vm2249_vm12, %v4065_v37, 0.0 }
 0x619   :  { %v4111_v18 = vadd.f32 %v4110_v6, %v4109_v26 }
 0x61b   :  { %v4113_v46 = vadd.f32 %v4112_v34, %v4111_v18 }
 0x61c   :  { %v9670_v57 = vpop.f32.mrb[40].mxu1 }
 0x61d   :  { %v4078_v17 = vpop.f32.mrb[41].mxu1  ;;  %v4115_v39 = vadd.f32 %v4114_v21, %v4113_v46  ;;  %v4120_v23 = vsel %vm2249_vm12, %v9670_v57, 0.0 }
 0x61e   :  { %v4116_v42 = vsel %vm2249_vm12, %v4078_v17, 0.0  ;;  %v9671_v25 = vpop.f32.mrb[42].mxu1 }
 0x61f   :  { %v4117_v8 = vadd.f32 %v4116_v42, %v4115_v39  ;;  %v4081_v45 = vpop.f32.mrb[43].mxu1  ;;  %v4122_v2 = vsel %vm2249_vm12, %v9671_v25, 0.0 }
 0x620   :  { %v4118_v63 = vsel %vm2249_vm12, %v4081_v45, 0.0 }
 0x621   :  { %v4119_v44 = vadd.f32 %v4118_v63, %v4117_v8 }
 0x623   :  { %v4121_v9 = vadd.f32 %v4120_v23, %v4119_v44 }
 0x625   :  { %v4123_v31 = vadd.f32 %v4122_v2, %v4121_v9 }
 0x627   :  { %v4124_v43 = vrot.slane %v4123_v31, 4 }
 0x629   :  { %v4125_v11 = vadd.f32 %v4124_v43, %v4123_v31 }
 0x62b   :  { %v4126_v19 = vrot.slane %v4125_v11, 2 }
 0x62d   :  { %v4127_v5 = vadd.f32 %v4126_v19, %v4125_v11 }
 0x62f   :  { %v4128_v52 = vrot.slane %v4127_v5, 1 }
 0x631   :  { %v4129_v28 = vadd.f32 %v4128_v52, %v4127_v5 }
 0x633   :  { %v4131_v22 = vmul.f32 0.0078125, %v4129_v28 }
 0x635   :  { %v14048_v26 = vsub.f32 %v14018_v0, %v4131_v22  ;;  %v14051_v6 = vsub.f32 %v14022_v55, %v4131_v22  ;;  %v14054_v18 = vsub.f32 %v14016_v51, %v4131_v22  ;;  %v14057_v34 = vsub.f32 %v14020_v24, %v4131_v22 }
 0x636   :  { %v14059_v46 = vsub.f32 %v4046_v35, %v4131_v22  ;;  %v14061_v21 = vsub.f32 %v4049_v4, %v4131_v22  ;;  %v14064_v39 = vsub.f32 %v14032_v15, %v4131_v22  ;;  %v14066_v42 = vsub.f32 %v9663_v41, %v4131_v22 }
 0x637   :  { %v14068_v0 = vsub.f32 %v4062_v38, %v4131_v22  ;;  %v14070_v8 = vsub.f32 %v4065_v37, %v4131_v22  ;;  %v14072_v55 = vsub.f32 %v9666_v60, %v4131_v22  ;;  %v14074_v51 = vsub.f32 %v9667_v48, %v4131_v22 }
 0x638   :  { %v14076_v63 = vsub.f32 %v4078_v17, %v4131_v22  ;;  %v14078_v24 = vsub.f32 %v4081_v45, %v4131_v22  ;;  %v14080_v35 = vsub.f32 %v9670_v57, %v4131_v22  ;;  %v14082_v4 = vsub.f32 %v9671_v25, %v4131_v22 }
 0x639   :  { %v4148_v15 = vmul.f32 %v14048_v26, %v14048_v26  ;;  %v4149_v41 = vmul.f32 %v14051_v6, %v14051_v6  ;;  %v4150_v60 = vmul.f32 %v14054_v18, %v14054_v18  ;;  %v4151_v38 = vmul.f32 %v14057_v34, %v14057_v34 }
 0x63a   :  { %v4152_v17 = vmul.f32 %v14059_v46, %v14059_v46  ;;  %v4153_v16 = vmul.f32 %v14061_v21, %v14061_v21  ;;  %v4154_v23 = vmul.f32 %v14064_v39, %v14064_v39  ;;  %v4155_v58 = vmul.f32 %v14066_v42, %v14066_v42 }
 0x63b   :  { %v4164_v48 = vsel %vm2249_vm12, %v4148_v15, 0.0  ;;  %v4165_v37 = vsel %vm2249_vm12, %v4149_v41, 0.0  ;;  %v4167_v25 = vsel %vm2249_vm12, %v4150_v60, 0.0  ;;  %v4169_v14 = vsel %vm2249_vm12, %v4151_v38, 0.0 }
 0x63c   :  { %v4166_v57 = vadd.f32 %v4165_v37, %v4164_v48  ;;  %v4171_v9 = vsel %vm2249_vm12, %v4152_v17, 0.0  ;;  %v4173_v31 = vsel %vm2249_vm12, %v4153_v16, 0.0  ;;  %v4156_v29 = vmul.f32 %v14068_v0, %v14068_v0 }
 0x63d   :  { %v4175_v11 = vsel %vm2249_vm12, %v4154_v23, 0.0  ;;  %v4157_v20 = vmul.f32 %v14070_v8, %v14070_v8  ;;  %v4177_v5 = vsel %vm2249_vm12, %v4155_v58, 0.0  ;;  %v4158_v28 = vmul.f32 %v14072_v55, %v14072_v55 }
 0x63e   :  { %v4168_v45 = vadd.f32 %v4167_v25, %v4166_v57  ;;  %v4179_v22 = vsel %vm2249_vm12, %v4156_v29, 0.0  ;;  %v4159_v41 = vmul.f32 %v14074_v51, %v14074_v51  ;;  %v4160_v48 = vmul.f32 %v14076_v63, %v14076_v63 }
 0x63f   :  { %v4181_v60 = vsel %vm2249_vm12, %v4157_v20, 0.0  ;;  %v4183_v37 = vsel %vm2249_vm12, %v4158_v28, 0.0  ;;  %v4161_v17 = vmul.f32 %v14078_v24, %v14078_v24  ;;  %v4162_v16 = vmul.f32 %v14080_v35, %v14080_v35 }
 0x640   :  { %v4170_v44 = vadd.f32 %v4169_v14, %v4168_v45  ;;  %v4185_v25 = vsel %vm2249_vm12, %v4159_v41, 0.0  ;;  %v4187_v14 = vsel %vm2249_vm12, %v4160_v48, 0.0  ;;  %v4163_v23 = vmul.f32 %v14082_v4, %v14082_v4  ;;  %v3397_v41 = vld [vmem:[%s15401_s2 + $0x6] sm:$0x1] }
 0x641   :  { %v4191_v58 = vsel %vm2249_vm12, %v4162_v16, 0.0 }
 0x642   :  { %v4172_v2 = vadd.f32 %v4171_v9, %v4170_v44  ;;  %v4189_v9 = vsel %vm2249_vm12, %v4161_v17, 0.0 }
 0x644   :  { %v4174_v43 = vadd.f32 %v4173_v31, %v4172_v2 }
 0x646   :  { %v4176_v19 = vadd.f32 %v4175_v11, %v4174_v43  ;;  %v4193_v43 = vsel %vm2249_vm12, %v4163_v23, 0.0 }
 0x648   :  { %v4178_v52 = vadd.f32 %v4177_v5, %v4176_v19 }
 0x64a   :  { %v4180_v15 = vadd.f32 %v4179_v22, %v4178_v52 }
 0x64c   :  { %v4182_v38 = vadd.f32 %v4181_v60, %v4180_v15 }
 0x64e   :  { %v4184_v57 = vadd.f32 %v4183_v37, %v4182_v38  ;;  %v14136_v38 = vadd.s32 56, %v15673_v12 }
 0x650   :  { %v4186_v45 = vadd.f32 %v4185_v25, %v4184_v57  ;;  %v14144_v57 = vld [vmem:[%s15401_s2 + $0x7] ss:$0 sm:$0xff]  ;;  %v3551_v17 = vand.u32 63, %v14136_v38 }
 0x652   :  { %v4188_v44 = vadd.f32 %v4187_v14, %v4186_v45  ;;  %vm14192_vm1 = vcmp.le.s32.totalorder %v3551_v17, 62 }
 0x654   :  { %v4190_v2 = vadd.f32 %v4189_v9, %v4188_v44 }
 0x656   :  { %v4192_v31 = vadd.f32 %v4191_v58, %v4190_v2 }
 0x658   :  { %v4194_v29 = vadd.f32 %v4193_v43, %v4192_v31 }
 0x65a   :  { %v4195_v11 = vrot.slane %v4194_v29, 4 }
 0x65c   :  { %v4196_v19 = vadd.f32 %v4195_v11, %v4194_v29  ;;  %v15679_v11 = vld [vmem:[#allocation14_spill] sm:$0xff] }
 0x65e   :  { %v4197_v20 = vrot.slane %v4196_v19, 2 }
 0x660   :  { %v4198_v5 = vadd.f32 %v4197_v20, %v4196_v19  ;;  %v3607_v19 = vand.u32 63, %v15679_v11 }
 0x662   :  { %v4199_v52 = vrot.slane %v4198_v5, 1  ;;  %vm14266_vm3 = vcmp.le.s32.totalorder %v3607_v19, 62 }
 0x664   :  { %v4200_v28 = vadd.f32 %v4199_v52, %v4198_v5 }
 0x666   :  { %v4201_v22 = vmul.f32 0.0078125, %v4200_v28 }
 0x668   :  { %v4202_v15 = vadd.f32 1e-05, %v4201_v22 }
 0x66a   :  { %10789 = vrsqrt.f32 %v4202_v15 }
 0x674   :  { %v10790_v60 = vpop.eup %10789 }
 0x675   :  { %v4204_v48 = vmul.f32 %v10790_v60, %v3397_v41 }
 0x677   :  { %v14139_v37 = vrot.slane %v4204_v48, %v15678_v40 }
 0x679   :  { %v4222_v25 = vmul.f32 %v14139_v37, %v14078_v24  ;;  %v4211_v45 = vmul.f32 %v14139_v37, %v14054_v18  ;;  %v4212_v16 = vmul.f32 %v14139_v37, %v14057_v34  ;;  %v4209_v14 = vmul.f32 %v14139_v37, %v14048_v26 }
 0x67a   :  { %v4210_v44 = vmul.f32 %v14139_v37, %v14051_v6  ;;  %v4213_v23 = vmul.f32 %v14139_v37, %v14059_v46  ;;  %v4215_v9 = vmul.f32 %v14139_v37, %v14064_v39  ;;  %v4216_v24 = vmul.f32 %v14139_v37, %v14066_v42  ;;  %v10606_v39 = vld [vmem:[#allocation7 + $0x68] sm:$0xff]  }
 0x67b   :  { %v4242_v18 = vadd.f32 %v14144_v57, %v4222_v25  ;;  %v4231_v2 = vadd.f32 %v14144_v57, %v4211_v45  ;;  %v4232_v34 = vadd.f32 %v14144_v57, %v4212_v16  ;;  %v4229_v26 = vadd.f32 %v14144_v57, %v4209_v14  ;;  %9682 = vmatprep.subr.bf16.mxu1 %v10606_v39 }
 0x67c   :  { %v4230_v58 = vadd.f32 %v14144_v57, %v4210_v44  ;;  %v4233_v6 = vadd.f32 %v14144_v57, %v4213_v23  ;;  %v4235_v46 = vadd.f32 %v14144_v57, %v4215_v9  ;;  %v4236_v31 = vadd.f32 %v14144_v57, %v4216_v24  ;;  %9683 = vmatpush3.bf16.msra.mxu1 %v10606_v39 }
 0x67d   :  { %v14171_v43 = vmax.f32 %v4231_v2, 0.0  ;;  %v14173_v42 = vmax.f32 %v4232_v34, 0.0  ;;  %v14175_v29 = vmax.f32 %v4229_v26, 0.0  ;;  %v14186_v22 = vmax.f32 %v4242_v18, 0.0 }
 0x67e   :  { %v14178_v20 = vmax.f32 %v4230_v58, 0.0  ;;  %v14180_v5 = vmax.f32 %v4233_v6, 0.0  ;;  %v14182_v52 = vmax.f32 %v4235_v46, 0.0  ;;  %v14184_v28 = vmax.f32 %v4236_v31, 0.0 }
 0x67f   :  { %v10418_v15 = vpack.i.bf16 %v14173_v42, %v14171_v43  ;;  %v4327_v41 = vrot.slane %v14171_v43, 1  ;;  %v4328_v60 = vrot.slane %v14173_v42, 1  ;;  %v4325_v16 = vrot.slane %v14175_v29, 1 }
 0x680   :  { %v10413_v25 = vpack.i.bf16 %v14178_v20, %v14175_v29  ;;  %v4329_v45 = vrot.slane %v14180_v5, 1  ;;  %v4326_v14 = vrot.slane %v14178_v20, 1  ;;  %v10438_v17 = vpack.i.bf16 %v14184_v28, %v14182_v52 }
 0x681   :  { %10419 = vrot.lane.b32.xlu1 %v10418_v15, %s10908_s14  ;;  %v4353_v44 = vsel %vm770_vm0, %v4327_v41, %v4328_v60  ;;  %v4214_v23 = vmul.f32 %v14139_v37, %v14061_v21  ;;  %v4217_v9 = vmul.f32 %v14139_v37, %v14068_v0  ;;  %v4331_v34 = vrot.slane %v14182_v52, 1 }
 0x682   :  { %10414 = vrot.lane.b32.xlu0 %v10413_v25, %s10908_s14  ;;  %v4352_v24 = vsel %vm770_vm0, %v4328_v60, %v4329_v45  ;;  %v4354_v18 = vsel %vm770_vm0, %v4326_v14, %v4327_v41  ;;  %v4355_v2 = vsel %vm770_vm0, %v4325_v16, %v4326_v14  ;;  %v4332_v6 = vrot.slane %v14184_v28, 1 }
 0x683   :  { %v10433_v26 = vpack.i.bf16 %v4352_v24, %v4353_v44  ;;  %v10423_v21 = vpack.i.bf16 %v4354_v18, %v4355_v2  ;;  %v4234_v58 = vadd.f32 %v14144_v57, %v4214_v23  ;;  %v4237_v0 = vadd.f32 %v14144_v57, %v4217_v9 }
 0x684   :  { %v4219_v46 = vmul.f32 %v14139_v37, %v14072_v55  ;;  %v4220_v31 = vmul.f32 %v14139_v37, %v14074_v51  ;;  %v4218_v39 = vmul.f32 %v14139_v37, %v14070_v8  ;;  %v4221_v41 = vmul.f32 %v14139_v37, %v14076_v63 }
 0x685   :  { %10434 = vrot.lane.b32.xlu1 %v10433_v26, %s10903_s28  ;;  %v14230_v11 = vmax.f32 %v4234_v58, 0.0  ;;  %v14232_v15 = vmax.f32 %v4237_v0, 0.0  ;;  %v4223_v60 = vmul.f32 %v14139_v37, %v14080_v35  ;;  %v4349_v55 = vsel %vm770_vm0, %v4331_v34, %v4332_v6 }
 0x686   :  { %10424 = vrot.lane.b32.xlu0 %v10423_v21, %s10903_s28  ;;  %v4239_v51 = vadd.f32 %v14144_v57, %v4219_v46  ;;  %v4240_v8 = vadd.f32 %v14144_v57, %v4220_v31  ;;  %v4238_v25 = vadd.f32 %v14144_v57, %v4218_v39  ;;  %v4241_v35 = vadd.f32 %v14144_v57, %v4221_v41 }
 0x687   :  { %v10428_v14 = vpack.i.bf16 %v14230_v11, %v14180_v5  ;;  %v4333_v44 = vrot.slane %v14232_v15, 1  ;;  %v4330_v63 = vrot.slane %v14230_v11, 1  ;;  %v4224_v18 = vmul.f32 %v14139_v37, %v14082_v4 }
 0x688   :  { %v14249_v23 = vmax.f32 %v4239_v51, 0.0  ;;  %v14251_v9 = vmax.f32 %v4240_v8, 0.0  ;;  %v14253_v24 = vmax.f32 %v4238_v25, 0.0  ;;  %v14264_v58 = vmax.f32 %v4241_v35, 0.0 }
 0x689   :  { %10439 = vrot.lane.b32.xlu1 %v10438_v17, %s10908_s14  ;;  %v4348_v2 = vsel %vm770_vm0, %v4332_v6, %v4333_v44  ;;  %v4350_v26 = vsel %vm770_vm0, %v4330_v63, %v4331_v34  ;;  %v4351_v21 = vsel %vm770_vm0, %v4329_v45, %v4330_v63  ;;  %v4243_v39 = vadd.f32 %v14144_v57, %v4223_v60 }
 0x68a   :  { %10429 = vrot.lane.b32.xlu0 %v10428_v14, %s10908_s14  ;;  %v4396_v4 = vsel %vm14192_vm1, %v4348_v2, 0.0  ;;  %v10443_v37 = vpack.i.bf16 %v4350_v26, %v4351_v21  ;;  %v10458_v17 = vpack.i.bf16 %v14251_v9, %v14249_v23  ;;  %v10448_v34 = vpack.i.bf16 %v14253_v24, %v14232_v15 }
 0x68b   :  { %v10453_v6 = vpack.i.bf16 %v4396_v4, %v4349_v55  ;;  %v4335_v45 = vrot.slane %v14249_v23, 1  ;;  %v4336_v19 = vrot.slane %v14251_v9, 1  ;;  %v4337_v46 = vrot.slane %v14264_v58, 1 }
 0x68c   :  { %v4334_v31 = vrot.slane %v14253_v24, 1  ;;  %v4244_v48 = vadd.f32 %v14144_v57, %v4224_v18  ;;  %v10473_v41 = vpack.i.bf16 %v14186_v22, %v14264_v58  ;;  %v4338_v8 = vrot.slane %v14186_v22, 1 }
 0x68d   :  { %10454 = vrot.lane.b32.xlu1 %v10453_v6, %s10903_s28  ;;  %v4344_v55 = vsel %vm770_vm0, %v4336_v19, %v4337_v46  ;;  %v4345_v51 = vsel %vm770_vm0, %v4335_v45, %v4336_v19  ;;  %v4264_v25 = vrot.slane %v14173_v42, 7  ;;  %v4259_v63 = vmax.f32 %v4243_v39, 0.0 }
 0x68e   :  { %10444 = vrot.lane.b32.xlu0 %v10443_v37, %s10903_s28  ;;  %v10468_v60 = vpack.i.bf16 %v4344_v55, %v4345_v51  ;;  %v4346_v57 = vsel %vm770_vm0, %v4334_v31, %v4335_v45  ;;  %v4347_v14 = vsel %vm770_vm0, %v4333_v44, %v4334_v31  ;;  %v4260_v18 = vmax.f32 %v4244_v48, 0.0 }
 0x68f   :  { %v10463_v35 = vpack.i.bf16 %v4346_v57, %v4347_v14  ;;  %v4343_v2 = vsel %vm770_vm0, %v4337_v46, %v4338_v8  ;;  %v4262_v26 = vrot.slane %v14178_v20, 7  ;;  %v4339_v21 = vrot.slane %v4259_v63, 1 }
 0x690   :  { %v4263_v42 = vrot.slane %v14171_v43, 7  ;;  %v4261_v4 = vrot.slane %v14175_v29, 7  ;;  %v4266_v37 = vrot.slane %v14230_v11, 7  ;;  %v4276_v6 = vrot.slane %v4260_v18, 7 }
 0x691   :  { %10459 = vrot.lane.b32.xlu1 %v10458_v17, %s10908_s14  ;;  %v10478_v45 = vpack.i.bf16 %v4260_v18, %v4259_v63  ;;  %v4340_v44 = vrot.slane %v4260_v18, 1  ;;  %v4267_v19 = vrot.slane %v14182_v52, 7  ;;  %v4342_v46 = vsel %vm770_vm0, %v4338_v8, %v4339_v21 }
 0x692   :  { %10449 = vrot.lane.b32.xlu0 %v10448_v34, %s10908_s14  ;;  %v4289_v20 = vsel %vm577_vm2, %v4263_v42, %v4264_v25  ;;  %v4290_v43 = vsel %vm577_vm2, %v4262_v26, %v4263_v42  ;;  %v4291_v11 = vsel %vm577_vm2, %v4261_v4, %v4262_v26  ;;  %v10483_v34 = vpack.i.bf16 %v4342_v46, %v4343_v2 }
 0x693   :  { %v4341_v17 = vsel %vm770_vm0, %v4339_v21, %v4340_v44  ;;  %v4356_v52 = vsel %vm770_vm0, %v4340_v44, %v4325_v16  ;;  %v4292_v31 = vsel %vm577_vm2, %v4276_v6, %v4261_v4  ;;  %v4268_v48 = vrot.slane %v14184_v28, 7 }
 0x694   :  { %v4404_v39 = vsel %vm14266_vm3, %v4356_v52, 0.0  ;;  %v14327_v55 = vsel %vm577_vm2, %v4266_v37, %v4267_v19  ;;  %v4274_v51 = vrot.slane %v14186_v22, 7  ;;  %v4265_v16 = vrot.slane %v14180_v5, 7 }
 0x695   :  { %10469 = vrot.lane.b32.xlu1 %v10468_v60, %s10903_s28  ;;  %v10488_v29 = vpack.i.bf16 %v4404_v39, %v4341_v17  ;;  %v4270_v8 = vrot.slane %v14253_v24, 7  ;;  %v4285_v0 = vsel %vm577_vm2, %v4267_v19, %v4268_v48  ;;  %v4271_v28 = vrot.slane %v14249_v23, 7 }
 0x696   :  { %10464 = vrot.lane.b32.xlu0 %v10463_v35, %s10903_s28  ;;  %v4272_v57 = vrot.slane %v14251_v9, 7  ;;  %v4269_v14 = vrot.slane %v14232_v15, 7  ;;  %v4287_v22 = vsel %vm577_vm2, %v4265_v16, %v4266_v37  ;;  %v4288_v60 = vsel %vm577_vm2, %v4264_v25, %v4265_v16 }
 0x697   :  { %v4275_v5 = vrot.slane %v4259_v63, 7  ;;  %v4273_v24 = vrot.slane %v14264_v58, 7  ;;  %v14350_v23 = vsel %vm577_vm2, %v4270_v8, %v4271_v28 }
 0x698   :  { %v14346_v35 = vsel %vm577_vm2, %v4271_v28, %v4272_v57  ;;  %v14354_v15 = vsel %vm577_vm2, %v4269_v14, %v4270_v8  ;;  %v14358_v9 = vsel %vm577_vm2, %v4268_v48, %v4269_v14 }
 0x699   :  { %10479 = vrot.lane.b32.xlu1 %v10478_v45, %s10908_s14  ;;  %v14363_v58 = vsel %vm577_vm2, %v4275_v5, %v4276_v6  ;;  %v14367_v25 = vsel %vm577_vm2, %v4274_v51, %v4275_v5  ;;  %v14371_v63 = vsel %vm577_vm2, %v4273_v24, %v4274_v51  ;;  %v14376_v18 = vsel %vm577_vm2, %v4272_v57, %v4273_v24 }
 0x69a   :  { %10474 = vrot.lane.b32.xlu0 %v10473_v41, %s10908_s14  ;;  %v4293_v45 = vsel %vm13790_vm14, %v4292_v31, 0.0 }
 0x69d   :  { %10489 = vrot.lane.b32.xlu1 %v10488_v29, %s10903_s28 }
 0x69e   :  { %10484 = vrot.lane.b32.xlu0 %v10483_v34, %s10903_s28 }
 0x6f3   :  { %v10420_v2 = vpop.permute.xlu1 %10419 }
 0x6f4   :  { %v10415_v26 = vpop.permute.xlu0 %10414  ;;  %v10422_v21 = vunpack.i.h.bf16 %v10420_v2  ;;  %v10421_v42 = vunpack.i.l.bf16 %v10420_v2 }
 0x6f5   :  { %v10417_v4 = vunpack.i.h.bf16 %v10415_v26  ;;  %v10416_v37 = vunpack.i.l.bf16 %v10415_v26 }
 0x6f6   :  { %v4535_v46 = vsel %vm2249_vm12, %v4290_v43, %v10421_v42  ;;  %v4536_v17 = vsel %vm2249_vm12, %v4289_v20, %v10422_v21 }
 0x6f7   :  { %v10435_v6 = vpop.permute.xlu1 %10434  ;;  %v4533_v39 = vsel %vm2249_vm12, %v4293_v45, %v10416_v37  ;;  %v4534_v48 = vsel %vm2249_vm12, %v4291_v11, %v10417_v4 }
 0x6f8   :  { %v10437_v41 = vunpack.i.h.bf16 %v10435_v6  ;;  %v10436_v44 = vunpack.i.l.bf16 %v10435_v6  ;;  %v10425_v19 = vpop.permute.xlu0 %10424 }
 0x6f9   :  { %v10427_v52 = vunpack.i.h.bf16 %v10425_v19  ;;  %v10426_v34 = vunpack.i.l.bf16 %v10425_v19 }
 0x6fa   :  { %v4552_v51 = vsel %vm4549_vm4, %v4535_v46, %v10436_v44  ;;  %v4553_v29 = vsel %vm4549_vm4, %v4536_v17, %v10437_v41 }
 0x6fb   :  { %v4567_v16 = vpack.c.bf16 %v4553_v29, %v4552_v51  ;;  %v4550_v13 = vsel %vm4549_vm4, %v4533_v39, %v10426_v34  ;;  %v4551_v31 = vsel %vm4549_vm4, %v4534_v48, %v10427_v52  ;;  %v10440_v8 = vpop.permute.xlu1 %10439 }
 0x6fc   :  { %v4566_v43 = vpack.c.bf16 %v4551_v31, %v4550_v13  ;;  %v10430_v28 = vpop.permute.xlu0 %10429  ;;  %v10442_v20 = vunpack.i.h.bf16 %v10440_v8  ;;  %v10441_v57 = vunpack.i.l.bf16 %v10440_v8 }
 0x6fd   :  { %v10432_v14 = vunpack.i.h.bf16 %v10430_v28  ;;  %v10431_v5 = vunpack.i.l.bf16 %v10430_v28 }
 0x6fe   :  { %9684 = vmatprep.mubr.msk.bf16.mxu1 %vm4610_vm5, %v4566_v43  ;;  %v4540_v21 = vsel %vm2249_vm12, %v4285_v0, %v10442_v20  ;;  %v4539_v42 = vsel %vm2249_vm12, %v14327_v55, %v10441_v57 }
 0x6ff   :  { %9685 = vmatmul.mubr.msk.bf16.vlgmr.msra.gmra.mrb[44].mxu1 %vm4610_vm5, %v4567_v16  ;;  %v10455_v11 = vpop.permute.xlu1 %10454  ;;  %v4538_v6 = vsel %vm2249_vm12, %v4287_v22, %v10432_v14  ;;  %v4537_v45 = vsel %vm2249_vm12, %v4288_v60, %v10431_v5  ;;  %v4301_v60 = vsel %vm13822_vm15, %v14358_v9, 0.0  ;;  %vm10912_vm15 = vmmov 0  }
 0x700   :  { %v10457_v24 = vunpack.i.h.bf16 %v10455_v11  ;;  %v10456_v2 = vunpack.i.l.bf16 %v10455_v11  ;;  %v10445_v26 = vpop.permute.xlu0 %10444 }
 0x701   :  { %v10447_v4 = vunpack.i.h.bf16 %v10445_v26  ;;  %v10446_v37 = vunpack.i.l.bf16 %v10445_v26 }
 0x702   :  { %v4556_v41 = vsel %vm4549_vm4, %v4539_v42, %v10456_v2  ;;  %v4557_v44 = vsel %vm4549_vm4, %v4540_v21, %v10457_v24 }
 0x703   :  { %v4569_v19 = vpack.c.bf16 %v4557_v44, %v4556_v41  ;;  %v4554_v46 = vsel %vm4549_vm4, %v4537_v45, %v10446_v37  ;;  %v4555_v17 = vsel %vm4549_vm4, %v4538_v6, %v10447_v4  ;;  %v10460_v52 = vpop.permute.xlu1 %10459 }
 0x704   :  { %v4568_v0 = vpack.c.bf16 %v4555_v17, %v4554_v46  ;;  %v10450_v34 = vpop.permute.xlu0 %10449  ;;  %v10462_v39 = vunpack.i.h.bf16 %v10460_v52  ;;  %v10461_v55 = vunpack.i.l.bf16 %v10460_v52 }
 0x705   :  { %v10452_v48 = vunpack.i.h.bf16 %v10450_v34  ;;  %v10451_v51 = vunpack.i.l.bf16 %v10450_v34 }
 0x706   :  { %9688 = vmatprep.mubr.msk.bf16.mxu1 %vm4610_vm5, %v4568_v0  ;;  %v4544_v31 = vsel %vm2249_vm12, %v14346_v35, %v10462_v39  ;;  %v4543_v8 = vsel %vm2249_vm12, %v14350_v23, %v10461_v55 }
 0x707   :  { %9689 = vmatmul.mubr.msk.bf16.gmra.mrb[48].mxu1 %vm4610_vm5, %v4569_v19  ;;  %v10470_v22 = vpop.permute.xlu1 %10469  ;;  %v4542_v20 = vsel %vm2249_vm12, %v14354_v15, %v10452_v48  ;;  %v4541_v57 = vsel %vm2249_vm12, %v4301_v60, %v10451_v51 }
 0x708   :  { %v10472_v29 = vunpack.i.h.bf16 %v10470_v22  ;;  %v10471_v16 = vunpack.i.l.bf16 %v10470_v22  ;;  %v10465_v13 = vpop.permute.xlu0 %10464 }
 0x709   :  { %v10467_v43 = vunpack.i.h.bf16 %v10465_v13  ;;  %v10466_v28 = vunpack.i.l.bf16 %v10465_v13 }
 0x70a   :  { %v4560_v14 = vsel %vm4549_vm4, %v4543_v8, %v10471_v16  ;;  %v4561_v59 = vsel %vm4549_vm4, %v4544_v31, %v10472_v29 }
 0x70b   :  { %v4571_v9 = vpack.c.bf16 %v4561_v59, %v4560_v14  ;;  %v4558_v5 = vsel %vm4549_vm4, %v4541_v57, %v10466_v28  ;;  %v4559_v11 = vsel %vm4549_vm4, %v4542_v20, %v10467_v43  ;;  %v10480_v35 = vpop.permute.xlu1 %10479 }
 0x70c   :  { %v4570_v24 = vpack.c.bf16 %v4559_v11, %v4558_v5  ;;  %v10475_v2 = vpop.permute.xlu0 %10474  ;;  %v10482_v23 = vunpack.i.h.bf16 %v10480_v35  ;;  %v10481_v26 = vunpack.i.l.bf16 %v10480_v35 }
 0x70d   :  { %v10477_v21 = vunpack.i.h.bf16 %v10475_v2  ;;  %v10476_v42 = vunpack.i.l.bf16 %v10475_v2 }
 0x70e   :  { %9692 = vmatprep.mubr.msk.bf16.mxu1 %vm4610_vm5, %v4570_v24  ;;  %v4548_v45 = vsel %vm2249_vm12, %v14363_v58, %v10482_v23  ;;  %v4547_v41 = vsel %vm2249_vm12, %v14367_v25, %v10481_v26 }
 0x70f   :  { %9693 = vmatmul.mubr.msk.bf16.gmra.mrb[52].mxu1 %vm4610_vm5, %v4571_v9  ;;  %v10490_v15 = vpop.permute.xlu1 %10489  ;;  %v4546_v46 = vsel %vm2249_vm12, %v14371_v63, %v10477_v21  ;;  %v4545_v17 = vsel %vm2249_vm12, %v14376_v18, %v10476_v42 }
 0x710   :  { %v10492_v4 = vunpack.i.h.bf16 %v10490_v15  ;;  %v10491_v37 = vunpack.i.l.bf16 %v10490_v15  ;;  %v10485_v6 = vpop.permute.xlu0 %10484 }
 0x711   :  { %v10487_v44 = vunpack.i.h.bf16 %v10485_v6  ;;  %v10486_v19 = vunpack.i.l.bf16 %v10485_v6 }
 0x712   :  { %v4565_v52 = vsel %vm4549_vm4, %v4548_v45, %v10492_v4  ;;  %v4564_v0 = vsel %vm4549_vm4, %v4547_v41, %v10491_v37 }
 0x713   :  { %v4573_v34 = vpack.c.bf16 %v4565_v52, %v4564_v0  ;;  %v4562_v39 = vsel %vm4549_vm4, %v4545_v17, %v10486_v19  ;;  %v4563_v58 = vsel %vm4549_vm4, %v4546_v46, %v10487_v44 }
 0x714   :  { %v4572_v55 = vpack.c.bf16 %v4563_v58, %v4562_v39 }
 0x716   :  { %9696 = vmatprep.mubr.msk.bf16.mxu1 %vm4610_vm5, %v4572_v55 }
 0x717   :  { %9697 = vmatmul.mubr.msk.bf16.gmra.mrb[56].mxu1 %vm4610_vm5, %v4573_v34 }
 0x7d2   :  { %v14433_v25 = vpop.f32.mrb[44].mxu1 }
 0x7d3   :  { %v14435_v63 = vpop.f32.mrb[45].mxu1  ;;  %v4735_v29 = vsel %vm2249_vm12, %v14433_v25, 0.0 }
 0x7d4   :  { %v14437_v48 = vpop.f32.mrb[46].mxu1  ;;  %v4732_v51 = vsel %vm2249_vm12, %v14435_v63, 0.0 }
 0x7d5   :  { %v14439_v18 = vpop.f32.mrb[47].mxu1  ;;  %v4737_v13 = vsel %vm2249_vm12, %v14437_v48, 0.0 }
 0x7d6   :  { %v4733_v22 = vsel %vm2249_vm12, %v14439_v18, 0.0 }
 0x7d7   :  { %v4734_v60 = vadd.f32 %v4733_v22, %v4732_v51  ;;  %v10607_v51 = vld [vmem:[#allocation7 + $0x78] sm:$0xff]   ;;  %v10608_v22 = vld [vmem:[#allocation7 + $0x80] sm:$0xff]  }
 0x7d8   :  { %9718 = vmatprep.subr.bf16.mxu1 %v10607_v51 }
 0x7d9   :  { %v4736_v16 = vadd.f32 %v4735_v29, %v4734_v60  ;;  %9719 = vmatpush3.bf16.msra.mxu1 %v10607_v51 }
 0x7da   :  { %v14449_v31 = vpop.f32.mrb[48].mxu1  ;;  %9720 = vmatprep.subr.bf16.mxu1 %v10608_v22 }
 0x7db   :  { %v4685_v8 = vpop.f32.mrb[49].mxu1  ;;  %v4738_v43 = vadd.f32 %v4737_v13, %v4736_v16  ;;  %v4743_v5 = vsel %vm2249_vm12, %v14449_v31, 0.0  ;;  %v10609_v13 = vld [vmem:[#allocation7 + $0x88] sm:$0xff]  }
 0x7dc   :  { %v4739_v28 = vsel %vm2249_vm12, %v4685_v8, 0.0  ;;  %v9691_v20 = vpop.f32.mrb[50].mxu1 }
 0x7dd   :  { %v4740_v57 = vadd.f32 %v4739_v28, %v4738_v43  ;;  %v4688_v14 = vpop.f32.mrb[51].mxu1  ;;  %v4745_v35 = vsel %vm2249_vm12, %v9691_v20, 0.0  ;;  %9721 = vmatpush3.bf16.msra.mxu1 %v10608_v22 }
 0x7de   :  { %v4741_v59 = vsel %vm2249_vm12, %v4688_v14, 0.0  ;;  %9722 = vmatprep.subr.bf16.mxu1 %v10609_v13 }
 0x7df   :  { %v4742_v9 = vadd.f32 %v4741_v59, %v4740_v57  ;;  %v10610_v57 = vld [vmem:[#allocation7 + $0x90] sm:$0xff]  }
 0x7e1   :  { %v4744_v11 = vadd.f32 %v4743_v5, %v4742_v9  ;;  %9723 = vmatpush3.bf16.msra.mxu1 %v10609_v13  ;;  %v10611_v5 = vld [vmem:[#allocation7 + $0x98] sm:$0xff]  }
 0x7e2   :  { %v9694_v24 = vpop.f32.mrb[52].mxu1  ;;  %9724 = vmatprep.subr.bf16.mxu1 %v10610_v57 }
 0x7e3   :  { %v4701_v2 = vpop.f32.mrb[53].mxu1  ;;  %v4746_v23 = vadd.f32 %v4745_v35, %v4744_v11  ;;  %v4751_v6 = vsel %vm2249_vm12, %v9694_v24, 0.0 }
 0x7e4   :  { %v4747_v26 = vsel %vm2249_vm12, %v4701_v2, 0.0  ;;  %v9695_v21 = vpop.f32.mrb[54].mxu1 }
 0x7e5   :  { %v4748_v42 = vadd.f32 %v4747_v26, %v4746_v23  ;;  %v4704_v15 = vpop.f32.mrb[55].mxu1  ;;  %v4753_v41 = vsel %vm2249_vm12, %v9695_v21, 0.0  ;;  %9725 = vmatpush3.bf16.msra.mxu1 %v10610_v57 }
 0x7e6   :  { %v4749_v4 = vsel %vm2249_vm12, %v4704_v15, 0.0  ;;  %9726 = vmatprep.subr.bf16.mxu1 %v10611_v5 }
 0x7e7   :  { %v4750_v37 = vadd.f32 %v4749_v4, %v4748_v42 }
 0x7e9   :  { %v4752_v45 = vadd.f32 %v4751_v6, %v4750_v37  ;;  %9727 = vmatpush3.bf16.msra.mxu1 %v10611_v5 }
 0x7ea   :  { %v9698_v44 = vpop.f32.mrb[56].mxu1 }
 0x7eb   :  { %v4717_v19 = vpop.f32.mrb[57].mxu1  ;;  %v4754_v46 = vadd.f32 %v4753_v41, %v4752_v45  ;;  %v4759_v55 = vsel %vm2249_vm12, %v9698_v44, 0.0 }
 0x7ec   :  { %v4755_v17 = vsel %vm2249_vm12, %v4717_v19, 0.0  ;;  %v9699_v52 = vpop.f32.mrb[58].mxu1 }
 0x7ed   :  { %v4756_v0 = vadd.f32 %v4755_v17, %v4754_v46  ;;  %v4720_v34 = vpop.f32.mrb[59].mxu1  ;;  %v4761_v29 = vsel %vm2249_vm12, %v9699_v52, 0.0 }
 0x7ee   :  { %v4757_v39 = vsel %vm2249_vm12, %v4720_v34, 0.0 }
 0x7ef   :  { %v4758_v58 = vadd.f32 %v4757_v39, %v4756_v0 }
 0x7f1   :  { %v4760_v60 = vadd.f32 %v4759_v55, %v4758_v58 }
 0x7f3   :  { %v4762_v16 = vadd.f32 %v4761_v29, %v4760_v60 }
 0x7f5   :  { %v4763_v43 = vrot.slane %v4762_v16, 4 }
 0x7f7   :  { %v4764_v28 = vadd.f32 %v4763_v43, %v4762_v16 }
 0x7f9   :  { %v4765_v59 = vrot.slane %v4764_v28, 2 }
 0x7fb   :  { %v4766_v9 = vadd.f32 %v4765_v59, %v4764_v28 }
 0x7fd   :  { %v4767_v11 = vrot.slane %v4766_v9, 1 }
 0x7ff   :  { %v4768_v35 = vadd.f32 %v4767_v11, %v4766_v9 }
 0x801   :  { %v4769_v23 = vmul.f32 0.0078125, %v4768_v35 }
 0x803   :  { %v14465_v26 = vsub.f32 %v14435_v63, %v4769_v23  ;;  %v14468_v42 = vsub.f32 %v14439_v18, %v4769_v23  ;;  %v14471_v4 = vsub.f32 %v14433_v25, %v4769_v23  ;;  %v14474_v37 = vsub.f32 %v14437_v48, %v4769_v23 }
 0x804   :  { %v14476_v6 = vsub.f32 %v4685_v8, %v4769_v23  ;;  %v14478_v45 = vsub.f32 %v4688_v14, %v4769_v23  ;;  %v14481_v41 = vsub.f32 %v14449_v31, %v4769_v23  ;;  %v14483_v46 = vsub.f32 %v9691_v20, %v4769_v23 }
 0x805   :  { %v14485_v63 = vsub.f32 %v4701_v2, %v4769_v23  ;;  %v14487_v18 = vsub.f32 %v4704_v15, %v4769_v23  ;;  %v14489_v17 = vsub.f32 %v9694_v24, %v4769_v23  ;;  %v14491_v25 = vsub.f32 %v9695_v21, %v4769_v23 }
 0x806   :  { %v14493_v48 = vsub.f32 %v4717_v19, %v4769_v23  ;;  %v14495_v0 = vsub.f32 %v4720_v34, %v4769_v23  ;;  %v14497_v8 = vsub.f32 %v9698_v44, %v4769_v23  ;;  %v14499_v14 = vsub.f32 %v9699_v52, %v4769_v23 }
 0x807   :  { %v4786_v31 = vmul.f32 %v14465_v26, %v14465_v26  ;;  %v4787_v20 = vmul.f32 %v14468_v42, %v14468_v42  ;;  %v4788_v24 = vmul.f32 %v14471_v4, %v14471_v4  ;;  %v4789_v2 = vmul.f32 %v14474_v37, %v14474_v37 }
 0x808   :  { %v4790_v19 = vmul.f32 %v14476_v6, %v14476_v6  ;;  %v4791_v39 = vmul.f32 %v14478_v45, %v14478_v45  ;;  %v4792_v51 = vmul.f32 %v14481_v41, %v14481_v41  ;;  %v4793_v29 = vmul.f32 %v14483_v46, %v14483_v46 }
 0x809   :  { %v4802_v21 = vsel %vm2249_vm12, %v4786_v31, 0.0  ;;  %v4803_v15 = vsel %vm2249_vm12, %v4787_v20, 0.0  ;;  %v4805_v52 = vsel %vm2249_vm12, %v4788_v24, 0.0  ;;  %v4807_v58 = vsel %vm2249_vm12, %v4789_v2, 0.0 }
 0x80a   :  { %v4804_v44 = vadd.f32 %v4803_v15, %v4802_v21  ;;  %v4809_v22 = vsel %vm2249_vm12, %v4790_v19, 0.0  ;;  %v4811_v16 = vsel %vm2249_vm12, %v4791_v39, 0.0  ;;  %v4794_v43 = vmul.f32 %v14485_v63, %v14485_v63 }
 0x80b   :  { %v4813_v28 = vsel %vm2249_vm12, %v4792_v51, 0.0  ;;  %v4795_v59 = vmul.f32 %v14487_v18, %v14487_v18  ;;  %v4815_v9 = vsel %vm2249_vm12, %v4793_v29, 0.0  ;;  %v4796_v11 = vmul.f32 %v14489_v17, %v14489_v17 }
 0x80c   :  { %v4806_v34 = vadd.f32 %v4805_v52, %v4804_v44  ;;  %v4817_v35 = vsel %vm2249_vm12, %v4794_v43, 0.0  ;;  %v4797_v31 = vmul.f32 %v14491_v25, %v14491_v25  ;;  %v4798_v2 = vmul.f32 %v14493_v48, %v14493_v48 }
 0x80d   :  { %v4819_v20 = vsel %vm2249_vm12, %v4795_v59, 0.0  ;;  %v4821_v21 = vsel %vm2249_vm12, %v4796_v11, 0.0  ;;  %v4799_v44 = vmul.f32 %v14495_v0, %v14495_v0 }
 0x80e   :  { %v4808_v55 = vadd.f32 %v4807_v58, %v4806_v34  ;;  %v4823_v19 = vsel %vm2249_vm12, %v4797_v31, 0.0  ;;  %v4800_v34 = vmul.f32 %v14497_v8, %v14497_v8  ;;  %v4825_v39 = vsel %vm2249_vm12, %v4798_v2, 0.0 }
 0x80f   :  { %v4827_v51 = vsel %vm2249_vm12, %v4799_v44, 0.0  ;;  %v5134_v31 = vmul.f32 %v13958_v62, %v13876_v53 }
 0x810   :  { %v4810_v60 = vadd.f32 %v4809_v22, %v4808_v55  ;;  %v4801_v55 = vmul.f32 %v14499_v14, %v14499_v14 }
 0x812   :  { %v4812_v13 = vadd.f32 %v4811_v16, %v4810_v60  ;;  %v4829_v60 = vsel %vm2249_vm12, %v4800_v34, 0.0  ;;  %v4831_v16 = vsel %vm2249_vm12, %v4801_v55, 0.0 }
 0x814   :  { %v4814_v57 = vadd.f32 %v4813_v28, %v4812_v13 }
 0x816   :  { %v4816_v5 = vadd.f32 %v4815_v9, %v4814_v57 }
 0x818   :  { %v4818_v23 = vadd.f32 %v4817_v35, %v4816_v5 }
 0x81a   :  { %v4820_v24 = vadd.f32 %v4819_v20, %v4818_v23  ;;  %v5133_v23 = vmul.f32 %v13958_v62, %v13874_v56  ;;  %v9047_v20 = vld [vmem:[%s15401_s2 + $0xb] ss:$0 sm:$0xff] }
 0x81b   :  { %v5155_v44 = vadd.f32 %v9047_v20, %v13962_v32  ;;  %v5157_v56 = vadd.f32 %v9047_v20, %v13970_v27  ;;  %v5158_v53 = vadd.f32 %v9047_v20, %v13974_v10  ;;  %v5159_v62 = vadd.f32 %v9047_v20, %v13978_v1 }
 0x81c   :  { %v4822_v15 = vadd.f32 %v4821_v21, %v4820_v24  ;;  %v3399_v24 = vld [vmem:[%s15401_s2 + $0x8] sm:$0x1]  ;;  %v5153_v21 = vadd.f32 %v9047_v20, %v5133_v23  ;;  %v5160_v34 = vadd.f32 %v9047_v20, %v13982_v49  ;;  %v5163_v55 = vadd.f32 %v9047_v20, %v13994_v36 }
 0x81d   :  { %v5166_v27 = vadd.f32 %v9047_v20, %v14006_v30  ;;  %v5167_v10 = vadd.f32 %v9047_v20, %v14010_v7  ;;  %v5168_v1 = vadd.f32 %v9047_v20, %v14014_v50 }
 0x81e   :  { %v4824_v52 = vadd.f32 %v4823_v19, %v4822_v15  ;;  %v5154_v15 = vadd.f32 %v9047_v20, %v5134_v31  ;;  %v5156_v19 = vadd.f32 %v9047_v20, %v13966_v47  ;;  %v5165_v47 = vadd.f32 %v9047_v20, %v14002_v54 }
 0x820   :  { %v4826_v58 = vadd.f32 %v4825_v39, %v4824_v52  ;;  %v5161_v39 = vadd.f32 %v9047_v20, %v13986_v33 }
 0x822   :  { %v4828_v22 = vadd.f32 %v4827_v51, %v4826_v58  ;;  %v5162_v58 = vadd.f32 %v9047_v20, %v13990_v61  ;;  %v5164_v51 = vadd.f32 %v9047_v20, %v13998_v3  ;;  %v9037_v3 = vld [vmem:[%s15401_s2 + $0x9] ss:$0 sm:$0xff] }
 0x824   :  { %v4830_v29 = vadd.f32 %v4829_v60, %v4828_v22 }
 0x826   :  { %v4832_v13 = vadd.f32 %v4831_v16, %v4830_v29 }
 0x828   :  { %v4833_v43 = vrot.slane %v4832_v13, 4 }
 0x82a   :  { %v4834_v28 = vadd.f32 %v4833_v43, %v4832_v13 }
 0x82c   :  { %v4835_v57 = vrot.slane %v4834_v28, 2 }
 0x82e   :  { %v4836_v59 = vadd.f32 %v4835_v57, %v4834_v28 }
 0x830   :  { %v4837_v9 = vrot.slane %v4836_v59, 1 }
 0x832   :  { %v4838_v5 = vadd.f32 %v4837_v9, %v4836_v59 }
 0x834   :  { %v4839_v11 = vmul.f32 0.0078125, %v4838_v5 }
 0x836   :  { %v4840_v35 = vadd.f32 1e-05, %v4839_v11 }
 0x838   :  { %10791 = vrsqrt.f32 %v4840_v35 }
 0x842   :  { %v10792_v2 = vpop.eup %10791 }
 0x843   :  { %v4842_v52 = vmul.f32 %v10792_v2, %v3399_v24 }
 0x845   :  { %v4846_v32 = vrot.slane %v4842_v52, %v15678_v40 }
 0x847   :  { %v4847_v49 = vmul.f32 %v4846_v32, %v14465_v26  ;;  %v4848_v33 = vmul.f32 %v4846_v32, %v14468_v42  ;;  %v4849_v61 = vmul.f32 %v4846_v32, %v14471_v4  ;;  %v4850_v36 = vmul.f32 %v4846_v32, %v14474_v37 }
 0x848   :  { %v4851_v54 = vmul.f32 %v4846_v32, %v14476_v6  ;;  %v4852_v30 = vmul.f32 %v4846_v32, %v14478_v45  ;;  %v4853_v7 = vmul.f32 %v4846_v32, %v14481_v41  ;;  %v4854_v50 = vmul.f32 %v4846_v32, %v14483_v46 }
 0x849   :  { %v4855_v26 = vmul.f32 %v4846_v32, %v14485_v63  ;;  %v4856_v42 = vmul.f32 %v4846_v32, %v14487_v18  ;;  %v4857_v4 = vmul.f32 %v4846_v32, %v14489_v17  ;;  %v4858_v37 = vmul.f32 %v4846_v32, %v14491_v25 }
 0x84a   :  { %v4859_v22 = vmul.f32 %v4846_v32, %v14493_v48  ;;  %v4860_v60 = vmul.f32 %v4846_v32, %v14495_v0  ;;  %v4861_v6 = vmul.f32 %v4846_v32, %v14497_v8  ;;  %v4862_v45 = vmul.f32 %v4846_v32, %v14499_v14 }
 0x84b   :  { %v4867_v29 = vadd.f32 %v9037_v3, %v4847_v49  ;;  %v4868_v41 = vadd.f32 %v9037_v3, %v4848_v33  ;;  %v4869_v16 = vadd.f32 %v9037_v3, %v4849_v61  ;;  %v4870_v46 = vadd.f32 %v9037_v3, %v4850_v36 }
 0x84c   :  { %v4871_v13 = vadd.f32 %v9037_v3, %v4851_v54  ;;  %v4872_v63 = vadd.f32 %v9037_v3, %v4852_v30  ;;  %v4873_v43 = vadd.f32 %v9037_v3, %v4853_v7  ;;  %v4874_v18 = vadd.f32 %v9037_v3, %v4854_v50 }
 0x84d   :  { %v4875_v28 = vadd.f32 %v9037_v3, %v4855_v26  ;;  %v4876_v17 = vadd.f32 %v9037_v3, %v4856_v42  ;;  %v4877_v57 = vadd.f32 %v9037_v3, %v4857_v4  ;;  %v4878_v25 = vadd.f32 %v9037_v3, %v4858_v37  ;;  %v10612_v42 = vld [vmem:[#allocation7 + $0xa0] sm:$0xff]  }
 0x84e   :  { %v4879_v59 = vadd.f32 %v9037_v3, %v4859_v22  ;;  %v4880_v48 = vadd.f32 %v9037_v3, %v4860_v60  ;;  %v4881_v9 = vadd.f32 %v9037_v3, %v4861_v6  ;;  %v4882_v0 = vadd.f32 %v9037_v3, %v4862_v45  ;;  %9728 = vmatprep.subr.bf16.mxu1 %v10612_v42 }
 0x84f   :  { %v5169_v5 = vadd.f32 %v5153_v21, %v4867_v29  ;;  %v5170_v8 = vadd.f32 %v5154_v15, %v4868_v41  ;;  %v5171_v11 = vadd.f32 %v5155_v44, %v4869_v16  ;;  %v5172_v14 = vadd.f32 %v5156_v19, %v4870_v46  ;;  %9729 = vmatpush3.bf16.msra.mxu1 %v10612_v42 }
 0x850   :  { %v5173_v35 = vadd.f32 %v5157_v56, %v4871_v13  ;;  %v5174_v23 = vadd.f32 %v5158_v53, %v4872_v63  ;;  %v5175_v31 = vadd.f32 %v5159_v62, %v4873_v43  ;;  %v5176_v20 = vadd.f32 %v5160_v34, %v4874_v18 }
 0x851   :  { %v5177_v24 = vadd.f32 %v5161_v39, %v4875_v28  ;;  %v5178_v2 = vadd.f32 %v5162_v58, %v4876_v17  ;;  %v5179_v52 = vadd.f32 %v5163_v55, %v4877_v57  ;;  %v5180_v32 = vadd.f32 %v5164_v51, %v4878_v25 }
 0x852   :  { %v5181_v49 = vadd.f32 %v5165_v47, %v4879_v59  ;;  %v5182_v33 = vadd.f32 %v5166_v27, %v4880_v48  ;;  %v5183_v61 = vadd.f32 %v5167_v10, %v4881_v9  ;;  %v5184_v36 = vadd.f32 %v5168_v1, %v4882_v0 }
 0x853   :  { %v5187_v54 = vmax.f32 %v5171_v11, 0.0  ;;  %v5188_v30 = vmax.f32 %v5172_v14, 0.0  ;;  %v5189_v7 = vmax.f32 %v5173_v35, 0.0  ;;  %v5190_v3 = vmax.f32 %v5174_v23, 0.0 }
 0x854   :  { %v5191_v21 = vmax.f32 %v5175_v31, 0.0  ;;  %v5192_v15 = vmax.f32 %v5176_v20, 0.0  ;;  %v5193_v44 = vmax.f32 %v5177_v24, 0.0  ;;  %v5194_v19 = vmax.f32 %v5178_v2, 0.0 }
 0x855   :  { %v5195_v56 = vmax.f32 %v5179_v52, 0.0  ;;  %v5196_v53 = vmax.f32 %v5180_v32, 0.0  ;;  %v5197_v62 = vmax.f32 %v5181_v49, 0.0  ;;  %v5198_v34 = vmax.f32 %v5182_v33, 0.0  ;;  %5249 = vst.msk [vmem:[#allocation3 + $0x10] sm:$0xff] %vm2249_vm12, %v5187_v54  ;;  %5250 = vst.msk [vmem:[#allocation3 + $0x18] sm:$0xff] %vm2249_vm12, %v5188_v30 }
 0x856   :  { %5251 = vst.msk [vmem:[#allocation3 + $0x20] sm:$0xff] %vm2249_vm12, %v5189_v7  ;;  %5252 = vst.msk [vmem:[#allocation3 + $0x28] sm:$0xff] %vm2249_vm12, %v5190_v3  ;;  %v5199_v39 = vmax.f32 %v5183_v61, 0.0  ;;  %v5200_v58 = vmax.f32 %v5184_v36, 0.0  ;;  %v5185_v55 = vmax.f32 %v5169_v5, 0.0  ;;  %v5186_v51 = vmax.f32 %v5170_v8, 0.0 }
 0x857   :  { %5253 = vst.msk [vmem:[#allocation3 + $0x30] sm:$0xff] %vm2249_vm12, %v5191_v21  ;;  %5254 = vst.msk [vmem:[#allocation3 + $0x38] sm:$0xff] %vm2249_vm12, %v5192_v15  ;;  %v10613_v33 = vld [vmem:[#allocation7 + $0x108] sm:$0xff]   ;;  %v5298_v30 = vand.u32 31, %v15673_v12 }
 0x858   :  { %5255 = vst.msk [vmem:[#allocation3 + $0x40] sm:$0xff] %vm2249_vm12, %v5193_v44  ;;  %5256 = vst.msk [vmem:[#allocation3 + $0x48] sm:$0xff] %vm2249_vm12, %v5194_v19  ;;  %9738 = vmatprep.subr.bf16.mxu1 %v10613_v33  ;;  %v101_v44 = vadd.s32 32, %v15673_v12 }
 0x859   :  { %5257 = vst.msk [vmem:[#allocation3 + $0x50] sm:$0xff] %vm2249_vm12, %v5195_v56  ;;  %5258 = vst.msk [vmem:[#allocation3 + $0x58] sm:$0xff] %vm2249_vm12, %v5196_v53  ;;  %vm14671_vm6 = vcmp.ge.s32.totalorder %v5298_v30, 1 }
 0x85a   :  { %5259 = vst.msk [vmem:[#allocation3 + $0x60] sm:$0xff] %vm2249_vm12, %v5197_v62  ;;  %5260 = vst.msk [vmem:[#allocation3 + $0x68] sm:$0xff] %vm2249_vm12, %v5198_v34 }
 0x85b   :  { %5261 = vst.msk [vmem:[#allocation3 + $0x70] sm:$0xff] %vm2249_vm12, %v5199_v39  ;;  %5262 = vst.msk [vmem:[#allocation3 + $0x78] sm:$0xff] %vm2249_vm12, %v5200_v58 }
 0x85c   :  { %5247 = vst.msk [vmem:[#allocation3] sm:$0xff] %vm2249_vm12, %v5185_v55  ;;  %5248 = vst.msk [vmem:[#allocation3 + $0x8] sm:$0xff] %vm2249_vm12, %v5186_v51  ;;  %v14611_v27 = vld [vmem:[#allocation3 + $0x10] ss:$2 sm:$0xff]  ;;  %v5281_v60 = vld [vmem:[#allocation3 + $0x11] ss:$2 sm:$0xff] }
 0x85d   :  { %v14609_v47 = vld [vmem:[#allocation3 + $0x20] ss:$2 sm:$0xff]  ;;  %v5283_v10 = vld [vmem:[#allocation3 + $0x21] ss:$2 sm:$0xff]  ;;  %v5399_v41 = vrot.slane %v5281_v60, 7 }
 0x85e   :  { %v14613_v1 = vld [vmem:[#allocation3 + $0x30] ss:$2 sm:$0xff]  ;;  %v5285_v50 = vld [vmem:[#allocation3 + $0x31] ss:$2 sm:$0xff]  ;;  %v5400_v26 = vrot.slane %v5283_v10, 7 }
 0x85f   :  { %v10498_v4 = vpack.i.bf16 %v14613_v1, %v14609_v47  ;;  %v6088_v37 = vpack.c.bf16 %v14613_v1, %v14609_v47  ;;  %v5401_v22 = vrot.slane %v5285_v50, 7  ;;  %v14630_v43 = vld [vmem:[#allocation3 + $0x40] ss:$2 sm:$0xff]  ;;  %v10508_v48 = vpack.i.bf16 %v5285_v50, %v5283_v10  ;;  %v5287_v5 = vld [vmem:[#allocation3 + $0x41] ss:$2 sm:$0xff]  ;;  %v10618_v1 = vld [vmem:[#allocation7 + $0xc0] sm:$0xff]  }
 0x860   :  { %v14632_v18 = vld [vmem:[#allocation3 + $0x50] ss:$2 sm:$0xff]  ;;  %v5411_v25 = vsel %vm577_vm2, %v5399_v41, %v5400_v26  ;;  %v5289_v8 = vld [vmem:[#allocation3 + $0x51] ss:$2 sm:$0xff]  ;;  %v5402_v14 = vrot.slane %v5287_v5, 7  ;;  %v5326_v50 = vand.u32 31, %v101_v44 }
 0x861   :  { %v14619_v6 = vld [vmem:[#allocation3 + $0x60] ss:$2 sm:$0xff]  ;;  %10499 = vrot.lane.b32.xlu1 %v10498_v4, %s10908_s14  ;;  %v5291_v28 = vld [vmem:[#allocation3 + $0x61] ss:$2 sm:$0xff]  ;;  %v5410_v57 = vsel %vm577_vm2, %v5400_v26, %v5401_v22  ;;  %v5403_v11 = vrot.slane %v5289_v8, 7  ;;  %v6089_v24 = vpack.c.bf16 %v14632_v18, %v14630_v43  ;;  %v10513_v61 = vpack.i.bf16 %v14632_v18, %v14630_v43 }
 0x862   :  { %v14628_v63 = vld [vmem:[#allocation3 + $0x70] ss:$2 sm:$0xff]  ;;  %v5293_v17 = vld [vmem:[#allocation3 + $0x71] ss:$2 sm:$0xff]  ;;  %v5404_v0 = vrot.slane %v5291_v28, 7  ;;  %v14658_v32 = vsel %vm577_vm2, %v5401_v22, %v5402_v14  ;;  %v10523_v54 = vpack.i.bf16 %v5289_v8, %v5287_v5  ;;  %vm14685_vm7 = vcmp.ge.s32.totalorder %v5326_v50, 1 }
 0x863   :  { %v14621_v45 = vld [vmem:[#allocation3] ss:$2 sm:$0xff]  ;;  %v5279_v29 = vld [vmem:[#allocation3 + $0x1] ss:$2 sm:$0xff]  ;;  %v6090_v59 = vpack.c.bf16 %v14628_v63, %v14619_v6  ;;  %v5405_v9 = vrot.slane %v5293_v17, 7  ;;  %v14654_v52 = vsel %vm577_vm2, %v5402_v14, %v5403_v11  ;;  %v10518_v49 = vpack.i.bf16 %v14628_v63, %v14619_v6  ;;  %v10623_v50 = vld [vmem:[#allocation7 + $0xe8] sm:$0xff]  }
 0x864   :  { %v10493_v16 = vpack.i.bf16 %v14611_v27, %v14621_v45  ;;  %v6087_v46 = vpack.c.bf16 %v14611_v27, %v14621_v45  ;;  %v5398_v13 = vrot.slane %v5279_v29, 7  ;;  %v10503_v23 = vpack.i.bf16 %v5281_v60, %v5279_v29  ;;  %v10616_v47 = vld [vmem:[#allocation7 + $0xb0] sm:$0xff]   ;;  %v10617_v27 = vld [vmem:[#allocation7 + $0xb8] sm:$0xff]  }
 0x865   :  { %10509 = vrot.lane.b32.xlu1 %v10508_v48, %s10903_s28  ;;  %v5406_v20 = vsel %vm577_vm2, %v5404_v0, %v5405_v9  ;;  %v5407_v2 = vsel %vm577_vm2, %v5403_v11, %v5404_v0  ;;  %v10528_v36 = vpack.i.bf16 %v5293_v17, %v5291_v28  ;;  %v10614_v0 = vld [vmem:[#allocation7 + $0x110] sm:$0xff]   ;;  %v10621_v43 = vld [vmem:[#allocation7 + $0xd8] sm:$0xff]  }
 0x866   :  { %10494 = vrot.lane.b32.xlu0 %v10493_v16, %s10908_s14  ;;  %v5412_v35 = vsel %vm577_vm2, %v5398_v13, %v5399_v41  ;;  %v5413_v31 = vsel %vm577_vm2, %v5405_v9, %v5398_v13  ;;  %v10620_v6 = vld [vmem:[#allocation7 + $0xd0] sm:$0xff]   ;;  %v10629_v9 = vld [vmem:[#allocation7 + $0x128] sm:$0xff]  }
 0x867   :  { %v5430_v51 = vsel %vm14671_vm6, %v5413_v31, 0.0 }
 0x869   :  { %10519 = vrot.lane.b32.xlu1 %v10518_v49, %s10908_s14  ;;  %v5434_v49 = vsel %vm14685_vm7, %v14658_v32, 0.0 }
 0x86a   :  { %10504 = vrot.lane.b32.xlu0 %v10503_v23, %s10903_s28 }
 0x86d   :  { %10529 = vrot.lane.b32.xlu1 %v10528_v36, %s10903_s28 }
 0x86e   :  { %10514 = vrot.lane.b32.xlu0 %v10513_v61, %s10908_s14 }
 0x872   :  { %10524 = vrot.lane.b32.xlu0 %v10523_v54, %s10903_s28 }
 0x8d3   :  { %v10500_v7 = vpop.permute.xlu1 %10499 }
 0x8d4   :  { %v10502_v3 = vunpack.i.h.bf16 %v10500_v7  ;;  %v10501_v21 = vunpack.i.l.bf16 %v10500_v7 }
 0x8d6   :  { %v5505_v58 = vsel %vm2249_vm12, %v5410_v57, %v10502_v3  ;;  %v5504_v55 = vsel %vm2249_vm12, %v5411_v25, %v10501_v21 }
 0x8d7   :  { %v10510_v62 = vpop.permute.xlu1 %10509 }
 0x8d8   :  { %v10495_v15 = vpop.permute.xlu0 %10494  ;;  %v10512_v34 = vunpack.i.h.bf16 %v10510_v62  ;;  %v10511_v39 = vunpack.i.l.bf16 %v10510_v62 }
 0x8d9   :  { %v10497_v56 = vunpack.i.h.bf16 %v10495_v15  ;;  %v10496_v53 = vunpack.i.l.bf16 %v10495_v15 }
 0x8da   :  { %v5512_v26 = vsel %vm4549_vm4, %v5504_v55, %v10511_v39  ;;  %v5513_v42 = vsel %vm4549_vm4, %v5505_v58, %v10512_v34 }
 0x8db   :  { %v5503_v60 = vsel %vm2249_vm12, %v5412_v35, %v10497_v56  ;;  %v5502_v29 = vsel %vm2249_vm12, %v5430_v51, %v10496_v53  ;;  %v5519_v41 = vpack.c.bf16 %v5513_v42, %v5512_v26  ;;  %v10520_v16 = vpop.permute.xlu1 %10519  ;;  %v10622_v53 = vld [vmem:[#allocation7 + $0xe0] sm:$0xff]  }
 0x8dc   :  { %v10505_v10 = vpop.permute.xlu0 %10504  ;;  %v10522_v57 = vunpack.i.h.bf16 %v10520_v16  ;;  %v10521_v25 = vunpack.i.l.bf16 %v10520_v16 }
 0x8dd   :  { %v10507_v4 = vunpack.i.h.bf16 %v10505_v10  ;;  %v10506_v22 = vunpack.i.l.bf16 %v10505_v10 }
 0x8de   :  { %v5509_v23 = vsel %vm2249_vm12, %v5406_v20, %v10522_v57  ;;  %v5508_v31 = vsel %vm2249_vm12, %v5407_v2, %v10521_v25  ;;  %v10625_v25 = vld [vmem:[#allocation7 + $0xf8] sm:$0xff]  }
 0x8df   :  { %v5510_v13 = vsel %vm4549_vm4, %v5502_v29, %v10506_v22  ;;  %v5511_v28 = vsel %vm4549_vm4, %v5503_v60, %v10507_v4  ;;  %v10530_v11 = vpop.permute.xlu1 %10529  ;;  %v10624_v29 = vld [vmem:[#allocation7 + $0xf0] sm:$0xff]  }
 0x8e0   :  { %v5518_v17 = vpack.c.bf16 %v5511_v28, %v5510_v13  ;;  %v10515_v48 = vpop.permute.xlu0 %10514  ;;  %v10532_v14 = vunpack.i.h.bf16 %v10530_v11  ;;  %v10531_v35 = vunpack.i.l.bf16 %v10530_v11 }
 0x8e1   :  { %v10517_v5 = vunpack.i.h.bf16 %v10515_v48  ;;  %v10516_v8 = vunpack.i.l.bf16 %v10515_v48 }
 0x8e2   :  { %9730 = vmatprep.mubr.msk.bf16.mxu1 %vm4610_vm5, %v5518_v17  ;;  %v5516_v36 = vsel %vm4549_vm4, %v5508_v31, %v10531_v35  ;;  %v5517_v54 = vsel %vm4549_vm4, %v5509_v23, %v10532_v14 }
 0x8e3   :  { %9731 = vmatmul.mubr.msk.bf16.vlgmr.msra.gmra.mrb[60].mxu1 %vm4610_vm5, %v5519_v41  ;;  %v5507_v3 = vsel %vm2249_vm12, %v14654_v52, %v10517_v5  ;;  %v5506_v20 = vsel %vm2249_vm12, %v5434_v49, %v10516_v8  ;;  %v5521_v21 = vpack.c.bf16 %v5517_v54, %v5516_v36  ;;  %v10615_v52 = vld [vmem:[#allocation7 + $0xa8] sm:$0xff]  }
 0x8e4   :  { %v10525_v61 = vpop.permute.xlu0 %10524  ;;  %9739 = vmatpush3.bf16.msra.mxu1 %v10613_v33  ;;  %v10909_v33 = vmov 0  }
 0x8e5   :  { %v10527_v30 = vunpack.i.h.bf16 %v10525_v61  ;;  %v10526_v7 = vunpack.i.l.bf16 %v10525_v61  ;;  %9740 = vmatprep.subr.bf16.mxu1 %v10614_v0  ;;  %5935 = vmatprep.subr.bf16.mxu0 %v10909_v33 }
 0x8e6   :  { %5936 = vmatpush1.bf16.msra.mxu0 %v10615_v52 }
 0x8e7   :  { %v5514_v2 = vsel %vm4549_vm4, %v5506_v20, %v10526_v7  ;;  %v5515_v15 = vsel %vm4549_vm4, %v5507_v3, %v10527_v30  ;;  %5937 = vmatprep.subr.bf16.mxu0 %v10909_v33 }
 0x8e8   :  { %v5520_v32 = vpack.c.bf16 %v5515_v15, %v5514_v2  ;;  %9741 = vmatpush3.bf16.msra.mxu1 %v10614_v0 }
 0x8e9   :  { %6554 = vmatprep.subr.bf16.mxu1 %v10909_v33 }
 0x8ea   :  { %9734 = vmatprep.mubr.msk.bf16.mxu1 %vm4610_vm5, %v5520_v32  ;;  %5938 = vmatpush1.bf16.msra.mxu0 %v10616_v47 }
 0x8eb   :  { %9735 = vmatmul.mubr.msk.bf16.gmra.mrb[64].mxu1 %vm4610_vm5, %v5521_v21  ;;  %5939 = vmatprep.subr.bf16.mxu0 %v10909_v33 }
 0x8ec   :  { %9742 = vmatprep.mubr.msk.bf16.mxu1 %vm2249_vm12, %v6087_v46 }
 0x8ee   :  { %5940 = vmatpush1.bf16.msra.mxu0 %v10617_v27 }
 0x8ef   :  { %5941 = vmatprep.subr.bf16.mxu0 %v10909_v33 }
 0x8f2   :  { %5942 = vmatpush1.bf16.msra.mxu0 %v10618_v1 }
 0x8f3   :  { %9743 = vmatmul.mubr.msk.bf16.vlgmr.msra.gmra.mrb[68].mxu1 %vm2249_vm12, %v6088_v37  ;;  %v10619_v37 = vld [vmem:[#allocation7 + $0xc8] sm:$0xff]   ;;  %5943 = vmatprep.subr.bf16.mxu0 %v10909_v33 }
 0x8f4   :  { %9746 = vmatprep.mubr.msk.bf16.mxu1 %vm2249_vm12, %v6089_v24 }
 0x8f6   :  { %5944 = vmatpush1.bf16.msra.mxu0 %v10619_v37 }
 0x8f7   :  { %5945 = vmatprep.subr.bf16.mxu0 %v10909_v33 }
 0x8fa   :  { %5946 = vmatpush1.bf16.msra.mxu0 %v10620_v6 }
 0x8fb   :  { %9747 = vmatmul.mubr.msk.bf16.gmra.mrb[72].mxu1 %vm2249_vm12, %v6090_v59  ;;  %5947 = vmatprep.subr.bf16.mxu0 %v10909_v33 }
 0x8fe   :  { %5948 = vmatpush1.bf16.msra.mxu0 %v10621_v43 }
 0x8ff   :  { %5949 = vmatprep.subr.bf16.mxu0 %v10909_v33 }
 0x902   :  { %5950 = vmatpush1.bf16.msra.mxu0 %v10622_v53 }
 0x903   :  { %5951 = vmatprep.subr.bf16.mxu0 %v10909_v33 }
 0x906   :  { %5952 = vmatpush1.bf16.msra.mxu0 %v10623_v50 }
 0x907   :  { %5953 = vmatprep.subr.bf16.mxu0 %v10909_v33 }
 0x90a   :  { %5954 = vmatpush1.bf16.msra.mxu0 %v10624_v29 }
 0x90b   :  { %5955 = vmatprep.subr.bf16.mxu0 %v10909_v33 }
 0x90e   :  { %5956 = vmatpush1.bf16.msra.mxu0 %v10625_v25 }
 0x90f   :  { %5957 = vmatprep.subr.bf16.mxu0 %v10909_v33 }
 0x9b6   :  { %v14728_v45 = vpop.f32.mrb[60].mxu1 }
 0x9b7   :  { %v14730_v46 = vpop.f32.mrb[61].mxu1  ;;  %v5638_v56 = vsel %vm4549_vm4, %v14728_v45, 0.0 }
 0x9b8   :  { %v14732_v63 = vpop.f32.mrb[62].mxu1  ;;  %v5635_v59 = vsel %vm4549_vm4, %v14730_v46, 0.0 }
 0x9b9   :  { %v14734_v18 = vpop.f32.mrb[63].mxu1  ;;  %v5640_v34 = vsel %vm4549_vm4, %v14732_v63, 0.0 }
 0x9ba   :  { %v5636_v24 = vsel %vm4549_vm4, %v14734_v18, 0.0 }
 0x9bb   :  { %v5637_v44 = vadd.f32 %v5636_v24, %v5635_v59 }
 0x9bd   :  { %v5639_v62 = vadd.f32 %v5638_v56, %v5637_v44 }
 0x9be   :  { %v9736_v39 = vpop.f32.mrb[64].mxu1 }
 0x9bf   :  { %v5620_v58 = vpop.f32.mrb[65].mxu1  ;;  %v5641_v55 = vadd.f32 %v5640_v34, %v5639_v62  ;;  %v5646_v60 = vsel %vm4549_vm4, %v9736_v39, 0.0 }
 0x9c0   :  { %v5642_v51 = vsel %vm4549_vm4, %v5620_v58, 0.0  ;;  %v9737_v10 = vpop.f32.mrb[66].mxu1 }
 0x9c1   :  { %v5643_v26 = vadd.f32 %v5642_v51, %v5641_v55  ;;  %v5623_v42 = vpop.f32.mrb[67].mxu1  ;;  %v5648_v16 = vsel %vm4549_vm4, %v9737_v10, 0.0 }
 0x9c2   :  { %v5644_v4 = vsel %vm4549_vm4, %v5623_v42, 0.0 }
 0x9c3   :  { %v5645_v22 = vadd.f32 %v5644_v4, %v5643_v26 }
 0x9c5   :  { %v5647_v41 = vadd.f32 %v5646_v60, %v5645_v22 }
 0x9c6   :  { %v14752_v13 = vpop.f32.mrb[68].mxu1 }
 0x9c7   :  { %v5649_v28 = vadd.f32 %v5648_v16, %v5647_v41  ;;  %v14754_v17 = vpop.f32.mrb[69].mxu1  ;;  %v6183_v35 = vsel %vm4549_vm4, %v14752_v13, 0.0 }
 0x9c8   :  { %v14756_v57 = vpop.f32.mrb[70].mxu1  ;;  %v6180_v5 = vsel %vm4549_vm4, %v14754_v17, 0.0 }
 0x9c9   :  { %v5650_v48 = vrot.slane %v5649_v28, 4  ;;  %v14758_v0 = vpop.f32.mrb[71].mxu1  ;;  %v6185_v49 = vsel %vm4549_vm4, %v14756_v57, 0.0 }
 0x9ca   :  { %v6181_v8 = vsel %vm4549_vm4, %v14758_v0, 0.0 }
 0x9cb   :  { %v5651_v11 = vadd.f32 %v5650_v48, %v5649_v28  ;;  %v6182_v14 = vadd.f32 %v6181_v8, %v6180_v5 }
 0x9cd   :  { %v5652_v23 = vrot.slane %v5651_v11, 2  ;;  %v6184_v31 = vadd.f32 %v6183_v35, %v6182_v14 }
 0x9ce   :  { %v14770_v61 = vpop.f32.mrb[72].mxu1 }
 0x9cf   :  { %v5653_v36 = vadd.f32 %v5652_v23, %v5651_v11  ;;  %v6165_v54 = vpop.f32.mrb[73].mxu1  ;;  %v6186_v30 = vadd.f32 %v6185_v49, %v6184_v31  ;;  %v6191_v47 = vsel %vm4549_vm4, %v14770_v61, 0.0 }
 0x9d0   :  { %v6187_v7 = vsel %vm4549_vm4, %v6165_v54, 0.0  ;;  %v9749_v3 = vpop.f32.mrb[74].mxu1 }
 0x9d1   :  { %v5654_v20 = vrot.slane %v5653_v36, 1  ;;  %v6188_v21 = vadd.f32 %v6187_v7, %v6186_v30  ;;  %v6168_v2 = vpop.f32.mrb[75].mxu1 }
 0x9d2   :  { %v6189_v15 = vsel %vm4549_vm4, %v6168_v2, 0.0 }
 0x9d3   :  { %v5655_v32 = vadd.f32 %v5654_v20, %v5653_v36  ;;  %v6190_v52 = vadd.f32 %v6189_v15, %v6188_v21 }
 0x9d5   :  { %v5657_v27 = vmul.f32 0.015625, %v5655_v32  ;;  %v6192_v1 = vadd.f32 %v6191_v47, %v6190_v52 }
 0x9d7   :  { %v14777_v37 = vsub.f32 %v14730_v46, %v5657_v27  ;;  %v14780_v6 = vsub.f32 %v14734_v18, %v5657_v27  ;;  %v14783_v43 = vsub.f32 %v14728_v45, %v5657_v27  ;;  %v14786_v59 = vsub.f32 %v14732_v63, %v5657_v27 }
 0x9d8   :  { %v14788_v24 = vsub.f32 %v5620_v58, %v5657_v27  ;;  %v14790_v44 = vsub.f32 %v5623_v42, %v5657_v27  ;;  %v14792_v56 = vsub.f32 %v9736_v39, %v5657_v27  ;;  %v14794_v53 = vsub.f32 %v9737_v10, %v5657_v27 }
 0x9d9   :  { %v5666_v46 = vmul.f32 %v14777_v37, %v14777_v37  ;;  %v5667_v18 = vmul.f32 %v14780_v6, %v14780_v6  ;;  %v5668_v45 = vmul.f32 %v14783_v43, %v14783_v43  ;;  %v5669_v63 = vmul.f32 %v14786_v59, %v14786_v59 }
 0x9da   :  { %v6193_v58 = vsel %vm4549_vm4, %v9749_v3, 0.0  ;;  %v5670_v55 = vmul.f32 %v14788_v24, %v14788_v24  ;;  %v5671_v26 = vmul.f32 %v14790_v44, %v14790_v44  ;;  %v5672_v60 = vmul.f32 %v14792_v56, %v14792_v56 }
 0x9db   :  { %v5674_v62 = vsel %vm4549_vm4, %v5666_v46, 0.0  ;;  %v5675_v34 = vsel %vm4549_vm4, %v5667_v18, 0.0  ;;  %v5677_v51 = vsel %vm4549_vm4, %v5668_v45, 0.0  ;;  %v6194_v10 = vadd.f32 %v6193_v58, %v6192_v1 }
 0x9dc   :  { %v5676_v39 = vadd.f32 %v5675_v34, %v5674_v62  ;;  %v5679_v42 = vsel %vm4549_vm4, %v5669_v63, 0.0  ;;  %v5681_v29 = vsel %vm4549_vm4, %v5670_v55, 0.0  ;;  %v5673_v28 = vmul.f32 %v14794_v53, %v14794_v53 }
 0x9dd   :  { %v6195_v4 = vrot.slane %v6194_v10, 4  ;;  %v5683_v25 = vsel %vm4549_vm4, %v5671_v26, 0.0  ;;  %v5685_v8 = vsel %vm4549_vm4, %v5672_v60, 0.0 }
 0x9de   :  { %v5678_v50 = vadd.f32 %v5677_v51, %v5676_v39  ;;  %v5687_v35 = vsel %vm4549_vm4, %v5673_v28, 0.0 }
 0x9df   :  { %v6196_v41 = vadd.f32 %v6195_v4, %v6194_v10 }
 0x9e0   :  { %v5680_v22 = vadd.f32 %v5679_v42, %v5678_v50 }
 0x9e1   :  { %v6197_v48 = vrot.slane %v6196_v41, 2 }
 0x9e2   :  { %v5682_v16 = vadd.f32 %v5681_v29, %v5680_v22 }
 0x9e3   :  { %v6198_v11 = vadd.f32 %v6197_v48, %v6196_v41  ;;  %v5241_v48 = vld [vmem:[%s15401_s2 + $0xc] sm:$0x1] }
 0x9e4   :  { %v5684_v5 = vadd.f32 %v5683_v25, %v5682_v16 }
 0x9e5   :  { %v6199_v23 = vrot.slane %v6198_v11, 1 }
 0x9e6   :  { %v5686_v14 = vadd.f32 %v5685_v8, %v5684_v5 }
 0x9e7   :  { %v6200_v49 = vadd.f32 %v6199_v23, %v6198_v11 }
 0x9e8   :  { %v5688_v31 = vadd.f32 %v5687_v35, %v5686_v14  ;;  %v14870_v14 = vadd.s32 24, %v15673_v12 }
 0x9e9   :  { %v6201_v30 = vmul.f32 0.015625, %v6200_v49  ;;  %v5347_v49 = vand.u32 31, %v14136_v38 }
 0x9ea   :  { %v5689_v36 = vrot.slane %v5688_v31, 4 }
 0x9eb   :  { %v14822_v20 = vsub.f32 %v14754_v17, %v6201_v30  ;;  %v14825_v21 = vsub.f32 %v14758_v0, %v6201_v30  ;;  %v14828_v15 = vsub.f32 %v14752_v13, %v6201_v30  ;;  %v14831_v32 = vsub.f32 %v14756_v57, %v6201_v30 }
 0x9ec   :  { %v5690_v7 = vadd.f32 %v5689_v36, %v5688_v31  ;;  %v14833_v47 = vsub.f32 %v6165_v54, %v6201_v30  ;;  %v14835_v27 = vsub.f32 %v6168_v2, %v6201_v30  ;;  %v14838_v1 = vsub.f32 %v14770_v61, %v6201_v30  ;;  %v9058_v36 = vld [vmem:[%s15401_s2 + $0xd] ss:$0 sm:$0xff] }
 0x9ed   :  { %v14840_v46 = vsub.f32 %v9749_v3, %v6201_v30  ;;  %v6210_v17 = vmul.f32 %v14822_v20, %v14822_v20  ;;  %v6211_v13 = vmul.f32 %v14825_v21, %v14825_v21  ;;  %v6212_v57 = vmul.f32 %v14828_v15, %v14828_v15 }
 0x9ee   :  { %v5691_v52 = vrot.slane %v5690_v7, 2  ;;  %v6213_v54 = vmul.f32 %v14831_v32, %v14831_v32  ;;  %v6214_v45 = vmul.f32 %v14833_v47, %v14833_v47  ;;  %v6215_v39 = vmul.f32 %v14835_v27, %v14835_v27 }
 0x9ef   :  { %v6218_v2 = vsel %vm4549_vm4, %v6210_v17, 0.0  ;;  %v6219_v61 = vsel %vm4549_vm4, %v6211_v13, 0.0  ;;  %v6221_v63 = vsel %vm4549_vm4, %v6212_v57, 0.0  ;;  %v6216_v10 = vmul.f32 %v14838_v1, %v14838_v1 }
 0x9f0   :  { %v5692_v0 = vadd.f32 %v5691_v52, %v5690_v7  ;;  %v6220_v3 = vadd.f32 %v6219_v61, %v6218_v2  ;;  %v6223_v58 = vsel %vm4549_vm4, %v6213_v54, 0.0  ;;  %v6225_v50 = vsel %vm4549_vm4, %v6214_v45, 0.0  ;;  %v10626_v7 = vld [vmem:[#allocation7 + $0x100] sm:$0xff]  }
 0x9f1   :  { %v6217_v4 = vmul.f32 %v14840_v46, %v14840_v46  ;;  %v6227_v22 = vsel %vm4549_vm4, %v6215_v39, 0.0  ;;  %v6229_v29 = vsel %vm4549_vm4, %v6216_v10, 0.0  ;;  %v5319_v52 = vand.u32 31, %v14870_v14  ;;  %5958 = vmatpush1.bf16.msra.mxu0 %v10626_v7 }
 0x9f2   :  { %v5693_v18 = vrot.slane %v5692_v0, 1  ;;  %v6222_v34 = vadd.f32 %v6221_v63, %v6220_v3  ;;  %vm14904_vm8 = vcmp.le.s32.totalorder %v5347_v49, 30  ;;  %v5245_v49 = vld [vmem:[%s15401_s2 + $0x10] sm:$0x1] }
 0x9f3   :  { %v6231_v16 = vsel %vm4549_vm4, %v6217_v4, 0.0  ;;  %vm14912_vm9 = vcmp.le.s32.totalorder %v5319_v52, 30 }
 0x9f4   :  { %v5694_v62 = vadd.f32 %v5693_v18, %v5692_v0  ;;  %v6224_v51 = vadd.f32 %v6223_v58, %v6222_v34 }
 0x9f6   :  { %v5695_v55 = vmul.f32 0.015625, %v5694_v62  ;;  %v6226_v42 = vadd.f32 %v6225_v50, %v6224_v51 }
 0x9f8   :  { %v5696_v26 = vadd.f32 1e-05, %v5695_v55  ;;  %v6228_v60 = vadd.f32 %v6227_v22, %v6226_v42 }
 0x9fa   :  { %10793 = vrsqrt.f32 %v5696_v26  ;;  %v6230_v41 = vadd.f32 %v6229_v29, %v6228_v60 }
 0x9fc   :  { %v6232_v28 = vadd.f32 %v6231_v16, %v6230_v41 }
 0x9fe   :  { %v6233_v25 = vrot.slane %v6232_v28, 4 }
 0xa00   :  { %v6234_v5 = vadd.f32 %v6233_v25, %v6232_v28 }
 0xa02   :  { %v6235_v11 = vrot.slane %v6234_v5, 2 }
 0xa04   :  { %v10794_v8 = vpop.eup %10793  ;;  %v6236_v23 = vadd.f32 %v6235_v11, %v6234_v5 }
 0xa05   :  { %v5698_v35 = vmul.f32 %v10794_v8, %v5241_v48 }
 0xa06   :  { %v6237_v30 = vrot.slane %v6236_v23, 1 }
 0xa07   :  { %v5702_v31 = vrot.slane %v5698_v35, %v15678_v40 }
 0xa08   :  { %v6238_v54 = vadd.f32 %v6237_v30, %v6236_v23 }
 0xa09   :  { %v5708_v17 = vmul.f32 %v5702_v31, %v14790_v44  ;;  %v5705_v13 = vmul.f32 %v5702_v31, %v14783_v43  ;;  %v5706_v57 = vmul.f32 %v5702_v31, %v14786_v59  ;;  %v5703_v0 = vmul.f32 %v5702_v31, %v14777_v37 }
 0xa0a   :  { %v5704_v2 = vmul.f32 %v5702_v31, %v14780_v6  ;;  %v5709_v38 = vmul.f32 %v5702_v31, %v14792_v56  ;;  %v5710_v61 = vmul.f32 %v5702_v31, %v14794_v53  ;;  %v6239_v62 = vmul.f32 0.015625, %v6238_v54 }
 0xa0b   :  { %v5720_v18 = vadd.f32 %v9058_v36, %v5708_v17  ;;  %v5717_v3 = vadd.f32 %v9058_v36, %v5705_v13  ;;  %v5718_v45 = vadd.f32 %v9058_v36, %v5706_v57  ;;  %v5715_v63 = vadd.f32 %v9058_v36, %v5703_v0  ;;  %v10627_v57 = vld [vmem:[#allocation7 + $0x118] sm:$0xff]  }
 0xa0c   :  { %v5716_v44 = vadd.f32 %v9058_v36, %v5704_v2  ;;  %v5721_v34 = vadd.f32 %v9058_v36, %v5709_v38  ;;  %v5722_v43 = vadd.f32 %v9058_v36, %v5710_v61  ;;  %v6240_v55 = vadd.f32 1e-05, %v6239_v62  ;;  %6555 = vmatpush1.bf16.msra.mxu1 %v10627_v57 }
 0xa0d   :  { %v5728_v39 = vmax.f32 %v5720_v18, 0.0  ;;  %v5725_v59 = vmax.f32 %v5717_v3, 0.0  ;;  %v5726_v58 = vmax.f32 %v5718_v45, 0.0  ;;  %v5723_v37 = vmax.f32 %v5715_v63, 0.0  ;;  %6556 = vmatprep.subr.bf16.mxu1 %v10909_v33 }
 0xa0e   :  { %v5724_v51 = vmax.f32 %v5716_v44, 0.0  ;;  %v5729_v6 = vmax.f32 %v5721_v34, 0.0  ;;  %v5730_v10 = vmax.f32 %v5722_v43, 0.0  ;;  %10795 = vrsqrt.f32 %v6240_v55 }
 0xa0f   :  { %v5736_v56 = vrot.slane %v5728_v39, 7  ;;  %v5768_v50 = vrot.slane %v5728_v39, 1  ;;  %v10538_v53 = vpack.i.bf16 %v5726_v58, %v5725_v59  ;;  %v5763_v26 = vrot.slane %v5723_v37, 1 }
 0xa10   :  { %v10533_v42 = vpack.i.bf16 %v5724_v51, %v5723_v37  ;;  %v5764_v4 = vrot.slane %v5724_v51, 1  ;;  %v5765_v22 = vrot.slane %v5725_v59, 1  ;;  %v5738_v60 = vrot.slane %v5730_v10, 7 }
 0xa11   :  { %10539 = vrot.lane.b32.xlu1 %v10538_v53, %s10903_s28  ;;  %v10548_v29 = vpack.i.bf16 %v5730_v10, %v5729_v6  ;;  %v5707_v41 = vmul.f32 %v5702_v31, %v14788_v24  ;;  %v5732_v16 = vrot.slane %v5724_v51, 7  ;;  %v5731_v48 = vrot.slane %v5723_v37, 7 }
 0xa12   :  { %10534 = vrot.lane.b32.xlu0 %v10533_v42, %s10903_s28  ;;  %v5776_v28 = vsel %vm770_vm0, %v5764_v4, %v5765_v22  ;;  %v5777_v25 = vsel %vm770_vm0, %v5763_v26, %v5764_v4  ;;  %v5766_v5 = vrot.slane %v5726_v58, 1  ;;  %v5733_v35 = vrot.slane %v5725_v59, 7 }
 0xa13   :  { %v5844_v8 = vpack.c.bf16 %v5776_v28, %v5777_v25  ;;  %v5719_v11 = vadd.f32 %v9058_v36, %v5707_v41  ;;  %v5734_v23 = vrot.slane %v5726_v58, 7  ;;  %v5745_v30 = vsel %vm577_vm2, %v5731_v48, %v5732_v16 }
 0xa14   :  { %v5746_v24 = vsel %vm577_vm2, %v5738_v60, %v5731_v48  ;;  %v5775_v31 = vsel %vm770_vm0, %v5765_v22, %v5766_v5  ;;  %v5769_v7 = vrot.slane %v5729_v6, 1  ;;  %v5744_v13 = vsel %vm577_vm2, %v5732_v16, %v5733_v35 }
 0xa15   :  { %9071 = vmatprep.mubr.msk.bf16.mxu0 %vm4549_vm4, %v5844_v8  ;;  %10549 = vrot.lane.b32.xlu1 %v10548_v29, %s10903_s28  ;;  %v5727_v17 = vmax.f32 %v5719_v11, 0.0  ;;  %v5743_v36 = vsel %vm577_vm2, %v5733_v35, %v5734_v23  ;;  %v5770_v54 = vrot.slane %v5730_v10, 1  ;;  %v5737_v2 = vrot.slane %v5729_v6, 7 }
 0xa16   :  { %v14910_v0 = vsel %vm770_vm0, %v5768_v50, %v5769_v7 }
 0xa17   :  { %v10543_v38 = vpack.i.bf16 %v5728_v39, %v5727_v17  ;;  %v5767_v61 = vrot.slane %v5727_v17, 1  ;;  %v5735_v3 = vrot.slane %v5727_v17, 7  ;;  %v5771_v45 = vsel %vm770_vm0, %v5769_v7, %v5770_v54 }
 0xa18   :  { %v5778_v63 = vsel %vm770_vm0, %v5770_v54, %v5763_v26  ;;  %v5739_v62 = vsel %vm577_vm2, %v5737_v2, %v5738_v60  ;;  %v5740_v52 = vsel %vm577_vm2, %v5736_v56, %v5737_v2  ;;  %v10796_v59 = vpop.eup %10795  ;;  %v10630_v54 = vld [vmem:[#allocation7 + $0x130] sm:$0xff]  }
 0xa19   :  { %10544 = vrot.lane.b32.xlu0 %v10543_v38, %s10903_s28  ;;  %v5774_v44 = vsel %vm770_vm0, %v5766_v5, %v5767_v61  ;;  %v5773_v34 = vsel %vm770_vm0, %v5767_v61, %v5768_v50  ;;  %v5741_v43 = vsel %vm577_vm2, %v5735_v3, %v5736_v56  ;;  %v5742_v39 = vsel %vm577_vm2, %v5734_v23, %v5735_v3  ;;  %v10631_v38 = vld [vmem:[#allocation7 + $0x138] sm:$0xff]  }
 0xa1a   :  { %v5798_v58 = vsel %vm14912_vm9, %v5774_v44, 0.0  ;;  %v5848_v37 = vpack.c.bf16 %v14910_v0, %v5773_v34  ;;  %v5802_v55 = vsel %vm14904_vm8, %v5778_v63, 0.0  ;;  %v6242_v51 = vmul.f32 %v10796_v59, %v5245_v49  ;;  %v10628_v0 = vld [vmem:[#allocation7 + $0x120] sm:$0xff]   ;;  %v10633_v44 = vld [vmem:[#allocation7 + $0x148] sm:$0xff]  }
 0xa1b   :  { %v5846_v6 = vpack.c.bf16 %v5798_v58, %v5775_v31  ;;  %v5850_v10 = vpack.c.bf16 %v5802_v55, %v5771_v45  ;;  %v5751_v17 = vsel %vm14685_vm7, %v5742_v39, 0.0  ;;  %6557 = vmatpush1.bf16.msra.mxu1 %v10628_v0 }
 0xa1c   :  { %v6246_v50 = vrot.slane %v6242_v51, %v15678_v40  ;;  %6558 = vmatprep.subr.bf16.mxu1 %v10909_v33  ;;  %v10634_v51 = vld [vmem:[#allocation7 + $0x150] sm:$0xff]  }
 0xa1e   :  { %v14943_v53 = vmul.f32 %v6246_v50, %v14822_v20  ;;  %v14946_v56 = vmul.f32 %v6246_v50, %v14825_v21  ;;  %v14949_v26 = vmul.f32 %v6246_v50, %v14828_v15  ;;  %v14952_v42 = vmul.f32 %v6246_v50, %v14831_v32 }
 0xa1f   :  { %v14955_v4 = vmul.f32 %v6246_v50, %v14833_v47  ;;  %v14958_v22 = vmul.f32 %v6246_v50, %v14835_v27  ;;  %v14961_v60 = vmul.f32 %v6246_v50, %v14838_v1  ;;  %v14964_v20 = vmul.f32 %v6246_v50, %v14840_v46  ;;  %6559 = vmatpush1.bf16.msra.mxu1 %v10629_v9 }
 0xa20   :  { %v5747_v32 = vsel %vm14671_vm6, %v5746_v24, 0.0  ;;  %6560 = vmatprep.subr.bf16.mxu1 %v10909_v33 }
 0xa23   :  { %6561 = vmatpush1.bf16.msra.mxu1 %v10630_v54 }
 0xa24   :  { %6562 = vmatprep.subr.bf16.mxu1 %v10909_v33 }
 0xa27   :  { %6563 = vmatpush1.bf16.msra.mxu1 %v10631_v38 }
 0xa28   :  { %6564 = vmatprep.subr.bf16.mxu1 %v10909_v33 }
 0xa83   :  { %v10540_v21 = vpop.permute.xlu1 %10539 }
 0xa84   :  { %v10542_v29 = vunpack.i.h.bf16 %v10540_v21  ;;  %v10541_v41 = vunpack.i.l.bf16 %v10540_v21  ;;  %v10535_v15 = vpop.permute.xlu0 %10534 }
 0xa85   :  { %v10537_v16 = vunpack.i.h.bf16 %v10535_v15  ;;  %v10536_v28 = vunpack.i.l.bf16 %v10535_v15 }
 0xa86   :  { %v5837_v47 = vsel %vm4549_vm4, %v5744_v13, %v10541_v41  ;;  %v5838_v27 = vsel %vm4549_vm4, %v5743_v36, %v10542_v29 }
 0xa87   :  { %v5835_v25 = vsel %vm4549_vm4, %v5747_v32, %v10536_v28  ;;  %v5836_v1 = vsel %vm4549_vm4, %v5745_v30, %v10537_v16  ;;  %v10550_v48 = vpop.permute.xlu1 %10549  ;;  %v5845_v46 = vpack.c.bf16 %v5838_v27, %v5837_v47  ;;  %v10636_v32 = vld [vmem:[#allocation7 + $0x160] sm:$0xff]   ;;  %v10637_v27 = vld [vmem:[#allocation7 + $0x168] sm:$0xff]  }
 0xa88   :  { %v5843_v5 = vpack.c.bf16 %v5836_v1, %v5835_v25  ;;  %v10552_v8 = vunpack.i.h.bf16 %v10550_v48  ;;  %v10551_v11 = vunpack.i.l.bf16 %v10550_v48 }
 0xa8a   :  { %5968 = vmatmul.mubr.bf16.vlgmr.msra.gmra.mrb[84].mxu0 %v5843_v5  ;;  %v5841_v35 = vsel %vm4549_vm4, %v5740_v52, %v10551_v11  ;;  %v5842_v23 = vsel %vm4549_vm4, %v5739_v62, %v10552_v8  ;;  %v10632_v62 = vld [vmem:[#allocation7 + $0x140] sm:$0xff]  }
 0xa8b   :  { %v10545_v19 = vpop.permute.xlu0 %10544  ;;  %9072 = vmatprep.mubr.msk.bf16.mxu0 %vm4549_vm4, %v5846_v6  ;;  %v5849_v24 = vpack.c.bf16 %v5842_v23, %v5841_v35  ;;  %6565 = vmatpush1.bf16.msra.mxu1 %v10632_v62 }
 0xa8c   :  { %v10547_v31 = vunpack.i.h.bf16 %v10545_v19  ;;  %v10546_v7 = vunpack.i.l.bf16 %v10545_v19  ;;  %6566 = vmatprep.subr.bf16.mxu1 %v10909_v33 }
 0xa8e   :  { %v5839_v30 = vsel %vm4549_vm4, %v5751_v17, %v10546_v7  ;;  %v5840_v36 = vsel %vm4549_vm4, %v5741_v43, %v10547_v31 }
 0xa8f   :  { %v5847_v13 = vpack.c.bf16 %v5840_v36, %v5839_v30  ;;  %6567 = vmatpush1.bf16.msra.mxu1 %v10633_v44 }
 0xa90   :  { %6568 = vmatprep.subr.bf16.mxu1 %v10909_v33 }
 0xa92   :  { %5976 = vmatmul.mubr.bf16.gmra.mrb[88].mxu0 %v5845_v46 }
 0xa93   :  { %9073 = vmatprep.mubr.msk.bf16.mxu0 %vm4549_vm4, %v5848_v37  ;;  %6569 = vmatpush1.bf16.msra.mxu1 %v10634_v51 }
 0xa94   :  { %6570 = vmatprep.subr.bf16.mxu1 %v10909_v33 }
 0xa9a   :  { %5984 = vmatmul.mubr.bf16.gmra.mrb[92].mxu0 %v5847_v13 }
 0xa9b   :  { %9074 = vmatprep.mubr.msk.bf16.mxu0 %vm4549_vm4, %v5850_v10  ;;  %v10635_v10 = vld [vmem:[#allocation7 + $0x158] sm:$0xff]  }
 0xa9c   :  { %6571 = vmatpush1.bf16.msra.mxu1 %v10635_v10 }
 0xa9d   :  { %6572 = vmatprep.subr.bf16.mxu1 %v10909_v33 }
 0xaa0   :  { %6573 = vmatpush1.bf16.msra.mxu1 %v10636_v32 }
 0xaa1   :  { %6574 = vmatprep.subr.bf16.mxu1 %v10909_v33 }
 0xaa2   :  { %5992 = vmatmul.mubr.bf16.gmra.mrb[96].mxu0 %v5849_v24 }
 0xaa4   :  { %6575 = vmatpush1.bf16.msra.mxu1 %v10637_v27 }
 0xaa5   :  { %6576 = vmatprep.subr.bf16.mxu1 %v10909_v33 }
 0xb5d   :  { %v5969_v2 = vpop.f32.mrb[84].mxu0 }
 0xb5e   :  { %v5971_v61 = vpop.f32.mrb[85].mxu0  ;;  %v6000_v3 = vsel %vm4549_vm4, %v5969_v2, 0.0 }
 0xb5f   :  { %v5972_v18 = vpop.f32.mrb[86].mxu0 }
 0xb60   :  { %v6001_v49 = vsel %vm4549_vm4, %v5972_v18, 0.0  ;;  %v5974_v45 = vpop.f32.mrb[87].mxu0 }
 0xb61   :  { %v6002_v63 = vadd.f32 %v6001_v49, %v6000_v3 }
 0xb65   :  { %v5977_v52 = vpop.f32.mrb[88].mxu0 }
 0xb66   :  { %v6003_v34 = vsel %vm4549_vm4, %v5977_v52, 0.0  ;;  %v5979_v43 = vpop.f32.mrb[89].mxu0 }
 0xb67   :  { %v6004_v39 = vadd.f32 %v6003_v34, %v6002_v63  ;;  %v5980_v59 = vpop.f32.mrb[90].mxu0 }
 0xb68   :  { %v6005_v58 = vsel %vm4549_vm4, %v5980_v59, 0.0  ;;  %v5982_v37 = vpop.f32.mrb[91].mxu0 }
 0xb69   :  { %v6006_v55 = vadd.f32 %v6005_v58, %v6004_v39 }
 0xb6d   :  { %v5985_v6 = vpop.f32.mrb[92].mxu0 }
 0xb6e   :  { %v6007_v50 = vsel %vm4549_vm4, %v5985_v6, 0.0  ;;  %v5987_v21 = vpop.f32.mrb[93].mxu0 }
 0xb6f   :  { %v6008_v29 = vadd.f32 %v6007_v50, %v6006_v55  ;;  %v5988_v41 = vpop.f32.mrb[94].mxu0 }
 0xb70   :  { %v6009_v15 = vsel %vm4549_vm4, %v5988_v41, 0.0  ;;  %v5990_v16 = vpop.f32.mrb[95].mxu0 }
 0xb71   :  { %v6010_v28 = vadd.f32 %v6009_v15, %v6008_v29 }
 0xb75   :  { %v5993_v47 = vpop.f32.mrb[96].mxu0 }
 0xb76   :  { %v6011_v25 = vsel %vm4549_vm4, %v5993_v47, 0.0  ;;  %v5995_v1 = vpop.f32.mrb[97].mxu0 }
 0xb77   :  { %v6012_v48 = vadd.f32 %v6011_v25, %v6010_v28  ;;  %v5996_v46 = vpop.f32.mrb[98].mxu0  ;;  %v5243_v25 = vld [vmem:[%s15401_s2 + $0xe] sm:$0x1]  ;;  %v9082_v1 = vld [vmem:[%s15401_s2 + $0x11] ss:$0 sm:$0xff] }
 0xb78   :  { %v6013_v5 = vsel %vm4549_vm4, %v5996_v46, 0.0  ;;  %v5998_v8 = vpop.f32.mrb[99].mxu0 }
 0xb79   :  { %v6014_v11 = vadd.f32 %v6013_v5, %v6012_v48  ;;  %v6259_v5 = vadd.f32 %v9082_v1, %v14943_v53  ;;  %v6260_v8 = vadd.f32 %v9082_v1, %v14946_v56  ;;  %v6266_v53 = vadd.f32 %v9082_v1, %v14964_v20 }
 0xb7b   :  { %v6015_v35 = vrot.slane %v6014_v11, 4 }
 0xb7d   :  { %v6016_v23 = vadd.f32 %v6015_v35, %v6014_v11  ;;  %v6261_v11 = vadd.f32 %v9082_v1, %v14949_v26  ;;  %v6262_v35 = vadd.f32 %v9082_v1, %v14952_v42 }
 0xb7f   :  { %v6017_v19 = vrot.slane %v6016_v23, 2 }
 0xb81   :  { %v6018_v24 = vadd.f32 %v6017_v19, %v6016_v23  ;;  %v6263_v19 = vadd.f32 %v9082_v1, %v14955_v4 }
 0xb83   :  { %v6019_v31 = vrot.slane %v6018_v24, 1 }
 0xb85   :  { %v6020_v7 = vadd.f32 %v6019_v31, %v6018_v24  ;;  %v6264_v24 = vadd.f32 %v9082_v1, %v14958_v22  ;;  %v6265_v31 = vadd.f32 %v9082_v1, %v14961_v60  ;;  %v6384_v1 = vand.u32 15, %v15673_v12 }
 0xb87   :  { %v6021_v17 = vmul.f32 0.015625, %v6020_v7  ;;  %v9075_v7 = vld [vmem:[%s15401_s2 + $0xf] ss:$0 sm:$0xff]  ;;  %vm15057_vm10 = vcmp.ge.s32.totalorder %v6384_v1, 1 }
 0xb89   :  { %v6022_v30 = vsub.f32 %v5969_v2, %v6021_v17  ;;  %v6023_v36 = vsub.f32 %v5972_v18, %v6021_v17  ;;  %v6024_v13 = vsub.f32 %v5977_v52, %v6021_v17  ;;  %v6025_v57 = vsub.f32 %v5980_v59, %v6021_v17 }
 0xb8a   :  { %v6026_v0 = vsub.f32 %v5985_v6, %v6021_v17  ;;  %v6027_v9 = vsub.f32 %v5988_v41, %v6021_v17  ;;  %v6028_v54 = vsub.f32 %v5993_v47, %v6021_v17  ;;  %v6029_v38 = vsub.f32 %v5996_v46, %v6021_v17 }
 0xb8b   :  { %v6030_v61 = vmul.f32 %v6022_v30, %v6022_v30  ;;  %v6031_v3 = vmul.f32 %v6023_v36, %v6023_v36  ;;  %v6032_v49 = vmul.f32 %v6024_v13, %v6024_v13  ;;  %v6033_v45 = vmul.f32 %v6025_v57, %v6025_v57 }
 0xb8c   :  { %v6034_v44 = vmul.f32 %v6026_v0, %v6026_v0  ;;  %v6035_v18 = vmul.f32 %v6027_v9, %v6027_v9  ;;  %v6036_v39 = vmul.f32 %v6028_v54, %v6028_v54  ;;  %v6037_v37 = vmul.f32 %v6029_v38, %v6029_v38 }
 0xb8d   :  { %v6038_v33 = vsel %vm4549_vm4, %v6030_v61, 0.0  ;;  %v6039_v63 = vsel %vm4549_vm4, %v6031_v3, 0.0  ;;  %v6041_v34 = vsel %vm4549_vm4, %v6032_v49, 0.0  ;;  %v6043_v52 = vsel %vm4549_vm4, %v6033_v45, 0.0 }
 0xb8e   :  { %v6040_v62 = vadd.f32 %v6039_v63, %v6038_v33  ;;  %v6045_v59 = vsel %vm4549_vm4, %v6034_v44, 0.0  ;;  %v6047_v55 = vsel %vm4549_vm4, %v6035_v18, 0.0  ;;  %v6049_v6 = vsel %vm4549_vm4, %v6036_v39, 0.0 }
 0xb8f   :  { %v6051_v50 = vsel %vm4549_vm4, %v6037_v37, 0.0  ;;  %v10638_v37 = vld [vmem:[#allocation7 + $0x170] sm:$0xff]  }
 0xb90   :  { %v6042_v2 = vadd.f32 %v6041_v34, %v6040_v62  ;;  %6577 = vmatpush1.bf16.msra.mxu1 %v10638_v37 }
 0xb92   :  { %v6044_v43 = vadd.f32 %v6043_v52, %v6042_v2 }
 0xb94   :  { %v6046_v58 = vadd.f32 %v6045_v59, %v6044_v43 }
 0xb96   :  { %v6048_v51 = vadd.f32 %v6047_v55, %v6046_v58 }
 0xb98   :  { %v6050_v10 = vadd.f32 %v6049_v6, %v6048_v51 }
 0xb9a   :  { %v6052_v21 = vadd.f32 %v6051_v50, %v6050_v10 }
 0xb9c   :  { %v6053_v29 = vrot.slane %v6052_v21, 4 }
 0xb9e   :  { %v6054_v41 = vadd.f32 %v6053_v29, %v6052_v21 }
 0xba0   :  { %v6055_v15 = vrot.slane %v6054_v41, 2 }
 0xba2   :  { %v6056_v16 = vadd.f32 %v6055_v15, %v6054_v41 }
 0xba4   :  { %v6057_v28 = vrot.slane %v6056_v16, 1 }
 0xba6   :  { %v6058_v32 = vadd.f32 %v6057_v28, %v6056_v16 }
 0xba8   :  { %v6059_v47 = vmul.f32 0.015625, %v6058_v32 }
 0xbaa   :  { %v6060_v27 = vadd.f32 1e-05, %v6059_v47 }
 0xbac   :  { %10797 = vrsqrt.f32 %v6060_v27 }
 0xbb6   :  { %v10798_v48 = vpop.eup %10797 }
 0xbb7   :  { %v6062_v46 = vmul.f32 %v10798_v48, %v5243_v25 }
 0xbb9   :  { %v6066_v23 = vrot.slane %v6062_v46, %v15678_v40  ;;  %v99_v46 = vadd.s32 16, %v15673_v12 }
 0xbbb   :  { %v6067_v17 = vmul.f32 %v6066_v23, %v6022_v30  ;;  %v6068_v56 = vmul.f32 %v6066_v23, %v6023_v36  ;;  %v6069_v61 = vmul.f32 %v6066_v23, %v6024_v13  ;;  %v6070_v26 = vmul.f32 %v6066_v23, %v6025_v57 }
 0xbbc   :  { %v6071_v3 = vmul.f32 %v6066_v23, %v6026_v0  ;;  %v6072_v42 = vmul.f32 %v6066_v23, %v6027_v9  ;;  %v6073_v49 = vmul.f32 %v6066_v23, %v6028_v54  ;;  %v6074_v45 = vmul.f32 %v6066_v23, %v6029_v38 }
 0xbbd   :  { %v6079_v33 = vadd.f32 %v9075_v7, %v6067_v17  ;;  %v6080_v4 = vadd.f32 %v9075_v7, %v6068_v56  ;;  %v6081_v63 = vadd.f32 %v9075_v7, %v6069_v61  ;;  %v6082_v22 = vadd.f32 %v9075_v7, %v6070_v26 }
 0xbbe   :  { %v6083_v62 = vadd.f32 %v9075_v7, %v6071_v3  ;;  %v6084_v60 = vadd.f32 %v9075_v7, %v6072_v42  ;;  %v6085_v44 = vadd.f32 %v9075_v7, %v6073_v49  ;;  %v6086_v34 = vadd.f32 %v9075_v7, %v6074_v45 }
 0xbbf   :  { %v6267_v2 = vadd.f32 %v6259_v5, %v6079_v33  ;;  %v6268_v18 = vadd.f32 %v6260_v8, %v6080_v4  ;;  %v6269_v52 = vadd.f32 %v6261_v11, %v6081_v63  ;;  %v6270_v20 = vadd.f32 %v6262_v35, %v6082_v22 }
 0xbc0   :  { %v6271_v30 = vadd.f32 %v6263_v19, %v6083_v62  ;;  %v6272_v36 = vadd.f32 %v6264_v24, %v6084_v60  ;;  %v6273_v13 = vadd.f32 %v6265_v31, %v6085_v44  ;;  %v6274_v57 = vadd.f32 %v6266_v53, %v6086_v34  ;;  %v10639_v60 = vld [vmem:[#allocation7 + $0x1b8] sm:$0xff]   ;;  %v10641_v34 = vld [vmem:[#allocation7 + $0x1c0] sm:$0xff]  }
 0xbc1   :  { %v6275_v0 = vmax.f32 %v6267_v2, 0.0  ;;  %v6276_v9 = vmax.f32 %v6268_v18, 0.0  ;;  %v6277_v54 = vmax.f32 %v6269_v52, 0.0  ;;  %v6278_v38 = vmax.f32 %v6270_v20, 0.0  ;;  %v10640_v44 = vld [vmem:[#allocation7 + $0x178] sm:$0xff]   ;;  %9362 = vmatprep.subr.bf16.mxu0 %v10639_v60  ;;  %v10642_v2 = vld [vmem:[#allocation7 + $0x180] sm:$0xff]  }
 0xbc2   :  { %v6279_v43 = vmax.f32 %v6271_v30, 0.0  ;;  %v6280_v39 = vmax.f32 %v6272_v36, 0.0  ;;  %v6281_v59 = vmax.f32 %v6273_v13, 0.0  ;;  %v6282_v58 = vmax.f32 %v6274_v57, 0.0  ;;  %9363 = vmatpush3.bf16.msra.mxu0 %v10640_v44  ;;  %v10643_v18 = vld [vmem:[#allocation7 + $0x1c8] sm:$0xff]   ;;  %v10645_v20 = vld [vmem:[#allocation7 + $0x1d0] sm:$0xff]  }
 0xbc3   :  { %6357 = vst.msk [vmem:[#allocation4] sm:$0xff] %vm4549_vm4, %v6275_v0  ;;  %6358 = vst.msk [vmem:[#allocation4 + $0x8] sm:$0xff] %vm4549_vm4, %v6276_v9  ;;  %v6398_v23 = vand.u32 15, %v99_v46  ;;  %9364 = vmatprep.subr.bf16.mxu0 %v10641_v34  ;;  %v10644_v52 = vld [vmem:[#allocation7 + $0x188] sm:$0xff]   ;;  %v10646_v30 = vld [vmem:[#allocation7 + $0x190] sm:$0xff]  }
 0xbc4   :  { %6359 = vst.msk [vmem:[#allocation4 + $0x10] sm:$0xff] %vm4549_vm4, %v6277_v54  ;;  %6360 = vst.msk [vmem:[#allocation4 + $0x18] sm:$0xff] %vm4549_vm4, %v6278_v38  ;;  %v10647_v36 = vld [vmem:[#allocation7 + $0x1d8] sm:$0xff]   ;;  %v10649_v57 = vld [vmem:[#allocation7 + $0x1e0] sm:$0xff]  }
 0xbc5   :  { %6361 = vst.msk [vmem:[#allocation4 + $0x20] sm:$0xff] %vm4549_vm4, %v6279_v43  ;;  %6362 = vst.msk [vmem:[#allocation4 + $0x28] sm:$0xff] %vm4549_vm4, %v6280_v39  ;;  %vm15067_vm11 = vcmp.ge.s32.totalorder %v6398_v23, 1  ;;  %v10648_v13 = vld [vmem:[#allocation7 + $0x198] sm:$0xff]   ;;  %v10650_v0 = vld [vmem:[#allocation7 + $0x1a0] sm:$0xff]  }
 0xbc6   :  { %6363 = vst.msk [vmem:[#allocation4 + $0x30] sm:$0xff] %vm4549_vm4, %v6281_v59  ;;  %6364 = vst.msk [vmem:[#allocation4 + $0x38] sm:$0xff] %vm4549_vm4, %v6282_v58  ;;  %9365 = vmatpush3.bf16.msra.mxu0 %v10642_v2 }
 0xbc7   :  { %9366 = vmatprep.subr.bf16.mxu0 %v10643_v18  ;;  %v6351_v18 = vld [vmem:[%s15401_s2 + $0x12] sm:$0x1] }
 0xbca   :  { %v6373_v55 = vld [vmem:[#allocation4 + $0x1] ss:$2 sm:$0xff]  ;;  %v15034_v6 = vld [vmem:[#allocation4] ss:$2 sm:$0xff]  ;;  %9367 = vmatpush3.bf16.msra.mxu0 %v10644_v52 }
 0xbcb   :  { %v6375_v51 = vld [vmem:[#allocation4 + $0x11] ss:$2 sm:$0xff]  ;;  %v6432_v21 = vrot.slane %v6373_v55, 7  ;;  %v15044_v28 = vld [vmem:[#allocation4 + $0x10] ss:$2 sm:$0xff]  ;;  %9368 = vmatprep.subr.bf16.mxu0 %v10645_v20 }
 0xbcc   :  { %v15036_v10 = vld [vmem:[#allocation4 + $0x20] ss:$2 sm:$0xff]  ;;  %v6433_v29 = vrot.slane %v6375_v51, 7  ;;  %v6473_v41 = vpack.c.bf16 %v6375_v51, %v6373_v55  ;;  %v10553_v32 = vpack.i.bf16 %v15044_v28, %v15034_v6  ;;  %v7012_v47 = vpack.c.bf16 %v15044_v28, %v15034_v6  ;;  %v6377_v5 = vld [vmem:[#allocation4 + $0x21] ss:$2 sm:$0xff]  ;;  %v10673_v28 = vld [vmem:[#allocation7 + $0x2a8] sm:$0xff]  }
 0xbcd   :  { %v15038_v50 = vld [vmem:[#allocation4 + $0x30] ss:$2 sm:$0xff]  ;;  %v6379_v25 = vld [vmem:[#allocation4 + $0x31] ss:$2 sm:$0xff]  ;;  %v6434_v31 = vrot.slane %v6377_v5, 7  ;;  %v10665_v6 = vld [vmem:[#allocation7 + $0x278] sm:$0xff]  }
 0xbce   :  { %v10558_v15 = vpack.i.bf16 %v15038_v50, %v15036_v10  ;;  %v7013_v16 = vpack.c.bf16 %v15038_v50, %v15036_v10  ;;  %9095 = vmatprep.mubr.msk.bf16.mxu1 %vm4549_vm4, %v6473_v41  ;;  %v6438_v27 = vsel %vm577_vm2, %v6432_v21, %v6433_v29  ;;  %10554 = vrot.lane.b32.xlu0 %v10553_v32, %s10903_s28  ;;  %v6435_v48 = vrot.slane %v6379_v25, 7  ;;  %v10667_v10 = vld [vmem:[#allocation7 + $0x280] sm:$0xff]  }
 0xbcf   :  { %v6475_v49 = vpack.c.bf16 %v6379_v25, %v6377_v5  ;;  %v6437_v45 = vsel %vm577_vm2, %v6433_v29, %v6434_v31  ;;  %9369 = vmatpush3.bf16.msra.mxu0 %v10646_v30  ;;  %v15092_v30 = vadd.s32 8, %v15673_v12  ;;  %v10668_v50 = vld [vmem:[#allocation7 + $0x240] sm:$0xff]  }
 0xbd0   :  { %10559 = vrot.lane.b32.xlu1 %v10558_v15, %s10903_s28  ;;  %v6439_v11 = vsel %vm577_vm2, %v6435_v48, %v6432_v21  ;;  %v6436_v33 = vsel %vm577_vm2, %v6434_v31, %v6435_v48  ;;  %v6450_v4 = vsel %vm15067_vm11, %v6437_v45, 0.0  ;;  %9370 = vmatprep.subr.bf16.mxu0 %v10647_v36 }
 0xbd1   :  { %v6448_v53 = vsel %vm15057_vm10, %v6439_v11, 0.0 }
 0xbd3   :  { %9371 = vmatpush3.bf16.msra.mxu0 %v10648_v13  ;;  %v10651_v13 = vld [vmem:[#allocation7 + $0x1e8] sm:$0xff]  }
 0xbd4   :  { %9372 = vmatprep.subr.bf16.mxu0 %v10649_v57  ;;  %v10652_v57 = vld [vmem:[#allocation7 + $0x1a8] sm:$0xff]  }
 0xbd7   :  { %9373 = vmatpush3.bf16.msra.mxu0 %v10650_v0  ;;  %v9097_v0 = vld [vmem:[%s15401_s2 + $0x13] ss:$0 sm:$0xff] }
 0xbd8   :  { %9374 = vmatprep.subr.bf16.mxu0 %v10651_v13 }
 0xbdb   :  { %9375 = vmatpush3.bf16.msra.mxu0 %v10652_v57 }
 0xc40   :  { %v10555_v35 = vpop.permute.xlu0 %10554 }
 0xc41   :  { %v10557_v19 = vunpack.i.h.bf16 %v10555_v35  ;;  %v10556_v24 = vunpack.i.l.bf16 %v10555_v35 }
 0xc42   :  { %v10560_v7 = vpop.permute.xlu1 %10559 }
 0xc43   :  { %v6469_v17 = vsel %vm4549_vm4, %v6438_v27, %v10557_v19  ;;  %v6468_v56 = vsel %vm4549_vm4, %v6448_v53, %v10556_v24  ;;  %v10562_v3 = vunpack.i.h.bf16 %v10560_v7  ;;  %v10561_v42 = vunpack.i.l.bf16 %v10560_v7 }
 0xc44   :  { %v6472_v61 = vpack.c.bf16 %v6469_v17, %v6468_v56 }
 0xc45   :  { %v6470_v63 = vsel %vm4549_vm4, %v6450_v4, %v10561_v42  ;;  %v6471_v22 = vsel %vm4549_vm4, %v6436_v33, %v10562_v3 }
 0xc46   :  { %6587 = vmatmul.mubr.bf16.vlgmr.msra.gmra.mrb[76].mxu1 %v6472_v61  ;;  %v6474_v62 = vpack.c.bf16 %v6471_v22, %v6470_v63 }
 0xc47   :  { %9096 = vmatprep.mubr.msk.bf16.mxu1 %vm4549_vm4, %v6475_v49 }
 0xc4e   :  { %6595 = vmatmul.mubr.bf16.gmra.mrb[80].mxu1 %v6474_v62 }
 0xd19   :  { %v6588_v9 = vpop.f32.mrb[76].mxu1 }
 0xd1a   :  { %v6590_v54 = vpop.f32.mrb[77].mxu1  ;;  %v6603_v43 = vsel %vm4610_vm5, %v6588_v9, 0.0 }
 0xd1b   :  { %v6591_v38 = vpop.f32.mrb[78].mxu1 }
 0xd1c   :  { %v6604_v39 = vsel %vm4610_vm5, %v6591_v38, 0.0  ;;  %v6593_v59 = vpop.f32.mrb[79].mxu1 }
 0xd1d   :  { %v6605_v58 = vadd.f32 %v6604_v39, %v6603_v43  ;;  %v6391_v39 = vand.u32 15, %v15092_v30  ;;  %v6405_v59 = vand.u32 15, %v14870_v14  ;;  %v10660_v14 = vld [vmem:[#allocation7 + $0x220] sm:$0xff]  }
 0xd1f   :  { %vm15100_vm13 = vcmp.le.s32.totalorder %v6391_v39, 14  ;;  %vm15104_vm14 = vcmp.le.s32.totalorder %v6405_v59, 14 }
 0xd21   :  { %v6596_v37 = vpop.f32.mrb[80].mxu1 }
 0xd22   :  { %v6606_v55 = vsel %vm4610_vm5, %v6596_v37, 0.0  ;;  %v6598_v51 = vpop.f32.mrb[81].mxu1 }
 0xd23   :  { %v6607_v21 = vadd.f32 %v6606_v55, %v6605_v58  ;;  %v6599_v29 = vpop.f32.mrb[82].mxu1 }
 0xd24   :  { %v6608_v41 = vsel %vm4610_vm5, %v6599_v29, 0.0  ;;  %v6601_v15 = vpop.f32.mrb[83].mxu1 }
 0xd25   :  { %v6609_v32 = vadd.f32 %v6608_v41, %v6607_v21  ;;  %v10653_v21 = vld [vmem:[#allocation7 + $0x1f8] sm:$0xff]   ;;  %v10655_v41 = vld [vmem:[#allocation7 + $0x1b0] sm:$0xff]  }
 0xd26   :  { %9750 = vmatprep.subr.bf16.mxu1 %v10653_v21 }
 0xd27   :  { %v6610_v27 = vrot.slane %v6609_v32, 4  ;;  %9751 = vmatpush3.bf16.msra.mxu1 %v10653_v21 }
 0xd29   :  { %v6611_v25 = vadd.f32 %v6610_v27, %v6609_v32 }
 0xd2b   :  { %v6612_v1 = vrot.slane %v6611_v25, 2 }
 0xd2d   :  { %v6613_v48 = vadd.f32 %v6612_v1, %v6611_v25  ;;  %v10659_v1 = vld [vmem:[#allocation7 + $0x218] sm:$0xff]  }
 0xd2f   :  { %v6614_v46 = vrot.slane %v6613_v48, 1 }
 0xd31   :  { %v6615_v5 = vadd.f32 %v6614_v46, %v6613_v48 }
 0xd33   :  { %v6617_v11 = vmul.f32 0.03125, %v6615_v5 }
 0xd35   :  { %v6618_v35 = vsub.f32 %v6588_v9, %v6617_v11  ;;  %v6619_v23 = vsub.f32 %v6591_v38, %v6617_v11  ;;  %v6620_v19 = vsub.f32 %v6596_v37, %v6617_v11  ;;  %v6621_v24 = vsub.f32 %v6599_v29, %v6617_v11  ;;  %v10654_v29 = vld [vmem:[#allocation7 + $0x1f0] sm:$0xff]  }
 0xd36   :  { %9376 = vmatprep.subr.bf16.mxu0 %v10654_v29 }
 0xd37   :  { %v6622_v31 = vmul.f32 %v6618_v35, %v6618_v35  ;;  %v6623_v7 = vmul.f32 %v6619_v23, %v6619_v23  ;;  %v6624_v53 = vmul.f32 %v6620_v19, %v6620_v19  ;;  %v6625_v17 = vmul.f32 %v6621_v24, %v6621_v24  ;;  %9377 = vmatpush3.bf16.msra.mxu0 %v10655_v41 }
 0xd39   :  { %v6626_v56 = vsel %vm4610_vm5, %v6622_v31, 0.0  ;;  %v6627_v61 = vsel %vm4610_vm5, %v6623_v7, 0.0  ;;  %v6629_v42 = vsel %vm4610_vm5, %v6624_v53, 0.0  ;;  %v6631_v45 = vsel %vm4610_vm5, %v6625_v17, 0.0 }
 0xd3a   :  { %v6628_v3 = vadd.f32 %v6627_v61, %v6626_v56 }
 0xd3c   :  { %v6630_v49 = vadd.f32 %v6629_v42, %v6628_v3 }
 0xd3e   :  { %v6632_v33 = vadd.f32 %v6631_v45, %v6630_v49 }
 0xd40   :  { %v6633_v4 = vrot.slane %v6632_v33, 4 }
 0xd42   :  { %v6634_v63 = vadd.f32 %v6633_v4, %v6632_v33 }
 0xd44   :  { %v6635_v22 = vrot.slane %v6634_v63, 2 }
 0xd46   :  { %v6636_v62 = vadd.f32 %v6635_v22, %v6634_v63 }
 0xd48   :  { %v6637_v60 = vrot.slane %v6636_v62, 1 }
 0xd4a   :  { %v6638_v44 = vadd.f32 %v6637_v60, %v6636_v62 }
 0xd4c   :  { %v6639_v34 = vmul.f32 0.03125, %v6638_v44 }
 0xd4e   :  { %v6640_v2 = vadd.f32 1e-05, %v6639_v34 }
 0xd50   :  { %10799 = vrsqrt.f32 %v6640_v2 }
 0xd5a   :  { %v10800_v52 = vpop.eup %10799 }
 0xd5b   :  { %v6642_v20 = vmul.f32 %v10800_v52, %v6351_v18 }
 0xd5d   :  { %v6646_v36 = vrot.slane %v6642_v20, %v15678_v40 }
 0xd5f   :  { %v6650_v9 = vmul.f32 %v6646_v36, %v6621_v24  ;;  %v6647_v54 = vmul.f32 %v6646_v36, %v6618_v35  ;;  %v6648_v38 = vmul.f32 %v6646_v36, %v6619_v23  ;;  %v6649_v43 = vmul.f32 %v6646_v36, %v6620_v19  ;;  %v10656_v35 = vld [vmem:[#allocation7 + $0x200] sm:$0xff]   ;;  %v10657_v23 = vld [vmem:[#allocation7 + $0x208] sm:$0xff]  }
 0xd60   :  { %9752 = vmatprep.subr.bf16.mxu1 %v10656_v35  ;;  %9758 = vmatprep.subr.bf16.mxu0 %v10657_v23 }
 0xd61   :  { %v6658_v58 = vadd.f32 %v9097_v0, %v6650_v9  ;;  %v6655_v37 = vadd.f32 %v9097_v0, %v6647_v54  ;;  %v6656_v55 = vadd.f32 %v9097_v0, %v6648_v38  ;;  %v6657_v51 = vadd.f32 %v9097_v0, %v6649_v43  ;;  %9753 = vmatpush3.bf16.msra.mxu1 %v10656_v35  ;;  %v10664_v35 = vld [vmem:[#allocation7 + $0x230] sm:$0xff]  }
 0xd63   :  { %v6662_v15 = vmax.f32 %v6658_v58, 0.0  ;;  %v6659_v32 = vmax.f32 %v6655_v37, 0.0  ;;  %v6660_v27 = vmax.f32 %v6656_v55, 0.0  ;;  %v6661_v25 = vmax.f32 %v6657_v51, 0.0 }
 0xd65   :  { %v6666_v48 = vrot.slane %v6662_v15, 7  ;;  %v10563_v46 = vpack.i.bf16 %v6660_v27, %v6659_v32  ;;  %v10573_v5 = vpack.i.bf16 %v6662_v15, %v6661_v25  ;;  %v6679_v11 = vrot.slane %v6659_v32, 1 }
 0xd66   :  { %v6680_v19 = vrot.slane %v6660_v27, 1  ;;  %v6681_v24 = vrot.slane %v6661_v25, 1  ;;  %v6682_v31 = vrot.slane %v6662_v15, 1  ;;  %v6664_v7 = vrot.slane %v6660_v27, 7  ;;  %v10658_v15 = vld [vmem:[#allocation7 + $0x210] sm:$0xff]  }
 0xd67   :  { %10564 = vrot.lane.b32.xlu0 %v10563_v46, %s10910_s9  ;;  %v6663_v53 = vrot.slane %v6659_v32, 7  ;;  %v6665_v17 = vrot.slane %v6661_v25, 7  ;;  %v10662_v46 = vld [vmem:[#allocation7 + $0x228] sm:$0xff]  }
 0xd68   :  { %v6684_v56 = vsel %vm770_vm0, %v6680_v19, %v6681_v24  ;;  %v6685_v61 = vsel %vm770_vm0, %v6679_v11, %v6680_v19  ;;  %v6683_v3 = vsel %vm770_vm0, %v6681_v24, %v6682_v31  ;;  %v6686_v42 = vsel %vm770_vm0, %v6682_v31, %v6679_v11  ;;  %v10671_v19 = vld [vmem:[#allocation7 + $0x290] sm:$0xff]   ;;  %v10674_v31 = vld [vmem:[#allocation7 + $0x298] sm:$0xff]  }
 0xd69   :  { %v6696_v49 = vsel %vm15100_vm13, %v6684_v56, 0.0  ;;  %v6698_v45 = vsel %vm15104_vm14, %v6686_v42, 0.0  ;;  %v6669_v33 = vsel %vm577_vm2, %v6663_v53, %v6664_v7  ;;  %v6670_v4 = vsel %vm577_vm2, %v6666_v48, %v6663_v53  ;;  %v10672_v24 = vld [vmem:[#allocation7 + $0x250] sm:$0xff]  }
 0xd6a   :  { %v10568_v63 = vpack.i.bf16 %v6696_v49, %v6685_v61  ;;  %v10578_v22 = vpack.i.bf16 %v6698_v45, %v6683_v3  ;;  %v6667_v62 = vsel %vm577_vm2, %v6665_v17, %v6666_v48  ;;  %v6668_v60 = vsel %vm577_vm2, %v6664_v7, %v6665_v17  ;;  %v10661_v48 = vld [vmem:[#allocation7 + $0x268] sm:$0xff]   ;;  %v10675_v7 = vld [vmem:[#allocation7 + $0x258] sm:$0xff]  }
 0xd6b   :  { %10574 = vrot.lane.b32.xlu0 %v10573_v5, %s10910_s9  ;;  %v6671_v18 = vsel %vm15057_vm10, %v6670_v4, 0.0  ;;  %v6673_v43 = vsel %vm15067_vm11, %v6668_v60, 0.0  ;;  %v10663_v5 = vld [vmem:[#allocation7 + $0x270] sm:$0xff]   ;;  %v10911_v11 = vmov 0.0   ;;  %9400 = vmatprep.subr.bf16.mxu1 %v10661_v48 }
 0xd6c   :  { %10569 = vrot.lane.b32.xlu1 %v10568_v63, %s10903_s28 }
 0xd70   :  { %10579 = vrot.lane.b32.xlu1 %v10578_v22, %s10903_s28 }
 0xdd9   :  { %v10565_v44 = vpop.permute.xlu0 %10564 }
 0xdda   :  { %v10567_v34 = vunpack.i.h.bf16 %v10565_v44  ;;  %v10566_v2 = vunpack.i.l.bf16 %v10565_v44 }
 0xddc   :  { %v6731_v52 = vsel %vm4610_vm5, %v6671_v18, %v10566_v2  ;;  %v6732_v20 = vsel %vm4610_vm5, %v6669_v33, %v10567_v34 }
 0xddd   :  { %v6739_v36 = vpack.c.bf16 %v6732_v20, %v6731_v52  ;;  %v10575_v13 = vpop.permute.xlu0 %10574 }
 0xdde   :  { %v10577_v57 = vunpack.i.h.bf16 %v10575_v13  ;;  %v10576_v0 = vunpack.i.l.bf16 %v10575_v13  ;;  %v10570_v9 = vpop.permute.xlu1 %10569 }
 0xddf   :  { %v10572_v54 = vunpack.i.h.bf16 %v10570_v9  ;;  %v10571_v38 = vunpack.i.l.bf16 %v10570_v9 }
 0xde0   :  { %v6733_v39 = vsel %vm4610_vm5, %v6673_v43, %v10576_v0  ;;  %v6734_v59 = vsel %vm4610_vm5, %v6667_v62, %v10577_v57 }
 0xde1   :  { %v6741_v8 = vpack.c.bf16 %v10572_v54, %v10571_v38  ;;  %v6735_v58 = vsel %vm4549_vm4, %v10566_v2, %v10571_v38  ;;  %v6736_v37 = vsel %vm4549_vm4, %v10567_v34, %v10572_v54  ;;  %v6742_v55 = vpack.c.bf16 %v6734_v59, %v6733_v39 }
 0xde2   :  { %v10580_v51 = vpop.permute.xlu1 %10579  ;;  %v6740_v21 = vpack.c.bf16 %v6736_v37, %v6735_v58 }
 0xde3   :  { %v10582_v29 = vunpack.i.h.bf16 %v10580_v51  ;;  %v10581_v41 = vunpack.i.l.bf16 %v10580_v51  ;;  %9754 = vmatprep.mubr.msk.bf16.mxu1 %vm2249_vm12, %v6741_v8 }
 0xde4   :  { %6891 = vmatprep.mubr.bf16.mxu0 %v6740_v21 }
 0xde5   :  { %v6744_v26 = vpack.c.bf16 %v10582_v29, %v10581_v41  ;;  %6892 = vmatmul.mubr.bf16.vlgmr.msra.gmra.mrb[100].mxu0 %v6739_v36  ;;  %v6737_v32 = vsel %vm4549_vm4, %v10576_v0, %v10581_v41  ;;  %v6738_v27 = vsel %vm4549_vm4, %v10577_v57, %v10582_v29 }
 0xde6   :  { %9759 = vmatpush3.bf16.msra.mxu0 %v10657_v23  ;;  %v6743_v25 = vpack.c.bf16 %v6738_v27, %v6737_v32  ;;  %v10670_v23 = vld [vmem:[#allocation7 + $0x248] sm:$0xff]  }
 0xde7   :  { %9755 = vmatmul.mubr.msk.bf16.vlgmr.msra.gmra.mrb[84].mxu1 %vm2249_vm12, %v6744_v26  ;;  %9760 = vmatprep.subr.bf16.mxu0 %v10658_v15 }
 0xde8   :  { %6899 = vmatprep.mubr.bf16.mxu0 %v6743_v25  ;;  %9401 = vmatpush3.bf16.msra.mxu1 %v10662_v46 }
 0xde9   :  { %9402 = vmatprep.subr.bf16.mxu1 %v10663_v5 }
 0xdea   :  { %9761 = vmatpush3.bf16.msra.mxu0 %v10658_v15 }
 0xdeb   :  { %9762 = vmatprep.subr.bf16.mxu0 %v10659_v1 }
 0xdec   :  { %9403 = vmatpush3.bf16.msra.mxu1 %v10664_v35 }
 0xded   :  { %6900 = vmatmul.mubr.bf16.gmra.mrb[104].mxu0 %v6742_v55  ;;  %9404 = vmatprep.subr.bf16.mxu1 %v10665_v6 }
 0xdee   :  { %9763 = vmatpush3.bf16.msra.mxu0 %v10659_v1  ;;  %9766 = vmatprep.mubr.msk.bf16.mxu0 %vm4549_vm4, %v7012_v47  ;;  %v10666_v47 = vld [vmem:[#allocation7 + $0x238] sm:$0xff]  }
 0xdef   :  { %9764 = vmatprep.subr.bf16.mxu0 %v10660_v14 }
 0xdf0   :  { %9405 = vmatpush3.bf16.msra.mxu1 %v10666_v47 }
 0xdf1   :  { %9406 = vmatprep.subr.bf16.mxu1 %v10667_v10 }
 0xdf2   :  { %9765 = vmatpush3.bf16.msra.mxu0 %v10660_v14 }
 0xdf3   :  { %9770 = vmatprep.subr.bf16.mxu0 %v10911_v11 }
 0xdf4   :  { %9407 = vmatpush3.bf16.msra.mxu1 %v10668_v50 }
 0xdf5   :  { %9767 = vmatmul.mubr.msk.bf16.vlgmr.msra.gmra.mrb[108].mxu0 %vm4549_vm4, %v7013_v16  ;;  %v10669_v16 = vld [vmem:[#allocation7 + $0x288] sm:$0xff]  }
 0xdf6   :  { %9771 = vmatpush3.bf16.msra.mxu0 %v10673_v28  ;;  %9408 = vmatprep.subr.bf16.mxu1 %v10669_v16 }
 0xdf7   :  { %9772 = vmatprep.subr.bf16.mxu0 %v10911_v11  ;;  %9774 = vmatprep.mubr.msk.bf16.mxu0 %vm10912_vm15, %v10911_v11 }
 0xdf8   :  { %9409 = vmatpush3.bf16.msra.mxu1 %v10670_v23 }
 0xdf9   :  { %9410 = vmatprep.subr.bf16.mxu1 %v10671_v19 }
 0xdfc   :  { %9411 = vmatpush3.bf16.msra.mxu1 %v10672_v24 }
 0xdfd   :  { %9412 = vmatprep.subr.bf16.mxu1 %v10674_v31 }
 0xe00   :  { %9413 = vmatpush3.bf16.msra.mxu1 %v10675_v7 }
 0xeb8   :  { %v9378_v53 = vpop.f32.mrb[100].mxu0 }
 0xeb9   :  { %v9379_v17 = vpop.f32.mrb[101].mxu0 }
 0xeba   :  { %v9380_v56 = vadd.f32 %v9379_v17, %v9378_v53  ;;  %v9381_v61 = vpop.f32.mrb[102].mxu0  ;;  %v9756_v3 = vpop.f32.mrb[84].mxu1 }
 0xebb   :  { %v9382_v42 = vpop.f32.mrb[103].mxu0  ;;  %v6942_v49 = vpop.f32.mrb[85].mxu1 }
 0xebc   :  { %v9383_v45 = vadd.f32 %v9382_v42, %v9381_v61  ;;  %v6943_v33 = vadd.f32 %v9380_v56, %v6942_v49  ;;  %v9757_v4 = vpop.f32.mrb[86].mxu1 }
 0xebd   :  { %v6945_v63 = vpop.f32.mrb[87].mxu1 }
 0xebe   :  { %v6946_v22 = vadd.f32 %v9383_v45, %v6945_v63  ;;  %v6957_v62 = vsel %vm4610_vm5, %v6943_v33, 0.0 }
 0xec0   :  { %v6958_v60 = vsel %vm4610_vm5, %v6946_v22, 0.0  ;;  %v9384_v44 = vpop.f32.mrb[104].mxu0 }
 0xec1   :  { %v6959_v34 = vadd.f32 %v6958_v60, %v6957_v62  ;;  %v9385_v2 = vpop.f32.mrb[105].mxu0 }
 0xec2   :  { %v9386_v18 = vadd.f32 %v9385_v2, %v9384_v44  ;;  %v9387_v52 = vpop.f32.mrb[106].mxu0 }
 0xec3   :  { %v9388_v20 = vpop.f32.mrb[107].mxu0 }
 0xec4   :  { %v6951_v36 = vadd.f32 %v9756_v3, %v9386_v18  ;;  %v9389_v13 = vadd.f32 %v9388_v20, %v9387_v52 }
 0xec6   :  { %v6960_v57 = vsel %vm4610_vm5, %v6951_v36, 0.0  ;;  %v6954_v0 = vadd.f32 %v9757_v4, %v9389_v13 }
 0xec7   :  { %v6961_v9 = vadd.f32 %v6960_v57, %v6959_v34 }
 0xec8   :  { %v6962_v54 = vsel %vm4610_vm5, %v6954_v0, 0.0  ;;  %v9768_v38 = vpop.f32.mrb[108].mxu0 }
 0xec9   :  { %v6963_v43 = vadd.f32 %v6962_v54, %v6961_v9  ;;  %v7078_v39 = vpop.f32.mrb[109].mxu0  ;;  %v7096_v29 = vsel %vm4610_vm5, %v9768_v38, 0.0 }
 0xeca   :  { %v9769_v59 = vpop.f32.mrb[110].mxu0  ;;  %v7093_v37 = vsel %vm4610_vm5, %v7078_v39, 0.0 }
 0xecb   :  { %v6964_v8 = vrot.slane %v6963_v43, 4  ;;  %v7081_v58 = vpop.f32.mrb[111].mxu0  ;;  %v7098_v26 = vsel %vm4610_vm5, %v9769_v59, 0.0 }
 0xecc   :  { %v7094_v55 = vsel %vm4610_vm5, %v7081_v58, 0.0 }
 0xecd   :  { %v6965_v51 = vadd.f32 %v6964_v8, %v6963_v43  ;;  %v7095_v21 = vadd.f32 %v7094_v55, %v7093_v37 }
 0xecf   :  { %v6966_v41 = vrot.slane %v6965_v51, 2  ;;  %v7097_v15 = vadd.f32 %v7096_v29, %v7095_v21 }
 0xed1   :  { %v6967_v32 = vadd.f32 %v6966_v41, %v6965_v51  ;;  %v7099_v27 = vadd.f32 %v7098_v26, %v7097_v15  ;;  %v6353_v15 = vld [vmem:[%s15401_s2 + $0x14] sm:$0x1] }
 0xed3   :  { %v6968_v25 = vrot.slane %v6967_v32, 1  ;;  %v7100_v1 = vrot.slane %v7099_v27, 4 }
 0xed5   :  { %v6969_v14 = vadd.f32 %v6968_v25, %v6967_v32  ;;  %v7101_v48 = vadd.f32 %v7100_v1, %v7099_v27 }
 0xed7   :  { %v6970_v46 = vmul.f32 0.03125, %v6969_v14  ;;  %v7102_v5 = vrot.slane %v7101_v48, 2 }
 0xed9   :  { %v6971_v35 = vsub.f32 %v6943_v33, %v6970_v46  ;;  %v6972_v6 = vsub.f32 %v6946_v22, %v6970_v46  ;;  %v6973_v28 = vsub.f32 %v6951_v36, %v6970_v46  ;;  %v6974_v47 = vsub.f32 %v6954_v0, %v6970_v46  ;;  %v6355_v46 = vld [vmem:[%s15401_s2 + $0x16] sm:$0x1] }
 0xeda   :  { %v7103_v10 = vadd.f32 %v7102_v5, %v7101_v48 }
 0xedb   :  { %v6975_v50 = vmul.f32 %v6971_v35, %v6971_v35  ;;  %v6976_v16 = vmul.f32 %v6972_v6, %v6972_v6  ;;  %v6977_v23 = vmul.f32 %v6973_v28, %v6973_v28  ;;  %v6978_v24 = vmul.f32 %v6974_v47, %v6974_v47 }
 0xedc   :  { %v7104_v19 = vrot.slane %v7103_v10, 1 }
 0xedd   :  { %v6979_v31 = vsel %vm4610_vm5, %v6975_v50, 0.0  ;;  %v6980_v7 = vsel %vm4610_vm5, %v6976_v16, 0.0  ;;  %v6982_v56 = vsel %vm4610_vm5, %v6977_v23, 0.0  ;;  %v6984_v42 = vsel %vm4610_vm5, %v6978_v24, 0.0  ;;  %v9118_v50 = vld [vmem:[%s15401_s2 + $0x15] ss:$0 sm:$0xff] }
 0xede   :  { %v6981_v53 = vadd.f32 %v6980_v7, %v6979_v31  ;;  %v7105_v17 = vadd.f32 %v7104_v19, %v7103_v10  ;;  %v9125_v23 = vld [vmem:[%s15401_s2 + $0x17] ss:$0 sm:$0xff] }
 0xee0   :  { %v6983_v61 = vadd.f32 %v6982_v56, %v6981_v53  ;;  %v7106_v3 = vmul.f32 0.03125, %v7105_v17 }
 0xee2   :  { %v6985_v49 = vadd.f32 %v6984_v42, %v6983_v61  ;;  %v7107_v45 = vsub.f32 %v7078_v39, %v7106_v3  ;;  %v7108_v33 = vsub.f32 %v7081_v58, %v7106_v3  ;;  %v7109_v4 = vsub.f32 %v9768_v38, %v7106_v3 }
 0xee3   :  { %v7110_v63 = vsub.f32 %v9769_v59, %v7106_v3 }
 0xee4   :  { %v6986_v22 = vrot.slane %v6985_v49, 4  ;;  %v7111_v62 = vmul.f32 %v7107_v45, %v7107_v45  ;;  %v7112_v60 = vmul.f32 %v7108_v33, %v7108_v33  ;;  %v7113_v44 = vmul.f32 %v7109_v4, %v7109_v4 }
 0xee5   :  { %v7114_v2 = vmul.f32 %v7110_v63, %v7110_v63 }
 0xee6   :  { %v6987_v34 = vadd.f32 %v6986_v22, %v6985_v49  ;;  %v7115_v18 = vsel %vm4610_vm5, %v7111_v62, 0.0  ;;  %v7116_v52 = vsel %vm4610_vm5, %v7112_v60, 0.0  ;;  %v7118_v13 = vsel %vm4610_vm5, %v7113_v44, 0.0 }
 0xee7   :  { %v7117_v20 = vadd.f32 %v7116_v52, %v7115_v18  ;;  %v7120_v9 = vsel %vm4610_vm5, %v7114_v2, 0.0 }
 0xee8   :  { %v6988_v36 = vrot.slane %v6987_v34, 2 }
 0xee9   :  { %v7119_v57 = vadd.f32 %v7118_v13, %v7117_v20 }
 0xeea   :  { %v6989_v0 = vadd.f32 %v6988_v36, %v6987_v34 }
 0xeeb   :  { %v7121_v54 = vadd.f32 %v7120_v9, %v7119_v57 }
 0xeec   :  { %v6990_v38 = vrot.slane %v6989_v0, 1 }
 0xeed   :  { %v7122_v43 = vrot.slane %v7121_v54, 4 }
 0xeee   :  { %v6991_v39 = vadd.f32 %v6990_v38, %v6989_v0  ;;  %v7273_v38 = vand.u32 7, %v15673_v12  ;;  %v10705_v12 = vld [vmem:[#allocation7 + $0x388] sm:$0xff]  }
 0xeef   :  { %v7123_v59 = vadd.f32 %v7122_v43, %v7121_v54  ;;  %v7280_v43 = vand.u32 7, %v15092_v30 }
 0xef0   :  { %v6992_v8 = vmul.f32 0.03125, %v6991_v39  ;;  %vm15211_vm1 = vcmp.ge.s32.totalorder %v7273_v38, 1 }
 0xef1   :  { %v7124_v58 = vrot.slane %v7123_v59, 2  ;;  %vm15217_vm3 = vcmp.ge.s32.totalorder %v7280_v43, 1 }
 0xef2   :  { %v6993_v37 = vadd.f32 1e-05, %v6992_v8  ;;  %vm9170_vm6 = vmpackc.low %vm15217_vm3, %vm15211_vm1 }
 0xef3   :  { %v7125_v55 = vadd.f32 %v7124_v58, %v7123_v59  ;;  %v10703_v59 = vld [vmem:[#allocation7 + $0x378] sm:$0xff]  }
 0xef4   :  { %10801 = vrsqrt.f32 %v6993_v37 }
 0xef5   :  { %v7126_v51 = vrot.slane %v7125_v55, 1 }
 0xef7   :  { %v7127_v21 = vadd.f32 %v7126_v51, %v7125_v55 }
 0xef9   :  { %v7128_v29 = vmul.f32 0.03125, %v7127_v21 }
 0xefb   :  { %v7129_v41 = vadd.f32 1e-05, %v7128_v29 }
 0xefd   :  { %10803 = vrsqrt.f32 %v7129_v41 }
 0xefe   :  { %v10802_v26 = vpop.eup %10801 }
 0xeff   :  { %v6995_v32 = vmul.f32 %v10802_v26, %v6353_v15 }
 0xf01   :  { %v6999_v27 = vrot.slane %v6995_v32, %v15678_v40 }
 0xf03   :  { %v7000_v25 = vmul.f32 %v6999_v27, %v6971_v35  ;;  %v7002_v1 = vmul.f32 %v6999_v27, %v6973_v28  ;;  %v7003_v14 = vmul.f32 %v6999_v27, %v6974_v47  ;;  %v7001_v48 = vmul.f32 %v6999_v27, %v6972_v6 }
 0xf05   :  { %v7008_v19 = vadd.f32 %v9118_v50, %v7000_v25  ;;  %v7010_v24 = vadd.f32 %v9118_v50, %v7002_v1  ;;  %v7011_v31 = vadd.f32 %v9118_v50, %v7003_v14  ;;  %v7009_v7 = vadd.f32 %v9118_v50, %v7001_v48  ;;  %v10679_v48 = vld [vmem:[#allocation7 + $0x2f8] sm:$0xff]   ;;  %v10683_v50 = vld [vmem:[#allocation7 + $0x2c0] sm:$0xff]  }
 0xf07   :  { %v10804_v5 = vpop.eup %10803 }
 0xf08   :  { %v7131_v10 = vmul.f32 %v10804_v5, %v6355_v46  ;;  %v10680_v46 = vld [vmem:[#allocation7 + $0x2b8] sm:$0xff]  }
 0xf09   :  { %v10681_v5 = vld [vmem:[#allocation7 + $0x338] sm:$0xff]  }
 0xf0a   :  { %v7135_v16 = vrot.slane %v7131_v10, %v15678_v40  ;;  %v10682_v10 = vld [vmem:[#allocation7 + $0x300] sm:$0xff]  }
 0xf0c   :  { %v7136_v35 = vmul.f32 %v7135_v16, %v7107_v45  ;;  %v7137_v28 = vmul.f32 %v7135_v16, %v7108_v33  ;;  %v7138_v47 = vmul.f32 %v7135_v16, %v7109_v4  ;;  %v7139_v6 = vmul.f32 %v7135_v16, %v7110_v63  ;;  %v10676_v45 = vld [vmem:[#allocation7 + $0x2b0] sm:$0xff]   ;;  %v10677_v33 = vld [vmem:[#allocation7 + $0x2a0] sm:$0xff]  }
 0xf0d   :  { %v10678_v4 = vld [vmem:[#allocation7 + $0x260] sm:$0xff]   ;;  %9773 = vmatpush3.bf16.msra.mxu0 %v10676_v45  ;;  %9414 = vmatprep.subr.bf16.mxu1 %v10677_v33 }
 0xf0e   :  { %v7144_v53 = vadd.f32 %v9125_v23, %v7136_v35  ;;  %v7145_v17 = vadd.f32 %v9125_v23, %v7137_v28  ;;  %v7146_v56 = vadd.f32 %v9125_v23, %v7138_v47  ;;  %v7147_v61 = vadd.f32 %v9125_v23, %v7139_v6  ;;  %9415 = vmatpush3.bf16.msra.mxu1 %v10678_v4  ;;  %v10684_v16 = vld [vmem:[#allocation7 + $0x340] sm:$0xff]   ;;  %v10685_v23 = vld [vmem:[#allocation7 + $0x308] sm:$0xff]   ;;  %v10688_v47 = vld [vmem:[#allocation7 + $0x310] sm:$0xff]  }
 0xf0f   :  { %9778 = vmatprep.subr.bf16.mxu1 %v10911_v11  ;;  %9425 = vmatprep.subr.bf16.mxu0 %v10679_v48  ;;  %v10686_v35 = vld [vmem:[#allocation7 + $0x2c8] sm:$0xff]   ;;  %v10689_v6 = vld [vmem:[#allocation7 + $0x2d0] sm:$0xff]  }
 0xf10   :  { %v7148_v3 = vadd.f32 %v7144_v53, %v7008_v19  ;;  %v7149_v42 = vadd.f32 %v7145_v17, %v7009_v7  ;;  %v7150_v49 = vadd.f32 %v7146_v56, %v7010_v24  ;;  %v7151_v22 = vadd.f32 %v7147_v61, %v7011_v31  ;;  %v10687_v28 = vld [vmem:[#allocation7 + $0x348] sm:$0xff]   ;;  %v10690_v19 = vld [vmem:[#allocation7 + $0x350] sm:$0xff]   ;;  %v10691_v24 = vld [vmem:[#allocation7 + $0x318] sm:$0xff]  }
 0xf11   :  { %v10692_v31 = vld [vmem:[#allocation7 + $0x2d8] sm:$0xff]   ;;  %v10694_v53 = vld [vmem:[#allocation7 + $0x320] sm:$0xff]   ;;  %v10697_v61 = vld [vmem:[#allocation7 + $0x328] sm:$0xff]  }
 0xf12   :  { %v7152_v62 = vmax.f32 %v7148_v3, 0.0  ;;  %v7153_v60 = vmax.f32 %v7149_v42, 0.0  ;;  %v7154_v44 = vmax.f32 %v7150_v49, 0.0  ;;  %v7155_v34 = vmax.f32 %v7151_v22, 0.0  ;;  %v10693_v7 = vld [vmem:[#allocation7 + $0x358] sm:$0xff]   ;;  %v10695_v17 = vld [vmem:[#allocation7 + $0x2e0] sm:$0xff]  }
 0xf13   :  { %v10696_v56 = vld [vmem:[#allocation7 + $0x360] sm:$0xff]   ;;  %v10698_v3 = vld [vmem:[#allocation7 + $0x2e8] sm:$0xff]   ;;  %v10700_v49 = vld [vmem:[#allocation7 + $0x330] sm:$0xff]  }
 0xf14   :  { %7258 = vst.msk [vmem:[#allocation5] sm:$0xff] %vm4610_vm5, %v7152_v62  ;;  %7259 = vst.msk [vmem:[#allocation5 + $0x8] sm:$0xff] %vm4610_vm5, %v7153_v60  ;;  %v10699_v42 = vld [vmem:[#allocation7 + $0x368] sm:$0xff]   ;;  %v10701_v22 = vld [vmem:[#allocation7 + $0x2f0] sm:$0xff]  }
 0xf15   :  { %7260 = vst.msk [vmem:[#allocation5 + $0x10] sm:$0xff] %vm4610_vm5, %v7154_v44  ;;  %7261 = vst.msk [vmem:[#allocation5 + $0x18] sm:$0xff] %vm4610_vm5, %v7155_v34  ;;  %v10702_v62 = vld [vmem:[#allocation7 + $0x370] sm:$0xff]  }
 0xf1b   :  { %v7266_v63 = vld [vmem:[#allocation5 + $0x1] ss:$2 sm:$0xff]  ;;  %v15193_v18 = vld [vmem:[#allocation5] ss:$2 sm:$0xff] }
 0xf1c   :  { %v7268_v2 = vld [vmem:[#allocation5 + $0x11] ss:$2 sm:$0xff]  ;;  %v7295_v36 = vrot.slane %v7266_v63, 7  ;;  %v15195_v13 = vld [vmem:[#allocation5 + $0x10] ss:$2 sm:$0xff] }
 0xf1d   :  { %v7296_v52 = vrot.slane %v7268_v2, 7  ;;  %v10588_v20 = vpack.i.bf16 %v7268_v2, %v7266_v63  ;;  %v10583_v57 = vpack.i.bf16 %v15195_v13, %v15193_v18  ;;  %v7841_v0 = vpack.c.bf16 %v15195_v13, %v15193_v18  ;;  %v10713_v18 = vld [vmem:[#allocation9 + $0x50] sm:$0xff]  }
 0xf1e   :  { %v10714_v13 = vld [vmem:[#allocation9 + $0x10] sm:$0xff]  }
 0xf1f   :  { %10589 = vrot.lane.b32.xlu1 %v10588_v20, %s10903_s28  ;;  %v7297_v9 = vsel %vm577_vm2, %v7295_v36, %v7296_v52  ;;  %v7298_v54 = vsel %vm577_vm2, %v7296_v52, %v7295_v36  ;;  %10584 = vrot.lane.b32.xlu0 %v10583_v57, %s10910_s9 }
 0xf20   :  { %v7303_v41 = vsel %vm15211_vm1, %v7298_v54, 0.0  ;;  %v7304_v15 = vsel %vm15217_vm3, %v7297_v9, 0.0 }
 0xf91   :  { %v10590_v39 = vpop.permute.xlu1 %10589  ;;  %v10585_v55 = vpop.permute.xlu0 %10584 }
 0xf92   :  { %v10592_v58 = vunpack.i.h.bf16 %v10590_v39  ;;  %v10591_v37 = vunpack.i.l.bf16 %v10590_v39  ;;  %v10587_v51 = vunpack.i.h.bf16 %v10585_v55  ;;  %v10586_v21 = vunpack.i.l.bf16 %v10585_v55 }
 0xf94   :  { %v7327_v29 = vpack.c.bf16 %v10592_v58, %v10591_v37  ;;  %v7322_v26 = vsel %vm4610_vm5, %v7304_v15, %v10587_v51  ;;  %v7321_v32 = vsel %vm4610_vm5, %v7303_v41, %v10586_v21  ;;  %v7323_v27 = vsel %vm4549_vm4, %v10586_v21, %v10591_v37 }
 0xf95   :  { %v7324_v25 = vsel %vm4549_vm4, %v10587_v51, %v10592_v58  ;;  %v7325_v1 = vpack.c.bf16 %v7322_v26, %v7321_v32  ;;  %vm15256_vm4 = vcmp.le.s32.totalorder %v7280_v43, 6 }
 0xf96   :  { %9775 = vmatmul.mubr.msk.bf16.vlgmr.msra.gmra.mrb[112].mxu0 %vm2249_vm12, %v7327_v29  ;;  %v7326_v14 = vpack.c.bf16 %v7324_v25, %v7323_v27  ;;  %vm15250_vm12 = vcmp.le.s32.totalorder %v7273_v38, 6 }
 0xf97   :  { %9426 = vmatpush3.bf16.msra.mxu0 %v10680_v46  ;;  %vm9173_vm7 = vmpackc.low %vm15256_vm4, %vm15250_vm12 }
 0xf98   :  { %7471 = vmatprep.mubr.bf16.mxu1 %v7326_v14  ;;  %9427 = vmatprep.subr.bf16.mxu0 %v10682_v10 }
 0xf99   :  { %7472 = vmatmul.mubr.bf16.vlgmr.msra.gmra.mrb[88].mxu1 %v7325_v1 }
 0xf9a   :  { %9794 = vmatprep.mubr.msk.bf16.mxu1 %vm10912_vm15, %v10911_v11  ;;  %9779 = vmatpush3.bf16.msra.mxu1 %v10681_v5 }
 0xf9b   :  { %9780 = vmatprep.subr.bf16.mxu1 %v10911_v11  ;;  %9428 = vmatpush3.bf16.msra.mxu0 %v10683_v50  ;;  %v7252_v50 = vld [vmem:[%s15401_s2 + $0x18] sm:$0x1] }
 0xf9c   :  { %9429 = vmatprep.subr.bf16.mxu0 %v10685_v23 }
 0xf9e   :  { %9781 = vmatpush3.bf16.msra.mxu1 %v10684_v16 }
 0xf9f   :  { %9782 = vmatprep.subr.bf16.mxu1 %v10911_v11  ;;  %9430 = vmatpush3.bf16.msra.mxu0 %v10686_v35 }
 0xfa0   :  { %9431 = vmatprep.subr.bf16.mxu0 %v10688_v47 }
 0xfa2   :  { %9783 = vmatpush3.bf16.msra.mxu1 %v10687_v28  ;;  %v9145_v28 = vld [vmem:[%s15401_s2 + $0x19] ss:$0 sm:$0xff] }
 0xfa3   :  { %9784 = vmatprep.subr.bf16.mxu1 %v10911_v11  ;;  %9432 = vmatpush3.bf16.msra.mxu0 %v10689_v6 }
 0xfa4   :  { %9433 = vmatprep.subr.bf16.mxu0 %v10691_v24 }
 0xfa6   :  { %9785 = vmatpush3.bf16.msra.mxu1 %v10690_v19 }
 0xfa7   :  { %9786 = vmatprep.subr.bf16.mxu1 %v10911_v11  ;;  %9434 = vmatpush3.bf16.msra.mxu0 %v10692_v31 }
 0xfa8   :  { %9435 = vmatprep.subr.bf16.mxu0 %v10694_v53 }
 0xfaa   :  { %9787 = vmatpush3.bf16.msra.mxu1 %v10693_v7 }
 0xfab   :  { %9788 = vmatprep.subr.bf16.mxu1 %v10911_v11  ;;  %9436 = vmatpush3.bf16.msra.mxu0 %v10695_v17 }
 0xfac   :  { %9437 = vmatprep.subr.bf16.mxu0 %v10697_v61 }
 0xfae   :  { %9789 = vmatpush3.bf16.msra.mxu1 %v10696_v56 }
 0xfaf   :  { %9790 = vmatprep.subr.bf16.mxu1 %v10911_v11  ;;  %9438 = vmatpush3.bf16.msra.mxu0 %v10698_v3 }
 0xfb0   :  { %9439 = vmatprep.subr.bf16.mxu0 %v10700_v49 }
 0xfb2   :  { %9791 = vmatpush3.bf16.msra.mxu1 %v10699_v42 }
 0xfb3   :  { %9792 = vmatprep.subr.bf16.mxu1 %v10911_v11  ;;  %9440 = vmatpush3.bf16.msra.mxu0 %v10701_v22 }
 0xfb4   :  { %9798 = vmatprep.subr.bf16.mxu0 %v10911_v11 }
 0xfb6   :  { %9793 = vmatpush3.bf16.msra.mxu1 %v10702_v62 }
 0xfb7   :  { %9814 = vmatprep.subr.bf16.mxu1 %v10911_v11 }
0x1069   :  { %v7514_v60 = vpop.f32.mrb[112].mxu0 }
0x106a   :  { %v9776_v44 = vpop.f32.mrb[113].mxu0 }
0x106b   :  { %v7517_v34 = vpop.f32.mrb[114].mxu0  ;;  %v10706_v44 = vld [vmem:[#allocation7 + $0x390] sm:$0xff]  }
0x106c   :  { %v9416_v45 = vpop.f32.mrb[88].mxu1  ;;  %v9777_v33 = vpop.f32.mrb[115].mxu0 }
0x106d   :  { %v9417_v4 = vpop.f32.mrb[89].mxu1  ;;  %v10709_v33 = vld [vmem:[#allocation9 + $0x40] sm:$0xff]  }
0x106e   :  { %v9418_v63 = vadd.f32 %v9417_v4, %v9416_v45  ;;  %v9419_v2 = vpop.f32.mrb[90].mxu1  ;;  %v10708_v45 = vld [vmem:[#allocation7 + $0x3a0] sm:$0xff]   ;;  %v10710_v4 = vld [vmem:[#allocation9] sm:$0xff]  }
0x106f   :  { %v9420_v52 = vpop.f32.mrb[91].mxu1 }
0x1070   :  { %v7515_v20 = vadd.f32 %v9418_v63, %v7514_v60  ;;  %v9421_v36 = vadd.f32 %v9420_v52, %v9419_v2  ;;  %v10704_v60 = vld [vmem:[#allocation7 + $0x380] sm:$0xff]   ;;  %v10711_v63 = vld [vmem:[#allocation9 + $0x48] sm:$0xff]  }
0x1071   :  { %v10712_v2 = vld [vmem:[#allocation9 + $0x8] sm:$0xff]   ;;  %v10716_v52 = vld [vmem:[#allocation9 + $0x18] sm:$0xff]  }
0x1072   :  { %v7518_v57 = vadd.f32 %v9421_v36, %v7517_v34  ;;  %v10707_v34 = vld [vmem:[#allocation7 + $0x398] sm:$0xff]   ;;  %v10718_v36 = vld [vmem:[#allocation9 + $0x20] sm:$0xff]  }
0x1074   :  { %v7521_v9 = vadd.f32 %v7518_v57, %v7515_v20 }
0x1076   :  { %v7522_v54 = vrot.slane %v7521_v9, 4 }
0x1078   :  { %v7523_v39 = vadd.f32 %v7522_v54, %v7521_v9  ;;  %v10720_v9 = vld [vmem:[#allocation9 + $0x28] sm:$0xff]   ;;  %v10721_v54 = vld [vmem:[#allocation9 + $0x70] sm:$0xff]  }
0x107a   :  { %v7524_v58 = vrot.slane %v7523_v39, 2 }
0x107c   :  { %v7525_v37 = vadd.f32 %v7524_v58, %v7523_v39  ;;  %v10722_v39 = vld [vmem:[#allocation9 + $0x30] sm:$0xff]   ;;  %v10723_v58 = vld [vmem:[#allocation9 + $0x78] sm:$0xff]  }
0x107e   :  { %v7526_v55 = vrot.slane %v7525_v37, 1 }
0x1080   :  { %v7527_v51 = vadd.f32 %v7526_v55, %v7525_v37  ;;  %v10724_v37 = vld [vmem:[#allocation9 + $0x38] sm:$0xff]  }
0x1082   :  { %v7529_v21 = vmul.f32 0.0625, %v7527_v51 }
0x1084   :  { %v7530_v29 = vsub.f32 %v7515_v20, %v7529_v21  ;;  %v7531_v41 = vsub.f32 %v7518_v57, %v7529_v21  ;;  %v10717_v20 = vld [vmem:[#allocation9 + $0x60] sm:$0xff]   ;;  %v10719_v57 = vld [vmem:[#allocation9 + $0x68] sm:$0xff]  }
0x1086   :  { %v7532_v15 = vmul.f32 %v7530_v29, %v7530_v29  ;;  %v7533_v26 = vmul.f32 %v7531_v41, %v7531_v41 }
0x1088   :  { %v7534_v32 = vadd.f32 %v7533_v26, %v7532_v15 }
0x108a   :  { %v7535_v27 = vrot.slane %v7534_v32, 4 }
0x108c   :  { %v7536_v25 = vadd.f32 %v7535_v27, %v7534_v32 }
0x108e   :  { %v7537_v1 = vrot.slane %v7536_v25, 2 }
0x1090   :  { %v7538_v14 = vadd.f32 %v7537_v1, %v7536_v25 }
0x1092   :  { %v7539_v48 = vrot.slane %v7538_v14, 1 }
0x1094   :  { %v7540_v46 = vadd.f32 %v7539_v48, %v7538_v14 }
0x1096   :  { %v7541_v5 = vmul.f32 0.0625, %v7540_v46 }
0x1098   :  { %v7542_v10 = vadd.f32 1e-05, %v7541_v5 }
0x109a   :  { %10805 = vrsqrt.f32 %v7542_v10 }
0x10a4   :  { %v10806_v16 = vpop.eup %10805 }
0x10a5   :  { %v7544_v23 = vmul.f32 %v10806_v16, %v7252_v50 }
0x10a7   :  { %v7548_v35 = vrot.slane %v7544_v23, %v15678_v40 }
0x10a9   :  { %v7549_v47 = vmul.f32 %v7548_v35, %v7530_v29  ;;  %v7550_v6 = vmul.f32 %v7548_v35, %v7531_v41 }
0x10ab   :  { %v7556_v19 = vadd.f32 %v9145_v28, %v7550_v6  ;;  %v7555_v24 = vadd.f32 %v9145_v28, %v7549_v47 }
0x10ad   :  { %v7557_v31 = vmax.f32 %v7555_v24, 0.0  ;;  %v7558_v7 = vmax.f32 %v7556_v19, 0.0 }
0x10af   :  { %v7559_v56 = vrot.slane %v7557_v31, 7  ;;  %v7560_v61 = vrot.slane %v7558_v7, 7  ;;  %v7567_v3 = vrot.slane %v7557_v31, 1  ;;  %v7568_v42 = vrot.slane %v7558_v7, 1 }
0x10b0   :  { %v7578_v49 = vpack.c.bf16 %v7558_v7, %v7557_v31 }
0x10b1   :  { %v7561_v38 = vsel %vm577_vm2, %v7559_v56, %v7560_v61  ;;  %v7562_v30 = vsel %vm577_vm2, %v7560_v61, %v7559_v56  ;;  %v7569_v43 = vsel %vm770_vm0, %v7567_v3, %v7568_v42  ;;  %v7570_v22 = vsel %vm770_vm0, %v7568_v42, %v7567_v3 }
0x10b2   :  { %7756 = vmatprep.mubr.bf16.mxu0 %v7578_v49  ;;  %v9171_v8 = vpack.c.bf16 %v7561_v38, %v7562_v30  ;;  %v9174_v62 = vpack.c.bf16 %v7570_v22, %v7569_v43  ;;  %vm8948_vm0 = vcmask 1024  }
0x10b4   :  { %9172 = vmatmul.mubr.msk.bf16.vlgmr.msra.gmra.mrb[116].mxu0 %vm9170_vm6, %v9171_v8  ;;  %9795 = vmatmul.mubr.msk.bf16.vlgmr.msra.gmra.mrb[92].mxu1 %vm9173_vm7, %v9174_v62 }
0x10b5   :  { %9799 = vmatpush3.bf16.msra.mxu0 %v10703_v59  ;;  %9810 = vmatprep.mubr.msk.bf16.mxu0 %vm10912_vm15, %v10911_v11 }
0x10b6   :  { %9800 = vmatprep.subr.bf16.mxu0 %v10911_v11  ;;  %9830 = vmatprep.mubr.msk.bf16.mxu1 %vm10912_vm15, %v10911_v11 }
0x10b7   :  { %9815 = vmatpush3.bf16.msra.mxu1 %v10709_v33 }
0x10b8   :  { %9816 = vmatprep.subr.bf16.mxu1 %v10911_v11 }
0x10b9   :  { %9801 = vmatpush3.bf16.msra.mxu0 %v10704_v60 }
0x10ba   :  { %9802 = vmatprep.subr.bf16.mxu0 %v10911_v11 }
0x10bb   :  { %9817 = vmatpush3.bf16.msra.mxu1 %v10711_v63 }
0x10bc   :  { %9818 = vmatprep.subr.bf16.mxu1 %v10911_v11 }
0x10bd   :  { %9803 = vmatpush3.bf16.msra.mxu0 %v10705_v12 }
0x10be   :  { %9804 = vmatprep.subr.bf16.mxu0 %v10911_v11 }
0x10bf   :  { %9819 = vmatpush3.bf16.msra.mxu1 %v10713_v18 }
0x10c0   :  { %9820 = vmatprep.subr.bf16.mxu1 %v10911_v11 }
0x10c1   :  { %9805 = vmatpush3.bf16.msra.mxu0 %v10706_v44 }
0x10c2   :  { %9806 = vmatprep.subr.bf16.mxu0 %v10911_v11 }
0x10c5   :  { %9807 = vmatpush3.bf16.msra.mxu0 %v10707_v34 }
0x10c6   :  { %9808 = vmatprep.subr.bf16.mxu0 %v10911_v11 }
0x10c9   :  { %9809 = vmatpush3.bf16.msra.mxu0 %v10708_v45 }
0x10ca   :  { %9834 = vmatprep.subr.bf16.mxu0 %v10911_v11 }
0x10cc   :  { %9811 = vmatmul.mubr.msk.bf16.vlgmr.msra.gmra.mrb[120].mxu0 %vm4610_vm5, %v7841_v0  ;;  %v10715_v0 = vld [vmem:[#allocation9 + $0x58] sm:$0xff]  }
0x10cd   :  { %9850 = vmatprep.mubr.msk.bf16.mxu0 %vm10912_vm15, %v10911_v11  ;;  %9835 = vmatpush3.bf16.msra.mxu0 %v10710_v4 }
0x10ce   :  { %9836 = vmatprep.subr.bf16.mxu0 %v10911_v11  ;;  %9821 = vmatpush3.bf16.msra.mxu1 %v10715_v0 }
0x10cf   :  { %9822 = vmatprep.subr.bf16.mxu1 %v10911_v11 }
0x10d1   :  { %9837 = vmatpush3.bf16.msra.mxu0 %v10712_v2 }
0x10d2   :  { %9838 = vmatprep.subr.bf16.mxu0 %v10911_v11  ;;  %9823 = vmatpush3.bf16.msra.mxu1 %v10717_v20 }
0x10d3   :  { %9824 = vmatprep.subr.bf16.mxu1 %v10911_v11 }
0x10d5   :  { %9839 = vmatpush3.bf16.msra.mxu0 %v10714_v13 }
0x10d6   :  { %9840 = vmatprep.subr.bf16.mxu0 %v10911_v11  ;;  %9825 = vmatpush3.bf16.msra.mxu1 %v10719_v57 }
0x10d7   :  { %9826 = vmatprep.subr.bf16.mxu1 %v10911_v11 }
0x10d9   :  { %9841 = vmatpush3.bf16.msra.mxu0 %v10716_v52  ;;  %v7254_v52 = vld [vmem:[%s15401_s2 + $0x1a] sm:$0x1] }
0x10da   :  { %9842 = vmatprep.subr.bf16.mxu0 %v10911_v11  ;;  %9827 = vmatpush3.bf16.msra.mxu1 %v10721_v54 }
0x10db   :  { %9828 = vmatprep.subr.bf16.mxu1 %v10911_v11 }
0x10dd   :  { %9843 = vmatpush3.bf16.msra.mxu0 %v10718_v36 }
0x10de   :  { %9844 = vmatprep.subr.bf16.mxu0 %v10911_v11  ;;  %9829 = vmatpush3.bf16.msra.mxu1 %v10723_v58 }
0x10df   :  { %9854 = vmatprep.subr.bf16.mxu1 %v10911_v11 }
0x10e1   :  { %9845 = vmatpush3.bf16.msra.mxu0 %v10720_v9 }
0x10e2   :  { %9846 = vmatprep.subr.bf16.mxu0 %v10911_v11 }
0x10e5   :  { %9847 = vmatpush3.bf16.msra.mxu0 %v10722_v39 }
0x10e6   :  { %9848 = vmatprep.subr.bf16.mxu0 %v10911_v11 }
0x10e9   :  { %9849 = vmatpush3.bf16.msra.mxu0 %v10724_v37 }
0x10ea   :  { %9874 = vmatprep.subr.bf16.mxu0 %v10911_v11 }
0x1187   :  { %v9441_v55 = vpop.f32.mrb[116].mxu0  ;;  %v7799_v51 = vpop.f32.mrb[92].mxu1 }
0x1188   :  { %v9442_v21 = vpop.f32.mrb[117].mxu0  ;;  %v9796_v29 = vpop.f32.mrb[93].mxu1 }
0x1189   :  { %v9443_v41 = vadd.f32 %v9442_v21, %v9441_v55  ;;  %v9444_v15 = vpop.f32.mrb[118].mxu0  ;;  %v7802_v26 = vpop.f32.mrb[94].mxu1  ;;  %v7256_v21 = vld [vmem:[%s15401_s2 + $0x1c] sm:$0x1] }
0x118a   :  { %v9445_v32 = vpop.f32.mrb[119].mxu0  ;;  %v9797_v27 = vpop.f32.mrb[95].mxu1 }
0x118b   :  { %v7800_v25 = vadd.f32 %v9443_v41, %v7799_v51  ;;  %v9446_v1 = vadd.f32 %v9445_v32, %v9444_v15  ;;  %v9184_v32 = vld [vmem:[%s15401_s2 + $0x1d] ss:$0 sm:$0xff] }
0x118d   :  { %v7803_v14 = vadd.f32 %v9446_v1, %v7802_v26  ;;  %v9176_v26 = vld [vmem:[%s15401_s2 + $0x1b] ss:$0 sm:$0xff] }
0x118f   :  { %v7806_v48 = vadd.f32 %v7803_v14, %v7800_v25 }
0x1191   :  { %v7807_v46 = vrot.slane %v7806_v48, 4 }
0x1193   :  { %v7808_v5 = vadd.f32 %v7807_v46, %v7806_v48 }
0x1195   :  { %v7809_v10 = vrot.slane %v7808_v5, 2 }
0x1197   :  { %v7810_v50 = vadd.f32 %v7809_v10, %v7808_v5 }
0x1199   :  { %v7811_v16 = vrot.slane %v7810_v50, 1 }
0x119b   :  { %v7812_v23 = vadd.f32 %v7811_v16, %v7810_v50 }
0x119d   :  { %v7813_v35 = vmul.f32 0.0625, %v7812_v23  ;;  %v10726_v23 = vld [vmem:[#allocation9 + $0xc0] sm:$0xff]  }
0x119f   :  { %v7814_v28 = vsub.f32 %v7800_v25, %v7813_v35  ;;  %v7815_v47 = vsub.f32 %v7803_v14, %v7813_v35  ;;  %v7915_v6 = vpop.f32.mrb[120].mxu0 }
0x11a0   :  { %v9812_v19 = vpop.f32.mrb[121].mxu0 }
0x11a1   :  { %v7816_v24 = vmul.f32 %v7814_v28, %v7814_v28  ;;  %v7817_v31 = vmul.f32 %v7815_v47, %v7815_v47  ;;  %v7918_v7 = vpop.f32.mrb[122].mxu0  ;;  %v10727_v19 = vld [vmem:[#allocation9 + $0x88] sm:$0xff]  }
0x11a2   :  { %v7922_v53 = vadd.f32 %v7918_v7, %v7915_v6  ;;  %v9813_v17 = vpop.f32.mrb[123].mxu0 }
0x11a3   :  { %v7818_v56 = vadd.f32 %v7817_v31, %v7816_v24  ;;  %v10728_v24 = vld [vmem:[#allocation9 + $0xc8] sm:$0xff]   ;;  %v10729_v31 = vld [vmem:[#allocation9 + $0x90] sm:$0xff]   ;;  %v10732_v17 = vld [vmem:[#allocation9 + $0xd8] sm:$0xff]  }
0x11a4   :  { %v7923_v61 = vrot.slane %v7922_v53, 4 }
0x11a5   :  { %v7819_v3 = vrot.slane %v7818_v56, 4 }
0x11a6   :  { %v7924_v42 = vadd.f32 %v7923_v61, %v7922_v53  ;;  %v10731_v53 = vld [vmem:[#allocation9 + $0x98] sm:$0xff]   ;;  %v10734_v61 = vld [vmem:[#allocation9 + $0xe0] sm:$0xff]  }
0x11a7   :  { %v7820_v49 = vadd.f32 %v7819_v3, %v7818_v56  ;;  %v10733_v56 = vld [vmem:[#allocation9 + $0xa0] sm:$0xff]   ;;  %v10735_v3 = vld [vmem:[#allocation9 + $0xa8] sm:$0xff]  }
0x11a8   :  { %v7925_v38 = vrot.slane %v7924_v42, 2 }
0x11a9   :  { %v7821_v30 = vrot.slane %v7820_v49, 2 }
0x11aa   :  { %v7926_v43 = vadd.f32 %v7925_v38, %v7924_v42  ;;  %v10736_v42 = vld [vmem:[#allocation9 + $0xe8] sm:$0xff]   ;;  %v10738_v38 = vld [vmem:[#allocation9 + $0xf0] sm:$0xff]  }
0x11ab   :  { %v7822_v22 = vadd.f32 %v7821_v30, %v7820_v49  ;;  %v10737_v49 = vld [vmem:[#allocation9 + $0xb0] sm:$0xff]   ;;  %v10739_v30 = vld [vmem:[#allocation9 + $0xb8] sm:$0xff]  }
0x11ac   :  { %v7927_v59 = vrot.slane %v7926_v43, 1 }
0x11ad   :  { %v7823_v8 = vrot.slane %v7822_v22, 1 }
0x11ae   :  { %v7928_v62 = vadd.f32 %v7927_v59, %v7926_v43  ;;  %v10740_v43 = vld [vmem:[#allocation9 + $0xf8] sm:$0xff]  }
0x11af   :  { %v7824_v60 = vadd.f32 %v7823_v8, %v7822_v22  ;;  %v10741_v8 = vld [vmem:[#allocation9 + $0x100] sm:$0xff]  }
0x11b0   :  { %v7929_v12 = vmul.f32 0.0625, %v7928_v62  ;;  %v10742_v62 = vld [vmem:[#allocation9 + $0x140] sm:$0xff]  }
0x11b1   :  { %v7825_v44 = vmul.f32 0.0625, %v7824_v60 }
0x11b2   :  { %v7930_v34 = vsub.f32 %v7915_v6, %v7929_v12  ;;  %v7931_v45 = vsub.f32 %v7918_v7, %v7929_v12  ;;  %v10730_v7 = vld [vmem:[#allocation9 + $0xd0] sm:$0xff]  }
0x11b3   :  { %v7826_v33 = vadd.f32 1e-05, %v7825_v44  ;;  %v10743_v44 = vld [vmem:[#allocation9 + $0x108] sm:$0xff]  }
0x11b4   :  { %v7932_v4 = vmul.f32 %v7930_v34, %v7930_v34  ;;  %v7933_v63 = vmul.f32 %v7931_v45, %v7931_v45 }
0x11b5   :  { %10807 = vrsqrt.f32 %v7826_v33  ;;  %v10746_v33 = vld [vmem:[#allocation9 + $0x150] sm:$0xff]  }
0x11b6   :  { %v7934_v2 = vadd.f32 %v7933_v63, %v7932_v4  ;;  %v10747_v4 = vld [vmem:[#allocation9 + $0x118] sm:$0xff]  }
0x11b7   :  { %v10748_v63 = vld [vmem:[#allocation9 + $0x158] sm:$0xff]  }
0x11b8   :  { %v7935_v18 = vrot.slane %v7934_v2, 4 }
0x11ba   :  { %v7936_v13 = vadd.f32 %v7935_v18, %v7934_v2  ;;  %v10749_v2 = vld [vmem:[#allocation9 + $0x120] sm:$0xff]  }
0x11bb   :  { %v10750_v18 = vld [vmem:[#allocation9 + $0x160] sm:$0xff]  }
0x11bc   :  { %v7937_v0 = vrot.slane %v7936_v13, 2 }
0x11be   :  { %v7938_v20 = vadd.f32 %v7937_v0, %v7936_v13  ;;  %v10751_v13 = vld [vmem:[#allocation9 + $0x128] sm:$0xff]  }
0x11bf   :  { %v10808_v36 = vpop.eup %10807  ;;  %v10752_v0 = vld [vmem:[#allocation9 + $0x168] sm:$0xff]  }
0x11c0   :  { %v7828_v57 = vmul.f32 %v10808_v36, %v7254_v52  ;;  %v7939_v9 = vrot.slane %v7938_v20, 1  ;;  %v10753_v52 = vld [vmem:[#allocation9 + $0x130] sm:$0xff]   ;;  %v10755_v36 = vld [vmem:[#allocation9 + $0x138] sm:$0xff]  }
0x11c2   :  { %v7832_v54 = vrot.slane %v7828_v57, %v15678_v40  ;;  %v7940_v39 = vadd.f32 %v7939_v9, %v7938_v20  ;;  %v10754_v20 = vld [vmem:[#allocation9 + $0x170] sm:$0xff]   ;;  %v10756_v57 = vld [vmem:[#allocation9 + $0x178] sm:$0xff]  }
0x11c4   :  { %v7833_v58 = vmul.f32 %v7832_v54, %v7814_v28  ;;  %v7834_v37 = vmul.f32 %v7832_v54, %v7815_v47  ;;  %v7941_v55 = vmul.f32 0.0625, %v7940_v39  ;;  %v10757_v39 = vld [vmem:[#allocation9 + $0x180] sm:$0xff]  }
0x11c6   :  { %v7942_v51 = vadd.f32 1e-05, %v7941_v55  ;;  %v7839_v1 = vadd.f32 %v9176_v26, %v7833_v58  ;;  %v7840_v14 = vadd.f32 %v9176_v26, %v7834_v37  ;;  %v10758_v58 = vld [vmem:[#allocation9 + $0x1c0] sm:$0xff]   ;;  %v10764_v26 = vld [vmem:[#allocation9 + $0x1d8] sm:$0xff]  }
0x11c8   :  { %10809 = vrsqrt.f32 %v7942_v51  ;;  %v10759_v51 = vld [vmem:[#allocation9 + $0x188] sm:$0xff]  }
0x11d2   :  { %v10810_v29 = vpop.eup %10809 }
0x11d3   :  { %v7944_v41 = vmul.f32 %v10810_v29, %v7256_v21  ;;  %v10760_v21 = vld [vmem:[#allocation9 + $0x1c8] sm:$0xff]   ;;  %v10761_v29 = vld [vmem:[#allocation9 + $0x190] sm:$0xff]  }
0x11d5   :  { %v7948_v15 = vrot.slane %v7944_v41, %v15678_v40  ;;  %v10725_v40 = vld [vmem:[#allocation9 + $0x80] sm:$0xff]   ;;  %v10762_v41 = vld [vmem:[#allocation9 + $0x1d0] sm:$0xff]  }
0x11d7   :  { %v7949_v27 = vmul.f32 %v7948_v15, %v7930_v34  ;;  %v7950_v25 = vmul.f32 %v7948_v15, %v7931_v45  ;;  %v10744_v34 = vld [vmem:[#allocation9 + $0x148] sm:$0xff]   ;;  %v10745_v45 = vld [vmem:[#allocation9 + $0x110] sm:$0xff]   ;;  %v10763_v15 = vld [vmem:[#allocation9 + $0x198] sm:$0xff]  }
0x11d9   :  { %v7955_v48 = vadd.f32 %v9184_v32, %v7949_v27  ;;  %v7956_v46 = vadd.f32 %v9184_v32, %v7950_v25  ;;  %v10765_v32 = vld [vmem:[#allocation9 + $0x1a0] sm:$0xff]   ;;  %v10767_v25 = vld [vmem:[#allocation9 + $0x1a8] sm:$0xff]  }
0x11da   :  { %v10766_v27 = vld [vmem:[#allocation9 + $0x1e0] sm:$0xff]  }
0x11db   :  { %v7957_v5 = vadd.f32 %v7955_v48, %v7839_v1  ;;  %v7958_v10 = vadd.f32 %v7956_v46, %v7840_v14  ;;  %v10768_v1 = vld [vmem:[#allocation9 + $0x1e8] sm:$0xff]   ;;  %v10769_v14 = vld [vmem:[#allocation9 + $0x1b0] sm:$0xff]   ;;  %v10771_v46 = vld [vmem:[#allocation9 + $0x1b8] sm:$0xff]  }
0x11dc   :  { %v10770_v48 = vld [vmem:[#allocation9 + $0x1f0] sm:$0xff]  }
0x11dd   :  { %v7959_v50 = vmax.f32 %v7957_v5, 0.0  ;;  %v7960_v16 = vmax.f32 %v7958_v10, 0.0  ;;  %v10772_v5 = vld [vmem:[#allocation9 + $0x1f8] sm:$0xff]  }
0x11df   :  { %7961 = vst [vmem:[#allocation6] sm:$0xff] %v7959_v50  ;;  %7962 = vst [vmem:[#allocation6 + $0x8] sm:$0xff] %v7960_v16 }
0x11e6   :  { %v7984_v35 = vld [vmem:[#allocation6 + $0x1] ss:$8 sm:$0x3]  ;;  %v7965_v28 = vld [vmem:[#allocation6] ss:$8 sm:$0x3] }
0x11e7   :  { %v7985_v47 = vpack.c.bf16 %v7984_v35, %v7984_v35  ;;  %v7966_v6 = vpack.c.bf16 %v7965_v28, %v7965_v28  ;;  %v8180_v22 = vld [vmem:[#allocation6 + $0x2] ss:$8 sm:$0x3]  ;;  %v8289_v59 = vld [vmem:[#allocation6 + $0x3] ss:$8 sm:$0x3] }
0x11e8   :  { %v8181_v60 = vpack.c.bf16 %v8180_v22, %v8180_v22  ;;  %v8290_v12 = vpack.c.bf16 %v8289_v59, %v8289_v59  ;;  %v8398_v9 = vld [vmem:[#allocation6 + $0x4] ss:$8 sm:$0x3]  ;;  %v8507_v54 = vld [vmem:[#allocation6 + $0x5] ss:$8 sm:$0x3] }
0x11e9   :  { %9831 = vmatmul.mubr.bf16.vlgmr.msra.gmra.mrb[96].mxu1 %v7985_v47  ;;  %9851 = vmatmul.mubr.bf16.vlgmr.msra.gmra.mrb[124].mxu0 %v7966_v6  ;;  %v8399_v37 = vpack.c.bf16 %v8398_v9, %v8398_v9  ;;  %v8508_v55 = vpack.c.bf16 %v8507_v54, %v8507_v54  ;;  %v8616_v10 = vld [vmem:[#allocation6 + $0x6] ss:$8 sm:$0x3]  ;;  %v8725_v50 = vld [vmem:[#allocation6 + $0x7] ss:$8 sm:$0x3] }
0x11ea   :  { %9855 = vmatpush3.bf16.msra.mxu1 %v10725_v40  ;;  %9875 = vmatpush3.bf16.msra.mxu0 %v10726_v23  ;;  %v8617_v16 = vpack.c.bf16 %v8616_v10, %v8616_v10  ;;  %v8726_v40 = vpack.c.bf16 %v8725_v50, %v8725_v50  ;;  %v10773_v23 = vld [vmem:[#allocation7 + $0x3a8] sm:$0xff]   ;;  %v10774_v35 = vld [vmem:[#allocation7 + $0x3b0] sm:$0xff]   ;;  %v10775_v28 = vld [vmem:[#allocation7 + $0x3b8] sm:$0xff]  }
0x11eb   :  { %9856 = vmatprep.subr.bf16.mxu1 %v10911_v11  ;;  %9876 = vmatprep.subr.bf16.mxu0 %v10911_v11  ;;  %v10776_v47 = vld [vmem:[#allocation7 + $0x3c0] sm:$0xff]   ;;  %v10777_v6 = vld [vmem:[#allocation7 + $0x3c8] sm:$0xff]  }
0x11ec   :  { %9870 = vmatprep.mubr.msk.bf16.mxu1 %vm10912_vm15, %v10911_v11  ;;  %9890 = vmatprep.mubr.msk.bf16.mxu0 %vm10912_vm15, %v10911_v11 }
0x11ee   :  { %9857 = vmatpush3.bf16.msra.mxu1 %v10727_v19  ;;  %9877 = vmatpush3.bf16.msra.mxu0 %v10728_v24  ;;  %v10778_v19 = vld [vmem:[#allocation7 + $0x3d0] sm:$0xff]   ;;  %v10779_v24 = vld [vmem:[#allocation7 + $0x3d8] sm:$0xff]  }
0x11ef   :  { %9858 = vmatprep.subr.bf16.mxu1 %v10911_v11  ;;  %9878 = vmatprep.subr.bf16.mxu0 %v10911_v11 }
0x11f2   :  { %9859 = vmatpush3.bf16.msra.mxu1 %v10729_v31  ;;  %9879 = vmatpush3.bf16.msra.mxu0 %v10730_v7  ;;  %v10780_v31 = vld [vmem:[#allocation7 + $0x3e0] sm:$0xff]  }
0x11f3   :  { %9860 = vmatprep.subr.bf16.mxu1 %v10911_v11  ;;  %9880 = vmatprep.subr.bf16.mxu0 %v10911_v11 }
0x11f6   :  { %9861 = vmatpush3.bf16.msra.mxu1 %v10731_v53  ;;  %9881 = vmatpush3.bf16.msra.mxu0 %v10732_v17 }
0x11f7   :  { %9862 = vmatprep.subr.bf16.mxu1 %v10911_v11  ;;  %9882 = vmatprep.subr.bf16.mxu0 %v10911_v11 }
0x11fa   :  { %9863 = vmatpush3.bf16.msra.mxu1 %v10733_v56  ;;  %9883 = vmatpush3.bf16.msra.mxu0 %v10734_v61 }
0x11fb   :  { %9864 = vmatprep.subr.bf16.mxu1 %v10911_v11  ;;  %9884 = vmatprep.subr.bf16.mxu0 %v10911_v11 }
0x11fe   :  { %9865 = vmatpush3.bf16.msra.mxu1 %v10735_v3  ;;  %9885 = vmatpush3.bf16.msra.mxu0 %v10736_v42 }
0x11ff   :  { %9866 = vmatprep.subr.bf16.mxu1 %v10911_v11  ;;  %9886 = vmatprep.subr.bf16.mxu0 %v10911_v11 }
0x1202   :  { %9867 = vmatpush3.bf16.msra.mxu1 %v10737_v49  ;;  %9887 = vmatpush3.bf16.msra.mxu0 %v10738_v38 }
0x1203   :  { %9868 = vmatprep.subr.bf16.mxu1 %v10911_v11  ;;  %9888 = vmatprep.subr.bf16.mxu0 %v10911_v11 }
0x1206   :  { %9869 = vmatpush3.bf16.msra.mxu1 %v10739_v30  ;;  %9889 = vmatpush3.bf16.msra.mxu0 %v10740_v43 }
0x1207   :  { %9894 = vmatprep.subr.bf16.mxu1 %v10911_v11  ;;  %9914 = vmatprep.subr.bf16.mxu0 %v10911_v11 }
0x1209   :  { %9871 = vmatmul.mubr.bf16.vlgmr.msra.gmra.mrb[100].mxu1 %v8181_v60  ;;  %9891 = vmatmul.mubr.bf16.vlgmr.msra.gmra.mrb[128].mxu0 %v8290_v12 }
0x120a   :  { %9895 = vmatpush3.bf16.msra.mxu1 %v10741_v8  ;;  %9915 = vmatpush3.bf16.msra.mxu0 %v10742_v62 }
0x120b   :  { %9896 = vmatprep.subr.bf16.mxu1 %v10911_v11  ;;  %9916 = vmatprep.subr.bf16.mxu0 %v10911_v11 }
0x120c   :  { %9910 = vmatprep.mubr.msk.bf16.mxu1 %vm10912_vm15, %v10911_v11  ;;  %9930 = vmatprep.mubr.msk.bf16.mxu0 %vm10912_vm15, %v10911_v11 }
0x120e   :  { %9897 = vmatpush3.bf16.msra.mxu1 %v10743_v44  ;;  %9917 = vmatpush3.bf16.msra.mxu0 %v10744_v34 }
0x120f   :  { %9898 = vmatprep.subr.bf16.mxu1 %v10911_v11  ;;  %9918 = vmatprep.subr.bf16.mxu0 %v10911_v11 }
0x1212   :  { %9899 = vmatpush3.bf16.msra.mxu1 %v10745_v45  ;;  %9919 = vmatpush3.bf16.msra.mxu0 %v10746_v33 }
0x1213   :  { %9900 = vmatprep.subr.bf16.mxu1 %v10911_v11  ;;  %9920 = vmatprep.subr.bf16.mxu0 %v10911_v11 }
0x1216   :  { %9901 = vmatpush3.bf16.msra.mxu1 %v10747_v4  ;;  %9921 = vmatpush3.bf16.msra.mxu0 %v10748_v63 }
0x1217   :  { %9902 = vmatprep.subr.bf16.mxu1 %v10911_v11  ;;  %9922 = vmatprep.subr.bf16.mxu0 %v10911_v11 }
0x121a   :  { %9903 = vmatpush3.bf16.msra.mxu1 %v10749_v2  ;;  %9923 = vmatpush3.bf16.msra.mxu0 %v10750_v18 }
0x121b   :  { %9904 = vmatprep.subr.bf16.mxu1 %v10911_v11  ;;  %9924 = vmatprep.subr.bf16.mxu0 %v10911_v11 }
0x121e   :  { %9905 = vmatpush3.bf16.msra.mxu1 %v10751_v13  ;;  %9925 = vmatpush3.bf16.msra.mxu0 %v10752_v0 }
0x121f   :  { %9906 = vmatprep.subr.bf16.mxu1 %v10911_v11  ;;  %9926 = vmatprep.subr.bf16.mxu0 %v10911_v11 }
0x1222   :  { %9907 = vmatpush3.bf16.msra.mxu1 %v10753_v52  ;;  %9927 = vmatpush3.bf16.msra.mxu0 %v10754_v20 }
0x1223   :  { %9908 = vmatprep.subr.bf16.mxu1 %v10911_v11  ;;  %9928 = vmatprep.subr.bf16.mxu0 %v10911_v11 }
0x1226   :  { %9909 = vmatpush3.bf16.msra.mxu1 %v10755_v36  ;;  %9929 = vmatpush3.bf16.msra.mxu0 %v10756_v57 }
0x1227   :  { %9934 = vmatprep.subr.bf16.mxu1 %v10911_v11  ;;  %9954 = vmatprep.subr.bf16.mxu0 %v10911_v11 }
0x1229   :  { %9911 = vmatmul.mubr.bf16.vlgmr.msra.gmra.mrb[104].mxu1 %v8399_v37  ;;  %9931 = vmatmul.mubr.bf16.vlgmr.msra.gmra.mrb[132].mxu0 %v8508_v55 }
0x122a   :  { %9935 = vmatpush3.bf16.msra.mxu1 %v10757_v39  ;;  %9955 = vmatpush3.bf16.msra.mxu0 %v10758_v58  ;;  %v9249_v39 = vld [vmem:[%s15403_s4] ss:$0 sm:$0xff] }
0x122b   :  { %9936 = vmatprep.subr.bf16.mxu1 %v10911_v11  ;;  %9956 = vmatprep.subr.bf16.mxu0 %v10911_v11 }
0x122c   :  { %9950 = vmatprep.mubr.msk.bf16.mxu1 %vm10912_vm15, %v10911_v11  ;;  %9970 = vmatprep.mubr.msk.bf16.mxu0 %vm10912_vm15, %v10911_v11 }
0x122e   :  { %9937 = vmatpush3.bf16.msra.mxu1 %v10759_v51  ;;  %9957 = vmatpush3.bf16.msra.mxu0 %v10760_v21 }
0x122f   :  { %9938 = vmatprep.subr.bf16.mxu1 %v10911_v11  ;;  %9958 = vmatprep.subr.bf16.mxu0 %v10911_v11 }
0x1232   :  { %9939 = vmatpush3.bf16.msra.mxu1 %v10761_v29  ;;  %9959 = vmatpush3.bf16.msra.mxu0 %v10762_v41 }
0x1233   :  { %9940 = vmatprep.subr.bf16.mxu1 %v10911_v11  ;;  %9960 = vmatprep.subr.bf16.mxu0 %v10911_v11 }
0x1236   :  { %9941 = vmatpush3.bf16.msra.mxu1 %v10763_v15  ;;  %9961 = vmatpush3.bf16.msra.mxu0 %v10764_v26  ;;  %v9250_v26 = vld [vmem:[%s15403_s4 + $0x1] ss:$0 sm:$0xff] }
0x1237   :  { %9942 = vmatprep.subr.bf16.mxu1 %v10911_v11  ;;  %9962 = vmatprep.subr.bf16.mxu0 %v10911_v11 }
0x123a   :  { %9943 = vmatpush3.bf16.msra.mxu1 %v10765_v32  ;;  %9963 = vmatpush3.bf16.msra.mxu0 %v10766_v27 }
0x123b   :  { %9944 = vmatprep.subr.bf16.mxu1 %v10911_v11  ;;  %9964 = vmatprep.subr.bf16.mxu0 %v10911_v11 }
0x123e   :  { %9945 = vmatpush3.bf16.msra.mxu1 %v10767_v25  ;;  %9965 = vmatpush3.bf16.msra.mxu0 %v10768_v1 }
0x123f   :  { %9946 = vmatprep.subr.bf16.mxu1 %v10911_v11  ;;  %9966 = vmatprep.subr.bf16.mxu0 %v10911_v11 }
0x1242   :  { %9947 = vmatpush3.bf16.msra.mxu1 %v10769_v14  ;;  %9967 = vmatpush3.bf16.msra.mxu0 %v10770_v48 }
0x1243   :  { %9948 = vmatprep.subr.bf16.mxu1 %v10911_v11  ;;  %9968 = vmatprep.subr.bf16.mxu0 %v10911_v11 }
0x1246   :  { %9949 = vmatpush3.bf16.msra.mxu1 %v10771_v46  ;;  %9969 = vmatpush3.bf16.msra.mxu0 %v10772_v5 }
0x1247   :  { %9974 = vmatprep.subr.bf16.mxu1 %v10911_v11 }
0x1249   :  { %9951 = vmatmul.mubr.bf16.vlgmr.msra.gmra.mrb[108].mxu1 %v8617_v16  ;;  %9971 = vmatmul.mubr.bf16.vlgmr.msra.gmra.mrb[136].mxu0 %v8726_v40 }
0x124a   :  { %9990 = vmatprep.mubr.msk.bf16.mxu1 %vm10912_vm15, %v10911_v11  ;;  %9975 = vmatpush3.bf16.msra.mxu1 %v10773_v23 }
0x124b   :  { %9976 = vmatprep.subr.bf16.mxu1 %v10911_v11 }
0x124e   :  { %9977 = vmatpush3.bf16.msra.mxu1 %v10774_v35 }
0x124f   :  { %9978 = vmatprep.subr.bf16.mxu1 %v10911_v11 }
0x1252   :  { %9979 = vmatpush3.bf16.msra.mxu1 %v10775_v28 }
0x1253   :  { %9980 = vmatprep.subr.bf16.mxu1 %v10911_v11 }
0x1256   :  { %9981 = vmatpush3.bf16.msra.mxu1 %v10776_v47 }
0x1257   :  { %9982 = vmatprep.subr.bf16.mxu1 %v10911_v11 }
0x125a   :  { %9983 = vmatpush3.bf16.msra.mxu1 %v10777_v6 }
0x125b   :  { %9984 = vmatprep.subr.bf16.mxu1 %v10911_v11 }
0x125e   :  { %9985 = vmatpush3.bf16.msra.mxu1 %v10778_v19 }
0x125f   :  { %9986 = vmatprep.subr.bf16.mxu1 %v10911_v11 }
0x1262   :  { %9987 = vmatpush3.bf16.msra.mxu1 %v10779_v24 }
0x1263   :  { %9988 = vmatprep.subr.bf16.mxu1 %v10911_v11 }
0x1266   :  { %9989 = vmatpush3.bf16.msra.mxu1 %v10780_v31 }
0x12bc   :  { %v8085_v7 = vpop.f32.mrb[96].mxu1  ;;  %v8173_v53 = vpop.f32.mrb[124].mxu0 }
0x12bd   :  { %v8174_v17 = vadd.f32 %v8173_v53, %v8085_v7  ;;  %v9832_v56 = vpop.f32.mrb[97].mxu1  ;;  %v9852_v61 = vpop.f32.mrb[125].mxu0 }
0x12be   :  { %v8088_v3 = vpop.f32.mrb[98].mxu1  ;;  %v8176_v42 = vpop.f32.mrb[126].mxu0 }
0x12bf   :  { %v9833_v49 = vpop.f32.mrb[99].mxu1  ;;  %v9853_v38 = vpop.f32.mrb[127].mxu0 }
0x12dc   :  { %v8281_v30 = vpop.f32.mrb[100].mxu1  ;;  %v8390_v43 = vpop.f32.mrb[128].mxu0 }
0x12dd   :  { %v8287_v22 = vadd.f32 %v8281_v30, %v8174_v17  ;;  %v9872_v59 = vpop.f32.mrb[101].mxu1  ;;  %v9892_v8 = vpop.f32.mrb[129].mxu0 }
0x12de   :  { %v8284_v62 = vpop.f32.mrb[102].mxu1  ;;  %v8393_v60 = vpop.f32.mrb[130].mxu0 }
0x12df   :  { %v8396_v12 = vadd.f32 %v8390_v43, %v8287_v22  ;;  %v9873_v11 = vpop.f32.mrb[103].mxu1  ;;  %v9893_v44 = vpop.f32.mrb[131].mxu0 }
0x12fc   :  { %v8499_v34 = vpop.f32.mrb[104].mxu1  ;;  %v8608_v45 = vpop.f32.mrb[132].mxu0 }
0x12fd   :  { %v8505_v33 = vadd.f32 %v8499_v34, %v8396_v12  ;;  %v9912_v4 = vpop.f32.mrb[105].mxu1  ;;  %v9932_v63 = vpop.f32.mrb[133].mxu0 }
0x12fe   :  { %v8502_v2 = vpop.f32.mrb[106].mxu1  ;;  %v8611_v18 = vpop.f32.mrb[134].mxu0 }
0x12ff   :  { %v8614_v13 = vadd.f32 %v8608_v45, %v8505_v33  ;;  %v9913_v0 = vpop.f32.mrb[107].mxu1  ;;  %v9933_v52 = vpop.f32.mrb[135].mxu0 }
0x131c   :  { %v8717_v20 = vpop.f32.mrb[108].mxu1  ;;  %v8826_v36 = vpop.f32.mrb[136].mxu0 }
0x131d   :  { %v8723_v57 = vadd.f32 %v8717_v20, %v8614_v13  ;;  %v9952_v9 = vpop.f32.mrb[109].mxu1  ;;  %v9972_v54 = vpop.f32.mrb[137].mxu0 }
0x131e   :  { %v8720_v58 = vpop.f32.mrb[110].mxu1  ;;  %v8829_v37 = vpop.f32.mrb[138].mxu0 }
0x131f   :  { %v8832_v55 = vadd.f32 %v8826_v36, %v8723_v57  ;;  %v9953_v51 = vpop.f32.mrb[111].mxu1  ;;  %v9973_v21 = vpop.f32.mrb[139].mxu0 }
0x1321   :  { %v8837_v29 = vadd.f32 %v9249_v39, %v8832_v55 }
0x1323   :  { %v8838_v41 = vmax.f32 %v8837_v29, 0.0 }
0x1325   :  { %v8855_v15 = vpack.c.bf16 %v8838_v41, %v8838_v41 }
0x1327   :  { %9991 = vmatmul.mubr.bf16.vlgmr.msra.gmra.mrb[112].mxu1 %v8855_v15 }
0x13fa   :  { %v8942_v32 = vpop.f32.mrb[112].mxu1 }
0x13fb   :  { %v8943_v27 = vadd.f32 %v9250_v26, %v8942_v32  ;;  %v9992_v25 = vpop.f32.mrb[113].mxu1 }
0x13fc   :  { %v8945_v1 = vpop.f32.mrb[114].mxu1 }
0x13fd   :  { %8949 = vst.msk [vmem:[%s15404_s5] sm:$0x3] %vm8948_vm0, %v8943_v27  ;;  %v9993_v14 = vpop.f32.mrb[115].mxu1 }
0x13fe   :  { %8954 = vsyncpa [#allocation8], 1 }
0x13ff   :  { %8955 = vsyncpa [#allocation10], 1 }

</bundles_post_ra>
